<compile_context>
chip_gen: v7x
topology: tpu7x:2x2x1
jax: 0.10.0
libtpu: 0.0.40
codegen_flags: <defaults>
</compile_context>

<pallas_src>
import jax
import jax.numpy as jnp
from jax.experimental import pallas as pl
from jax.experimental.pallas import tpu as pltpu

HIDDEN_DIM = 32
NUM_WEAPONS = 3
NUM_TARGETS = 5
N = NUM_WEAPONS * NUM_TARGETS + 1          # 16 value slots per sample
IN_DIM = 9

# Lane packing: G slots of the same sample share one MXU row (block-diag weights).
G = 4
ROWS_PER_SAMPLE = N // G                   # 4 MXU rows per sample
GIN = G * IN_DIM                           # 36  input lanes per row
GH1 = G * HIDDEN_DIM                       # 128 h1 lanes per row
GH2 = G * 2 * HIDDEN_DIM                   # 256 h2 lanes per row
GH3 = G * HIDDEN_DIM                       # 128 h3 lanes per row

BLK_B = 256                                # samples per grid step
BLK_R = BLK_B * ROWS_PER_SAMPLE            # 1024 MXU rows per grid step

# ---- packed parameter slab: one (432, 256) f32 buffer, resident in VMEM ------
SLAB_COLS = 256
R_W2 = 0        # rows [  0,128) cols [0,256): block-diag 4x W2 (32x64)
R_W3 = 128      # rows [128,384) cols [0,128): block-diag 4x W3 (64x32)
R_W4 = 128      # rows [128,256) cols [128,132): block-diag 4x (W4 / N) (32x1)
C_W4 = 128
R_W1 = 384      # rows [384,420) cols [0,128): block-diag 4x W1 (9x32)
R_B1 = 424      # row 424 cols [0,128): b1 tiled 4x
R_B2 = 425      # row 425 cols [0,256): b2 tiled 4x
R_B3 = 426      # row 426 cols [0,128): b3 tiled 4x
R_B4 = 427      # row 427 cols [0,4):   (b4 / N) per slot lane
SLAB_ROWS = 432


def critic_kernel(x_ref, m_ref, p_ref, out_ref):
    x = x_ref[...]                                           # (BLK_R, 36) f32

    # Static, aligned views into the resident parameter slab.
    w1 = p_ref[R_W1:R_W1 + GIN, 0:GH1]                       # (36, 128)
    w2 = p_ref[R_W2:R_W2 + GH1, 0:GH2]                       # (128, 256)
    w3 = p_ref[R_W3:R_W3 + GH2, 0:GH3]                       # (256, 128)
    w4 = p_ref[R_W4:R_W4 + GH3, C_W4:C_W4 + G]               # (128, 4)  (1/N folded)
    b1 = p_ref[R_B1:R_B1 + 1, 0:GH1]                         # (1, 128)
    b2 = p_ref[R_B2:R_B2 + 1, 0:GH2]                         # (1, 256)
    b3 = p_ref[R_B3:R_B3 + 1, 0:GH3]                         # (1, 128)
    b4 = p_ref[R_B4:R_B4 + 1, 0:G]                           # (1, 4)    (1/N folded)

    # Lane-dense block-diagonal MXU chain over 1024 rows (256 samples x 4 rows).
    h1 = jnp.maximum(jnp.dot(x, w1, preferred_element_type=jnp.float32) + b1, 0.0)
    h2 = jnp.maximum(jnp.dot(h1, w2, preferred_element_type=jnp.float32) + b2, 0.0)
    h3 = jnp.maximum(jnp.dot(h2, w3, preferred_element_type=jnp.float32) + b3, 0.0)

    # Final 32 -> 1 layer as a (128, 4) block-diag matmul: one value per slot
    # in this row; 1/N is already folded into w4/b4 (relu commutes with the
    # positive scale).  Mask is applied per slot after the relu.
    u = jnp.dot(h3, w4, preferred_element_type=jnp.float32) + b4      # (BLK_R, 4)
    v = jnp.maximum(u, 0.0) * m_ref[...]                              # (BLK_R, 4)

    # Per-row partial sum (4 slots).  The cross-row (4 rows/sample) finish is a
    # 4-float-per-sample XLA op in the wrapper -- avoids an in-kernel
    # sublane->lane relayout.
    out_ref[...] = jnp.sum(v, axis=-1, keepdims=True)                 # (BLK_R, 1)


def pack_params(params):
    """Pack (w1,b1,...,w4,b4) (stored as (in, out)) into the (432, 256) slab."""
    w1, b1, w2, b2, w3, b3, w4, b4 = [jnp.asarray(p, jnp.float32) for p in params]
    w1 = w1.reshape(IN_DIM, HIDDEN_DIM)
    w2 = w2.reshape(HIDDEN_DIM, 2 * HIDDEN_DIM)
    w3 = w3.reshape(2 * HIDDEN_DIM, HIDDEN_DIM)
    w4v = w4.reshape(HIDDEN_DIM) / N                 # fold mean scale (exact: 1/16)
    b4s = b4.reshape(()) / N

    slab = jnp.zeros((SLAB_ROWS, SLAB_COLS), jnp.float32)
    for j in range(G):
        slab = slab.at[R_W1 + j * IN_DIM:R_W1 + (j + 1) * IN_DIM,
                       j * HIDDEN_DIM:(j + 1) * HIDDEN_DIM].set(w1)
        slab = slab.at[R_W2 + j * HIDDEN_DIM:R_W2 + (j + 1) * HIDDEN_DIM,
                       j * 2 * HIDDEN_DIM:(j + 1) * 2 * HIDDEN_DIM].set(w2)
        slab = slab.at[R_W3 + j * 2 * HIDDEN_DIM:R_W3 + (j + 1) * 2 * HIDDEN_DIM,
                       j * HIDDEN_DIM:(j + 1) * HIDDEN_DIM].set(w3)
        slab = slab.at[R_W4 + j * HIDDEN_DIM:R_W4 + (j + 1) * HIDDEN_DIM,
                       C_W4 + j].set(w4v)
    slab = slab.at[R_B1, 0:GH1].set(jnp.tile(b1.reshape(-1), G))
    slab = slab.at[R_B2, 0:GH2].set(jnp.tile(b2.reshape(-1), G))
    slab = slab.at[R_B3, 0:GH3].set(jnp.tile(b3.reshape(-1), G))
    slab = slab.at[R_B4, 0:G].set(jnp.full((G,), b4s, jnp.float32))
    return slab


@jax.jit
def critic_forward_batched(states, masks, slab):
    """states: (B, N, 9), masks: (B, N), slab: packed params. Returns (B,)."""
    B = states.shape[0]
    nb = pl.cdiv(B, BLK_B)

    # Pure row-major reshapes: no padding pass, no HBM copy.
    x = states.astype(jnp.float32).reshape(B * ROWS_PER_SAMPLE, GIN)   # (4B, 36)
    m = masks.astype(jnp.float32).reshape(B * ROWS_PER_SAMPLE, G)      # (4B, 4)

    row_sums = pl.pallas_call(
        critic_kernel,
        grid=(nb,),
        out_shape=jax.ShapeDtypeStruct((nb * BLK_R, 1), jnp.float32),
        in_specs=[
            pl.BlockSpec((BLK_R, GIN), lambda i: (i, 0)),              # states rows
            pl.BlockSpec((BLK_R, G), lambda i: (i, 0)),                # mask rows
            pl.BlockSpec((SLAB_ROWS, SLAB_COLS), lambda i: (0, 0)),    # params: resident
        ],
        out_specs=pl.BlockSpec((BLK_R, 1), lambda i: (i, 0)),
        compiler_params=pltpu.CompilerParams(dimension_semantics=("parallel",)),
    )(x, m, slab)

    # Tiny finish: sum the 4 per-row partials of each sample (4 floats/sample).
    valid = row_sums[:B * ROWS_PER_SAMPLE, 0]
    return valid.reshape(B, ROWS_PER_SAMPLE).sum(axis=-1)


def critic_forward(state, mask, slab):
    """Original single-sample semantics: state (N, 9), mask (N,) -> scalar."""
    return critic_forward_batched(state[None], mask.reshape(1, N), slab)[0]


def make_params(key):
    """Deterministic synthetic parameters stored as (in, out) matrices."""
    ks = jax.random.split(key, 8)

    def linear(kw, kb, fan_in, fan_out):
        bound = 1.0 / jnp.sqrt(jnp.float32(fan_in))   # PyTorch nn.Linear default init
        w = jax.random.uniform(kw, (fan_in, fan_out), jnp.float32, -bound, bound)
        b = jax.random.uniform(kb, (1, fan_out), jnp.float32, -bound, bound)
        return w, b

    w1, b1 = linear(ks[0], ks[1], IN_DIM, HIDDEN_DIM)
    w2, b2 = linear(ks[2], ks[3], HIDDEN_DIM, 2 * HIDDEN_DIM)
    w3, b3 = linear(ks[4], ks[5], 2 * HIDDEN_DIM, HIDDEN_DIM)
    w4, b4 = linear(ks[6], ks[7], HIDDEN_DIM, 1)
    return (w1, b1, w2, b2, w3, b3, w4, b4)


def critic_ref(state, mask, params):
    w1, b1, w2, b2, w3, b3, w4, b4 = params
    h = jnp.maximum(state @ w1 + b1, 0.0)
    h = jnp.maximum(h @ w2 + b2, 0.0)
    h = jnp.maximum(h @ w3 + b3, 0.0)
    v = jnp.maximum(h @ w4 + b4, 0.0).reshape(N)
    return jnp.mean(v * mask.reshape(N))


if __name__ == "__main__":
    key = jax.random.PRNGKey(0)
    kp, ks, km = jax.random.split(key, 3)

    params = make_params(kp)
    slab = jax.block_until_ready(pack_params(params))   # packed ONCE, reused per call

    B = 300                                   # 2 grid blocks of 256 (second is ragged)
    states = jax.random.normal(ks, (B, N, IN_DIM), jnp.float32)
    masks = (jax.random.uniform(km, (B, N)) > 0.3).astype(jnp.float32)

    out = jax.block_until_ready(critic_forward_batched(states, masks, slab))

    ref = jax.vmap(lambda s, m: critic_ref(s, m, params))(states, masks)
    assert out.shape == (B,)
    assert jnp.allclose(out, ref, rtol=1e-4, atol=1e-5), (out[:4], ref[:4])

    # Single-sample path (matches the original Critic.forward 2-D branch).
    o1 = jax.block_until_ready(critic_forward(states[0], masks[0], slab))
    assert jnp.allclose(o1, ref[0], rtol=1e-4, atol=1e-5), (o1, ref[0])

    print("KERNEL_OK")
</pallas_src>

<mosaic_0001>
module attributes {stable_mosaic.version = 11 : i64} {
  func.func @critic_kernel(%arg0: i32, %arg1: memref<1024x36xf32, #tpu.memory_space<vmem>>, %arg2: memref<1024x4xf32, #tpu.memory_space<vmem>>, %arg3: memref<432x256xf32, #tpu.memory_space<vmem>>, %arg4: memref<1024x1xf32, #tpu.memory_space<vmem>>) attributes {dimension_semantics = [#tpu.dimension_semantics<parallel>], iteration_bounds = array<i64: 2>, scalar_prefetch = 0 : i64, scratch_operands = 0 : i64, tpu.core_type = #tpu.core_type<tc>, window_params = [{transform_indices = @transform_0, window_bounds = array<i64: 1024, 36>}, {transform_indices = @transform_1, window_bounds = array<i64: 1024, 4>}, {pipeline_mode = #tpu.pipeline_mode<synchronous>, transform_indices = @transform_2, window_bounds = array<i64: 432, 256>}, {transform_indices = @transform_3, window_bounds = array<i64: 1024, 1>}]} {
    %c0 = arith.constant 0 : index
    %c0_0 = arith.constant 0 : index
    %0 = vector.load %arg1[%c0, %c0_0] : memref<1024x36xf32, #tpu.memory_space<vmem>>, vector<1024x36xf32>
    %c384 = arith.constant 384 : index
    %c0_1 = arith.constant 0 : index
    %1 = vector.load %arg3[%c384, %c0_1] : memref<432x256xf32, #tpu.memory_space<vmem>>, vector<36x128xf32>
    %c0_2 = arith.constant 0 : index
    %c0_3 = arith.constant 0 : index
    %2 = vector.load %arg3[%c0_2, %c0_3] : memref<432x256xf32, #tpu.memory_space<vmem>>, vector<128x256xf32>
    %c128 = arith.constant 128 : index
    %c0_4 = arith.constant 0 : index
    %3 = vector.load %arg3[%c128, %c0_4] : memref<432x256xf32, #tpu.memory_space<vmem>>, vector<256x128xf32>
    %c128_5 = arith.constant 128 : index
    %c128_6 = arith.constant 128 : index
    %4 = vector.load %arg3[%c128_5, %c128_6] : memref<432x256xf32, #tpu.memory_space<vmem>>, vector<128x4xf32>
    %c424 = arith.constant 424 : index
    %c0_7 = arith.constant 0 : index
    %5 = vector.load %arg3[%c424, %c0_7] : memref<432x256xf32, #tpu.memory_space<vmem>>, vector<1x128xf32>
    %c425 = arith.constant 425 : index
    %c0_8 = arith.constant 0 : index
    %6 = vector.load %arg3[%c425, %c0_8] : memref<432x256xf32, #tpu.memory_space<vmem>>, vector<1x256xf32>
    %c426 = arith.constant 426 : index
    %c0_9 = arith.constant 0 : index
    %7 = vector.load %arg3[%c426, %c0_9] : memref<432x256xf32, #tpu.memory_space<vmem>>, vector<1x128xf32>
    %c427 = arith.constant 427 : index
    %c0_10 = arith.constant 0 : index
    %8 = vector.load %arg3[%c427, %c0_10] : memref<432x256xf32, #tpu.memory_space<vmem>>, vector<1x4xf32>
    %cst = arith.constant dense<0.000000e+00> : vector<1024x128xf32>
    %9 = tpu.matmul %0, %1, %cst {dimension_numbers = #tpu.dot_dimension_numbers<[1], [0], [0], [1], [0, 0, 1, 1], [], []>} : vector<1024x36xf32>, vector<36x128xf32>, vector<1024x128xf32> -> vector<1024x128xf32>
    %10 = vector.broadcast %5 : vector<1x128xf32> to vector<1024x128xf32>
    %11 = arith.addf %9, %10 : vector<1024x128xf32>
    %cst_11 = arith.constant 0.000000e+00 : f32
    %12 = vector.broadcast %cst_11 : f32 to vector<1024x128xf32>
    %13 = arith.maximumf %11, %12 : vector<1024x128xf32>
    %cst_12 = arith.constant dense<0.000000e+00> : vector<1024x256xf32>
    %14 = tpu.matmul %13, %2, %cst_12 {dimension_numbers = #tpu.dot_dimension_numbers<[1], [0], [0], [1], [0, 0, 1, 1], [], []>} : vector<1024x128xf32>, vector<128x256xf32>, vector<1024x256xf32> -> vector<1024x256xf32>
    %15 = vector.broadcast %6 : vector<1x256xf32> to vector<1024x256xf32>
    %16 = arith.addf %14, %15 : vector<1024x256xf32>
    %cst_13 = arith.constant 0.000000e+00 : f32
    %17 = vector.broadcast %cst_13 : f32 to vector<1024x256xf32>
    %18 = arith.maximumf %16, %17 : vector<1024x256xf32>
    %cst_14 = arith.constant dense<0.000000e+00> : vector<1024x128xf32>
    %19 = tpu.matmul %18, %3, %cst_14 {dimension_numbers = #tpu.dot_dimension_numbers<[1], [0], [0], [1], [0, 0, 1, 1], [], []>} : vector<1024x256xf32>, vector<256x128xf32>, vector<1024x128xf32> -> vector<1024x128xf32>
    %20 = vector.broadcast %7 : vector<1x128xf32> to vector<1024x128xf32>
    %21 = arith.addf %19, %20 : vector<1024x128xf32>
    %cst_15 = arith.constant 0.000000e+00 : f32
    %22 = vector.broadcast %cst_15 : f32 to vector<1024x128xf32>
    %23 = arith.maximumf %21, %22 : vector<1024x128xf32>
    %cst_16 = arith.constant dense<0.000000e+00> : vector<1024x4xf32>
    %24 = tpu.matmul %23, %4, %cst_16 {dimension_numbers = #tpu.dot_dimension_numbers<[1], [0], [0], [1], [0, 0, 1, 1], [], []>} : vector<1024x128xf32>, vector<128x4xf32>, vector<1024x4xf32> -> vector<1024x4xf32>
    %25 = vector.broadcast %8 : vector<1x4xf32> to vector<1024x4xf32>
    %26 = arith.addf %24, %25 : vector<1024x4xf32>
    %cst_17 = arith.constant 0.000000e+00 : f32
    %27 = vector.broadcast %cst_17 : f32 to vector<1024x4xf32>
    %28 = arith.maximumf %26, %27 : vector<1024x4xf32>
    %c0_18 = arith.constant 0 : index
    %c0_19 = arith.constant 0 : index
    %29 = vector.load %arg2[%c0_18, %c0_19] : memref<1024x4xf32, #tpu.memory_space<vmem>>, vector<1024x4xf32>
    %30 = arith.mulf %28, %29 : vector<1024x4xf32>
    %cst_20 = arith.constant dense<0.000000e+00> : vector<1024xf32>
    %31 = vector.multi_reduction <add>, %30, %cst_20 [1] : vector<1024x4xf32> to vector<1024xf32>
    %32 = vector.shape_cast %31 : vector<1024xf32> to vector<1024x1xf32>
    %c0_21 = arith.constant 0 : index
    %c0_22 = arith.constant 0 : index
    %33 = vector.load %arg4[%c0_21, %c0_22] : memref<1024x1xf32, #tpu.memory_space<vmem>>, vector<1024x1xf32>
    tpu.vector_store %arg4[%c0_21, %c0_22], %32 {strides = array<i32>} : memref<1024x1xf32, #tpu.memory_space<vmem>>, vector<1024x1xf32>,
    return
  }
  func.func @transform_0(%arg0: i32) -> (i32, i32) {
    %c0_i32 = arith.constant 0 : i32
    %c0_i32_0 = arith.constant 0 : i32
    return %arg0, %c0_i32 : i32, i32
  }
  func.func @transform_1(%arg0: i32) -> (i32, i32) {
    %c0_i32 = arith.constant 0 : i32
    %c0_i32_0 = arith.constant 0 : i32
    return %arg0, %c0_i32 : i32, i32
  }
  func.func @transform_2(%arg0: i32) -> (i32, i32) {
    %c0_i32 = arith.constant 0 : i32
    %c0_i32_0 = arith.constant 0 : i32
    %c0_i32_1 = arith.constant 0 : i32
    return %c0_i32, %c0_i32_0 : i32, i32
  }
  func.func @transform_3(%arg0: i32) -> (i32, i32) {
    %c0_i32 = arith.constant 0 : i32
    %c0_i32_0 = arith.constant 0 : i32
    return %arg0, %c0_i32 : i32, i32
  }
}

</mosaic_0001>

<bundles_post_ra>
// kernel: squeeze.1
= control target key start
LH: loop header
LB: loop body
LE: loop exit
PB: predicated region body
PF: predicated region fallthrough
CT: control target
= control target key end

     0   :  { %vm3_vm0 = vcmask 31744   ;;  %s1247_s8 = smov 120   ;;  %s1248_s9 = smov 124   ;;  %s2628_s0 = inlined_call_operand.vmem [shape: f32[1200], index: 0, kind: input, shape index: {}]   ;;  %s2629_s1 = inlined_call_operand.vmem [shape: f32[300,4], index: 1, kind: output, shape index: {}]  }
   0x1   :  { %v1291_v0 = vld [vmem:[%s2628_s0] sm:$0xff]   ;;  %v914_v1 = vld [vmem:[%s2628_s0 + $0x8] sm:$0x3]   ;;  %s1249_s3 = smov 116   ;;  %s1250_s6 = smov 112  }
   0x2   :  { %56 = vrot.lane.b32.xlu1 %v1291_v0, %s1247_s8  ;;  %27 = vrot.lane.b32.xlu0 %v1291_v0, %s1248_s9  ;;  %4 = vst.msk [vmem:[%s2629_s1] sm:$0x1] %vm3_vm0, %v1291_v0   ;;  %885 = vst.msk [vmem:[%s2629_s1 + $0x1f] sm:$0x2] %vm3_vm0, %v1291_v0   ;;  %s1252_s12 = smov 104   ;;  %s1253_s15 = smov 100  }
   0x3   :  { %886 = vst.msk [vmem:[%s2629_s1 + $0x3e] sm:$0x4] %vm3_vm0, %v1291_v0   ;;  %887 = vst.msk [vmem:[%s2629_s1 + $0x5d] sm:$0x8] %vm3_vm0, %v1291_v0   ;;  %v903_v2 = vld [vmem:[%s2628_s0 + $0x8] sm:$0x3]  }
   0x4   :  { %888 = vst.msk [vmem:[%s2629_s1 + $0x7c] sm:$0x10] %vm3_vm0, %v1291_v0   ;;  %889 = vst.msk [vmem:[%s2629_s1 + $0x9b] sm:$0x20] %vm3_vm0, %v1291_v0   ;;  %v925_v3 = vld [vmem:[%s2628_s0 + $0x8] sm:$0x3]  }
   0x5   :  { %890 = vst.msk [vmem:[%s2629_s1 + $0xba] sm:$0x40] %vm3_vm0, %v1291_v0   ;;  %891 = vst.msk [vmem:[%s2629_s1 + $0xd9] sm:$0x80] %vm3_vm0, %v1291_v0   ;;  %v936_v4 = vld [vmem:[%s2628_s0 + $0x8] sm:$0x3]  }
   0x6   :  { %77 = vrot.lane.b32.xlu1 %v914_v1, %s1247_s8  ;;  %48 = vrot.lane.b32.xlu0 %v903_v2, %s1248_s9  ;;  %v947_v5 = vld [vmem:[%s2628_s0 + $0x8] sm:$0x3]   ;;  %s1251_s9 = smov 108   ;;  %s1254_s18 = smov 96  }
   0x7   :  { %v958_v6 = vld [vmem:[%s2628_s0 + $0x8] sm:$0x3]   ;;  %s1255_s21 = smov 92   ;;  %s1256_s24 = smov 88  }
   0x8   :  { %v969_v7 = vld [vmem:[%s2628_s0 + $0x8] sm:$0x3]   ;;  %s1257_s27 = smov 84   ;;  %s1258_s30 = smov 80  }
   0x9   :  { %v980_v8 = vld [vmem:[%s2628_s0 + $0x8] sm:$0x3]   ;;  %s1259_s4 = smov 76   ;;  %s1260_s7 = smov 72  }
   0xa   :  { %106 = vrot.lane.b32.xlu1 %v925_v3, %s1249_s3  ;;  %85 = vrot.lane.b32.xlu0 %v1291_v0, %s1249_s3  ;;  %v991_v9 = vld [vmem:[%s2628_s0 + $0x8] sm:$0x3]   ;;  %s1261_s10 = smov 68   ;;  %s1262_s13 = smov 64  }
   0xb   :  { %v1002_v10 = vld [vmem:[%s2628_s0 + $0x8] sm:$0x3]   ;;  %s1263_s16 = smov 60   ;;  %s1264_s19 = smov 56  }
   0xc   :  { %v1013_v11 = vld [vmem:[%s2628_s0 + $0x8] sm:$0x3]   ;;  %s1265_s22 = smov 52   ;;  %s1266_s25 = smov 48  }
   0xd   :  { %v1024_v12 = vld [vmem:[%s2628_s0 + $0x8] sm:$0x1]   ;;  %s1267_s28 = smov 44   ;;  %s1268_s2 = smov 40  }
   0xe   :  { %135 = vrot.lane.b32.xlu1 %v936_v4, %s1250_s6  ;;  %114 = vrot.lane.b32.xlu0 %v1291_v0, %s1250_s6  ;;  %v1034_v13 = vld [vmem:[%s2628_s0 + $0x8] sm:$0x1]   ;;  %s1269_s5 = smov 36   ;;  %s1270_s8 = smov 32  }
   0xf   :  { %v1044_v14 = vld [vmem:[%s2628_s0 + $0x8] sm:$0x1]   ;;  %s1271_s11 = smov 28   ;;  %s1272_s14 = smov 24  }
  0x10   :  { %v1054_v15 = vld [vmem:[%s2628_s0 + $0x8] sm:$0x1]   ;;  %s1273_s17 = smov 20   ;;  %s1274_s26 = smov 16  }
  0x11   :  { %v1064_v16 = vld [vmem:[%s2628_s0 + $0x8] sm:$0x1]   ;;  %s1275_s29 = smov 12   ;;  %s1276_s6 = smov 8  }
  0x12   :  { %164 = vrot.lane.b32.xlu1 %v947_v5, %s1251_s9  ;;  %143 = vrot.lane.b32.xlu0 %v1291_v0, %s1251_s9  ;;  %v1074_v17 = vld [vmem:[%s2628_s0 + $0x8] sm:$0x1]  }
  0x13   :  { %v1084_v18 = vld [vmem:[%s2628_s0 + $0x8] sm:$0x1]  }
  0x14   :  { %v1094_v19 = vld [vmem:[%s2628_s0 + $0x8] sm:$0x1]  }
  0x15   :  { %v1104_v20 = vld [vmem:[%s2628_s0 + $0x8] sm:$0x1]  }
  0x16   :  { %193 = vrot.lane.b32.xlu1 %v958_v6, %s1252_s12  ;;  %172 = vrot.lane.b32.xlu0 %v1291_v0, %s1252_s12  ;;  %v1114_v21 = vld [vmem:[%s2628_s0 + $0x8] sm:$0x1]  }
  0x17   :  { %v1124_v22 = vld [vmem:[%s2628_s0 + $0x8] sm:$0x1]  }
  0x18   :  { %v1134_v23 = vld [vmem:[%s2628_s0 + $0x8] sm:$0x1]  }
  0x19   :  { %v1144_v24 = vld [vmem:[%s2628_s0 + $0x8] sm:$0x1]  }
  0x1a   :  { %222 = vrot.lane.b32.xlu1 %v969_v7, %s1253_s15  ;;  %201 = vrot.lane.b32.xlu0 %v1291_v0, %s1253_s15  ;;  %v1154_v25 = vld [vmem:[%s2628_s0 + $0x8] sm:$0x1]  }
  0x1b   :  { %v1164_v26 = vld [vmem:[%s2628_s0 + $0x8] sm:$0x1]  }
  0x1c   :  { %v1174_v27 = vld [vmem:[%s2628_s0 + $0x8] sm:$0x1]  }
  0x1d   :  { %v1184_v28 = vld [vmem:[%s2628_s0 + $0x8] sm:$0x1]  }
  0x1e   :  { %251 = vrot.lane.b32.xlu1 %v980_v8, %s1254_s18  ;;  %230 = vrot.lane.b32.xlu0 %v1291_v0, %s1254_s18  ;;  %v892_v29 = vld [vmem:[%s2628_s0 + $0x8] sm:$0x3]  }
  0x1f   :  { %893 = vst.msk [vmem:[%s2629_s1 + $0x100] sm:$0x1] %vm3_vm0, %v892_v29   ;;  %894 = vst.msk [vmem:[%s2629_s1 + $0x11f] sm:$0x2] %vm3_vm0, %v892_v29   ;;  %v1194_v30 = vld [vmem:[%s2628_s0 + $0x8] sm:$0x1]  }
  0x20   :  { %v1204_v31 = vld [vmem:[%s2628_s0 + $0x8] sm:$0x1]  }
  0x21   :  { %v1214_v34 = vld [vmem:[%s2628_s0 + $0x8] sm:$0x1]  }
  0x22   :  { %280 = vrot.lane.b32.xlu1 %v991_v9, %s1255_s21  ;;  %259 = vrot.lane.b32.xlu0 %v1291_v0, %s1255_s21 }
  0x26   :  { %309 = vrot.lane.b32.xlu1 %v1002_v10, %s1256_s24  ;;  %288 = vrot.lane.b32.xlu0 %v1291_v0, %s1256_s24 }
  0x2a   :  { %338 = vrot.lane.b32.xlu1 %v1013_v11, %s1257_s27  ;;  %317 = vrot.lane.b32.xlu0 %v1291_v0, %s1257_s27 }
  0x2e   :  { %367 = vrot.lane.b32.xlu1 %v1024_v12, %s1258_s30  ;;  %346 = vrot.lane.b32.xlu0 %v1291_v0, %s1258_s30 }
  0x32   :  { %394 = vrot.lane.b32.xlu1 %v1034_v13, %s1259_s4  ;;  %373 = vrot.lane.b32.xlu0 %v1291_v0, %s1259_s4 }
  0x36   :  { %421 = vrot.lane.b32.xlu1 %v1044_v14, %s1260_s7  ;;  %400 = vrot.lane.b32.xlu0 %v1291_v0, %s1260_s7 }
  0x3a   :  { %448 = vrot.lane.b32.xlu1 %v1054_v15, %s1261_s10  ;;  %427 = vrot.lane.b32.xlu0 %v1291_v0, %s1261_s10 }
  0x3e   :  { %475 = vrot.lane.b32.xlu1 %v1064_v16, %s1262_s13  ;;  %454 = vrot.lane.b32.xlu0 %v1291_v0, %s1262_s13 }
  0x42   :  { %502 = vrot.lane.b32.xlu1 %v1074_v17, %s1263_s16  ;;  %481 = vrot.lane.b32.xlu0 %v1291_v0, %s1263_s16  ;;  %s1277_s16 = smov 4  }
  0x46   :  { %529 = vrot.lane.b32.xlu1 %v1084_v18, %s1264_s19  ;;  %508 = vrot.lane.b32.xlu0 %v1291_v0, %s1264_s19 }
  0x4a   :  { %556 = vrot.lane.b32.xlu1 %v1094_v19, %s1265_s22  ;;  %535 = vrot.lane.b32.xlu0 %v1291_v0, %s1265_s22 }
  0x4e   :  { %583 = vrot.lane.b32.xlu1 %v1104_v20, %s1266_s25  ;;  %562 = vrot.lane.b32.xlu0 %v1291_v0, %s1266_s25 }
  0x52   :  { %610 = vrot.lane.b32.xlu1 %v1114_v21, %s1267_s28  ;;  %589 = vrot.lane.b32.xlu0 %v1291_v0, %s1267_s28 }
  0x56   :  { %637 = vrot.lane.b32.xlu1 %v1124_v22, %s1268_s2  ;;  %616 = vrot.lane.b32.xlu0 %v1291_v0, %s1268_s2 }
  0x5a   :  { %664 = vrot.lane.b32.xlu1 %v1134_v23, %s1269_s5  ;;  %643 = vrot.lane.b32.xlu0 %v1291_v0, %s1269_s5 }
  0x5e   :  { %691 = vrot.lane.b32.xlu1 %v1144_v24, %s1270_s8  ;;  %670 = vrot.lane.b32.xlu0 %v1291_v0, %s1270_s8 }
  0x62   :  { %718 = vrot.lane.b32.xlu1 %v1154_v25, %s1271_s11  ;;  %697 = vrot.lane.b32.xlu0 %v1291_v0, %s1271_s11 }
  0x66   :  { %745 = vrot.lane.b32.xlu1 %v1164_v26, %s1272_s14  ;;  %724 = vrot.lane.b32.xlu0 %v1291_v0, %s1272_s14 }
  0x6a   :  { %772 = vrot.lane.b32.xlu1 %v1174_v27, %s1273_s17  ;;  %751 = vrot.lane.b32.xlu0 %v1291_v0, %s1273_s17 }
  0x6e   :  { %799 = vrot.lane.b32.xlu1 %v1184_v28, %s1274_s26  ;;  %778 = vrot.lane.b32.xlu0 %v1291_v0, %s1274_s26 }
  0x72   :  { %826 = vrot.lane.b32.xlu1 %v1194_v30, %s1275_s29  ;;  %805 = vrot.lane.b32.xlu0 %v1291_v0, %s1275_s29 }
  0x74   :  { %v57_v32 = vpop.permute.xlu1 %56   ;;  %v28_v33 = vpop.permute.xlu0 %27  }
  0x75   :  { %906 = vst.msk [vmem:[%s2629_s1 + $0x2] sm:$0x1] %vm3_vm0, %v57_v32   ;;  %907 = vst.msk [vmem:[%s2629_s1 + $0x21] sm:$0x2] %vm3_vm0, %v57_v32  }
  0x76   :  { %908 = vst.msk [vmem:[%s2629_s1 + $0x40] sm:$0x4] %vm3_vm0, %v57_v32   ;;  %909 = vst.msk [vmem:[%s2629_s1 + $0x5f] sm:$0x8] %vm3_vm0, %v57_v32   ;;  %853 = vrot.lane.b32.xlu1 %v1204_v31, %s1276_s6  ;;  %832 = vrot.lane.b32.xlu0 %v1291_v0, %s1276_s6 }
  0x77   :  { %910 = vst.msk [vmem:[%s2629_s1 + $0x7e] sm:$0x10] %vm3_vm0, %v57_v32   ;;  %911 = vst.msk [vmem:[%s2629_s1 + $0x9d] sm:$0x20] %vm3_vm0, %v57_v32  }
  0x78   :  { %912 = vst.msk [vmem:[%s2629_s1 + $0xbc] sm:$0x40] %vm3_vm0, %v57_v32   ;;  %913 = vst.msk [vmem:[%s2629_s1 + $0xdb] sm:$0x80] %vm3_vm0, %v57_v32   ;;  %v78_v35 = vpop.permute.xlu1 %77   ;;  %v49_v36 = vpop.permute.xlu0 %48  }
  0x79   :  { %895 = vst.msk [vmem:[%s2629_s1 + $0x1] sm:$0x1] %vm3_vm0, %v28_v33   ;;  %896 = vst.msk [vmem:[%s2629_s1 + $0x20] sm:$0x2] %vm3_vm0, %v28_v33  }
  0x7a   :  { %897 = vst.msk [vmem:[%s2629_s1 + $0x3f] sm:$0x4] %vm3_vm0, %v28_v33   ;;  %898 = vst.msk [vmem:[%s2629_s1 + $0x5e] sm:$0x8] %vm3_vm0, %v28_v33   ;;  %880 = vrot.lane.b32.xlu1 %v1214_v34, %s1277_s16  ;;  %859 = vrot.lane.b32.xlu0 %v1291_v0, %s1277_s16 }
  0x7b   :  { %899 = vst.msk [vmem:[%s2629_s1 + $0x7d] sm:$0x10] %vm3_vm0, %v28_v33   ;;  %900 = vst.msk [vmem:[%s2629_s1 + $0x9c] sm:$0x20] %vm3_vm0, %v28_v33  }
  0x7c   :  { %901 = vst.msk [vmem:[%s2629_s1 + $0xbb] sm:$0x40] %vm3_vm0, %v28_v33   ;;  %902 = vst.msk [vmem:[%s2629_s1 + $0xda] sm:$0x80] %vm3_vm0, %v28_v33   ;;  %v107_v37 = vpop.permute.xlu1 %106   ;;  %v86_v38 = vpop.permute.xlu0 %85  }
  0x7d   :  { %915 = vst.msk [vmem:[%s2629_s1 + $0x102] sm:$0x1] %vm3_vm0, %v78_v35   ;;  %916 = vst.msk [vmem:[%s2629_s1 + $0x121] sm:$0x2] %vm3_vm0, %v78_v35  }
  0x7e   :  { %904 = vst.msk [vmem:[%s2629_s1 + $0x101] sm:$0x1] %vm3_vm0, %v49_v36   ;;  %905 = vst.msk [vmem:[%s2629_s1 + $0x120] sm:$0x2] %vm3_vm0, %v49_v36  }
  0x7f   :  { %926 = vst.msk [vmem:[%s2629_s1 + $0x103] sm:$0x1] %vm3_vm0, %v107_v37   ;;  %927 = vst.msk [vmem:[%s2629_s1 + $0x122] sm:$0x2] %vm3_vm0, %v107_v37  }
  0x80   :  { %917 = vst.msk [vmem:[%s2629_s1 + $0x3] sm:$0x1] %vm3_vm0, %v86_v38   ;;  %918 = vst.msk [vmem:[%s2629_s1 + $0x22] sm:$0x2] %vm3_vm0, %v86_v38   ;;  %v136_v39 = vpop.permute.xlu1 %135   ;;  %v115_v40 = vpop.permute.xlu0 %114  }
  0x81   :  { %919 = vst.msk [vmem:[%s2629_s1 + $0x41] sm:$0x4] %vm3_vm0, %v86_v38   ;;  %920 = vst.msk [vmem:[%s2629_s1 + $0x60] sm:$0x8] %vm3_vm0, %v86_v38  }
  0x82   :  { %921 = vst.msk [vmem:[%s2629_s1 + $0x7f] sm:$0x10] %vm3_vm0, %v86_v38   ;;  %922 = vst.msk [vmem:[%s2629_s1 + $0x9e] sm:$0x20] %vm3_vm0, %v86_v38  }
  0x83   :  { %923 = vst.msk [vmem:[%s2629_s1 + $0xbd] sm:$0x40] %vm3_vm0, %v86_v38   ;;  %924 = vst.msk [vmem:[%s2629_s1 + $0xdc] sm:$0x80] %vm3_vm0, %v86_v38  }
  0x84   :  { %937 = vst.msk [vmem:[%s2629_s1 + $0x104] sm:$0x1] %vm3_vm0, %v136_v39   ;;  %938 = vst.msk [vmem:[%s2629_s1 + $0x123] sm:$0x2] %vm3_vm0, %v136_v39   ;;  %v165_v41 = vpop.permute.xlu1 %164   ;;  %v144_v42 = vpop.permute.xlu0 %143  }
  0x85   :  { %928 = vst.msk [vmem:[%s2629_s1 + $0x4] sm:$0x1] %vm3_vm0, %v115_v40   ;;  %929 = vst.msk [vmem:[%s2629_s1 + $0x23] sm:$0x2] %vm3_vm0, %v115_v40  }
  0x86   :  { %930 = vst.msk [vmem:[%s2629_s1 + $0x42] sm:$0x4] %vm3_vm0, %v115_v40   ;;  %931 = vst.msk [vmem:[%s2629_s1 + $0x61] sm:$0x8] %vm3_vm0, %v115_v40  }
  0x87   :  { %932 = vst.msk [vmem:[%s2629_s1 + $0x80] sm:$0x10] %vm3_vm0, %v115_v40   ;;  %933 = vst.msk [vmem:[%s2629_s1 + $0x9f] sm:$0x20] %vm3_vm0, %v115_v40  }
  0x88   :  { %934 = vst.msk [vmem:[%s2629_s1 + $0xbe] sm:$0x40] %vm3_vm0, %v115_v40   ;;  %935 = vst.msk [vmem:[%s2629_s1 + $0xdd] sm:$0x80] %vm3_vm0, %v115_v40   ;;  %v194_v43 = vpop.permute.xlu1 %193   ;;  %v173_v44 = vpop.permute.xlu0 %172  }
  0x89   :  { %948 = vst.msk [vmem:[%s2629_s1 + $0x105] sm:$0x1] %vm3_vm0, %v165_v41   ;;  %949 = vst.msk [vmem:[%s2629_s1 + $0x124] sm:$0x2] %vm3_vm0, %v165_v41  }
  0x8a   :  { %939 = vst.msk [vmem:[%s2629_s1 + $0x5] sm:$0x1] %vm3_vm0, %v144_v42   ;;  %940 = vst.msk [vmem:[%s2629_s1 + $0x24] sm:$0x2] %vm3_vm0, %v144_v42  }
  0x8b   :  { %941 = vst.msk [vmem:[%s2629_s1 + $0x43] sm:$0x4] %vm3_vm0, %v144_v42   ;;  %942 = vst.msk [vmem:[%s2629_s1 + $0x62] sm:$0x8] %vm3_vm0, %v144_v42  }
  0x8c   :  { %943 = vst.msk [vmem:[%s2629_s1 + $0x81] sm:$0x10] %vm3_vm0, %v144_v42   ;;  %944 = vst.msk [vmem:[%s2629_s1 + $0xa0] sm:$0x20] %vm3_vm0, %v144_v42   ;;  %v223_v45 = vpop.permute.xlu1 %222   ;;  %v202_v46 = vpop.permute.xlu0 %201  }
  0x8d   :  { %945 = vst.msk [vmem:[%s2629_s1 + $0xbf] sm:$0x40] %vm3_vm0, %v144_v42   ;;  %946 = vst.msk [vmem:[%s2629_s1 + $0xde] sm:$0x80] %vm3_vm0, %v144_v42  }
  0x8e   :  { %959 = vst.msk [vmem:[%s2629_s1 + $0x106] sm:$0x1] %vm3_vm0, %v194_v43   ;;  %960 = vst.msk [vmem:[%s2629_s1 + $0x125] sm:$0x2] %vm3_vm0, %v194_v43  }
  0x8f   :  { %950 = vst.msk [vmem:[%s2629_s1 + $0x6] sm:$0x1] %vm3_vm0, %v173_v44   ;;  %951 = vst.msk [vmem:[%s2629_s1 + $0x25] sm:$0x2] %vm3_vm0, %v173_v44  }
  0x90   :  { %952 = vst.msk [vmem:[%s2629_s1 + $0x44] sm:$0x4] %vm3_vm0, %v173_v44   ;;  %953 = vst.msk [vmem:[%s2629_s1 + $0x63] sm:$0x8] %vm3_vm0, %v173_v44   ;;  %v252_v47 = vpop.permute.xlu1 %251   ;;  %v231_v48 = vpop.permute.xlu0 %230  }
  0x91   :  { %954 = vst.msk [vmem:[%s2629_s1 + $0x82] sm:$0x10] %vm3_vm0, %v173_v44   ;;  %955 = vst.msk [vmem:[%s2629_s1 + $0xa1] sm:$0x20] %vm3_vm0, %v173_v44  }
  0x92   :  { %956 = vst.msk [vmem:[%s2629_s1 + $0xc0] sm:$0x40] %vm3_vm0, %v173_v44   ;;  %957 = vst.msk [vmem:[%s2629_s1 + $0xdf] sm:$0x80] %vm3_vm0, %v173_v44  }
  0x93   :  { %970 = vst.msk [vmem:[%s2629_s1 + $0x107] sm:$0x1] %vm3_vm0, %v223_v45   ;;  %971 = vst.msk [vmem:[%s2629_s1 + $0x126] sm:$0x2] %vm3_vm0, %v223_v45  }
  0x94   :  { %961 = vst.msk [vmem:[%s2629_s1 + $0x7] sm:$0x1] %vm3_vm0, %v202_v46   ;;  %962 = vst.msk [vmem:[%s2629_s1 + $0x26] sm:$0x2] %vm3_vm0, %v202_v46   ;;  %v281_v49 = vpop.permute.xlu1 %280   ;;  %v260_v50 = vpop.permute.xlu0 %259  }
  0x95   :  { %963 = vst.msk [vmem:[%s2629_s1 + $0x45] sm:$0x4] %vm3_vm0, %v202_v46   ;;  %964 = vst.msk [vmem:[%s2629_s1 + $0x64] sm:$0x8] %vm3_vm0, %v202_v46  }
  0x96   :  { %965 = vst.msk [vmem:[%s2629_s1 + $0x83] sm:$0x10] %vm3_vm0, %v202_v46   ;;  %966 = vst.msk [vmem:[%s2629_s1 + $0xa2] sm:$0x20] %vm3_vm0, %v202_v46  }
  0x97   :  { %967 = vst.msk [vmem:[%s2629_s1 + $0xc1] sm:$0x40] %vm3_vm0, %v202_v46   ;;  %968 = vst.msk [vmem:[%s2629_s1 + $0xe0] sm:$0x80] %vm3_vm0, %v202_v46  }
  0x98   :  { %981 = vst.msk [vmem:[%s2629_s1 + $0x108] sm:$0x1] %vm3_vm0, %v252_v47   ;;  %982 = vst.msk [vmem:[%s2629_s1 + $0x127] sm:$0x2] %vm3_vm0, %v252_v47   ;;  %v310_v51 = vpop.permute.xlu1 %309   ;;  %v289_v52 = vpop.permute.xlu0 %288  }
  0x99   :  { %972 = vst.msk [vmem:[%s2629_s1 + $0x8] sm:$0x1] %vm3_vm0, %v231_v48   ;;  %973 = vst.msk [vmem:[%s2629_s1 + $0x27] sm:$0x2] %vm3_vm0, %v231_v48  }
  0x9a   :  { %974 = vst.msk [vmem:[%s2629_s1 + $0x46] sm:$0x4] %vm3_vm0, %v231_v48   ;;  %975 = vst.msk [vmem:[%s2629_s1 + $0x65] sm:$0x8] %vm3_vm0, %v231_v48  }
  0x9b   :  { %976 = vst.msk [vmem:[%s2629_s1 + $0x84] sm:$0x10] %vm3_vm0, %v231_v48   ;;  %977 = vst.msk [vmem:[%s2629_s1 + $0xa3] sm:$0x20] %vm3_vm0, %v231_v48  }
  0x9c   :  { %978 = vst.msk [vmem:[%s2629_s1 + $0xc2] sm:$0x40] %vm3_vm0, %v231_v48   ;;  %979 = vst.msk [vmem:[%s2629_s1 + $0xe1] sm:$0x80] %vm3_vm0, %v231_v48   ;;  %v339_v53 = vpop.permute.xlu1 %338   ;;  %v318_v54 = vpop.permute.xlu0 %317  }
  0x9d   :  { %992 = vst.msk [vmem:[%s2629_s1 + $0x109] sm:$0x1] %vm3_vm0, %v281_v49   ;;  %993 = vst.msk [vmem:[%s2629_s1 + $0x128] sm:$0x2] %vm3_vm0, %v281_v49  }
  0x9e   :  { %983 = vst.msk [vmem:[%s2629_s1 + $0x9] sm:$0x1] %vm3_vm0, %v260_v50   ;;  %984 = vst.msk [vmem:[%s2629_s1 + $0x28] sm:$0x2] %vm3_vm0, %v260_v50  }
  0x9f   :  { %985 = vst.msk [vmem:[%s2629_s1 + $0x47] sm:$0x4] %vm3_vm0, %v260_v50   ;;  %986 = vst.msk [vmem:[%s2629_s1 + $0x66] sm:$0x8] %vm3_vm0, %v260_v50  }
  0xa0   :  { %987 = vst.msk [vmem:[%s2629_s1 + $0x85] sm:$0x10] %vm3_vm0, %v260_v50   ;;  %988 = vst.msk [vmem:[%s2629_s1 + $0xa4] sm:$0x20] %vm3_vm0, %v260_v50   ;;  %v368_v55 = vpop.permute.xlu1 %367   ;;  %v347_v56 = vpop.permute.xlu0 %346  }
  0xa1   :  { %989 = vst.msk [vmem:[%s2629_s1 + $0xc3] sm:$0x40] %vm3_vm0, %v260_v50   ;;  %990 = vst.msk [vmem:[%s2629_s1 + $0xe2] sm:$0x80] %vm3_vm0, %v260_v50  }
  0xa2   :  { %1003 = vst.msk [vmem:[%s2629_s1 + $0x10a] sm:$0x1] %vm3_vm0, %v310_v51   ;;  %1004 = vst.msk [vmem:[%s2629_s1 + $0x129] sm:$0x2] %vm3_vm0, %v310_v51  }
  0xa3   :  { %994 = vst.msk [vmem:[%s2629_s1 + $0xa] sm:$0x1] %vm3_vm0, %v289_v52   ;;  %995 = vst.msk [vmem:[%s2629_s1 + $0x29] sm:$0x2] %vm3_vm0, %v289_v52  }
  0xa4   :  { %996 = vst.msk [vmem:[%s2629_s1 + $0x48] sm:$0x4] %vm3_vm0, %v289_v52   ;;  %997 = vst.msk [vmem:[%s2629_s1 + $0x67] sm:$0x8] %vm3_vm0, %v289_v52   ;;  %v395_v57 = vpop.permute.xlu1 %394   ;;  %v374_v58 = vpop.permute.xlu0 %373  }
  0xa5   :  { %998 = vst.msk [vmem:[%s2629_s1 + $0x86] sm:$0x10] %vm3_vm0, %v289_v52   ;;  %999 = vst.msk [vmem:[%s2629_s1 + $0xa5] sm:$0x20] %vm3_vm0, %v289_v52  }
  0xa6   :  { %1000 = vst.msk [vmem:[%s2629_s1 + $0xc4] sm:$0x40] %vm3_vm0, %v289_v52   ;;  %1001 = vst.msk [vmem:[%s2629_s1 + $0xe3] sm:$0x80] %vm3_vm0, %v289_v52  }
  0xa7   :  { %1014 = vst.msk [vmem:[%s2629_s1 + $0x10b] sm:$0x1] %vm3_vm0, %v339_v53   ;;  %1015 = vst.msk [vmem:[%s2629_s1 + $0x12a] sm:$0x2] %vm3_vm0, %v339_v53  }
  0xa8   :  { %1005 = vst.msk [vmem:[%s2629_s1 + $0xb] sm:$0x1] %vm3_vm0, %v318_v54   ;;  %1006 = vst.msk [vmem:[%s2629_s1 + $0x2a] sm:$0x2] %vm3_vm0, %v318_v54   ;;  %v422_v59 = vpop.permute.xlu1 %421   ;;  %v401_v60 = vpop.permute.xlu0 %400  }
  0xa9   :  { %1007 = vst.msk [vmem:[%s2629_s1 + $0x49] sm:$0x4] %vm3_vm0, %v318_v54   ;;  %1008 = vst.msk [vmem:[%s2629_s1 + $0x68] sm:$0x8] %vm3_vm0, %v318_v54  }
  0xaa   :  { %1009 = vst.msk [vmem:[%s2629_s1 + $0x87] sm:$0x10] %vm3_vm0, %v318_v54   ;;  %1010 = vst.msk [vmem:[%s2629_s1 + $0xa6] sm:$0x20] %vm3_vm0, %v318_v54  }
  0xab   :  { %1011 = vst.msk [vmem:[%s2629_s1 + $0xc5] sm:$0x40] %vm3_vm0, %v318_v54   ;;  %1012 = vst.msk [vmem:[%s2629_s1 + $0xe4] sm:$0x80] %vm3_vm0, %v318_v54  }
  0xac   :  { %1025 = vst.msk [vmem:[%s2629_s1 + $0x10c] sm:$0x1] %vm3_vm0, %v368_v55   ;;  %1016 = vst.msk [vmem:[%s2629_s1 + $0xc] sm:$0x1] %vm3_vm0, %v347_v56   ;;  %v449_v61 = vpop.permute.xlu1 %448   ;;  %v428_v62 = vpop.permute.xlu0 %427  }
  0xad   :  { %1017 = vst.msk [vmem:[%s2629_s1 + $0x2b] sm:$0x2] %vm3_vm0, %v347_v56   ;;  %1018 = vst.msk [vmem:[%s2629_s1 + $0x4a] sm:$0x4] %vm3_vm0, %v347_v56  }
  0xae   :  { %1019 = vst.msk [vmem:[%s2629_s1 + $0x69] sm:$0x8] %vm3_vm0, %v347_v56   ;;  %1020 = vst.msk [vmem:[%s2629_s1 + $0x88] sm:$0x10] %vm3_vm0, %v347_v56  }
  0xaf   :  { %1021 = vst.msk [vmem:[%s2629_s1 + $0xa7] sm:$0x20] %vm3_vm0, %v347_v56   ;;  %1022 = vst.msk [vmem:[%s2629_s1 + $0xc6] sm:$0x40] %vm3_vm0, %v347_v56  }
  0xb0   :  { %1023 = vst.msk [vmem:[%s2629_s1 + $0xe5] sm:$0x80] %vm3_vm0, %v347_v56   ;;  %1035 = vst.msk [vmem:[%s2629_s1 + $0x10d] sm:$0x1] %vm3_vm0, %v395_v57   ;;  %v476_v63 = vpop.permute.xlu1 %475   ;;  %v455_v0 = vpop.permute.xlu0 %454  }
  0xb1   :  { %1026 = vst.msk [vmem:[%s2629_s1 + $0xd] sm:$0x1] %vm3_vm0, %v374_v58   ;;  %1027 = vst.msk [vmem:[%s2629_s1 + $0x2c] sm:$0x2] %vm3_vm0, %v374_v58  }
  0xb2   :  { %1028 = vst.msk [vmem:[%s2629_s1 + $0x4b] sm:$0x4] %vm3_vm0, %v374_v58   ;;  %1029 = vst.msk [vmem:[%s2629_s1 + $0x6a] sm:$0x8] %vm3_vm0, %v374_v58  }
  0xb3   :  { %1030 = vst.msk [vmem:[%s2629_s1 + $0x89] sm:$0x10] %vm3_vm0, %v374_v58   ;;  %1031 = vst.msk [vmem:[%s2629_s1 + $0xa8] sm:$0x20] %vm3_vm0, %v374_v58  }
  0xb4   :  { %1032 = vst.msk [vmem:[%s2629_s1 + $0xc7] sm:$0x40] %vm3_vm0, %v374_v58   ;;  %1033 = vst.msk [vmem:[%s2629_s1 + $0xe6] sm:$0x80] %vm3_vm0, %v374_v58   ;;  %v503_v1 = vpop.permute.xlu1 %502   ;;  %v482_v2 = vpop.permute.xlu0 %481  }
  0xb5   :  { %1045 = vst.msk [vmem:[%s2629_s1 + $0x10e] sm:$0x1] %vm3_vm0, %v422_v59   ;;  %1036 = vst.msk [vmem:[%s2629_s1 + $0xe] sm:$0x1] %vm3_vm0, %v401_v60  }
  0xb6   :  { %1037 = vst.msk [vmem:[%s2629_s1 + $0x2d] sm:$0x2] %vm3_vm0, %v401_v60   ;;  %1038 = vst.msk [vmem:[%s2629_s1 + $0x4c] sm:$0x4] %vm3_vm0, %v401_v60  }
  0xb7   :  { %1039 = vst.msk [vmem:[%s2629_s1 + $0x6b] sm:$0x8] %vm3_vm0, %v401_v60   ;;  %1040 = vst.msk [vmem:[%s2629_s1 + $0x8a] sm:$0x10] %vm3_vm0, %v401_v60  }
  0xb8   :  { %1041 = vst.msk [vmem:[%s2629_s1 + $0xa9] sm:$0x20] %vm3_vm0, %v401_v60   ;;  %1042 = vst.msk [vmem:[%s2629_s1 + $0xc8] sm:$0x40] %vm3_vm0, %v401_v60   ;;  %v530_v3 = vpop.permute.xlu1 %529   ;;  %v509_v4 = vpop.permute.xlu0 %508  }
  0xb9   :  { %1043 = vst.msk [vmem:[%s2629_s1 + $0xe7] sm:$0x80] %vm3_vm0, %v401_v60   ;;  %1055 = vst.msk [vmem:[%s2629_s1 + $0x10f] sm:$0x1] %vm3_vm0, %v449_v61  }
  0xba   :  { %1046 = vst.msk [vmem:[%s2629_s1 + $0xf] sm:$0x1] %vm3_vm0, %v428_v62   ;;  %1047 = vst.msk [vmem:[%s2629_s1 + $0x2e] sm:$0x2] %vm3_vm0, %v428_v62  }
  0xbb   :  { %1048 = vst.msk [vmem:[%s2629_s1 + $0x4d] sm:$0x4] %vm3_vm0, %v428_v62   ;;  %1049 = vst.msk [vmem:[%s2629_s1 + $0x6c] sm:$0x8] %vm3_vm0, %v428_v62  }
  0xbc   :  { %1050 = vst.msk [vmem:[%s2629_s1 + $0x8b] sm:$0x10] %vm3_vm0, %v428_v62   ;;  %1051 = vst.msk [vmem:[%s2629_s1 + $0xaa] sm:$0x20] %vm3_vm0, %v428_v62   ;;  %v557_v5 = vpop.permute.xlu1 %556   ;;  %v536_v6 = vpop.permute.xlu0 %535  }
  0xbd   :  { %1052 = vst.msk [vmem:[%s2629_s1 + $0xc9] sm:$0x40] %vm3_vm0, %v428_v62   ;;  %1053 = vst.msk [vmem:[%s2629_s1 + $0xe8] sm:$0x80] %vm3_vm0, %v428_v62  }
  0xbe   :  { %1065 = vst.msk [vmem:[%s2629_s1 + $0x110] sm:$0x1] %vm3_vm0, %v476_v63   ;;  %1056 = vst.msk [vmem:[%s2629_s1 + $0x10] sm:$0x1] %vm3_vm0, %v455_v0  }
  0xbf   :  { %1057 = vst.msk [vmem:[%s2629_s1 + $0x2f] sm:$0x2] %vm3_vm0, %v455_v0   ;;  %1058 = vst.msk [vmem:[%s2629_s1 + $0x4e] sm:$0x4] %vm3_vm0, %v455_v0  }
  0xc0   :  { %1059 = vst.msk [vmem:[%s2629_s1 + $0x6d] sm:$0x8] %vm3_vm0, %v455_v0   ;;  %1060 = vst.msk [vmem:[%s2629_s1 + $0x8c] sm:$0x10] %vm3_vm0, %v455_v0   ;;  %v584_v7 = vpop.permute.xlu1 %583   ;;  %v563_v8 = vpop.permute.xlu0 %562  }
  0xc1   :  { %1061 = vst.msk [vmem:[%s2629_s1 + $0xab] sm:$0x20] %vm3_vm0, %v455_v0   ;;  %1062 = vst.msk [vmem:[%s2629_s1 + $0xca] sm:$0x40] %vm3_vm0, %v455_v0  }
  0xc2   :  { %1063 = vst.msk [vmem:[%s2629_s1 + $0xe9] sm:$0x80] %vm3_vm0, %v455_v0   ;;  %1075 = vst.msk [vmem:[%s2629_s1 + $0x111] sm:$0x1] %vm3_vm0, %v503_v1  }
  0xc3   :  { %1066 = vst.msk [vmem:[%s2629_s1 + $0x11] sm:$0x1] %vm3_vm0, %v482_v2   ;;  %1067 = vst.msk [vmem:[%s2629_s1 + $0x30] sm:$0x2] %vm3_vm0, %v482_v2  }
  0xc4   :  { %1068 = vst.msk [vmem:[%s2629_s1 + $0x4f] sm:$0x4] %vm3_vm0, %v482_v2   ;;  %1069 = vst.msk [vmem:[%s2629_s1 + $0x6e] sm:$0x8] %vm3_vm0, %v482_v2   ;;  %v611_v9 = vpop.permute.xlu1 %610   ;;  %v590_v10 = vpop.permute.xlu0 %589  }
  0xc5   :  { %1070 = vst.msk [vmem:[%s2629_s1 + $0x8d] sm:$0x10] %vm3_vm0, %v482_v2   ;;  %1071 = vst.msk [vmem:[%s2629_s1 + $0xac] sm:$0x20] %vm3_vm0, %v482_v2  }
  0xc6   :  { %1072 = vst.msk [vmem:[%s2629_s1 + $0xcb] sm:$0x40] %vm3_vm0, %v482_v2   ;;  %1073 = vst.msk [vmem:[%s2629_s1 + $0xea] sm:$0x80] %vm3_vm0, %v482_v2  }
  0xc7   :  { %1085 = vst.msk [vmem:[%s2629_s1 + $0x112] sm:$0x1] %vm3_vm0, %v530_v3   ;;  %1076 = vst.msk [vmem:[%s2629_s1 + $0x12] sm:$0x1] %vm3_vm0, %v509_v4  }
  0xc8   :  { %1077 = vst.msk [vmem:[%s2629_s1 + $0x31] sm:$0x2] %vm3_vm0, %v509_v4   ;;  %1078 = vst.msk [vmem:[%s2629_s1 + $0x50] sm:$0x4] %vm3_vm0, %v509_v4   ;;  %v638_v11 = vpop.permute.xlu1 %637   ;;  %v617_v12 = vpop.permute.xlu0 %616  }
  0xc9   :  { %1079 = vst.msk [vmem:[%s2629_s1 + $0x6f] sm:$0x8] %vm3_vm0, %v509_v4   ;;  %1080 = vst.msk [vmem:[%s2629_s1 + $0x8e] sm:$0x10] %vm3_vm0, %v509_v4  }
  0xca   :  { %1081 = vst.msk [vmem:[%s2629_s1 + $0xad] sm:$0x20] %vm3_vm0, %v509_v4   ;;  %1082 = vst.msk [vmem:[%s2629_s1 + $0xcc] sm:$0x40] %vm3_vm0, %v509_v4  }
  0xcb   :  { %1083 = vst.msk [vmem:[%s2629_s1 + $0xeb] sm:$0x80] %vm3_vm0, %v509_v4   ;;  %1095 = vst.msk [vmem:[%s2629_s1 + $0x113] sm:$0x1] %vm3_vm0, %v557_v5  }
  0xcc   :  { %1086 = vst.msk [vmem:[%s2629_s1 + $0x13] sm:$0x1] %vm3_vm0, %v536_v6   ;;  %1087 = vst.msk [vmem:[%s2629_s1 + $0x32] sm:$0x2] %vm3_vm0, %v536_v6   ;;  %v665_v13 = vpop.permute.xlu1 %664   ;;  %v644_v14 = vpop.permute.xlu0 %643  }
  0xcd   :  { %1088 = vst.msk [vmem:[%s2629_s1 + $0x51] sm:$0x4] %vm3_vm0, %v536_v6   ;;  %1089 = vst.msk [vmem:[%s2629_s1 + $0x70] sm:$0x8] %vm3_vm0, %v536_v6  }
  0xce   :  { %1090 = vst.msk [vmem:[%s2629_s1 + $0x8f] sm:$0x10] %vm3_vm0, %v536_v6   ;;  %1091 = vst.msk [vmem:[%s2629_s1 + $0xae] sm:$0x20] %vm3_vm0, %v536_v6  }
  0xcf   :  { %1092 = vst.msk [vmem:[%s2629_s1 + $0xcd] sm:$0x40] %vm3_vm0, %v536_v6   ;;  %1093 = vst.msk [vmem:[%s2629_s1 + $0xec] sm:$0x80] %vm3_vm0, %v536_v6  }
  0xd0   :  { %1105 = vst.msk [vmem:[%s2629_s1 + $0x114] sm:$0x1] %vm3_vm0, %v584_v7   ;;  %1096 = vst.msk [vmem:[%s2629_s1 + $0x14] sm:$0x1] %vm3_vm0, %v563_v8   ;;  %v692_v15 = vpop.permute.xlu1 %691   ;;  %v671_v16 = vpop.permute.xlu0 %670  }
  0xd1   :  { %1097 = vst.msk [vmem:[%s2629_s1 + $0x33] sm:$0x2] %vm3_vm0, %v563_v8   ;;  %1098 = vst.msk [vmem:[%s2629_s1 + $0x52] sm:$0x4] %vm3_vm0, %v563_v8  }
  0xd2   :  { %1099 = vst.msk [vmem:[%s2629_s1 + $0x71] sm:$0x8] %vm3_vm0, %v563_v8   ;;  %1100 = vst.msk [vmem:[%s2629_s1 + $0x90] sm:$0x10] %vm3_vm0, %v563_v8  }
  0xd3   :  { %1101 = vst.msk [vmem:[%s2629_s1 + $0xaf] sm:$0x20] %vm3_vm0, %v563_v8   ;;  %1102 = vst.msk [vmem:[%s2629_s1 + $0xce] sm:$0x40] %vm3_vm0, %v563_v8  }
  0xd4   :  { %1103 = vst.msk [vmem:[%s2629_s1 + $0xed] sm:$0x80] %vm3_vm0, %v563_v8   ;;  %1115 = vst.msk [vmem:[%s2629_s1 + $0x115] sm:$0x1] %vm3_vm0, %v611_v9   ;;  %v719_v17 = vpop.permute.xlu1 %718   ;;  %v698_v18 = vpop.permute.xlu0 %697  }
  0xd5   :  { %1106 = vst.msk [vmem:[%s2629_s1 + $0x15] sm:$0x1] %vm3_vm0, %v590_v10   ;;  %1107 = vst.msk [vmem:[%s2629_s1 + $0x34] sm:$0x2] %vm3_vm0, %v590_v10  }
  0xd6   :  { %1108 = vst.msk [vmem:[%s2629_s1 + $0x53] sm:$0x4] %vm3_vm0, %v590_v10   ;;  %1109 = vst.msk [vmem:[%s2629_s1 + $0x72] sm:$0x8] %vm3_vm0, %v590_v10  }
  0xd7   :  { %1110 = vst.msk [vmem:[%s2629_s1 + $0x91] sm:$0x10] %vm3_vm0, %v590_v10   ;;  %1111 = vst.msk [vmem:[%s2629_s1 + $0xb0] sm:$0x20] %vm3_vm0, %v590_v10  }
  0xd8   :  { %1112 = vst.msk [vmem:[%s2629_s1 + $0xcf] sm:$0x40] %vm3_vm0, %v590_v10   ;;  %1113 = vst.msk [vmem:[%s2629_s1 + $0xee] sm:$0x80] %vm3_vm0, %v590_v10   ;;  %v746_v19 = vpop.permute.xlu1 %745   ;;  %v725_v20 = vpop.permute.xlu0 %724  }
  0xd9   :  { %1125 = vst.msk [vmem:[%s2629_s1 + $0x116] sm:$0x1] %vm3_vm0, %v638_v11   ;;  %1116 = vst.msk [vmem:[%s2629_s1 + $0x16] sm:$0x1] %vm3_vm0, %v617_v12  }
  0xda   :  { %1117 = vst.msk [vmem:[%s2629_s1 + $0x35] sm:$0x2] %vm3_vm0, %v617_v12   ;;  %1118 = vst.msk [vmem:[%s2629_s1 + $0x54] sm:$0x4] %vm3_vm0, %v617_v12  }
  0xdb   :  { %1119 = vst.msk [vmem:[%s2629_s1 + $0x73] sm:$0x8] %vm3_vm0, %v617_v12   ;;  %1120 = vst.msk [vmem:[%s2629_s1 + $0x92] sm:$0x10] %vm3_vm0, %v617_v12  }
  0xdc   :  { %1121 = vst.msk [vmem:[%s2629_s1 + $0xb1] sm:$0x20] %vm3_vm0, %v617_v12   ;;  %1122 = vst.msk [vmem:[%s2629_s1 + $0xd0] sm:$0x40] %vm3_vm0, %v617_v12   ;;  %v773_v21 = vpop.permute.xlu1 %772   ;;  %v752_v22 = vpop.permute.xlu0 %751  }
  0xdd   :  { %1123 = vst.msk [vmem:[%s2629_s1 + $0xef] sm:$0x80] %vm3_vm0, %v617_v12   ;;  %1135 = vst.msk [vmem:[%s2629_s1 + $0x117] sm:$0x1] %vm3_vm0, %v665_v13  }
  0xde   :  { %1126 = vst.msk [vmem:[%s2629_s1 + $0x17] sm:$0x1] %vm3_vm0, %v644_v14   ;;  %1127 = vst.msk [vmem:[%s2629_s1 + $0x36] sm:$0x2] %vm3_vm0, %v644_v14  }
  0xdf   :  { %1128 = vst.msk [vmem:[%s2629_s1 + $0x55] sm:$0x4] %vm3_vm0, %v644_v14   ;;  %1129 = vst.msk [vmem:[%s2629_s1 + $0x74] sm:$0x8] %vm3_vm0, %v644_v14  }
  0xe0   :  { %1130 = vst.msk [vmem:[%s2629_s1 + $0x93] sm:$0x10] %vm3_vm0, %v644_v14   ;;  %1131 = vst.msk [vmem:[%s2629_s1 + $0xb2] sm:$0x20] %vm3_vm0, %v644_v14   ;;  %v800_v23 = vpop.permute.xlu1 %799   ;;  %v779_v24 = vpop.permute.xlu0 %778  }
  0xe1   :  { %1132 = vst.msk [vmem:[%s2629_s1 + $0xd1] sm:$0x40] %vm3_vm0, %v644_v14   ;;  %1133 = vst.msk [vmem:[%s2629_s1 + $0xf0] sm:$0x80] %vm3_vm0, %v644_v14  }
  0xe2   :  { %1145 = vst.msk [vmem:[%s2629_s1 + $0x118] sm:$0x1] %vm3_vm0, %v692_v15   ;;  %1136 = vst.msk [vmem:[%s2629_s1 + $0x18] sm:$0x1] %vm3_vm0, %v671_v16  }
  0xe3   :  { %1137 = vst.msk [vmem:[%s2629_s1 + $0x37] sm:$0x2] %vm3_vm0, %v671_v16   ;;  %1138 = vst.msk [vmem:[%s2629_s1 + $0x56] sm:$0x4] %vm3_vm0, %v671_v16  }
  0xe4   :  { %1139 = vst.msk [vmem:[%s2629_s1 + $0x75] sm:$0x8] %vm3_vm0, %v671_v16   ;;  %1140 = vst.msk [vmem:[%s2629_s1 + $0x94] sm:$0x10] %vm3_vm0, %v671_v16   ;;  %v827_v25 = vpop.permute.xlu1 %826   ;;  %v806_v26 = vpop.permute.xlu0 %805  }
  0xe5   :  { %1141 = vst.msk [vmem:[%s2629_s1 + $0xb3] sm:$0x20] %vm3_vm0, %v671_v16   ;;  %1142 = vst.msk [vmem:[%s2629_s1 + $0xd2] sm:$0x40] %vm3_vm0, %v671_v16  }
  0xe6   :  { %1143 = vst.msk [vmem:[%s2629_s1 + $0xf1] sm:$0x80] %vm3_vm0, %v671_v16   ;;  %1155 = vst.msk [vmem:[%s2629_s1 + $0x119] sm:$0x1] %vm3_vm0, %v719_v17  }
  0xe7   :  { %1146 = vst.msk [vmem:[%s2629_s1 + $0x19] sm:$0x1] %vm3_vm0, %v698_v18   ;;  %1147 = vst.msk [vmem:[%s2629_s1 + $0x38] sm:$0x2] %vm3_vm0, %v698_v18  }
  0xe8   :  { %1148 = vst.msk [vmem:[%s2629_s1 + $0x57] sm:$0x4] %vm3_vm0, %v698_v18   ;;  %1149 = vst.msk [vmem:[%s2629_s1 + $0x76] sm:$0x8] %vm3_vm0, %v698_v18   ;;  %v854_v27 = vpop.permute.xlu1 %853   ;;  %v833_v28 = vpop.permute.xlu0 %832  }
  0xe9   :  { %1150 = vst.msk [vmem:[%s2629_s1 + $0x95] sm:$0x10] %vm3_vm0, %v698_v18   ;;  %1151 = vst.msk [vmem:[%s2629_s1 + $0xb4] sm:$0x20] %vm3_vm0, %v698_v18  }
  0xea   :  { %1152 = vst.msk [vmem:[%s2629_s1 + $0xd3] sm:$0x40] %vm3_vm0, %v698_v18   ;;  %1153 = vst.msk [vmem:[%s2629_s1 + $0xf2] sm:$0x80] %vm3_vm0, %v698_v18  }
  0xeb   :  { %1165 = vst.msk [vmem:[%s2629_s1 + $0x11a] sm:$0x1] %vm3_vm0, %v746_v19   ;;  %1156 = vst.msk [vmem:[%s2629_s1 + $0x1a] sm:$0x1] %vm3_vm0, %v725_v20  }
  0xec   :  { %1157 = vst.msk [vmem:[%s2629_s1 + $0x39] sm:$0x2] %vm3_vm0, %v725_v20   ;;  %1158 = vst.msk [vmem:[%s2629_s1 + $0x58] sm:$0x4] %vm3_vm0, %v725_v20   ;;  %v881_v29 = vpop.permute.xlu1 %880   ;;  %v860_v30 = vpop.permute.xlu0 %859  }
  0xed   :  { %1159 = vst.msk [vmem:[%s2629_s1 + $0x77] sm:$0x8] %vm3_vm0, %v725_v20   ;;  %1160 = vst.msk [vmem:[%s2629_s1 + $0x96] sm:$0x10] %vm3_vm0, %v725_v20  }
  0xee   :  { %1161 = vst.msk [vmem:[%s2629_s1 + $0xb5] sm:$0x20] %vm3_vm0, %v725_v20   ;;  %1162 = vst.msk [vmem:[%s2629_s1 + $0xd4] sm:$0x40] %vm3_vm0, %v725_v20  }
  0xef   :  { %1163 = vst.msk [vmem:[%s2629_s1 + $0xf3] sm:$0x80] %vm3_vm0, %v725_v20   ;;  %1175 = vst.msk [vmem:[%s2629_s1 + $0x11b] sm:$0x1] %vm3_vm0, %v773_v21  }
  0xf0   :  { %1166 = vst.msk [vmem:[%s2629_s1 + $0x1b] sm:$0x1] %vm3_vm0, %v752_v22   ;;  %1167 = vst.msk [vmem:[%s2629_s1 + $0x3a] sm:$0x2] %vm3_vm0, %v752_v22  }
  0xf1   :  { %1168 = vst.msk [vmem:[%s2629_s1 + $0x59] sm:$0x4] %vm3_vm0, %v752_v22   ;;  %1169 = vst.msk [vmem:[%s2629_s1 + $0x78] sm:$0x8] %vm3_vm0, %v752_v22  }
  0xf2   :  { %1170 = vst.msk [vmem:[%s2629_s1 + $0x97] sm:$0x10] %vm3_vm0, %v752_v22   ;;  %1171 = vst.msk [vmem:[%s2629_s1 + $0xb6] sm:$0x20] %vm3_vm0, %v752_v22  }
  0xf3   :  { %1172 = vst.msk [vmem:[%s2629_s1 + $0xd5] sm:$0x40] %vm3_vm0, %v752_v22   ;;  %1173 = vst.msk [vmem:[%s2629_s1 + $0xf4] sm:$0x80] %vm3_vm0, %v752_v22  }
  0xf4   :  { %1185 = vst.msk [vmem:[%s2629_s1 + $0x11c] sm:$0x1] %vm3_vm0, %v800_v23   ;;  %1176 = vst.msk [vmem:[%s2629_s1 + $0x1c] sm:$0x1] %vm3_vm0, %v779_v24  }
  0xf5   :  { %1177 = vst.msk [vmem:[%s2629_s1 + $0x3b] sm:$0x2] %vm3_vm0, %v779_v24   ;;  %1178 = vst.msk [vmem:[%s2629_s1 + $0x5a] sm:$0x4] %vm3_vm0, %v779_v24  }
  0xf6   :  { %1179 = vst.msk [vmem:[%s2629_s1 + $0x79] sm:$0x8] %vm3_vm0, %v779_v24   ;;  %1180 = vst.msk [vmem:[%s2629_s1 + $0x98] sm:$0x10] %vm3_vm0, %v779_v24  }
  0xf7   :  { %1181 = vst.msk [vmem:[%s2629_s1 + $0xb7] sm:$0x20] %vm3_vm0, %v779_v24   ;;  %1182 = vst.msk [vmem:[%s2629_s1 + $0xd6] sm:$0x40] %vm3_vm0, %v779_v24  }
  0xf8   :  { %1183 = vst.msk [vmem:[%s2629_s1 + $0xf5] sm:$0x80] %vm3_vm0, %v779_v24   ;;  %1195 = vst.msk [vmem:[%s2629_s1 + $0x11d] sm:$0x1] %vm3_vm0, %v827_v25  }
  0xf9   :  { %1186 = vst.msk [vmem:[%s2629_s1 + $0x1d] sm:$0x1] %vm3_vm0, %v806_v26   ;;  %1187 = vst.msk [vmem:[%s2629_s1 + $0x3c] sm:$0x2] %vm3_vm0, %v806_v26  }
  0xfa   :  { %1188 = vst.msk [vmem:[%s2629_s1 + $0x5b] sm:$0x4] %vm3_vm0, %v806_v26   ;;  %1189 = vst.msk [vmem:[%s2629_s1 + $0x7a] sm:$0x8] %vm3_vm0, %v806_v26  }
  0xfb   :  { %1190 = vst.msk [vmem:[%s2629_s1 + $0x99] sm:$0x10] %vm3_vm0, %v806_v26   ;;  %1191 = vst.msk [vmem:[%s2629_s1 + $0xb8] sm:$0x20] %vm3_vm0, %v806_v26  }
  0xfc   :  { %1192 = vst.msk [vmem:[%s2629_s1 + $0xd7] sm:$0x40] %vm3_vm0, %v806_v26   ;;  %1193 = vst.msk [vmem:[%s2629_s1 + $0xf6] sm:$0x80] %vm3_vm0, %v806_v26  }
  0xfd   :  { %1205 = vst.msk [vmem:[%s2629_s1 + $0x11e] sm:$0x1] %vm3_vm0, %v854_v27   ;;  %1196 = vst.msk [vmem:[%s2629_s1 + $0x1e] sm:$0x1] %vm3_vm0, %v833_v28  }
  0xfe   :  { %1197 = vst.msk [vmem:[%s2629_s1 + $0x3d] sm:$0x2] %vm3_vm0, %v833_v28   ;;  %1198 = vst.msk [vmem:[%s2629_s1 + $0x5c] sm:$0x4] %vm3_vm0, %v833_v28  }
  0xff   :  { %1199 = vst.msk [vmem:[%s2629_s1 + $0x7b] sm:$0x8] %vm3_vm0, %v833_v28   ;;  %1200 = vst.msk [vmem:[%s2629_s1 + $0x9a] sm:$0x10] %vm3_vm0, %v833_v28  }
 0x100   :  { %1201 = vst.msk [vmem:[%s2629_s1 + $0xb9] sm:$0x20] %vm3_vm0, %v833_v28   ;;  %1202 = vst.msk [vmem:[%s2629_s1 + $0xd8] sm:$0x40] %vm3_vm0, %v833_v28  }
 0x101   :  { %1203 = vst.msk [vmem:[%s2629_s1 + $0xf7] sm:$0x80] %vm3_vm0, %v833_v28   ;;  %1215 = vst.msk [vmem:[%s2629_s1 + $0x11f] sm:$0x1] %vm3_vm0, %v881_v29  }
 0x102   :  { %1206 = vst.msk [vmem:[%s2629_s1 + $0x1f] sm:$0x1] %vm3_vm0, %v860_v30   ;;  %1207 = vst.msk [vmem:[%s2629_s1 + $0x3e] sm:$0x2] %vm3_vm0, %v860_v30  }
 0x103   :  { %1208 = vst.msk [vmem:[%s2629_s1 + $0x5d] sm:$0x4] %vm3_vm0, %v860_v30   ;;  %1209 = vst.msk [vmem:[%s2629_s1 + $0x7c] sm:$0x8] %vm3_vm0, %v860_v30  }
 0x104   :  { %1210 = vst.msk [vmem:[%s2629_s1 + $0x9b] sm:$0x10] %vm3_vm0, %v860_v30   ;;  %1211 = vst.msk [vmem:[%s2629_s1 + $0xba] sm:$0x20] %vm3_vm0, %v860_v30  }
 0x105   :  { %1212 = vst.msk [vmem:[%s2629_s1 + $0xd9] sm:$0x40] %vm3_vm0, %v860_v30   ;;  %1213 = vst.msk [vmem:[%s2629_s1 + $0xf8] sm:$0x80] %vm3_vm0, %v860_v30  }

// kernel: critic_forward_batched.1
= control target key start
LH: loop header
LB: loop body
LE: loop exit
PB: predicated region body
PF: predicated region fallthrough
CT: control target
= control target key end

     0   :  { %s6309_s12 = smov 0   ;;  %s8652_s0 = inlined_call_operand.vmem [shape: f32[1200,36], index: 0, kind: input, shape index: {}]   ;;  %s8653_s1 = inlined_call_operand.vmem [shape: f32[1200,4], index: 1, kind: input, shape index: {}]   ;;  %s8654_s2 = inlined_call_operand.vmem [shape: f32[432,256], index: 2, kind: input, shape index: {}]   ;;  %s8655_s3 = inlined_call_operand.vmem [shape: f32[2048,1], index: 3, kind: output, shape index: {}]  }
   0x1 LB: > { %s5280_s13 = sadd.s32 4294967295, %s6285_s12   ;;  %p5284_p0 = scmp.ge.s32.totalorder %s6285_s12, 1  ;;  %s6285_s12 = sphi %s6309_s12, %s13_s12  }
   0x2   : > { %p165_p1 = scmp.lt.s32.totalorder %s6285_s12, 3 }
   0x4   : > { %p166_p2 = pnand %p5284_p0, %p165_p1 }
   0x6   : > { %169 = sbr.rel (%p166_p2) target bundleno = 1548 (0x60c), region = 32 }
   0xd   : > { %v364_v0 = vld [vmem:[%s8654_s2 + $0x300] sm:$0xff]  ;;  %v365_v1 = vld [vmem:[%s8654_s2 + $0x310] sm:$0xff]  ;;  %s6326_s20 = sshll.u32 %s5280_s13, 7  ;;  %v370_v6 = vld [vmem:[%s8654_s2 + $0x8] sm:$0xff]  ;;  %vm454_vm0 = vcmask 293888   ;;  %vm839_vm1 = vcmask 1043456  }
   0xe   : > { %v366_v2 = vld [vmem:[%s8654_s2 + $0x320] sm:$0xff]  ;;  %v6126_v3 = vpack.c.bf16 %v365_v1, %v364_v0  ;;  %v367_v4 = vld [vmem:[%s8654_s2 + $0x330] sm:$0xff]  ;;  %p207_p3 = scmp.lt.s32.totalorder %s6326_s20, 149  ;;  %v372_v7 = vld [vmem:[%s8654_s2 + $0x18] sm:$0xff]  ;;  %v6287_v33 = vmov 0.0|0.0   ;;  %vm4698_vm2 = vcmask 31744  }
   0xf   : > { %v6130_v5 = vpack.c.bf16 %v367_v4, %v366_v2  ;;  %v6134_v8 = vpack.c.bf16 %v372_v7, %v370_v6  ;;  %v369_v9 = vld [vmem:[%s8654_s2] sm:$0xff]  ;;  %v371_v10 = vld [vmem:[%s8654_s2 + $0x10] sm:$0xff]  ;;  %v374_v11 = vld [vmem:[%s8654_s2 + $0x28] sm:$0xff]  ;;  %p231_p4 = scmp.lt.s32.totalorder %s6326_s20, 255  ;;  %vm5083_vm3 = vcmask 7168  }
  0x10   : > { %6127 = vmatprep.subr.bf16.mxu0 %v6126_v3  ;;  %s6339_s27 = scalar_select %p207_p3, %s6326_s20, 149  ;;  %v6136_v12 = vpack.c.bf16 %v371_v10, %v369_v9  ;;  %v376_v13 = vld [vmem:[%s8654_s2 + $0x38] sm:$0xff]  ;;  %v373_v14 = vld [vmem:[%s8654_s2 + $0x20] sm:$0xff]  ;;  %v375_v15 = vld [vmem:[%s8654_s2 + $0x30] sm:$0xff] }
  0x11   : > { %6129 = vmatpush3.bf16.msra.mxu0 %v6126_v3  ;;  %6135 = vmatprep.subr.bf16.mxu1 %v6134_v8  ;;  %v6138_v16 = vpack.c.bf16 %v376_v13, %v374_v11  ;;  %v378_v17 = vld [vmem:[%s8654_s2 + $0x48] sm:$0xff]  ;;  %v380_v18 = vld [vmem:[%s8654_s2 + $0x58] sm:$0xff]  ;;  %v368_v19 = vld [vmem:[%s8654_s2 + $0x340] sm:$0xf]  ;;  %v6140_v20 = vpack.c.bf16 %v375_v15, %v373_v14  ;;  %s8669_s20 = smov (!%p231_p4, %s6326_s20), 255 }
  0x12   : > { %6131 = vmatprep.subr.bf16.mxu0 %v6130_v5  ;;  %s5286_s14 = sshll.u32 %s6339_s27, 3  ;;  %6137 = vmatpush1.bf16.msra.mxu1 %v6136_v12  ;;  %v401_v22 = vld [vmem:[%s8654_s2 + $0x100] sm:$0xff]  ;;  %v402_v23 = vld [vmem:[%s8654_s2 + $0x110] sm:$0xff]  ;;  %v6142_v24 = vpack.c.bf16 %v380_v18, %v378_v17  ;;  %v382_v41 = vld [vmem:[%s8654_s2 + $0x68] sm:$0xff]  ;;  %s5290_s29 = sshll.u32 %s8669_s20, 3 }
  0x13   : > { %s6374_s24 = scalar_lea.vmem %s8652_s0, %s5286_s14  ;;  %6139 = vmatprep.subr.bf16.mxu1 %v6138_v16  ;;  %v377_v25 = vld [vmem:[%s8654_s2 + $0x40] sm:$0xff]  ;;  %v379_v26 = vld [vmem:[%s8654_s2 + $0x50] sm:$0xff]  ;;  %v6167_v28 = vpack.c.bf16 %v402_v23, %v401_v22  ;;  %v384_v42 = vld [vmem:[%s8654_s2 + $0x78] sm:$0xff]  ;;  %s7925_s25 = scalar_lea.vmem %s8653_s1, %s5286_s14 }
  0x14   : > { %v236_v21 = vld [vmem:[%s6374_s24] sm:$0xff]  ;;  %v237_v27 = vld [vmem:[%s6374_s24 + $0x8] sm:$0xff]  ;;  %v238_v29 = vld [vmem:[%s6374_s24 + $0x10] sm:$0xff]  ;;  %v6144_v30 = vpack.c.bf16 %v379_v26, %v377_v25  ;;  %v6146_v45 = vpack.c.bf16 %v384_v42, %v382_v41  ;;  %s8140_s4 = scalar_lea.vmem %s8655_s3, %s5290_s29 }
  0x15   : > { %6133 = vmatpush3.bf16.msra.mxu0 %v6130_v5  ;;  %5710 = vmatprep.mubr.msk.f32.mxu0 %vm454_vm0, %v236_v21  ;;  %v403_v31 = vld [vmem:[%s8654_s2 + $0x120] sm:$0xff]  ;;  %v404_v32 = vld [vmem:[%s8654_s2 + $0x130] sm:$0xff]  ;;  %v239_v34 = vld [vmem:[%s6374_s24 + $0x18] sm:$0xff] }
  0x16   : > { %5708 = vmatprep.subr.msk.mxu0 %vm839_vm1, %v368_v19  ;;  %6141 = vmatpush1.bf16.msra.mxu1 %v6140_v20  ;;  %v6170_v35 = vpack.c.bf16 %v404_v32, %v403_v31  ;;  %v240_v36 = vld [vmem:[%s6374_s24 + $0x20] sm:$0xff]  ;;  %v241_v37 = vld [vmem:[%s6374_s24 + $0x28] sm:$0xff]  ;;  %v242_v38 = vld [vmem:[%s6374_s24 + $0x30] sm:$0xff] }
  0x17   : > { %6143 = vmatprep.subr.bf16.mxu1 %v6142_v24  ;;  %v243_v39 = vld [vmem:[%s6374_s24 + $0x38] sm:$0xff]  ;;  %v244_v40 = vld [vmem:[%s6374_s24 + $0x40] sm:$0xff]  ;;  %v245_v44 = vld [vmem:[%s6374_s24 + $0x48] sm:$0xff] }
  0x18   : > { %v381_v43 = vld [vmem:[%s8654_s2 + $0x60] sm:$0xff]  ;;  %v383_v46 = vld [vmem:[%s8654_s2 + $0x70] sm:$0xff]  ;;  %v386_v47 = vld [vmem:[%s8654_s2 + $0x88] sm:$0xff] }
  0x19   : > { %5709 = vmatpush3.msk.msra.mxu0 %vm839_vm1, %v368_v19  ;;  %v6148_v48 = vpack.c.bf16 %v383_v46, %v381_v43  ;;  %v388_v49 = vld [vmem:[%s8654_s2 + $0x98] sm:$0xff]  ;;  %v385_v50 = vld [vmem:[%s8654_s2 + $0x80] sm:$0xff]  ;;  %v387_v51 = vld [vmem:[%s8654_s2 + $0x90] sm:$0xff] }
  0x1a   : > { %5711 = vmatmul.mubr.msk.f32.vlgmr.msra.gmra.mrb[0].mxu0 %vm454_vm0, %v237_v27  ;;  %6166 = vmatprep.subr.bf16.mxu0 %v6287_v33  ;;  %v246_v52 = vld [vmem:[%s6374_s24 + $0x50] sm:$0xff]  ;;  %v6150_v53 = vpack.c.bf16 %v388_v49, %v386_v47  ;;  %v390_v54 = vld [vmem:[%s8654_s2 + $0xa8] sm:$0xff]  ;;  %v392_v55 = vld [vmem:[%s8654_s2 + $0xb8] sm:$0xff]  ;;  %v6152_v56 = vpack.c.bf16 %v387_v51, %v385_v50  ;;  %v6288_v49 = vmov 0.0  }
  0x1b   : > { %5713 = vmatprep.mubr.msk.f32.mxu0 %vm454_vm0, %v238_v29  ;;  %6168 = vmatpush1.bf16.msra.mxu0 %v6167_v28  ;;  %v6154_v57 = vpack.c.bf16 %v392_v55, %v390_v54  ;;  %v389_v58 = vld [vmem:[%s8654_s2 + $0xa0] sm:$0xff]  ;;  %v391_v59 = vld [vmem:[%s8654_s2 + $0xb0] sm:$0xff]  ;;  %v247_v60 = vld [vmem:[%s6374_s24 + $0x58] sm:$0xff] }
  0x1c   : > { %6145 = vmatpush1.bf16.msra.mxu1 %v6144_v30  ;;  %6169 = vmatprep.subr.bf16.mxu0 %v6287_v33  ;;  %v394_v61 = vld [vmem:[%s8654_s2 + $0xc8] sm:$0xff]  ;;  %v396_v62 = vld [vmem:[%s8654_s2 + $0xd8] sm:$0xff]  ;;  %v248_v63 = vld [vmem:[%s6374_s24 + $0x60] sm:$0xff]  ;;  %v6156_v0 = vpack.c.bf16 %v391_v59, %v389_v58 }
  0x1d   : > { %6147 = vmatprep.subr.bf16.mxu1 %v6146_v45  ;;  %v6158_v1 = vpack.c.bf16 %v396_v62, %v394_v61  ;;  %v393_v2 = vld [vmem:[%s8654_s2 + $0xc0] sm:$0xff]  ;;  %v395_v3 = vld [vmem:[%s8654_s2 + $0xd0] sm:$0xff]  ;;  %v249_v4 = vld [vmem:[%s6374_s24 + $0x68] sm:$0xff]  ;;  %1751 = vmatprep.mubr.f32.mxu1 %v6288_v49 }
  0x1e   : > { %5714 = vmatmul.mubr.msk.f32.gmra.mrb[2].mxu0 %vm454_vm0, %v239_v34  ;;  %v250_v5 = vld [vmem:[%s6374_s24 + $0x70] sm:$0xff]  ;;  %v6160_v6 = vpack.c.bf16 %v395_v3, %v393_v2  ;;  %v251_v7 = vld [vmem:[%s6374_s24 + $0x78] sm:$0xff]  ;;  %v252_v8 = vld [vmem:[%s6374_s24 + $0x80] sm:$0xff] }
  0x1f   : > { %5716 = vmatprep.mubr.msk.f32.mxu0 %vm454_vm0, %v240_v36  ;;  %6171 = vmatpush1.bf16.msra.mxu0 %v6170_v35  ;;  %v253_v9 = vld [vmem:[%s6374_s24 + $0x88] sm:$0xff]  ;;  %v254_v10 = vld [vmem:[%s6374_s24 + $0x90] sm:$0xff]  ;;  %v255_v11 = vld [vmem:[%s6374_s24 + $0x98] sm:$0xff] }
  0x20   : > { %6172 = vmatprep.subr.bf16.mxu0 %v6287_v33  ;;  %6149 = vmatpush1.bf16.msra.mxu1 %v6148_v48  ;;  %v256_v12 = vld [vmem:[%s6374_s24 + $0xa0] sm:$0xff]  ;;  %v257_v13 = vld [vmem:[%s6374_s24 + $0xa8] sm:$0xff]  ;;  %v258_v14 = vld [vmem:[%s6374_s24 + $0xb0] sm:$0xff] }
  0x21   : > { %6151 = vmatprep.subr.bf16.mxu1 %v6150_v53  ;;  %v259_v15 = vld [vmem:[%s6374_s24 + $0xb8] sm:$0xff]  ;;  %v260_v16 = vld [vmem:[%s6374_s24 + $0xc0] sm:$0xff]  ;;  %v261_v17 = vld [vmem:[%s6374_s24 + $0xc8] sm:$0xff] }
  0x22   : > { %5717 = vmatmul.mubr.msk.f32.gmra.mrb[4].mxu0 %vm454_vm0, %v241_v37  ;;  %v262_v18 = vld [vmem:[%s6374_s24 + $0xd0] sm:$0xff]  ;;  %v263_v19 = vld [vmem:[%s6374_s24 + $0xd8] sm:$0xff]  ;;  %v264_v20 = vld [vmem:[%s6374_s24 + $0xe0] sm:$0xff] }
  0x23   : > { %5719 = vmatprep.mubr.msk.f32.mxu0 %vm454_vm0, %v242_v38  ;;  %v265_v21 = vld [vmem:[%s6374_s24 + $0xe8] sm:$0xff]  ;;  %v266_v22 = vld [vmem:[%s6374_s24 + $0xf0] sm:$0xff]  ;;  %v267_v23 = vld [vmem:[%s6374_s24 + $0xf8] sm:$0xff] }
  0x24   : > { %6153 = vmatpush1.bf16.msra.mxu1 %v6152_v56  ;;  %v268_v24 = vld [vmem:[%s6374_s24 + $0x100] sm:$0xff]  ;;  %v269_v25 = vld [vmem:[%s6374_s24 + $0x108] sm:$0xff]  ;;  %v270_v26 = vld [vmem:[%s6374_s24 + $0x110] sm:$0xff] }
  0x25   : > { %6155 = vmatprep.subr.bf16.mxu1 %v6154_v57  ;;  %v271_v27 = vld [vmem:[%s6374_s24 + $0x118] sm:$0xff]  ;;  %v272_v28 = vld [vmem:[%s6374_s24 + $0x120] sm:$0xff]  ;;  %v273_v29 = vld [vmem:[%s6374_s24 + $0x128] sm:$0xff] }
  0x26   : > { %5720 = vmatmul.mubr.msk.f32.gmra.mrb[6].mxu0 %vm454_vm0, %v243_v39  ;;  %v274_v30 = vld [vmem:[%s6374_s24 + $0x130] sm:$0xff]  ;;  %v275_v31 = vld [vmem:[%s6374_s24 + $0x138] sm:$0xff]  ;;  %v276_v32 = vld [vmem:[%s6374_s24 + $0x140] sm:$0xff] }
  0x27   : > { %5722 = vmatprep.mubr.msk.f32.mxu0 %vm454_vm0, %v244_v40  ;;  %v277_v34 = vld [vmem:[%s6374_s24 + $0x148] sm:$0xff]  ;;  %v278_v35 = vld [vmem:[%s6374_s24 + $0x150] sm:$0xff]  ;;  %v279_v36 = vld [vmem:[%s6374_s24 + $0x158] sm:$0xff] }
  0x28   : > { %6157 = vmatpush1.bf16.msra.mxu1 %v6156_v0  ;;  %v280_v37 = vld [vmem:[%s6374_s24 + $0x160] sm:$0xff]  ;;  %v398_v38 = vld [vmem:[%s8654_s2 + $0xe8] sm:$0xff]  ;;  %v400_v39 = vld [vmem:[%s8654_s2 + $0xf8] sm:$0xff] }
  0x29   : > { %6159 = vmatprep.subr.bf16.mxu1 %v6158_v1  ;;  %v6162_v40 = vpack.c.bf16 %v400_v39, %v398_v38  ;;  %v397_v41 = vld [vmem:[%s8654_s2 + $0xe0] sm:$0xff]  ;;  %v399_v42 = vld [vmem:[%s8654_s2 + $0xf0] sm:$0xff]  ;;  %v281_v46 = vld [vmem:[%s6374_s24 + $0x168] sm:$0xff] }
  0x2a   : > { %5723 = vmatmul.mubr.msk.f32.gmra.mrb[8].mxu0 %vm454_vm0, %v245_v44  ;;  %v405_v43 = vld [vmem:[%s8654_s2 + $0x140] sm:$0xff]  ;;  %v406_v44 = vld [vmem:[%s8654_s2 + $0x150] sm:$0xff]  ;;  %v6164_v45 = vpack.c.bf16 %v399_v42, %v397_v41  ;;  %v283_v50 = vld [vmem:[%s6374_s24 + $0x178] sm:$0xff] }
  0x2b   : > { %5725 = vmatprep.mubr.msk.f32.mxu0 %vm454_vm0, %v246_v52  ;;  %v6173_v47 = vpack.c.bf16 %v406_v44, %v405_v43  ;;  %v282_v48 = vld [vmem:[%s6374_s24 + $0x170] sm:$0xff]  ;;  %v284_v51 = vld [vmem:[%s6374_s24 + $0x180] sm:$0xff]  ;;  %v285_v52 = vld [vmem:[%s6374_s24 + $0x188] sm:$0xff] }
  0x2c   : > { %6161 = vmatpush1.bf16.msra.mxu1 %v6160_v6  ;;  %v286_v53 = vld [vmem:[%s6374_s24 + $0x190] sm:$0xff]  ;;  %v287_v54 = vld [vmem:[%s6374_s24 + $0x198] sm:$0xff]  ;;  %v407_v55 = vld [vmem:[%s8654_s2 + $0x160] sm:$0xff] }
  0x2d   : > { %6163 = vmatprep.subr.bf16.mxu1 %v6162_v40  ;;  %6174 = vmatpush1.bf16.msra.mxu0 %v6173_v47  ;;  %v408_v56 = vld [vmem:[%s8654_s2 + $0x170] sm:$0xff]  ;;  %v288_v57 = vld [vmem:[%s6374_s24 + $0x1a0] sm:$0xff]  ;;  %v289_v59 = vld [vmem:[%s6374_s24 + $0x1a8] sm:$0xff] }
  0x2e   : > { %5726 = vmatmul.mubr.msk.f32.gmra.mrb[10].mxu0 %vm454_vm0, %v247_v60  ;;  %6175 = vmatprep.subr.bf16.mxu0 %v6287_v33  ;;  %v6176_v58 = vpack.c.bf16 %v408_v56, %v407_v55  ;;  %v290_v60 = vld [vmem:[%s6374_s24 + $0x1b0] sm:$0xff]  ;;  %v291_v61 = vld [vmem:[%s6374_s24 + $0x1b8] sm:$0xff]  ;;  %v292_v62 = vld [vmem:[%s6374_s24 + $0x1c0] sm:$0xff] }
  0x2f   : > { %5728 = vmatprep.mubr.msk.f32.mxu0 %vm454_vm0, %v248_v63  ;;  %v293_v63 = vld [vmem:[%s6374_s24 + $0x1c8] sm:$0xff]  ;;  %v294_v0 = vld [vmem:[%s6374_s24 + $0x1d0] sm:$0xff]  ;;  %v295_v1 = vld [vmem:[%s6374_s24 + $0x1d8] sm:$0xff] }
  0x30   : > { %6165 = vmatpush1.bf16.msra.mxu1 %v6164_v45  ;;  %v409_v2 = vld [vmem:[%s8654_s2 + $0x180] sm:$0xff]  ;;  %v410_v3 = vld [vmem:[%s8654_s2 + $0x190] sm:$0xff]  ;;  %v297_v6 = vld [vmem:[%s6374_s24 + $0x1e8] sm:$0xff] }
  0x31   : > { %6177 = vmatpush1.bf16.msra.mxu0 %v6176_v58  ;;  %v316_v38 = vld [vmem:[%s6374_s24 + $0x280] sm:$0xff]  ;;  %v317_v39 = vld [vmem:[%s6374_s24 + $0x288] sm:$0xff]  ;;  %v420_v41 = vld [vmem:[%s8654_s2 + $0x230] sm:$0xff] }
  0x32   : > { %5729 = vmatmul.mubr.msk.f32.gmra.mrb[12].mxu0 %vm454_vm0, %v249_v4  ;;  %6178 = vmatprep.subr.bf16.mxu0 %v6287_v33  ;;  %v296_v4 = vld [vmem:[%s6374_s24 + $0x1e0] sm:$0xff]  ;;  %v318_v43 = vld [vmem:[%s6374_s24 + $0x290] sm:$0xff]  ;;  %v319_v44 = vld [vmem:[%s6374_s24 + $0x298] sm:$0xff] }
  0x33   : > { %5731 = vmatprep.mubr.msk.f32.mxu0 %vm454_vm0, %v250_v5  ;;  %v6179_v5 = vpack.c.bf16 %v410_v3, %v409_v2  ;;  %v419_v40 = vld [vmem:[%s8654_s2 + $0x220] sm:$0xff]  ;;  %v322_v55 = vld [vmem:[%s6374_s24 + $0x2b0] sm:$0xff]  ;;  %v323_v56 = vld [vmem:[%s6374_s24 + $0x2b8] sm:$0xff] }
  0x34   : > { %v6194_v42 = vpack.c.bf16 %v420_v41, %v419_v40  ;;  %v320_v45 = vld [vmem:[%s6374_s24 + $0x2a0] sm:$0xff]  ;;  %v325_v3 = vld [vmem:[%s6374_s24 + $0x2c8] sm:$0xff] }
  0x35   : > { %6180 = vmatpush1.bf16.msra.mxu0 %v6179_v5  ;;  %v421_v47 = vld [vmem:[%s8654_s2 + $0x240] sm:$0xff] }
  0x36   : > { %5732 = vmatmul.mubr.msk.f32.gmra.mrb[14].mxu0 %vm454_vm0, %v251_v7  ;;  %v298_v7 = vld [vmem:[%s6374_s24 + $0x1f0] sm:$0xff]  ;;  %6181 = vmatprep.subr.bf16.mxu0 %v6287_v33  ;;  %v324_v2 = vld [vmem:[%s6374_s24 + $0x2c0] sm:$0xff] }
  0x37   : > { %5734 = vmatprep.mubr.msk.f32.mxu0 %vm454_vm0, %v252_v8  ;;  %v299_v8 = vld [vmem:[%s6374_s24 + $0x1f8] sm:$0xff] }
  0x3a   : > { %5735 = vmatmul.mubr.msk.f32.gmra.mrb[16].mxu0 %vm454_vm0, %v253_v9  ;;  %v300_v9 = vld [vmem:[%s6374_s24 + $0x200] sm:$0xff] }
  0x3b   : > { %5737 = vmatprep.mubr.msk.f32.mxu0 %vm454_vm0, %v254_v10  ;;  %v301_v10 = vld [vmem:[%s6374_s24 + $0x208] sm:$0xff] }
  0x3e   : > { %5738 = vmatmul.mubr.msk.f32.gmra.mrb[18].mxu0 %vm454_vm0, %v255_v11  ;;  %v411_v11 = vld [vmem:[%s8654_s2 + $0x1a0] sm:$0xff] }
  0x3f   : > { %5740 = vmatprep.mubr.msk.f32.mxu0 %vm454_vm0, %v256_v12  ;;  %v412_v12 = vld [vmem:[%s8654_s2 + $0x1b0] sm:$0xff] }
  0x42   : > { %5741 = vmatmul.mubr.msk.f32.gmra.mrb[20].mxu0 %vm454_vm0, %v257_v13  ;;  %v6182_v13 = vpack.c.bf16 %v412_v12, %v411_v11  ;;  %v326_v11 = vld [vmem:[%s6374_s24 + $0x2d0] sm:$0xff] }
  0x43   : > { %5743 = vmatprep.mubr.msk.f32.mxu0 %vm454_vm0, %v258_v14  ;;  %v302_v14 = vld [vmem:[%s6374_s24 + $0x210] sm:$0xff] }
  0x44   : > { %6183 = vmatpush1.bf16.msra.mxu0 %v6182_v13 }
  0x45   : > { %6184 = vmatprep.subr.bf16.mxu0 %v6287_v33 }
  0x46   : > { %5744 = vmatmul.mubr.msk.f32.gmra.mrb[22].mxu0 %vm454_vm0, %v259_v15  ;;  %v303_v15 = vld [vmem:[%s6374_s24 + $0x218] sm:$0xff] }
  0x47   : > { %5746 = vmatprep.mubr.msk.f32.mxu0 %vm454_vm0, %v260_v16  ;;  %v304_v16 = vld [vmem:[%s6374_s24 + $0x220] sm:$0xff] }
  0x4a   : > { %5747 = vmatmul.mubr.msk.f32.gmra.mrb[24].mxu0 %vm454_vm0, %v261_v17  ;;  %v305_v17 = vld [vmem:[%s6374_s24 + $0x228] sm:$0xff] }
  0x4b   : > { %5749 = vmatprep.mubr.msk.f32.mxu0 %vm454_vm0, %v262_v18  ;;  %v413_v18 = vld [vmem:[%s8654_s2 + $0x1c0] sm:$0xff] }
  0x4e   : > { %5750 = vmatmul.mubr.msk.f32.gmra.mrb[26].mxu0 %vm454_vm0, %v263_v19  ;;  %v414_v19 = vld [vmem:[%s8654_s2 + $0x1d0] sm:$0xff] }
  0x4f   : > { %5752 = vmatprep.mubr.msk.f32.mxu0 %vm454_vm0, %v264_v20  ;;  %v6185_v20 = vpack.c.bf16 %v414_v19, %v413_v18 }
  0x51   : > { %6186 = vmatpush1.bf16.msra.mxu0 %v6185_v20 }
  0x52   : > { %5753 = vmatmul.mubr.msk.f32.gmra.mrb[28].mxu0 %vm454_vm0, %v265_v21  ;;  %v306_v21 = vld [vmem:[%s6374_s24 + $0x230] sm:$0xff]  ;;  %6187 = vmatprep.subr.bf16.mxu0 %v6287_v33 }
  0x53   : > { %5755 = vmatprep.mubr.msk.f32.mxu0 %vm454_vm0, %v266_v22  ;;  %v307_v22 = vld [vmem:[%s6374_s24 + $0x238] sm:$0xff] }
  0x56   : > { %5756 = vmatmul.mubr.msk.f32.gmra.mrb[30].mxu0 %vm454_vm0, %v267_v23  ;;  %v308_v23 = vld [vmem:[%s6374_s24 + $0x240] sm:$0xff] }
  0x57   : > { %5758 = vmatprep.mubr.msk.f32.mxu0 %vm454_vm0, %v268_v24  ;;  %v309_v24 = vld [vmem:[%s6374_s24 + $0x248] sm:$0xff] }
  0x5a   : > { %5759 = vmatmul.mubr.msk.f32.gmra.mrb[32].mxu0 %vm454_vm0, %v269_v25  ;;  %v415_v25 = vld [vmem:[%s8654_s2 + $0x1e0] sm:$0xff] }
  0x5b   : > { %5761 = vmatprep.mubr.msk.f32.mxu0 %vm454_vm0, %v270_v26  ;;  %v416_v26 = vld [vmem:[%s8654_s2 + $0x1f0] sm:$0xff] }
  0x5e   : > { %5762 = vmatmul.mubr.msk.f32.gmra.mrb[34].mxu0 %vm454_vm0, %v271_v27  ;;  %v6188_v27 = vpack.c.bf16 %v416_v26, %v415_v25 }
  0x5f   : > { %5764 = vmatprep.mubr.msk.f32.mxu0 %vm454_vm0, %v272_v28  ;;  %v310_v28 = vld [vmem:[%s6374_s24 + $0x250] sm:$0xff] }
  0x60   : > { %6189 = vmatpush1.bf16.msra.mxu0 %v6188_v27 }
  0x61   : > { %6190 = vmatprep.subr.bf16.mxu0 %v6287_v33 }
  0x62   : > { %5765 = vmatmul.mubr.msk.f32.gmra.mrb[36].mxu0 %vm454_vm0, %v273_v29  ;;  %v311_v29 = vld [vmem:[%s6374_s24 + $0x258] sm:$0xff] }
  0x63   : > { %5767 = vmatprep.mubr.msk.f32.mxu0 %vm454_vm0, %v274_v30  ;;  %v312_v30 = vld [vmem:[%s6374_s24 + $0x260] sm:$0xff] }
  0x66   : > { %5768 = vmatmul.mubr.msk.f32.gmra.mrb[38].mxu0 %vm454_vm0, %v275_v31  ;;  %v313_v31 = vld [vmem:[%s6374_s24 + $0x268] sm:$0xff] }
  0x67   : > { %5770 = vmatprep.mubr.msk.f32.mxu0 %vm454_vm0, %v276_v32  ;;  %v417_v32 = vld [vmem:[%s8654_s2 + $0x200] sm:$0xff] }
  0x6a   : > { %5771 = vmatmul.mubr.msk.f32.gmra.mrb[40].mxu0 %vm454_vm0, %v277_v34  ;;  %v418_v34 = vld [vmem:[%s8654_s2 + $0x210] sm:$0xff] }
  0x6b   : > { %5773 = vmatprep.mubr.msk.f32.mxu0 %vm454_vm0, %v278_v35  ;;  %v6191_v35 = vpack.c.bf16 %v418_v34, %v417_v32 }
  0x6d   : > { %6192 = vmatpush1.bf16.msra.mxu0 %v6191_v35  ;;  %v333_v35 = vld [vmem:[%s6374_s24 + $0x308] sm:$0xff] }
  0x6e   : > { %5774 = vmatmul.mubr.msk.f32.gmra.mrb[42].mxu0 %vm454_vm0, %v279_v36  ;;  %v314_v36 = vld [vmem:[%s6374_s24 + $0x270] sm:$0xff]  ;;  %6193 = vmatprep.subr.bf16.mxu0 %v6287_v33 }
  0x6f   : > { %5776 = vmatprep.mubr.msk.f32.mxu0 %vm454_vm0, %v280_v37  ;;  %v315_v37 = vld [vmem:[%s6374_s24 + $0x278] sm:$0xff] }
  0x71   : > { %6195 = vmatpush1.bf16.msra.mxu0 %v6194_v42 }
  0x72   : > { %5777 = vmatmul.mubr.msk.f32.gmra.mrb[44].mxu0 %vm454_vm0, %v281_v46  ;;  %6196 = vmatprep.subr.bf16.mxu0 %v6287_v33  ;;  %v321_v46 = vld [vmem:[%s6374_s24 + $0x2a8] sm:$0xff] }
  0x73   : > { %5779 = vmatprep.mubr.msk.f32.mxu0 %vm454_vm0, %v282_v48  ;;  %v422_v48 = vld [vmem:[%s8654_s2 + $0x250] sm:$0xff] }
  0x76   : > { %5780 = vmatmul.mubr.msk.f32.gmra.mrb[46].mxu0 %vm454_vm0, %v283_v50  ;;  %v6697_v50 = vld [vmem:[%s8654_s2 + $0x350] ss:$0 sm:$0xff] }
  0x77   : > { %5782 = vmatprep.mubr.msk.f32.mxu0 %vm454_vm0, %v284_v51  ;;  %v6197_v51 = vpack.c.bf16 %v422_v48, %v421_v47 }
  0x79   : > { %6198 = vmatpush1.bf16.msra.mxu0 %v6197_v51 }
  0x7a   : > { %5783 = vmatmul.mubr.msk.f32.gmra.mrb[48].mxu0 %vm454_vm0, %v285_v52  ;;  %6199 = vmatprep.subr.bf16.mxu0 %v6287_v33 }
  0x7b   : > { %5785 = vmatprep.mubr.msk.f32.mxu0 %vm454_vm0, %v286_v53 }
  0x7e   : > { %5786 = vmatmul.mubr.msk.f32.gmra.mrb[50].mxu0 %vm454_vm0, %v287_v54 }
  0x7f   : > { %5788 = vmatprep.mubr.msk.f32.mxu0 %vm454_vm0, %v288_v57 }
  0x82   : > { %5789 = vmatmul.mubr.msk.f32.gmra.mrb[52].mxu0 %vm454_vm0, %v289_v59 }
  0x83   : > { %5791 = vmatprep.mubr.msk.f32.mxu0 %vm454_vm0, %v290_v60 }
  0x86   : > { %5792 = vmatmul.mubr.msk.f32.gmra.mrb[54].mxu0 %vm454_vm0, %v291_v61 }
  0x87   : > { %5794 = vmatprep.mubr.msk.f32.mxu0 %vm454_vm0, %v292_v62 }
  0x8a   : > { %5795 = vmatmul.mubr.msk.f32.gmra.mrb[56].mxu0 %vm454_vm0, %v293_v63 }
  0x8b   : > { %5797 = vmatprep.mubr.msk.f32.mxu0 %vm454_vm0, %v294_v0 }
  0x8e   : > { %5798 = vmatmul.mubr.msk.f32.gmra.mrb[58].mxu0 %vm454_vm0, %v295_v1 }
  0x8f   : > { %5800 = vmatprep.mubr.msk.f32.mxu0 %vm454_vm0, %v296_v4 }
  0x92   : > { %5801 = vmatmul.mubr.msk.f32.gmra.mrb[60].mxu0 %vm454_vm0, %v297_v6 }
  0x93   : > { %5803 = vmatprep.mubr.msk.f32.mxu0 %vm454_vm0, %v298_v7 }
  0x96   : > { %5804 = vmatmul.mubr.msk.f32.gmra.mrb[62].mxu0 %vm454_vm0, %v299_v8  ;;  %v423_v8 = vld [vmem:[%s8654_s2 + $0x260] sm:$0xff] }
  0x97   : > { %5806 = vmatprep.mubr.msk.f32.mxu0 %vm454_vm0, %v300_v9  ;;  %v424_v9 = vld [vmem:[%s8654_s2 + $0x270] sm:$0xff] }
  0x9a   : > { %5807 = vmatmul.mubr.msk.f32.gmra.mrb[64].mxu0 %vm454_vm0, %v301_v10  ;;  %v6200_v10 = vpack.c.bf16 %v424_v9, %v423_v8  ;;  %v343_v9 = vld [vmem:[%s6374_s24 + $0x358] sm:$0xff] }
  0x9b   : > { %5809 = vmatprep.mubr.msk.f32.mxu0 %vm454_vm0, %v302_v14 }
  0x9c   : > { %6201 = vmatpush1.bf16.msra.mxu0 %v6200_v10  ;;  %v344_v10 = vld [vmem:[%s6374_s24 + $0x360] sm:$0xff] }
  0x9d   : > { %6202 = vmatprep.subr.bf16.mxu0 %v6287_v33 }
  0x9e   : > { %5810 = vmatmul.mubr.msk.f32.gmra.mrb[66].mxu0 %vm454_vm0, %v303_v15 }
  0x9f   : > { %5812 = vmatprep.mubr.msk.f32.mxu0 %vm454_vm0, %v304_v16  ;;  %v327_v16 = vld [vmem:[%s6374_s24 + $0x2d8] sm:$0xff] }
  0xa2   : > { %5813 = vmatmul.mubr.msk.f32.gmra.mrb[68].mxu0 %vm454_vm0, %v305_v17  ;;  %v328_v17 = vld [vmem:[%s6374_s24 + $0x2e0] sm:$0xff] }
  0xa3   : > { %5815 = vmatprep.mubr.msk.f32.mxu0 %vm454_vm0, %v306_v21 }
  0xa6   : > { %5816 = vmatmul.mubr.msk.f32.gmra.mrb[70].mxu0 %vm454_vm0, %v307_v22  ;;  %v329_v22 = vld [vmem:[%s6374_s24 + $0x2e8] sm:$0xff] }
  0xa7   : > { %5818 = vmatprep.mubr.msk.f32.mxu0 %vm454_vm0, %v308_v23  ;;  %v330_v23 = vld [vmem:[%s6374_s24 + $0x2f0] sm:$0xff] }
  0xaa   : > { %5819 = vmatmul.mubr.msk.f32.gmra.mrb[72].mxu0 %vm454_vm0, %v309_v24 }
  0xab   : > { %5821 = vmatprep.mubr.msk.f32.mxu0 %vm454_vm0, %v310_v28  ;;  %v331_v28 = vld [vmem:[%s6374_s24 + $0x2f8] sm:$0xff] }
  0xae   : > { %5822 = vmatmul.mubr.msk.f32.gmra.mrb[74].mxu0 %vm454_vm0, %v311_v29  ;;  %v332_v29 = vld [vmem:[%s6374_s24 + $0x300] sm:$0xff] }
  0xaf   : > { %5824 = vmatprep.mubr.msk.f32.mxu0 %vm454_vm0, %v312_v30 }
  0xb2   : > { %5825 = vmatmul.mubr.msk.f32.gmra.mrb[76].mxu0 %vm454_vm0, %v313_v31 }
  0xb3   : > { %5827 = vmatprep.mubr.msk.f32.mxu0 %vm454_vm0, %v314_v36  ;;  %v425_v36 = vld [vmem:[%s8654_s2 + $0x280] sm:$0xff] }
  0xb6   : > { %5828 = vmatmul.mubr.msk.f32.gmra.mrb[78].mxu0 %vm454_vm0, %v315_v37  ;;  %v426_v37 = vld [vmem:[%s8654_s2 + $0x290] sm:$0xff] }
  0xb7   : > { %5830 = vmatprep.mubr.msk.f32.mxu0 %vm454_vm0, %v316_v38  ;;  %v6203_v38 = vpack.c.bf16 %v426_v37, %v425_v36 }
  0xb9   : > { %6204 = vmatpush1.bf16.msra.mxu0 %v6203_v38 }
  0xba   : > { %5831 = vmatmul.mubr.msk.f32.gmra.mrb[80].mxu0 %vm454_vm0, %v317_v39  ;;  %v334_v39 = vld [vmem:[%s6374_s24 + $0x310] sm:$0xff]  ;;  %6205 = vmatprep.subr.bf16.mxu0 %v6287_v33 }
  0xbb   : > { %5833 = vmatprep.mubr.msk.f32.mxu0 %vm454_vm0, %v318_v43 }
  0xbe   : > { %5834 = vmatmul.mubr.msk.f32.gmra.mrb[82].mxu0 %vm454_vm0, %v319_v44  ;;  %v335_v44 = vld [vmem:[%s6374_s24 + $0x318] sm:$0xff] }
  0xbf   : > { %5836 = vmatprep.mubr.msk.f32.mxu0 %vm454_vm0, %v320_v45  ;;  %v336_v45 = vld [vmem:[%s6374_s24 + $0x320] sm:$0xff] }
  0xc2   : > { %5837 = vmatmul.mubr.msk.f32.gmra.mrb[84].mxu0 %vm454_vm0, %v321_v46 }
  0xc3   : > { %5839 = vmatprep.mubr.msk.f32.mxu0 %vm454_vm0, %v322_v55 }
  0xc6   : > { %5840 = vmatmul.mubr.msk.f32.gmra.mrb[86].mxu0 %vm454_vm0, %v323_v56 }
  0xc7   : > { %5842 = vmatprep.mubr.msk.f32.mxu0 %vm454_vm0, %v324_v2  ;;  %v428_v2 = vld [vmem:[%s8654_s2 + $0x2b0] sm:$0xff] }
  0xca   : > { %5843 = vmatmul.mubr.msk.f32.gmra.mrb[88].mxu0 %vm454_vm0, %v325_v3 }
  0xcb   : > { %5845 = vmatprep.mubr.msk.f32.mxu0 %vm454_vm0, %v326_v11 }
  0xce   : > { %5846 = vmatmul.mubr.msk.f32.gmra.mrb[90].mxu0 %vm454_vm0, %v327_v16  ;;  %v433_v16 = vld [vmem:[%s8654_s2 + $0x108] sm:$0xff] }
  0xcf   : > { %5848 = vmatprep.mubr.msk.f32.mxu0 %vm454_vm0, %v328_v17  ;;  %v434_v17 = vld [vmem:[%s8654_s2 + $0x118] sm:$0xff] }
  0xd2   : > { %5849 = vmatmul.mubr.msk.f32.gmra.mrb[92].mxu0 %vm454_vm0, %v329_v22 }
  0xd3   : > { %5851 = vmatprep.mubr.msk.f32.mxu0 %vm454_vm0, %v330_v23 }
  0xd6   : > { %5852 = vmatmul.mubr.msk.f32.gmra.mrb[94].mxu0 %vm454_vm0, %v331_v28 }
  0xd7   : > { %5854 = vmatprep.mubr.msk.f32.mxu0 %vm454_vm0, %v332_v29 }
  0xda   : > { %5855 = vmatmul.mubr.msk.f32.gmra.mrb[96].mxu0 %vm454_vm0, %v333_v35  ;;  %v350_v35 = vld [vmem:[%s6374_s24 + $0x390] sm:$0xff] }
  0xdb   : > { %5857 = vmatprep.mubr.msk.f32.mxu0 %vm454_vm0, %v334_v39 }
  0xde   : > { %5858 = vmatmul.mubr.msk.f32.gmra.mrb[98].mxu0 %vm454_vm0, %v335_v44 }
  0xdf   : > { %5860 = vmatprep.mubr.msk.f32.mxu0 %vm454_vm0, %v336_v45 }
  0xed   : > { %v5712_v52 = vpop.f32.mrb[0].mxu0 }
  0xee   : > { %v909_v53 = vpop.f32.mrb[1].mxu0  ;;  %v915_v57 = vadd.f32 %v5712_v52, %v6697_v50  ;;  %v337_v52 = vld [vmem:[%s6374_s24 + $0x328] sm:$0xff] }
  0xef   : > { %v910_v54 = vadd.f32 %v909_v53, %v6697_v50  ;;  %5861 = vmatmul.mubr.msk.f32.gmra.mrb[100].mxu0 %vm454_vm0, %v337_v52  ;;  %v338_v53 = vld [vmem:[%s6374_s24 + $0x330] sm:$0xff] }
  0xf0   : > { %v1549_v62 = vmax.f32 %v915_v57, 0.0  ;;  %5863 = vmatprep.mubr.msk.f32.mxu0 %vm454_vm0, %v338_v53 }
  0xf1   : > { %v1548_v58 = vmax.f32 %v910_v54, 0.0  ;;  %v5715_v59 = vpop.f32.mrb[2].mxu0 }
  0xf2   : > { %v919_v60 = vpop.f32.mrb[3].mxu0  ;;  %v925_v4 = vadd.f32 %v5715_v59, %v6697_v50  ;;  %v340_v59 = vld [vmem:[%s6374_s24 + $0x340] sm:$0xff] }
  0xf3   : > { %1752 = vmatmul.mubr.f32.vlgmr.msra.gmra.mrb[0].mxu1 %v1548_v58  ;;  %v920_v61 = vadd.f32 %v919_v60, %v6697_v50  ;;  %v339_v58 = vld [vmem:[%s6374_s24 + $0x338] sm:$0xff] }
  0xf4   : > { %1757 = vmatprep.mubr.f32.mxu1 %v6288_v49  ;;  %v1551_v12 = vmax.f32 %v925_v4, 0.0  ;;  %5864 = vmatmul.mubr.msk.f32.gmra.mrb[102].mxu0 %vm454_vm0, %v339_v58  ;;  %v342_v4 = vld [vmem:[%s6374_s24 + $0x350] sm:$0xff] }
  0xf5   : > { %v5718_v63 = vpop.f32.mrb[4].mxu0  ;;  %v1550_v1 = vmax.f32 %v920_v61, 0.0  ;;  %5866 = vmatprep.mubr.msk.f32.mxu0 %vm454_vm0, %v340_v59 }
  0xf6   : > { %v929_v0 = vpop.f32.mrb[5].mxu0  ;;  %v935_v18 = vadd.f32 %v5718_v63, %v6697_v50 }
  0xf7   : > { %1758 = vmatmul.mubr.f32.gmra.mrb[2].mxu1 %v1549_v62  ;;  %v930_v7 = vadd.f32 %v929_v0, %v6697_v50  ;;  %v341_v0 = vld [vmem:[%s6374_s24 + $0x348] sm:$0xff] }
  0xf8   : > { %1763 = vmatprep.mubr.f32.mxu1 %v6288_v49  ;;  %v1553_v24 = vmax.f32 %v935_v18, 0.0  ;;  %5867 = vmatmul.mubr.msk.f32.gmra.mrb[104].mxu0 %vm454_vm0, %v341_v0  ;;  %v6838_v18 = vpack.c.bf16 %v434_v17, %v433_v16  ;;  %v357_v0 = vld [vmem:[%s6374_s24 + $0x3c8] sm:$0xff] }
  0xf9   : > { %v5721_v5 = vpop.f32.mrb[6].mxu0  ;;  %v1552_v15 = vmax.f32 %v930_v7, 0.0  ;;  %5869 = vmatprep.mubr.msk.f32.mxu0 %vm454_vm0, %v342_v4  ;;  %v361_v17 = vld [vmem:[%s6374_s24 + $0x3e8] sm:$0xff] }
  0xfa   : > { %v939_v6 = vpop.f32.mrb[7].mxu0  ;;  %v945_v30 = vadd.f32 %v5721_v5, %v6697_v50  ;;  %6246 = vmatprep.subr.bf16.mxu1 %v6838_v18 }
  0xfb   : > { %1764 = vmatmul.mubr.f32.gmra.mrb[4].mxu1 %v1550_v1  ;;  %v940_v21 = vadd.f32 %v939_v6, %v6697_v50  ;;  %v427_v1 = vld [vmem:[%s8654_s2 + $0x2a0] sm:$0xff] }
  0xfc   : > { %1769 = vmatprep.mubr.f32.mxu1 %v6288_v49  ;;  %v1555_v40 = vmax.f32 %v945_v30, 0.0  ;;  %v6206_v3 = vpack.c.bf16 %v428_v2, %v427_v1  ;;  %5870 = vmatmul.mubr.msk.f32.gmra.mrb[106].mxu0 %vm454_vm0, %v343_v9  ;;  %v349_v30 = vld [vmem:[%s6374_s24 + $0x388] sm:$0xff]  ;;  %v431_v1 = vld [vmem:[%s8654_s2 + $0x2e0] sm:$0xff]  ;;  %v359_v9 = vld [vmem:[%s6374_s24 + $0x3d8] sm:$0xff] }
  0xfd   : > { %v5724_v13 = vpop.f32.mrb[8].mxu0  ;;  %v1554_v27 = vmax.f32 %v940_v21, 0.0  ;;  %5872 = vmatprep.mubr.msk.f32.mxu0 %vm454_vm0, %v344_v10  ;;  %6254 = vmatpush3.bf16.msra.mxu1 %v6838_v18  ;;  %v360_v10 = vld [vmem:[%s6374_s24 + $0x3e0] sm:$0xff] }
  0xfe   : > { %v949_v14 = vpop.f32.mrb[9].mxu0  ;;  %v955_v46 = vadd.f32 %v5724_v13, %v6697_v50  ;;  %6207 = vmatpush1.bf16.msra.mxu0 %v6206_v3  ;;  %v358_v3 = vld [vmem:[%s6374_s24 + $0x3d0] sm:$0xff] }
  0xff   : > { %1770 = vmatmul.mubr.f32.gmra.mrb[6].mxu1 %v1551_v12  ;;  %v950_v34 = vadd.f32 %v949_v14, %v6697_v50  ;;  %6208 = vmatprep.subr.bf16.mxu0 %v6287_v33 }
 0x100   : > { %1775 = vmatprep.mubr.f32.mxu1 %v6288_v49  ;;  %v1557_v54 = vmax.f32 %v955_v46, 0.0  ;;  %v353_v46 = vld [vmem:[%s6374_s24 + $0x3a8] sm:$0xff] }
 0x101   : > { %v6730_v19 = vpop.f32.mrb[10].mxu0  ;;  %v1556_v43 = vmax.f32 %v950_v34, 0.0 }
 0x102   : > { %v959_v20 = vpop.f32.mrb[11].mxu0  ;;  %v965_v60 = vadd.f32 %v6730_v19, %v6697_v50  ;;  %v346_v19 = vld [vmem:[%s6374_s24 + $0x370] sm:$0xff] }
 0x103   : > { %1776 = vmatmul.mubr.f32.gmra.mrb[8].mxu1 %v1552_v15  ;;  %v960_v51 = vadd.f32 %v959_v20, %v6697_v50  ;;  %v345_v15 = vld [vmem:[%s6374_s24 + $0x368] sm:$0xff] }
 0x104   : > { %1781 = vmatprep.mubr.f32.mxu1 %v6288_v49  ;;  %v1559_v5 = vmax.f32 %v965_v60, 0.0  ;;  %5873 = vmatmul.mubr.msk.f32.gmra.mrb[108].mxu0 %vm454_vm0, %v345_v15 }
 0x105   : > { %v6738_v25 = vpop.f32.mrb[12].mxu0  ;;  %v1558_v57 = vmax.f32 %v960_v51, 0.0  ;;  %5875 = vmatprep.mubr.msk.f32.mxu0 %vm454_vm0, %v346_v19  ;;  %v354_v51 = vld [vmem:[%s6374_s24 + $0x3b0] sm:$0xff] }
 0x106   : > { %v969_v26 = vpop.f32.mrb[13].mxu0  ;;  %v975_v11 = vadd.f32 %v6738_v25, %v6697_v50  ;;  %v348_v25 = vld [vmem:[%s6374_s24 + $0x380] sm:$0xff] }
 0x107   : > { %1782 = vmatmul.mubr.f32.gmra.mrb[10].mxu1 %v1553_v24  ;;  %v970_v63 = vadd.f32 %v969_v26, %v6697_v50  ;;  %v347_v24 = vld [vmem:[%s6374_s24 + $0x378] sm:$0xff] }
 0x108   : > { %1787 = vmatprep.mubr.f32.mxu1 %v6288_v49  ;;  %v1561_v20 = vmax.f32 %v975_v11, 0.0  ;;  %5876 = vmatmul.mubr.msk.f32.gmra.mrb[110].mxu0 %vm454_vm0, %v347_v24 }
 0x109   : > { %v6746_v31 = vpop.f32.mrb[14].mxu0  ;;  %v1560_v8 = vmax.f32 %v970_v63, 0.0  ;;  %5878 = vmatprep.mubr.msk.f32.mxu0 %vm454_vm0, %v348_v25  ;;  %v363_v25 = vld [vmem:[%s6374_s24 + $0x3f8] sm:$0xff] }
 0x10a   : > { %v6749_v32 = vpop.f32.mrb[15].mxu0  ;;  %v985_v26 = vadd.f32 %v6746_v31, %v6697_v50  ;;  %v430_v31 = vld [vmem:[%s8654_s2 + $0x2d0] sm:$0xff] }
 0x10b   : > { %1788 = vmatmul.mubr.f32.gmra.mrb[12].mxu1 %v1554_v27  ;;  %v980_v14 = vadd.f32 %v6749_v32, %v6697_v50  ;;  %v429_v32 = vld [vmem:[%s8654_s2 + $0x2c0] sm:$0xff] }
 0x10c   : > { %1793 = vmatprep.mubr.f32.mxu1 %v6288_v49  ;;  %v6209_v34 = vpack.c.bf16 %v430_v31, %v429_v32  ;;  %v1563_v36 = vmax.f32 %v985_v26, 0.0  ;;  %5879 = vmatmul.mubr.msk.f32.gmra.mrb[112].mxu0 %vm454_vm0, %v349_v30 }
 0x10d   : > { %v6762_v41 = vpop.f32.mrb[16].mxu0  ;;  %v1562_v23 = vmax.f32 %v980_v14, 0.0  ;;  %5881 = vmatprep.mubr.msk.f32.mxu0 %vm454_vm0, %v350_v35 }
 0x10e   : > { %v6765_v42 = vpop.f32.mrb[17].mxu0  ;;  %6210 = vmatpush1.bf16.msra.mxu0 %v6209_v34 }
 0x10f   : > { %1794 = vmatmul.mubr.f32.gmra.mrb[14].mxu1 %v1555_v40  ;;  %v990_v29 = vadd.f32 %v6765_v42, %v6697_v50  ;;  %v351_v40 = vld [vmem:[%s6374_s24 + $0x398] sm:$0xff]  ;;  %6211 = vmatprep.subr.bf16.mxu0 %v6287_v33  ;;  %v352_v42 = vld [vmem:[%s6374_s24 + $0x3a0] sm:$0xff] }
 0x110   : > { %1799 = vmatprep.mubr.f32.mxu1 %v6288_v49  ;;  %5882 = vmatmul.mubr.msk.f32.gmra.mrb[114].mxu0 %vm454_vm0, %v351_v40 }
 0x111   : > { %v6773_v47 = vpop.f32.mrb[18].mxu0  ;;  %v1564_v39 = vmax.f32 %v990_v29, 0.0  ;;  %5884 = vmatprep.mubr.msk.f32.mxu0 %vm454_vm0, %v352_v42 }
 0x112   : > { %v6776_v48 = vpop.f32.mrb[19].mxu0  ;;  %v1005_v58 = vadd.f32 %v6773_v47, %v6697_v50  ;;  %v432_v47 = vld [vmem:[%s8654_s2 + $0x2f0] sm:$0xff] }
 0x113   : > { %1800 = vmatmul.mubr.f32.gmra.mrb[16].mxu1 %v1556_v43  ;;  %v995_v43 = vadd.f32 %v6762_v41, %v6697_v50  ;;  %v1000_v33 = vadd.f32 %v6776_v48, %v6697_v50  ;;  %v356_v48 = vld [vmem:[%s6374_s24 + $0x3c0] sm:$0xff]  ;;  %v6212_v2 = vpack.c.bf16 %v432_v47, %v431_v1  ;;  %v436_v1 = vld [vmem:[%s8654_s2 + $0x138] sm:$0xff] }
 0x114   : > { %1805 = vmatprep.mubr.f32.mxu1 %v6288_v49  ;;  %5885 = vmatmul.mubr.msk.f32.gmra.mrb[116].mxu0 %vm454_vm0, %v353_v46  ;;  %v1567_v4 = vmax.f32 %v1005_v58, 0.0 }
 0x115   : > { %v6783_v55 = vpop.f32.mrb[20].mxu0  ;;  %v1565_v52 = vmax.f32 %v995_v43, 0.0  ;;  %5887 = vmatprep.mubr.msk.f32.mxu0 %vm454_vm0, %v354_v51  ;;  %6213 = vmatpush1.bf16.msra.mxu0 %v6212_v2 }
 0x116   : > { %v6786_v56 = vpop.f32.mrb[21].mxu0  ;;  %6215 = vmatprep.subr.bf16.mxu0 %v6838_v18  ;;  %v1015_v11 = vadd.f32 %v6783_v55, %v6697_v50 }
 0x117   : > { %1806 = vmatmul.mubr.f32.gmra.mrb[18].mxu1 %v1557_v54  ;;  %v1566_v54 = vmax.f32 %v1000_v33, 0.0  ;;  %v1010_v63 = vadd.f32 %v6786_v56, %v6697_v50 }
 0x118   : > { %1811 = vmatprep.mubr.f32.mxu1 %v6288_v49  ;;  %v1569_v19 = vmax.f32 %v1015_v11, 0.0 }
 0x119   : > { %v6794_v61 = vpop.f32.mrb[22].mxu0 }
 0x11a   : > { %v6797_v62 = vpop.f32.mrb[23].mxu0 }
 0x11b   : > { %1812 = vmatmul.mubr.f32.gmra.mrb[20].mxu1 %v1558_v57  ;;  %v355_v57 = vld [vmem:[%s6374_s24 + $0x3b8] sm:$0xff]  ;;  %v1020_v16 = vadd.f32 %v6797_v62, %v6697_v50  ;;  %v1025_v62 = vadd.f32 %v6794_v61, %v6697_v50 }
 0x11c   : > { %1817 = vmatprep.mubr.f32.mxu1 %v6288_v49  ;;  %5888 = vmatmul.mubr.msk.f32.gmra.mrb[118].mxu0 %vm454_vm0, %v355_v57 }
 0x11d   : > { %v6810_v6 = vpop.f32.mrb[24].mxu0  ;;  %5890 = vmatprep.mubr.msk.f32.mxu0 %vm454_vm0, %v356_v48  ;;  %v1570_v24 = vmax.f32 %v1020_v16, 0.0  ;;  %v1571_v32 = vmax.f32 %v1025_v62, 0.0 }
 0x11e   : > { %v6813_v7 = vpop.f32.mrb[25].mxu0  ;;  %v1035_v61 = vadd.f32 %v6810_v6, %v6697_v50 }
 0x11f   : > { %1818 = vmatmul.mubr.f32.gmra.mrb[22].mxu1 %v1559_v5  ;;  %v1030_v30 = vadd.f32 %v6813_v7, %v6697_v50 }
 0x120   : > { %1823 = vmatprep.mubr.f32.mxu1 %v6288_v49  ;;  %5891 = vmatmul.mubr.msk.f32.gmra.mrb[120].mxu0 %vm454_vm0, %v357_v0  ;;  %v1573_v40 = vmax.f32 %v1035_v61, 0.0  ;;  %v435_v0 = vld [vmem:[%s8654_s2 + $0x128] sm:$0xff] }
 0x121   : > { %v6822_v12 = vpop.f32.mrb[26].mxu0  ;;  %5893 = vmatprep.mubr.msk.f32.mxu0 %vm454_vm0, %v358_v3  ;;  %v1572_v35 = vmax.f32 %v1030_v30, 0.0  ;;  %v7012_v2 = vpack.c.bf16 %v436_v1, %v435_v0 }
 0x122   : > { %v6825_v13 = vpop.f32.mrb[27].mxu0  ;;  %v1045_v6 = vadd.f32 %v6822_v12, %v6697_v50 }
 0x123   : > { %1824 = vmatmul.mubr.f32.gmra.mrb[24].mxu1 %v1560_v8  ;;  %v1568_v8 = vmax.f32 %v1010_v63, 0.0  ;;  %v1040_v7 = vadd.f32 %v6825_v13, %v6697_v50  ;;  %6247 = vmatprep.subr.bf16.mxu1 %v7012_v2 }
 0x124   : > { %1829 = vmatprep.mubr.f32.mxu1 %v6288_v49  ;;  %5894 = vmatmul.mubr.msk.f32.gmra.mrb[122].mxu0 %vm454_vm0, %v359_v9 }
 0x125   : > { %v6841_v21 = vpop.f32.mrb[28].mxu0  ;;  %5896 = vmatprep.mubr.msk.f32.mxu0 %vm454_vm0, %v360_v10  ;;  %v1574_v33 = vmax.f32 %v1040_v7, 0.0  ;;  %6255 = vmatpush3.bf16.msra.mxu1 %v7012_v2 }
 0x126   : > { %v6844_v22 = vpop.f32.mrb[29].mxu0  ;;  %v1055_v12 = vadd.f32 %v6841_v21, %v6697_v50 }
 0x127   : > { %1830 = vmatmul.mubr.f32.gmra.mrb[26].mxu1 %v1561_v20  ;;  %v1050_v13 = vadd.f32 %v6844_v22, %v6697_v50 }
 0x128   : > { %1835 = vmatprep.mubr.f32.mxu1 %v6288_v49  ;;  %5897 = vmatmul.mubr.msk.f32.gmra.mrb[124].mxu0 %vm454_vm0, %v361_v17  ;;  %v1577_v47 = vmax.f32 %v1055_v12, 0.0 }
 0x129   : > { %v6853_v27 = vpop.f32.mrb[30].mxu0  ;;  %v1576_v48 = vmax.f32 %v1050_v13, 0.0 }
 0x12a   : > { %v6856_v28 = vpop.f32.mrb[31].mxu0 }
 0x12b   : > { %1836 = vmatmul.mubr.f32.gmra.mrb[28].mxu1 %v1562_v23  ;;  %v362_v23 = vld [vmem:[%s6374_s24 + $0x3f0] sm:$0xff]  ;;  %v1060_v22 = vadd.f32 %v6856_v28, %v6697_v50  ;;  %v1065_v28 = vadd.f32 %v6853_v27, %v6697_v50 }
 0x12c   : > { %1841 = vmatprep.mubr.f32.mxu1 %v6288_v49  ;;  %5899 = vmatprep.mubr.msk.f32.mxu0 %vm454_vm0, %v362_v23 }
 0x12d   : > { %v6870_v37 = vpop.f32.mrb[32].mxu0  ;;  %5900 = vmatmul.mubr.msk.f32.gmra.mrb[126].mxu0 %vm454_vm0, %v363_v25  ;;  %v1579_v11 = vmax.f32 %v1065_v28, 0.0 }
 0x12e   : > { %v6873_v38 = vpop.f32.mrb[33].mxu0  ;;  %v1075_v27 = vadd.f32 %v6870_v37, %v6697_v50 }
 0x12f   : > { %1842 = vmatmul.mubr.f32.gmra.mrb[30].mxu1 %v1563_v36  ;;  %v1070_v10 = vadd.f32 %v6873_v38, %v6697_v50 }
 0x130   : > { %1847 = vmatprep.mubr.f32.mxu1 %v6288_v49 }
 0x131   : > { %v6882_v44 = vpop.f32.mrb[34].mxu0 }
 0x132   : > { %v6885_v45 = vpop.f32.mrb[35].mxu0  ;;  %v1085_v30 = vadd.f32 %v6882_v44, %v6697_v50 }
 0x133   : > { %1848 = vmatmul.mubr.f32.gmra.mrb[32].mxu1 %v1564_v39  ;;  %v1080_v23 = vadd.f32 %v6885_v45, %v6697_v50 }
 0x134   : > { %1853 = vmatprep.mubr.f32.mxu1 %v6288_v49 }
 0x135   : > { %v6893_v41 = vpop.f32.mrb[36].mxu0  ;;  %v1582_v62 = vmax.f32 %v1080_v23, 0.0  ;;  %v438_v23 = vld [vmem:[%s8654_s2 + $0x158] sm:$0xff] }
 0x136   : > { %v6896_v53 = vpop.f32.mrb[37].mxu0  ;;  %v1095_v7 = vadd.f32 %v6893_v41, %v6697_v50 }
 0x137   : > { %1854 = vmatmul.mubr.f32.gmra.mrb[34].mxu1 %v1565_v52  ;;  %v1575_v52 = vmax.f32 %v1045_v6, 0.0  ;;  %v1090_v37 = vadd.f32 %v6896_v53, %v6697_v50 }
 0x138   : > { %1859 = vmatprep.mubr.f32.mxu1 %v6288_v49 }
 0x139   : > { %v6904_v59 = vpop.f32.mrb[38].mxu0  ;;  %v1584_v61 = vmax.f32 %v1090_v37, 0.0 }
 0x13a   : > { %v6907_v60 = vpop.f32.mrb[39].mxu0  ;;  %v1105_v13 = vadd.f32 %v6904_v59, %v6697_v50 }
 0x13b   : > { %1860 = vmatmul.mubr.f32.gmra.mrb[36].mxu1 %v1566_v54  ;;  %v1100_v44 = vadd.f32 %v6907_v60, %v6697_v50 }
 0x13c   : > { %1865 = vmatprep.mubr.f32.mxu1 %v6288_v49 }
 0x13d   : > { %v6921_v5 = vpop.f32.mrb[40].mxu0  ;;  %v1586_v6 = vmax.f32 %v1100_v44, 0.0 }
 0x13e   : > { %v6924_v56 = vpop.f32.mrb[41].mxu0 }
 0x13f   : > { %1866 = vmatmul.mubr.f32.gmra.mrb[38].mxu1 %v1567_v4  ;;  %v1578_v4 = vmax.f32 %v1060_v22, 0.0  ;;  %v1110_v41 = vadd.f32 %v6924_v56, %v6697_v50  ;;  %v1115_v22 = vadd.f32 %v6921_v5, %v6697_v50 }
 0x140   : > { %1871 = vmatprep.mubr.f32.mxu1 %v6288_v49 }
 0x141   : > { %v6933_v14 = vpop.f32.mrb[42].mxu0  ;;  %v1588_v12 = vmax.f32 %v1110_v41, 0.0  ;;  %v1589_v0 = vmax.f32 %v1115_v22, 0.0 }
 0x142   : > { %v6936_v15 = vpop.f32.mrb[43].mxu0 }
 0x143   : > { %1872 = vmatmul.mubr.f32.gmra.mrb[40].mxu1 %v1568_v8  ;;  %v1120_v59 = vadd.f32 %v6936_v15, %v6697_v50 }
 0x144   : > { %1877 = vmatprep.mubr.f32.mxu1 %v6288_v49 }
 0x145   : > { %v6943_v20 = vpop.f32.mrb[44].mxu0 }
 0x146   : > { %v6946_v55 = vpop.f32.mrb[45].mxu0 }
 0x147   : > { %1878 = vmatmul.mubr.f32.gmra.mrb[42].mxu1 %v1569_v19  ;;  %v1580_v19 = vmax.f32 %v1070_v10, 0.0  ;;  %v1130_v5 = vadd.f32 %v6946_v55, %v6697_v50 }
 0x148   : > { %1883 = vmatprep.mubr.f32.mxu1 %v6288_v49 }
 0x149   : > { %v6954_v26 = vpop.f32.mrb[46].mxu0 }
 0x14a   : > { %v6957_v29 = vpop.f32.mrb[47].mxu0 }
 0x14b   : > { %1884 = vmatmul.mubr.f32.gmra.mrb[44].mxu1 %v1570_v24  ;;  %v1581_v24 = vmax.f32 %v1075_v27, 0.0  ;;  %v437_v27 = vld [vmem:[%s8654_s2 + $0x148] sm:$0xff] }
 0x14c   : > { %1889 = vmatprep.mubr.f32.mxu1 %v6288_v49 }
 0x14d   : > { %v6962_v31 = vpop.f32.mrb[48].mxu0 }
 0x14e   : > { %v6964_v34 = vpop.f32.mrb[49].mxu0 }
 0x14f   : > { %1890 = vmatmul.mubr.f32.gmra.mrb[46].mxu1 %v1571_v32  ;;  %v1583_v32 = vmax.f32 %v1085_v30, 0.0  ;;  %v1150_v37 = vadd.f32 %v6964_v34, %v6697_v50 }
 0x150   : > { %1895 = vmatprep.mubr.f32.mxu1 %v6288_v49 }
 0x151   : > { %v6969_v36 = vpop.f32.mrb[50].mxu0  ;;  %v1596_v44 = vmax.f32 %v1150_v37, 0.0 }
 0x152   : > { %v6971_v39 = vpop.f32.mrb[51].mxu0 }
 0x153   : > { %1896 = vmatmul.mubr.f32.gmra.mrb[48].mxu1 %v1572_v35 }
 0x154   : > { %1901 = vmatprep.mubr.f32.mxu1 %v6288_v49 }
 0x155   : > { %v6976_v42 = vpop.f32.mrb[52].mxu0 }
 0x156   : > { %v6978_v43 = vpop.f32.mrb[53].mxu0 }
 0x157   : > { %1902 = vmatmul.mubr.f32.gmra.mrb[50].mxu1 %v1573_v40  ;;  %v1585_v40 = vmax.f32 %v1095_v7, 0.0 }
 0x158   : > { %1907 = vmatprep.mubr.f32.mxu1 %v6288_v49 }
 0x159   : > { %v6983_v46 = vpop.f32.mrb[54].mxu0 }
 0x15a   : > { %v6985_v51 = vpop.f32.mrb[55].mxu0 }
 0x15b   : > { %1908 = vmatmul.mubr.f32.gmra.mrb[52].mxu1 %v1574_v33 }
 0x15c   : > { %1913 = vmatprep.mubr.f32.mxu1 %v6288_v49 }
 0x15d   : > { %v6990_v54 = vpop.f32.mrb[56].mxu0 }
 0x15e   : > { %v6992_v57 = vpop.f32.mrb[57].mxu0 }
 0x15f   : > { %1914 = vmatmul.mubr.f32.gmra.mrb[54].mxu1 %v1575_v52  ;;  %v1587_v52 = vmax.f32 %v1105_v13, 0.0 }
 0x160   : > { %1919 = vmatprep.mubr.f32.mxu1 %v6288_v49 }
 0x161   : > { %v6997_v58 = vpop.f32.mrb[58].mxu0 }
 0x162   : > { %v6999_v63 = vpop.f32.mrb[59].mxu0 }
 0x163   : > { %1920 = vmatmul.mubr.f32.gmra.mrb[56].mxu1 %v1576_v48 }
 0x164   : > { %1925 = vmatprep.mubr.f32.mxu1 %v6288_v49 }
 0x165   : > { %v7010_v21 = vpop.f32.mrb[60].mxu0 }
 0x166   : > { %v7014_v3 = vpop.f32.mrb[61].mxu0 }
 0x167   : > { %1926 = vmatmul.mubr.f32.gmra.mrb[58].mxu1 %v1577_v47  ;;  %v1590_v47 = vmax.f32 %v1120_v59, 0.0 }
 0x168   : > { %1931 = vmatprep.mubr.f32.mxu1 %v6288_v49 }
 0x169   : > { %v7021_v8 = vpop.f32.mrb[62].mxu0 }
 0x16a   : > { %v7023_v9 = vpop.f32.mrb[63].mxu0 }
 0x16b   : > { %1932 = vmatmul.mubr.f32.gmra.mrb[60].mxu1 %v1578_v4  ;;  %v1125_v4 = vadd.f32 %v6933_v14, %v6697_v50  ;;  %v1140_v14 = vadd.f32 %v6957_v29, %v6697_v50  ;;  %v1145_v29 = vadd.f32 %v6954_v26, %v6697_v50  ;;  %v1160_v26 = vadd.f32 %v6971_v39, %v6697_v50 }
 0x16c   : > { %1937 = vmatprep.mubr.f32.mxu1 %v6288_v49 }
 0x16d   : > { %v7028_v16 = vpop.f32.mrb[64].mxu0  ;;  %v1591_v28 = vmax.f32 %v1125_v4, 0.0  ;;  %v1594_v30 = vmax.f32 %v1140_v14, 0.0  ;;  %v1598_v41 = vmax.f32 %v1160_v26, 0.0 }
 0x16e   : > { %v7030_v17 = vpop.f32.mrb[65].mxu0 }
 0x16f   : > { %1938 = vmatmul.mubr.f32.gmra.mrb[62].mxu1 %v1579_v11  ;;  %v1592_v11 = vmax.f32 %v1130_v5, 0.0 }
 0x170   : > { %1943 = vmatprep.mubr.f32.mxu1 %v6288_v49 }
 0x171   : > { %v7038_v38 = vpop.f32.mrb[66].mxu0 }
 0x172   : > { %v7040_v25 = vpop.f32.mrb[67].mxu0 }
 0x173   : > { %1944 = vmatmul.mubr.f32.gmra.mrb[64].mxu1 %v1580_v19  ;;  %v1135_v19 = vadd.f32 %v6943_v20, %v6697_v50 }
 0x174   : > { %1949 = vmatprep.mubr.f32.mxu1 %v6288_v49 }
 0x175   : > { %v7048_v45 = vpop.f32.mrb[68].mxu0 }
 0x176   : > { %v7050_v35 = vpop.f32.mrb[69].mxu0 }
 0x177   : > { %1950 = vmatmul.mubr.f32.gmra.mrb[66].mxu1 %v1581_v24  ;;  %v1593_v24 = vmax.f32 %v1135_v19, 0.0 }
 0x178   : > { %1955 = vmatprep.mubr.f32.mxu1 %v6288_v49 }
 0x179   : > { %v7058_v53 = vpop.f32.mrb[70].mxu0 }
 0x17a   : > { %v7060_v33 = vpop.f32.mrb[71].mxu0 }
 0x17b   : > { %1956 = vmatmul.mubr.f32.gmra.mrb[68].mxu1 %v1582_v62  ;;  %v7106_v62 = vpack.c.bf16 %v438_v23, %v437_v27 }
 0x17c   : > { %1961 = vmatprep.mubr.f32.mxu1 %v6288_v49 }
 0x17d   : > { %v7068_v60 = vpop.f32.mrb[72].mxu0  ;;  %6248 = vmatprep.subr.bf16.mxu1 %v7106_v62 }
 0x17e   : > { %v7070_v48 = vpop.f32.mrb[73].mxu0  ;;  %6256 = vmatpush3.bf16.msra.mxu1 %v7106_v62 }
 0x17f   : > { %1962 = vmatmul.mubr.f32.gmra.mrb[70].mxu1 %v1583_v32 }
 0x180   : > { %1967 = vmatprep.mubr.f32.mxu1 %v6288_v49 }
 0x181   : > { %v7078_v56 = vpop.f32.mrb[74].mxu0 }
 0x182   : > { %v7080_v1 = vpop.f32.mrb[75].mxu0 }
 0x183   : > { %1968 = vmatmul.mubr.f32.gmra.mrb[72].mxu1 %v1584_v61  ;;  %v1595_v61 = vmax.f32 %v1145_v29, 0.0 }
 0x184   : > { %1973 = vmatprep.mubr.f32.mxu1 %v6288_v49 }
 0x185   : > { %v7088_v15 = vpop.f32.mrb[76].mxu0 }
 0x186   : > { %v7090_v10 = vpop.f32.mrb[77].mxu0 }
 0x187   : > { %1974 = vmatmul.mubr.f32.gmra.mrb[74].mxu1 %v1585_v40  ;;  %v1155_v40 = vadd.f32 %v6962_v31, %v6697_v50  ;;  %v1170_v31 = vadd.f32 %v6978_v43, %v6697_v50  ;;  %v1175_v43 = vadd.f32 %v6976_v42, %v6697_v50 }
 0x188   : > { %1979 = vmatprep.mubr.f32.mxu1 %v6288_v49 }
 0x189   : > { %v7098_v55 = vpop.f32.mrb[78].mxu0  ;;  %v1601_v27 = vmax.f32 %v1175_v43, 0.0  ;;  %v1195_v43 = vadd.f32 %v6990_v54, %v6697_v50 }
 0x18a   : > { %v7108_v20 = vpop.f32.mrb[79].mxu0 }
 0x18b   : > { %1980 = vmatmul.mubr.f32.gmra.mrb[76].mxu1 %v1586_v6  ;;  %v1597_v6 = vmax.f32 %v1155_v40, 0.0 }
 0x18c   : > { %1985 = vmatprep.mubr.f32.mxu1 %v6288_v49 }
 0x18d   : > { %v7118_v32 = vpop.f32.mrb[80].mxu0 }
 0x18e   : > { %v7120_v7 = vpop.f32.mrb[81].mxu0 }
 0x18f   : > { %1986 = vmatmul.mubr.f32.gmra.mrb[78].mxu1 %v1587_v52  ;;  %v1677_v52 = vlaneseq }
 0x190   : > { %1991 = vmatprep.mubr.f32.mxu1 %v6288_v49 }
 0x191   : > { %v7128_v34 = vpop.f32.mrb[82].mxu0  ;;  %v1678_v39 = vshrl.u32 %v1677_v52, 7 }
 0x192   : > { %v7130_v13 = vpop.f32.mrb[83].mxu0 }
 0x193   : > { %1992 = vmatmul.mubr.f32.gmra.mrb[80].mxu1 %v1588_v12  ;;  %v1165_v12 = vadd.f32 %v6969_v36, %v6697_v50  ;;  %v1679_v4 = vsub.s32 0, %v1678_v39  ;;  %v5291_v36 = vld [vmem:[%s8654_s2 + $0x351] ss:$8 sm:$0x3]  ;;  %v1683_v5 = vsub.s32 1, %v1678_v39 }
 0x194   : > { %1997 = vmatprep.mubr.f32.mxu1 %v6288_v49 }
 0x195   : > { %v7138_v22 = vpop.f32.mrb[84].mxu0  ;;  %v1599_v59 = vmax.f32 %v1165_v12, 0.0  ;;  %v7153_v19 = vrot.slane %v5291_v36, %v1683_v5 }
 0x197   : > { %1998 = vmatmul.mubr.f32.gmra.mrb[82].mxu1 %v1589_v0  ;;  %v7140_v0 = vpop.f32.mrb[85].mxu0 }
 0x198   : > { %2003 = vmatprep.mubr.f32.mxu1 %v6288_v49 }
 0x199   : > { %v7155_v14 = vpop.f32.mrb[86].mxu0 }
 0x19a   : > { %v7157_v23 = vpop.f32.mrb[87].mxu0 }
 0x19b   : > { %2004 = vmatmul.mubr.f32.gmra.mrb[84].mxu1 %v1590_v47  ;;  %v1600_v47 = vmax.f32 %v1170_v31, 0.0 }
 0x19c   : > { %2009 = vmatprep.mubr.f32.mxu1 %v6288_v49 }
 0x19d   : > { %v7169_v12 = vpop.f32.mrb[88].mxu0 }
 0x19f   : > { %2010 = vmatmul.mubr.f32.gmra.mrb[86].mxu1 %v1591_v28  ;;  %v1180_v28 = vadd.f32 %v6985_v51, %v6697_v50  ;;  %v1185_v51 = vadd.f32 %v6983_v46, %v6697_v50  ;;  %v7171_v46 = vpop.f32.mrb[89].mxu0 }
 0x1a0   : > { %2015 = vmatprep.mubr.f32.mxu1 %v6288_v49 }
 0x1a1   : > { %v1602_v42 = vmax.f32 %v1180_v28, 0.0  ;;  %v1603_v31 = vmax.f32 %v1185_v51, 0.0 }
 0x1a3   : > { %2016 = vmatmul.mubr.f32.gmra.mrb[88].mxu1 %v1592_v11  ;;  %v7150_v11 = vrot.slane %v5291_v36, %v1679_v4 }
 0x1a4   : > { %2021 = vmatprep.mubr.f32.mxu1 %v6288_v49 }
 0x1a7   : > { %2022 = vmatmul.mubr.f32.gmra.mrb[90].mxu1 %v1593_v24 }
 0x1a8   : > { %2027 = vmatprep.mubr.f32.mxu1 %v6288_v49 }
 0x1ab   : > { %2028 = vmatmul.mubr.f32.gmra.mrb[92].mxu1 %v1594_v30 }
 0x1ac   : > { %2033 = vmatprep.mubr.f32.mxu1 %v6288_v49 }
 0x1af   : > { %2034 = vmatmul.mubr.f32.gmra.mrb[94].mxu1 %v1595_v61 }
 0x1b0   : > { %2039 = vmatprep.mubr.f32.mxu1 %v6288_v49 }
 0x1b3   : > { %2040 = vmatmul.mubr.f32.gmra.mrb[96].mxu1 %v1596_v44 }
 0x1b4   : > { %2045 = vmatprep.mubr.f32.mxu1 %v6288_v49 }
 0x1b7   : > { %2046 = vmatmul.mubr.f32.gmra.mrb[98].mxu1 %v1597_v6 }
 0x1b8   : > { %2051 = vmatprep.mubr.f32.mxu1 %v6288_v49 }
 0x1bb   : > { %2052 = vmatmul.mubr.f32.gmra.mrb[100].mxu1 %v1598_v41  ;;  %v1190_v41 = vadd.f32 %v6992_v57, %v6697_v50 }
 0x1bc   : > { %2057 = vmatprep.mubr.f32.mxu1 %v6288_v49 }
 0x1bd   : > { %v1604_v36 = vmax.f32 %v1190_v41, 0.0 }
 0x1bf   : > { %2058 = vmatmul.mubr.f32.gmra.mrb[102].mxu1 %v1599_v59 }
 0x1c0   : > { %2063 = vmatprep.mubr.f32.mxu1 %v6288_v49 }
 0x1c3   : > { %2064 = vmatmul.mubr.f32.gmra.mrb[104].mxu1 %v1600_v47 }
 0x1c4   : > { %2069 = vmatprep.mubr.f32.mxu1 %v6288_v49 }
 0x1c6   : > { %v1753_v24 = vpop.f32.mrb[0].mxu1 }
 0x1c7   : > { %v1754_v30 = vadd.f32 %v1753_v24, %v7150_v11  ;;  %v1755_v29 = vpop.f32.mrb[1].mxu1  ;;  %2070 = vmatmul.mubr.f32.gmra.mrb[106].mxu1 %v1601_v27 }
 0x1c8   : > { %v1756_v37 = vadd.f32 %v1755_v29, %v7153_v19  ;;  %2075 = vmatprep.mubr.f32.mxu1 %v6288_v49 }
 0x1c9   : > { %v2520_v40 = vmax.f32 %v1754_v30, 0.0  ;;  %v1200_v30 = vadd.f32 %v6999_v63, %v6697_v50 }
 0x1ca   : > { %v1759_v61 = vpop.f32.mrb[2].mxu1  ;;  %v2521_v44 = vmax.f32 %v1756_v37, 0.0 }
 0x1cb   : > { %v1760_v26 = vadd.f32 %v1759_v61, %v7150_v11  ;;  %v1761_v6 = vpop.f32.mrb[3].mxu1  ;;  %2076 = vmatmul.mubr.f32.gmra.mrb[108].mxu1 %v1602_v42  ;;  %v7184_v42 = vpop.f32.mrb[90].mxu0 }
 0x1cc   : > { %v1762_v52 = vadd.f32 %v1761_v6, %v7153_v19  ;;  %2840 = vmatprep.mubr.f32.mxu0 %v2521_v44  ;;  %2081 = vmatprep.mubr.f32.mxu1 %v6288_v49  ;;  %v7189_v54 = vpop.f32.mrb[91].mxu0 }
 0x1cd   : > { %2841 = vmatmul.mubr.f32.vlgmr.msra.gmra.mrb[128].mxu0 %v2520_v40  ;;  %v2522_v57 = vmax.f32 %v1760_v26, 0.0  ;;  %v1606_v26 = vmax.f32 %v1200_v30, 0.0  ;;  %v7193_v6 = vpop.f32.mrb[92].mxu0 }
 0x1ce   : > { %v1765_v39 = vpop.f32.mrb[4].mxu1  ;;  %v2523_v59 = vmax.f32 %v1762_v52, 0.0  ;;  %6217 = vmatpush3.bf16.msra.mxu0 %v6838_v18  ;;  %v7197_v52 = vpop.f32.mrb[93].mxu0 }
 0x1cf   : > { %v1766_v47 = vadd.f32 %v1765_v39, %v7150_v11  ;;  %v1767_v4 = vpop.f32.mrb[5].mxu1  ;;  %2082 = vmatmul.mubr.f32.gmra.mrb[110].mxu1 %v1603_v31  ;;  %6219 = vmatprep.subr.bf16.mxu0 %v7012_v2  ;;  %v1205_v31 = vadd.f32 %v6997_v58, %v6697_v50 }
 0x1d0   : > { %v1768_v5 = vadd.f32 %v1767_v4, %v7153_v19  ;;  %2845 = vmatprep.mubr.f32.mxu0 %v2523_v59  ;;  %2087 = vmatprep.mubr.f32.mxu1 %v6288_v49  ;;  %v1210_v4 = vadd.f32 %v7014_v3, %v6697_v50 }
 0x1d1   : > { %2846 = vmatmul.mubr.f32.gmra.mrb[130].mxu0 %v2522_v57  ;;  %v2524_v29 = vmax.f32 %v1766_v47, 0.0  ;;  %v1607_v58 = vmax.f32 %v1205_v31, 0.0 }
 0x1d2   : > { %v1771_v28 = vpop.f32.mrb[6].mxu1  ;;  %v2525_v27 = vmax.f32 %v1768_v5, 0.0  ;;  %6221 = vmatpush3.bf16.msra.mxu0 %v7012_v2  ;;  %v1605_v2 = vmax.f32 %v1195_v43, 0.0  ;;  %v1608_v50 = vmax.f32 %v1210_v4, 0.0 }
 0x1d3   : > { %v1772_v18 = vadd.f32 %v1771_v28, %v7150_v11  ;;  %v1773_v24 = vpop.f32.mrb[7].mxu1  ;;  %2088 = vmatmul.mubr.f32.gmra.mrb[112].mxu1 %v1604_v36  ;;  %6223 = vmatprep.subr.bf16.mxu0 %v7106_v62  ;;  %v7204_v36 = vpop.f32.mrb[94].mxu0 }
 0x1d4   : > { %v1774_v37 = vadd.f32 %v1773_v24, %v7153_v19  ;;  %2850 = vmatprep.mubr.f32.mxu0 %v2525_v27  ;;  %2093 = vmatprep.mubr.f32.mxu1 %v6288_v49  ;;  %v7208_v43 = vpop.f32.mrb[95].mxu0 }
 0x1d5   : > { %2851 = vmatmul.mubr.f32.gmra.mrb[132].mxu0 %v2524_v29  ;;  %v2526_v40 = vmax.f32 %v1772_v18, 0.0  ;;  %v7211_v3 = vpop.f32.mrb[96].mxu0 }
 0x1d6   : > { %v1777_v51 = vpop.f32.mrb[8].mxu1  ;;  %v2527_v61 = vmax.f32 %v1774_v37, 0.0  ;;  %6225 = vmatpush3.bf16.msra.mxu0 %v7106_v62  ;;  %v7215_v37 = vpop.f32.mrb[97].mxu0 }
 0x1d7   : > { %v1778_v63 = vadd.f32 %v1777_v51, %v7150_v11  ;;  %v1779_v44 = vpop.f32.mrb[9].mxu1  ;;  %2094 = vmatmul.mubr.f32.gmra.mrb[114].mxu1 %v1605_v2  ;;  %v7220_v2 = vld [vmem:[%s8654_s2 + $0x350] ss:$0 sm:$0xff]  ;;  %v7227_v31 = vpop.f32.mrb[98].mxu0 }
 0x1d8   : > { %v1780_v41 = vadd.f32 %v1779_v44, %v7153_v19  ;;  %2855 = vmatprep.mubr.f32.mxu0 %v2527_v61  ;;  %2099 = vmatprep.mubr.f32.mxu1 %v6288_v49  ;;  %v1215_v51 = vadd.f32 %v7220_v2, %v7010_v21  ;;  %v439_v21 = vld [vmem:[%s8654_s2 + $0x168] sm:$0xff] }
 0x1d9   : > { %2856 = vmatmul.mubr.f32.gmra.mrb[134].mxu0 %v2526_v40  ;;  %v2528_v57 = vmax.f32 %v1778_v63, 0.0 }
 0x1da   : > { %v1783_v62 = vpop.f32.mrb[10].mxu1  ;;  %v2529_v39 = vmax.f32 %v1780_v41, 0.0 }
 0x1db   : > { %v1784_v59 = vadd.f32 %v1783_v62, %v7150_v11  ;;  %v1785_v47 = vpop.f32.mrb[11].mxu1  ;;  %2100 = vmatmul.mubr.f32.gmra.mrb[116].mxu1 %v1606_v26  ;;  %v1220_v26 = vadd.f32 %v7220_v2, %v7023_v9  ;;  %v1609_v9 = vmax.f32 %v1215_v51, 0.0 }
 0x1dc   : > { %v1786_v5 = vadd.f32 %v1785_v47, %v7153_v19  ;;  %2860 = vmatprep.mubr.f32.mxu0 %v2529_v39  ;;  %2105 = vmatprep.mubr.f32.mxu1 %v6288_v49  ;;  %v7231_v39 = vpop.f32.mrb[99].mxu0 }
 0x1dd   : > { %2861 = vmatmul.mubr.f32.gmra.mrb[136].mxu0 %v2528_v57  ;;  %v2530_v30 = vmax.f32 %v1784_v59, 0.0  ;;  %v440_v59 = vld [vmem:[%s8654_s2 + $0x178] sm:$0xff] }
 0x1de   : > { %v1789_v28 = vpop.f32.mrb[12].mxu1  ;;  %v2531_v27 = vmax.f32 %v1786_v5, 0.0  ;;  %v6226_v47 = vpack.c.bf16 %v440_v59, %v439_v21 }
 0x1df   : > { %v1790_v18 = vadd.f32 %v1789_v28, %v7150_v11  ;;  %v1791_v24 = vpop.f32.mrb[13].mxu1  ;;  %2106 = vmatmul.mubr.f32.gmra.mrb[118].mxu1 %v1607_v58 }
 0x1e0   : > { %v1792_v29 = vadd.f32 %v1791_v24, %v7153_v19  ;;  %2865 = vmatprep.mubr.f32.mxu0 %v2531_v27  ;;  %2111 = vmatprep.mubr.f32.mxu1 %v6288_v49  ;;  %v1610_v27 = vmax.f32 %v1220_v26, 0.0 }
 0x1e1   : > { %2866 = vmatmul.mubr.f32.gmra.mrb[138].mxu0 %v2530_v30  ;;  %v2532_v41 = vmax.f32 %v1790_v18, 0.0  ;;  %6249 = vmatprep.subr.bf16.mxu1 %v6226_v47  ;;  %v7240_v18 = vpop.f32.mrb[100].mxu0 }
 0x1e2   : > { %v1795_v61 = vpop.f32.mrb[14].mxu1  ;;  %v2533_v63 = vmax.f32 %v1792_v29, 0.0  ;;  %v7244_v30 = vpop.f32.mrb[101].mxu0  ;;  %6257 = vmatpush3.bf16.msra.mxu1 %v6226_v47  ;;  %6227 = vmatprep.subr.bf16.mxu0 %v6226_v47 }
 0x1e3   : > { %v1796_v44 = vadd.f32 %v1795_v61, %v7150_v11  ;;  %v1797_v40 = vpop.f32.mrb[15].mxu1  ;;  %2112 = vmatmul.mubr.f32.gmra.mrb[120].mxu1 %v1608_v50  ;;  %v1225_v50 = vadd.f32 %v7220_v2, %v7021_v8  ;;  %v7251_v26 = vpop.f32.mrb[102].mxu0  ;;  %6229 = vmatpush3.bf16.msra.mxu0 %v6226_v47 }
 0x1e4   : > { %v1798_v62 = vadd.f32 %v1797_v40, %v7153_v19  ;;  %2870 = vmatprep.mubr.f32.mxu0 %v2533_v63  ;;  %2117 = vmatprep.mubr.f32.mxu1 %v6288_v49  ;;  %v7255_v8 = vpop.f32.mrb[103].mxu0 }
 0x1e5   : > { %2871 = vmatmul.mubr.f32.gmra.mrb[140].mxu0 %v2532_v41  ;;  %v2534_v28 = vmax.f32 %v1796_v44, 0.0  ;;  %v1230_v44 = vadd.f32 %v7220_v2, %v7030_v17 }
 0x1e6   : > { %v1801_v4 = vpop.f32.mrb[16].mxu1  ;;  %v2535_v57 = vmax.f32 %v1798_v62, 0.0  ;;  %v1611_v62 = vmax.f32 %v1225_v50, 0.0 }
 0x1e7   : > { %v1802_v5 = vadd.f32 %v1801_v4, %v7150_v11  ;;  %v1803_v58 = vpop.f32.mrb[17].mxu1  ;;  %2118 = vmatmul.mubr.f32.gmra.mrb[122].mxu1 %v1609_v9 }
 0x1e8   : > { %v1804_v24 = vadd.f32 %v1803_v58, %v7153_v19  ;;  %2875 = vmatprep.mubr.f32.mxu0 %v2535_v57  ;;  %2123 = vmatprep.mubr.f32.mxu1 %v6288_v49  ;;  %v1612_v57 = vmax.f32 %v1230_v44, 0.0 }
 0x1e9   : > { %2876 = vmatmul.mubr.f32.gmra.mrb[142].mxu0 %v2534_v28  ;;  %v2536_v40 = vmax.f32 %v1802_v5, 0.0  ;;  %v7258_v5 = vpop.f32.mrb[104].mxu0  ;;  %v1235_v28 = vadd.f32 %v7220_v2, %v7028_v16 }
 0x1ea   : > { %v1807_v29 = vpop.f32.mrb[18].mxu1  ;;  %v2537_v51 = vmax.f32 %v1804_v24, 0.0  ;;  %v7262_v58 = vpop.f32.mrb[105].mxu0 }
 0x1eb   : > { %v1808_v61 = vadd.f32 %v1807_v29, %v7150_v11  ;;  %v1809_v63 = vpop.f32.mrb[19].mxu1  ;;  %2124 = vmatmul.mubr.f32.gmra.mrb[124].mxu1 %v1610_v27  ;;  %v1613_v16 = vmax.f32 %v1235_v28, 0.0 }
 0x1ec   : > { %v1810_v41 = vadd.f32 %v1809_v63, %v7153_v19  ;;  %2880 = vmatprep.mubr.f32.mxu0 %v2537_v51  ;;  %2129 = vmatprep.mubr.f32.mxu1 %v6288_v49  ;;  %v1240_v51 = vadd.f32 %v7220_v2, %v7040_v25  ;;  %v7269_v63 = vpop.f32.mrb[106].mxu0 }
 0x1ed   : > { %2881 = vmatmul.mubr.f32.gmra.mrb[144].mxu0 %v2536_v40  ;;  %v2538_v17 = vmax.f32 %v1808_v61, 0.0  ;;  %v7273_v40 = vpop.f32.mrb[107].mxu0 }
 0x1ee   : > { %v1813_v21 = vpop.f32.mrb[20].mxu1  ;;  %v2539_v59 = vmax.f32 %v1810_v41, 0.0  ;;  %v1614_v25 = vmax.f32 %v1240_v51, 0.0 }
 0x1ef   : > { %v1814_v9 = vadd.f32 %v1813_v21, %v7150_v11  ;;  %v1815_v4 = vpop.f32.mrb[21].mxu1  ;;  %2130 = vmatmul.mubr.f32.gmra.mrb[126].mxu1 %v1611_v62 }
 0x1f0   : > { %v1816_v47 = vadd.f32 %v1815_v4, %v7153_v19  ;;  %2885 = vmatprep.mubr.f32.mxu0 %v2539_v59  ;;  %2135 = vmatprep.mubr.f32.mxu1 %v6288_v49 }
 0x1f1   : > { %2886 = vmatmul.mubr.f32.gmra.mrb[146].mxu0 %v2538_v17  ;;  %v2540_v61 = vmax.f32 %v1814_v9, 0.0  ;;  %v7276_v9 = vpop.f32.mrb[108].mxu0 }
 0x1f2   : > { %v1819_v27 = vpop.f32.mrb[22].mxu1  ;;  %v2541_v24 = vmax.f32 %v1816_v47, 0.0  ;;  %v1245_v47 = vadd.f32 %v7220_v2, %v7038_v38 }
 0x1f3   : > { %v1820_v50 = vadd.f32 %v1819_v27, %v7150_v11  ;;  %v1821_v29 = vpop.f32.mrb[23].mxu1  ;;  %2136 = vmatmul.mubr.f32.gmra.mrb[128].mxu1 %v1612_v57  ;;  %v7280_v57 = vpop.f32.mrb[109].mxu0 }
 0x1f4   : > { %v1822_v44 = vadd.f32 %v1821_v29, %v7153_v19  ;;  %2890 = vmatprep.mubr.f32.mxu0 %v2541_v24  ;;  %2141 = vmatprep.mubr.f32.mxu1 %v6288_v49  ;;  %v1615_v38 = vmax.f32 %v1245_v47, 0.0  ;;  %v1255_v47 = vadd.f32 %v7220_v2, %v7048_v45 }
 0x1f5   : > { %2891 = vmatmul.mubr.f32.gmra.mrb[148].mxu0 %v2540_v61  ;;  %v2542_v4 = vmax.f32 %v1820_v50, 0.0  ;;  %v1250_v50 = vadd.f32 %v7220_v2, %v7050_v35 }
 0x1f6   : > { %v1825_v41 = vpop.f32.mrb[24].mxu1  ;;  %v2543_v62 = vmax.f32 %v1822_v44, 0.0  ;;  %v7289_v44 = vpop.f32.mrb[110].mxu0  ;;  %v1617_v45 = vmax.f32 %v1255_v47, 0.0  ;;  %v1265_v47 = vadd.f32 %v7220_v2, %v7058_v53 }
 0x1f7   : > { %v1826_v21 = vadd.f32 %v1825_v41, %v7150_v11  ;;  %v1827_v59 = vpop.f32.mrb[25].mxu1  ;;  %2142 = vmatmul.mubr.f32.gmra.mrb[130].mxu1 %v1613_v16  ;;  %v7291_v16 = vpop.f32.mrb[111].mxu0  ;;  %v1616_v35 = vmax.f32 %v1250_v50, 0.0 }
 0x1f8   : > { %v1828_v17 = vadd.f32 %v1827_v59, %v7153_v19  ;;  %2895 = vmatprep.mubr.f32.mxu0 %v2543_v62  ;;  %2147 = vmatprep.mubr.f32.mxu1 %v6288_v49  ;;  %v1619_v53 = vmax.f32 %v1265_v47, 0.0  ;;  %v1275_v47 = vadd.f32 %v7220_v2, %v7068_v60 }
 0x1f9   : > { %2896 = vmatmul.mubr.f32.gmra.mrb[150].mxu0 %v2542_v4  ;;  %v2544_v51 = vmax.f32 %v1826_v21, 0.0 }
 0x1fa   : > { %v1831_v28 = vpop.f32.mrb[26].mxu1  ;;  %v2545_v27 = vmax.f32 %v1828_v17, 0.0  ;;  %v7296_v17 = vpop.f32.mrb[112].mxu0  ;;  %v1621_v60 = vmax.f32 %v1275_v47, 0.0  ;;  %v1285_v47 = vadd.f32 %v7220_v2, %v7078_v56 }
 0x1fb   : > { %v1832_v24 = vadd.f32 %v1831_v28, %v7150_v11  ;;  %v1833_v29 = vpop.f32.mrb[27].mxu1  ;;  %2148 = vmatmul.mubr.f32.gmra.mrb[132].mxu1 %v1614_v25  ;;  %v7300_v28 = vpop.f32.mrb[113].mxu0 }
 0x1fc   : > { %v1834_v61 = vadd.f32 %v1833_v29, %v7153_v19  ;;  %2900 = vmatprep.mubr.f32.mxu0 %v2545_v27  ;;  %2153 = vmatprep.mubr.f32.mxu1 %v6288_v49  ;;  %v1623_v56 = vmax.f32 %v1285_v47, 0.0 }
 0x1fd   : > { %2901 = vmatmul.mubr.f32.gmra.mrb[152].mxu0 %v2544_v51  ;;  %v2546_v25 = vmax.f32 %v1832_v24, 0.0  ;;  %v1260_v24 = vadd.f32 %v7220_v2, %v7060_v33 }
 0x1fe   : > { %v1837_v41 = vpop.f32.mrb[28].mxu1  ;;  %v2547_v62 = vmax.f32 %v1834_v61, 0.0 }
 0x1ff   : > { %v1838_v59 = vadd.f32 %v1837_v41, %v7150_v11  ;;  %v1839_v4 = vpop.f32.mrb[29].mxu1  ;;  %2154 = vmatmul.mubr.f32.gmra.mrb[134].mxu1 %v1615_v38  ;;  %v7307_v41 = vpop.f32.mrb[114].mxu0  ;;  %v1618_v33 = vmax.f32 %v1260_v24, 0.0 }
 0x200   : > { %v1840_v21 = vadd.f32 %v1839_v4, %v7153_v19  ;;  %2905 = vmatprep.mubr.f32.mxu0 %v2547_v62  ;;  %2159 = vmatprep.mubr.f32.mxu1 %v6288_v49  ;;  %v7309_v62 = vpop.f32.mrb[115].mxu0 }
 0x201   : > { %2906 = vmatmul.mubr.f32.gmra.mrb[154].mxu0 %v2546_v25  ;;  %v2548_v50 = vmax.f32 %v1838_v59, 0.0 }
 0x202   : > { %v1843_v27 = vpop.f32.mrb[30].mxu1  ;;  %v2549_v29 = vmax.f32 %v1840_v21, 0.0 }
 0x203   : > { %v1844_v51 = vadd.f32 %v1843_v27, %v7150_v11  ;;  %v1845_v61 = vpop.f32.mrb[31].mxu1  ;;  %2160 = vmatmul.mubr.f32.gmra.mrb[136].mxu1 %v1616_v35 }
 0x204   : > { %v1846_v38 = vadd.f32 %v1845_v61, %v7153_v19  ;;  %2910 = vmatprep.mubr.f32.mxu0 %v2549_v29  ;;  %2165 = vmatprep.mubr.f32.mxu1 %v6288_v49  ;;  %v7314_v29 = vpop.f32.mrb[116].mxu0 }
 0x205   : > { %2911 = vmatmul.mubr.f32.gmra.mrb[156].mxu0 %v2548_v50  ;;  %v2550_v27 = vmax.f32 %v1844_v51, 0.0  ;;  %8656 = vst [vmem:[#allocation2_spill] sm:$0xff] %v7314_v29  ;;  %v7318_v61 = vpop.f32.mrb[117].mxu0  ;;  %v1270_v51 = vadd.f32 %v7220_v2, %v7070_v48 }
 0x206   : > { %v1849_v4 = vpop.f32.mrb[32].mxu1  ;;  %v2551_v25 = vmax.f32 %v1846_v38, 0.0  ;;  %8657 = vst [vmem:[#allocation3_spill] sm:$0xff] %v7318_v61 }
 0x207   : > { %v1850_v21 = vadd.f32 %v1849_v4, %v7150_v11  ;;  %v1851_v35 = vpop.f32.mrb[33].mxu1  ;;  %2166 = vmatmul.mubr.f32.gmra.mrb[138].mxu1 %v1617_v45  ;;  %v1620_v48 = vmax.f32 %v1270_v51, 0.0 }
 0x208   : > { %v1852_v59 = vadd.f32 %v1851_v35, %v7153_v19  ;;  %2915 = vmatprep.mubr.f32.mxu0 %v2551_v25  ;;  %2171 = vmatprep.mubr.f32.mxu1 %v6288_v49  ;;  %v7325_v35 = vpop.f32.mrb[118].mxu0 }
 0x209   : > { %2916 = vmatmul.mubr.f32.gmra.mrb[158].mxu0 %v2550_v27  ;;  %v2552_v24 = vmax.f32 %v1850_v21, 0.0  ;;  %v7327_v27 = vpop.f32.mrb[119].mxu0 }
 0x20a   : > { %v1855_v50 = vpop.f32.mrb[34].mxu1  ;;  %v2553_v38 = vmax.f32 %v1852_v59, 0.0 }
 0x20b   : > { %v1856_v4 = vadd.f32 %v1855_v50, %v7150_v11  ;;  %v1857_v45 = vpop.f32.mrb[35].mxu1  ;;  %2172 = vmatmul.mubr.f32.gmra.mrb[140].mxu1 %v1618_v33 }
 0x20c   : > { %v1858_v25 = vadd.f32 %v1857_v45, %v7153_v19  ;;  %2920 = vmatprep.mubr.f32.mxu0 %v2553_v38  ;;  %2177 = vmatprep.mubr.f32.mxu1 %v6288_v49  ;;  %v7332_v38 = vpop.f32.mrb[120].mxu0 }
 0x20d   : > { %2921 = vmatmul.mubr.f32.gmra.mrb[160].mxu0 %v2552_v24  ;;  %v2554_v61 = vmax.f32 %v1856_v4, 0.0  ;;  %8658 = vst [vmem:[#allocation4_spill] sm:$0xff] %v7332_v38  ;;  %v7336_v45 = vpop.f32.mrb[121].mxu0  ;;  %v1280_v4 = vadd.f32 %v7220_v2, %v7080_v1 }
 0x20e   : > { %v1861_v59 = vpop.f32.mrb[36].mxu1  ;;  %v2555_v29 = vmax.f32 %v1858_v25, 0.0  ;;  %8659 = vst [vmem:[#allocation5_spill] sm:$0xff] %v7336_v45 }
 0x20f   : > { %v1862_v50 = vadd.f32 %v1861_v59, %v7150_v11  ;;  %v1863_v33 = vpop.f32.mrb[37].mxu1  ;;  %2178 = vmatmul.mubr.f32.gmra.mrb[142].mxu1 %v1619_v53  ;;  %v1622_v1 = vmax.f32 %v1280_v4, 0.0 }
 0x210   : > { %v1864_v21 = vadd.f32 %v1863_v33, %v7153_v19  ;;  %2925 = vmatprep.mubr.f32.mxu0 %v2555_v29  ;;  %2183 = vmatprep.mubr.f32.mxu1 %v6288_v49  ;;  %v7343_v33 = vpop.f32.mrb[122].mxu0 }
 0x211   : > { %2926 = vmatmul.mubr.f32.gmra.mrb[162].mxu0 %v2554_v61  ;;  %v2556_v29 = vmax.f32 %v1862_v50, 0.0  ;;  %v7345_v61 = vpop.f32.mrb[123].mxu0 }
 0x212   : > { %v1867_v24 = vpop.f32.mrb[38].mxu1  ;;  %v2557_v25 = vmax.f32 %v1864_v21, 0.0 }
 0x213   : > { %v1868_v59 = vadd.f32 %v1867_v24, %v7150_v11  ;;  %v1869_v53 = vpop.f32.mrb[39].mxu1  ;;  %2184 = vmatmul.mubr.f32.gmra.mrb[144].mxu1 %v1620_v48 }
 0x214   : > { %v1870_v51 = vadd.f32 %v1869_v53, %v7153_v19  ;;  %2930 = vmatprep.mubr.f32.mxu0 %v2557_v25  ;;  %2189 = vmatprep.mubr.f32.mxu1 %v6288_v49  ;;  %v7350_v25 = vpop.f32.mrb[124].mxu0 }
 0x215   : > { %2931 = vmatmul.mubr.f32.gmra.mrb[164].mxu0 %v2556_v29  ;;  %v2558_v45 = vmax.f32 %v1868_v59, 0.0  ;;  %8660 = vst [vmem:[#allocation6_spill] sm:$0xff] %v7350_v25  ;;  %v7354_v53 = vpop.f32.mrb[125].mxu0  ;;  %v1290_v59 = vadd.f32 %v7220_v2, %v7090_v10 }
 0x216   : > { %v1873_v21 = vpop.f32.mrb[40].mxu1  ;;  %v2559_v38 = vmax.f32 %v1870_v51, 0.0  ;;  %8661 = vst [vmem:[#allocation7_spill] sm:$0xff] %v7354_v53 }
 0x217   : > { %v1874_v24 = vadd.f32 %v1873_v21, %v7150_v11  ;;  %v1875_v48 = vpop.f32.mrb[41].mxu1  ;;  %2190 = vmatmul.mubr.f32.gmra.mrb[146].mxu1 %v1621_v60  ;;  %v1624_v10 = vmax.f32 %v1290_v59, 0.0 }
 0x218   : > { %v1876_v50 = vadd.f32 %v1875_v48, %v7153_v19  ;;  %2935 = vmatprep.mubr.f32.mxu0 %v2559_v38  ;;  %2195 = vmatprep.mubr.f32.mxu1 %v6288_v49  ;;  %v7361_v48 = vpop.f32.mrb[126].mxu0 }
 0x219   : > { %2936 = vmatmul.mubr.f32.gmra.mrb[166].mxu0 %v2558_v45  ;;  %v2560_v38 = vmax.f32 %v1874_v24, 0.0  ;;  %v7363_v45 = vpop.f32.mrb[127].mxu0 }
 0x21a   : > { %v1879_v29 = vpop.f32.mrb[42].mxu1  ;;  %v2561_v51 = vmax.f32 %v1876_v50, 0.0 }
 0x21b   : > { %v1880_v21 = vadd.f32 %v1879_v29, %v7150_v11  ;;  %v1881_v60 = vpop.f32.mrb[43].mxu1  ;;  %2196 = vmatmul.mubr.f32.gmra.mrb[148].mxu1 %v1622_v1 }
 0x21c   : > { %v1882_v4 = vadd.f32 %v1881_v60, %v7153_v19  ;;  %2940 = vmatprep.mubr.f32.mxu0 %v2561_v51  ;;  %2201 = vmatprep.mubr.f32.mxu1 %v6288_v49  ;;  %v1295_v51 = vadd.f32 %v7220_v2, %v7088_v15 }
 0x21d   : > { %2941 = vmatmul.mubr.f32.gmra.mrb[168].mxu0 %v2560_v38  ;;  %v2562_v53 = vmax.f32 %v1880_v21, 0.0 }
 0x21e   : > { %v1885_v50 = vpop.f32.mrb[44].mxu1  ;;  %v2563_v25 = vmax.f32 %v1882_v4, 0.0 }
 0x21f   : > { %v1886_v29 = vadd.f32 %v1885_v50, %v7150_v11  ;;  %v1887_v1 = vpop.f32.mrb[45].mxu1  ;;  %2202 = vmatmul.mubr.f32.gmra.mrb[150].mxu1 %v1623_v56  ;;  %v1300_v56 = vadd.f32 %v7220_v2, %v7108_v20  ;;  %v441_v20 = vld [vmem:[%s8654_s2 + $0x188] sm:$0xff] }
 0x220   : > { %v1888_v24 = vadd.f32 %v1887_v1, %v7153_v19  ;;  %2945 = vmatprep.mubr.f32.mxu0 %v2563_v25  ;;  %2207 = vmatprep.mubr.f32.mxu1 %v6288_v49  ;;  %v1625_v25 = vmax.f32 %v1295_v51, 0.0 }
 0x221   : > { %2946 = vmatmul.mubr.f32.gmra.mrb[170].mxu0 %v2562_v53  ;;  %v2564_v21 = vmax.f32 %v1886_v29, 0.0  ;;  %v442_v29 = vld [vmem:[%s8654_s2 + $0x198] sm:$0xff] }
 0x222   : > { %v1891_v47 = vpop.f32.mrb[46].mxu1  ;;  %v2565_v60 = vmax.f32 %v1888_v24, 0.0  ;;  %v6230_v51 = vpack.c.bf16 %v442_v29, %v441_v20 }
 0x223   : > { %v1892_v38 = vadd.f32 %v1891_v47, %v7150_v11  ;;  %v1893_v4 = vpop.f32.mrb[47].mxu1  ;;  %2208 = vmatmul.mubr.f32.gmra.mrb[152].mxu1 %v1624_v10  ;;  %v1626_v47 = vmax.f32 %v1300_v56, 0.0 }
 0x224   : > { %v1894_v59 = vadd.f32 %v1893_v4, %v7153_v19  ;;  %2950 = vmatprep.mubr.f32.mxu0 %v2565_v60  ;;  %2213 = vmatprep.mubr.f32.mxu1 %v6288_v49  ;;  %v1305_v60 = vadd.f32 %v7220_v2, %v7098_v55 }
 0x225   : > { %2951 = vmatmul.mubr.f32.gmra.mrb[172].mxu0 %v2564_v21  ;;  %v2566_v24 = vmax.f32 %v1892_v38, 0.0  ;;  %6250 = vmatprep.subr.bf16.mxu1 %v6230_v51 }
 0x226   : > { %v1897_v50 = vpop.f32.mrb[48].mxu1  ;;  %v2567_v15 = vmax.f32 %v1894_v59, 0.0  ;;  %6231 = vmatprep.subr.bf16.mxu0 %v6230_v51  ;;  %v1310_v59 = vadd.f32 %v7220_v2, %v7120_v7  ;;  %v1627_v55 = vmax.f32 %v1305_v60, 0.0  ;;  %6258 = vmatpush3.bf16.msra.mxu1 %v6230_v51 }
 0x227   : > { %v1898_v53 = vadd.f32 %v1897_v50, %v7150_v11  ;;  %v1899_v1 = vpop.f32.mrb[49].mxu1  ;;  %2214 = vmatmul.mubr.f32.gmra.mrb[154].mxu1 %v1625_v25  ;;  %6233 = vmatpush3.bf16.msra.mxu0 %v6230_v51 }
 0x228   : > { %v1900_v10 = vadd.f32 %v1899_v1, %v7153_v19  ;;  %2955 = vmatprep.mubr.f32.mxu0 %v2567_v15  ;;  %2219 = vmatprep.mubr.f32.mxu1 %v6288_v49  ;;  %v1628_v29 = vmax.f32 %v1310_v59, 0.0 }
 0x229   : > { %2956 = vmatmul.mubr.f32.gmra.mrb[174].mxu0 %v2566_v24  ;;  %v2568_v25 = vmax.f32 %v1898_v53, 0.0  ;;  %v1315_v53 = vadd.f32 %v7220_v2, %v7118_v32 }
 0x22a   : > { %v1903_v38 = vpop.f32.mrb[50].mxu1  ;;  %v2569_v4 = vmax.f32 %v1900_v10, 0.0 }
 0x22b   : > { %v1904_v56 = vadd.f32 %v1903_v38, %v7150_v11  ;;  %v1905_v21 = vpop.f32.mrb[51].mxu1  ;;  %2220 = vmatmul.mubr.f32.gmra.mrb[156].mxu1 %v1626_v47  ;;  %v1629_v59 = vmax.f32 %v1315_v53, 0.0  ;;  %v1330_v53 = vadd.f32 %v7220_v2, %v7140_v0  ;;  %v1335_v0 = vadd.f32 %v7220_v2, %v7138_v22 }
 0x22c   : > { %v1906_v50 = vadd.f32 %v1905_v21, %v7153_v19  ;;  %2960 = vmatprep.mubr.f32.mxu0 %v2569_v4  ;;  %2225 = vmatprep.mubr.f32.mxu1 %v6288_v49  ;;  %v1320_v4 = vadd.f32 %v7220_v2, %v7130_v13  ;;  %v1325_v13 = vadd.f32 %v7220_v2, %v7128_v34 }
 0x22d   : > { %2961 = vmatmul.mubr.f32.gmra.mrb[176].mxu0 %v2568_v25  ;;  %v2570_v47 = vmax.f32 %v1904_v56, 0.0 }
 0x22e   : > { %v1909_v15 = vpop.f32.mrb[52].mxu1  ;;  %v2571_v1 = vmax.f32 %v1906_v50, 0.0 }
 0x22f   : > { %v1910_v24 = vadd.f32 %v1909_v15, %v7150_v11  ;;  %v1911_v20 = vpop.f32.mrb[53].mxu1  ;;  %2226 = vmatmul.mubr.f32.gmra.mrb[158].mxu1 %v1627_v55 }
 0x230   : > { %v1912_v7 = vadd.f32 %v1911_v20, %v7153_v19  ;;  %2965 = vmatprep.mubr.f32.mxu0 %v2571_v1  ;;  %2231 = vmatprep.mubr.f32.mxu1 %v6288_v49  ;;  %v1630_v1 = vmax.f32 %v1320_v4, 0.0 }
 0x231   : > { %2966 = vmatmul.mubr.f32.gmra.mrb[178].mxu0 %v2570_v47  ;;  %v2572_v56 = vmax.f32 %v1910_v24, 0.0 }
 0x232   : > { %v1915_v10 = vpop.f32.mrb[54].mxu1  ;;  %v2573_v60 = vmax.f32 %v1912_v7, 0.0 }
 0x233   : > { %v1916_v51 = vadd.f32 %v1915_v10, %v7150_v11  ;;  %v1917_v38 = vpop.f32.mrb[55].mxu1  ;;  %2232 = vmatmul.mubr.f32.gmra.mrb[160].mxu1 %v1628_v29 }
 0x234   : > { %v1918_v21 = vadd.f32 %v1917_v38, %v7153_v19  ;;  %2970 = vmatprep.mubr.f32.mxu0 %v2573_v60  ;;  %2237 = vmatprep.mubr.f32.mxu1 %v6288_v49 }
 0x235   : > { %2971 = vmatmul.mubr.f32.gmra.mrb[180].mxu0 %v2572_v56  ;;  %v2574_v15 = vmax.f32 %v1916_v51, 0.0  ;;  %v1631_v51 = vmax.f32 %v1325_v13, 0.0 }
 0x236   : > { %v1921_v25 = vpop.f32.mrb[56].mxu1  ;;  %v2575_v32 = vmax.f32 %v1918_v21, 0.0 }
 0x237   : > { %v1922_v50 = vadd.f32 %v1921_v25, %v7150_v11  ;;  %v1923_v55 = vpop.f32.mrb[57].mxu1  ;;  %2238 = vmatmul.mubr.f32.gmra.mrb[162].mxu1 %v1629_v59  ;;  %v1632_v59 = vmax.f32 %v1330_v53, 0.0 }
 0x238   : > { %v1924_v20 = vadd.f32 %v1923_v55, %v7153_v19  ;;  %2975 = vmatprep.mubr.f32.mxu0 %v2575_v32  ;;  %2243 = vmatprep.mubr.f32.mxu1 %v6288_v49 }
 0x239   : > { %2976 = vmatmul.mubr.f32.gmra.mrb[182].mxu0 %v2574_v15  ;;  %v2576_v10 = vmax.f32 %v1922_v50, 0.0 }
 0x23a   : > { %v1927_v24 = vpop.f32.mrb[58].mxu1  ;;  %v2577_v47 = vmax.f32 %v1924_v20, 0.0 }
 0x23b   : > { %v1928_v29 = vadd.f32 %v1927_v24, %v7150_v11  ;;  %v1929_v7 = vpop.f32.mrb[59].mxu1  ;;  %2244 = vmatmul.mubr.f32.gmra.mrb[164].mxu1 %v1630_v1  ;;  %v1340_v1 = vadd.f32 %v7220_v2, %v7157_v23  ;;  %v1633_v24 = vmax.f32 %v1335_v0, 0.0  ;;  %v1345_v23 = vadd.f32 %v7220_v2, %v7155_v14 }
 0x23c   : > { %v1930_v60 = vadd.f32 %v1929_v7, %v7153_v19  ;;  %2980 = vmatprep.mubr.f32.mxu0 %v2577_v47  ;;  %2249 = vmatprep.mubr.f32.mxu1 %v6288_v49 }
 0x23d   : > { %2981 = vmatmul.mubr.f32.gmra.mrb[184].mxu0 %v2576_v10  ;;  %v2578_v21 = vmax.f32 %v1928_v29, 0.0  ;;  %v1634_v10 = vmax.f32 %v1340_v1, 0.0 }
 0x23e   : > { %v1933_v38 = vpop.f32.mrb[60].mxu1  ;;  %v2579_v34 = vmax.f32 %v1930_v60, 0.0 }
 0x23f   : > { %v1934_v4 = vadd.f32 %v1933_v38, %v7150_v11  ;;  %v1935_v56 = vpop.f32.mrb[61].mxu1  ;;  %2250 = vmatmul.mubr.f32.gmra.mrb[166].mxu1 %v1631_v51 }
 0x240   : > { %v1936_v25 = vadd.f32 %v1935_v56, %v7153_v19  ;;  %2985 = vmatprep.mubr.f32.mxu0 %v2579_v34  ;;  %2255 = vmatprep.mubr.f32.mxu1 %v6288_v49  ;;  %v1350_v56 = vadd.f32 %v7220_v2, %v7171_v46  ;;  %v1355_v46 = vadd.f32 %v7220_v2, %v7169_v12 }
 0x241   : > { %2986 = vmatmul.mubr.f32.gmra.mrb[186].mxu0 %v2578_v21  ;;  %v2580_v20 = vmax.f32 %v1934_v4, 0.0 }
 0x242   : > { %v1939_v32 = vpop.f32.mrb[62].mxu1  ;;  %v2581_v50 = vmax.f32 %v1936_v25, 0.0  ;;  %v1635_v25 = vmax.f32 %v1345_v23, 0.0 }
 0x243   : > { %v1940_v55 = vadd.f32 %v1939_v32, %v7150_v11  ;;  %v1941_v15 = vpop.f32.mrb[63].mxu1  ;;  %2256 = vmatmul.mubr.f32.gmra.mrb[168].mxu1 %v1632_v59 }
 0x244   : > { %v1942_v13 = vadd.f32 %v1941_v15, %v7153_v19  ;;  %2990 = vmatprep.mubr.f32.mxu0 %v2581_v50  ;;  %2261 = vmatprep.mubr.f32.mxu1 %v6288_v49  ;;  %v1636_v15 = vmax.f32 %v1350_v56, 0.0 }
 0x245   : > { %2991 = vmatmul.mubr.f32.gmra.mrb[188].mxu0 %v2580_v20  ;;  %v2582_v53 = vmax.f32 %v1940_v55, 0.0 }
 0x246   : > { %v1945_v47 = vpop.f32.mrb[64].mxu1  ;;  %v2583_v22 = vmax.f32 %v1942_v13, 0.0 }
 0x247   : > { %v1946_v29 = vadd.f32 %v1945_v47, %v7150_v11  ;;  %v1947_v7 = vpop.f32.mrb[65].mxu1  ;;  %2262 = vmatmul.mubr.f32.gmra.mrb[170].mxu1 %v1633_v24 }
 0x248   : > { %v1948_v60 = vadd.f32 %v1947_v7, %v7153_v19  ;;  %2995 = vmatprep.mubr.f32.mxu0 %v2583_v22  ;;  %2267 = vmatprep.mubr.f32.mxu1 %v6288_v49  ;;  %v1360_v7 = vadd.f32 %v7220_v2, %v7189_v54 }
 0x249   : > { %2996 = vmatmul.mubr.f32.gmra.mrb[190].mxu0 %v2582_v53  ;;  %v2584_v21 = vmax.f32 %v1946_v29, 0.0  ;;  %v1637_v53 = vmax.f32 %v1355_v46, 0.0 }
 0x24a   : > { %v1951_v51 = vpop.f32.mrb[66].mxu1  ;;  %v2585_v38 = vmax.f32 %v1948_v60, 0.0 }
 0x24b   : > { %v1952_v34 = vadd.f32 %v1951_v51, %v7150_v11  ;;  %v1953_v4 = vpop.f32.mrb[67].mxu1  ;;  %2268 = vmatmul.mubr.f32.gmra.mrb[172].mxu1 %v1634_v10 }
 0x24c   : > { %v1954_v59 = vadd.f32 %v1953_v4, %v7153_v19  ;;  %3000 = vmatprep.mubr.f32.mxu0 %v2585_v38  ;;  %2273 = vmatprep.mubr.f32.mxu1 %v6288_v49  ;;  %v1638_v4 = vmax.f32 %v1360_v7, 0.0 }
 0x24d   : > { %3001 = vmatmul.mubr.f32.gmra.mrb[192].mxu0 %v2584_v21  ;;  %v2586_v55 = vmax.f32 %v1952_v34, 0.0  ;;  %v1365_v34 = vadd.f32 %v7220_v2, %v7184_v42 }
 0x24e   : > { %v1957_v0 = vpop.f32.mrb[68].mxu1  ;;  %v2587_v14 = vmax.f32 %v1954_v59, 0.0 }
 0x24f   : > { %v1958_v32 = vadd.f32 %v1957_v0, %v7150_v11  ;;  %v1959_v50 = vpop.f32.mrb[69].mxu1  ;;  %2274 = vmatmul.mubr.f32.gmra.mrb[174].mxu1 %v1635_v25 }
 0x250   : > { %v1960_v1 = vadd.f32 %v1959_v50, %v7153_v19  ;;  %3005 = vmatprep.mubr.f32.mxu0 %v2587_v14  ;;  %2279 = vmatprep.mubr.f32.mxu1 %v6288_v49  ;;  %v1370_v14 = vadd.f32 %v7220_v2, %v7197_v52 }
 0x251   : > { %3006 = vmatmul.mubr.f32.gmra.mrb[194].mxu0 %v2586_v55  ;;  %v2588_v22 = vmax.f32 %v1958_v32, 0.0  ;;  %v1639_v32 = vmax.f32 %v1365_v34, 0.0 }
 0x252   : > { %v1963_v20 = vpop.f32.mrb[70].mxu1  ;;  %v2589_v13 = vmax.f32 %v1960_v1, 0.0 }
 0x253   : > { %v1964_v24 = vadd.f32 %v1963_v20, %v7150_v11  ;;  %v1965_v47 = vpop.f32.mrb[71].mxu1  ;;  %2280 = vmatmul.mubr.f32.gmra.mrb[176].mxu1 %v1636_v15  ;;  %v1375_v20 = vadd.f32 %v7220_v2, %v7193_v6  ;;  %v444_v6 = vld [vmem:[%s8654_s2 + $0x1b8] sm:$0xff] }
 0x254   : > { %v1966_v29 = vadd.f32 %v1965_v47, %v7153_v19  ;;  %3010 = vmatprep.mubr.f32.mxu0 %v2589_v13  ;;  %2285 = vmatprep.mubr.f32.mxu1 %v6288_v49  ;;  %v1640_v13 = vmax.f32 %v1370_v14, 0.0 }
 0x255   : > { %3011 = vmatmul.mubr.f32.gmra.mrb[196].mxu0 %v2588_v22  ;;  %v2590_v51 = vmax.f32 %v1964_v24, 0.0 }
 0x256   : > { %v1969_v10 = vpop.f32.mrb[72].mxu1  ;;  %v2591_v12 = vmax.f32 %v1966_v29, 0.0 }
 0x257   : > { %v1970_v60 = vadd.f32 %v1969_v10, %v7150_v11  ;;  %v1971_v23 = vpop.f32.mrb[73].mxu1  ;;  %2286 = vmatmul.mubr.f32.gmra.mrb[178].mxu1 %v1637_v53  ;;  %v443_v53 = vld [vmem:[%s8654_s2 + $0x1a8] sm:$0xff]  ;;  %v1380_v10 = vadd.f32 %v7220_v2, %v7208_v43 }
 0x258   : > { %v1972_v38 = vadd.f32 %v1971_v23, %v7153_v19  ;;  %3015 = vmatprep.mubr.f32.mxu0 %v2591_v12  ;;  %2291 = vmatprep.mubr.f32.mxu1 %v6288_v49  ;;  %v1641_v12 = vmax.f32 %v1375_v20, 0.0  ;;  %v445_v43 = vld [vmem:[%s8654_s2 + $0x1c8] sm:$0xff] }
 0x259   : > { %3016 = vmatmul.mubr.f32.gmra.mrb[198].mxu0 %v2590_v51  ;;  %v2592_v25 = vmax.f32 %v1970_v60, 0.0  ;;  %v6234_v60 = vpack.c.bf16 %v444_v6, %v443_v53 }
 0x25a   : > { %v1975_v54 = vpop.f32.mrb[74].mxu1  ;;  %v2593_v56 = vmax.f32 %v1972_v38, 0.0 }
 0x25b   : > { %v1976_v21 = vadd.f32 %v1975_v54, %v7150_v11  ;;  %v1977_v59 = vpop.f32.mrb[75].mxu1  ;;  %2292 = vmatmul.mubr.f32.gmra.mrb[180].mxu1 %v1638_v4  ;;  %6251 = vmatprep.subr.bf16.mxu1 %v6234_v60 }
 0x25c   : > { %v1978_v0 = vadd.f32 %v1977_v59, %v7153_v19  ;;  %3020 = vmatprep.mubr.f32.mxu0 %v2593_v56  ;;  %2297 = vmatprep.mubr.f32.mxu1 %v6288_v49  ;;  %v446_v56 = vld [vmem:[%s8654_s2 + $0x1d8] sm:$0xff]  ;;  %v1642_v59 = vmax.f32 %v1380_v10, 0.0 }
 0x25d   : > { %3021 = vmatmul.mubr.f32.gmra.mrb[200].mxu0 %v2592_v25  ;;  %v2594_v1 = vmax.f32 %v1976_v21, 0.0  ;;  %v1385_v21 = vadd.f32 %v7220_v2, %v7204_v36  ;;  %6259 = vmatpush3.bf16.msra.mxu1 %v6234_v60  ;;  %v6238_v25 = vpack.c.bf16 %v446_v56, %v445_v43  ;;  %v447_v36 = vld [vmem:[%s8654_s2 + $0x1e8] sm:$0xff] }
 0x25e   : > { %v1981_v42 = vpop.f32.mrb[76].mxu1  ;;  %v2595_v50 = vmax.f32 %v1978_v0, 0.0  ;;  %6235 = vmatprep.subr.bf16.mxu0 %v6234_v60 }
 0x25f   : > { %v1982_v55 = vadd.f32 %v1981_v42, %v7150_v11  ;;  %v1983_v15 = vpop.f32.mrb[77].mxu1  ;;  %2298 = vmatmul.mubr.f32.gmra.mrb[182].mxu1 %v1639_v32  ;;  %6252 = vmatprep.subr.bf16.mxu1 %v6238_v25 }
 0x260   : > { %v1984_v46 = vadd.f32 %v1983_v15, %v7153_v19  ;;  %3025 = vmatprep.mubr.f32.mxu0 %v2595_v50  ;;  %2303 = vmatprep.mubr.f32.mxu1 %v6288_v49  ;;  %v448_v15 = vld [vmem:[%s8654_s2 + $0x1f8] sm:$0xff] }
 0x261   : > { %3026 = vmatmul.mubr.f32.gmra.mrb[202].mxu0 %v2594_v1  ;;  %v2596_v29 = vmax.f32 %v1982_v55, 0.0  ;;  %v1390_v1 = vadd.f32 %v7220_v2, %v7215_v37  ;;  %6260 = vmatpush3.bf16.msra.mxu1 %v6238_v25  ;;  %v6242_v20 = vpack.c.bf16 %v448_v15, %v447_v36  ;;  %v1395_v37 = vadd.f32 %v7220_v2, %v7211_v3 }
 0x262   : > { %v1987_v52 = vpop.f32.mrb[78].mxu1  ;;  %v2597_v24 = vmax.f32 %v1984_v46, 0.0  ;;  %v1643_v46 = vmax.f32 %v1385_v21, 0.0  ;;  %6237 = vmatpush3.bf16.msra.mxu0 %v6234_v60  ;;  %v1400_v3 = vadd.f32 %v7220_v2, %v7231_v39  ;;  %v7505_v2 = vld [vmem:[%s8654_s2 + $0x350] ss:$0 sm:$0xff] }
 0x263   : > { %v1988_v47 = vadd.f32 %v1987_v52, %v7150_v11  ;;  %v1989_v22 = vpop.f32.mrb[79].mxu1  ;;  %2304 = vmatmul.mubr.f32.gmra.mrb[184].mxu1 %v1640_v13  ;;  %6253 = vmatprep.subr.bf16.mxu1 %v6242_v20  ;;  %v1405_v39 = vadd.f32 %v7505_v2, %v7227_v31 }
 0x264   : > { %v1990_v7 = vadd.f32 %v1989_v22, %v7153_v19  ;;  %3030 = vmatprep.mubr.f32.mxu0 %v2597_v24  ;;  %2309 = vmatprep.mubr.f32.mxu1 %v6288_v49  ;;  %v1646_v21 = vmax.f32 %v1400_v3, 0.0  ;;  %v1425_v3 = vadd.f32 %v7505_v2, %v7251_v26 }
 0x265   : > { %3031 = vmatmul.mubr.f32.gmra.mrb[204].mxu0 %v2596_v29  ;;  %v2598_v4 = vmax.f32 %v1988_v47, 0.0  ;;  %6261 = vmatpush3.bf16.msra.mxu1 %v6242_v20 }
 0x266   : > { %v1993_v23 = vpop.f32.mrb[80].mxu1  ;;  %v2599_v51 = vmax.f32 %v1990_v7, 0.0  ;;  %v1644_v7 = vmax.f32 %v1390_v1, 0.0  ;;  %6239 = vmatprep.subr.bf16.mxu0 %v6238_v25 }
 0x267   : > { %v1994_v38 = vadd.f32 %v1993_v23, %v7150_v11  ;;  %v1995_v34 = vpop.f32.mrb[81].mxu1  ;;  %2310 = vmatmul.mubr.f32.gmra.mrb[186].mxu1 %v1641_v12  ;;  %6241 = vmatpush3.bf16.msra.mxu0 %v6238_v25 }
 0x268   : > { %v1996_v54 = vadd.f32 %v1995_v34, %v7153_v19  ;;  %3035 = vmatprep.mubr.f32.mxu0 %v2599_v51  ;;  %2315 = vmatprep.mubr.f32.mxu1 %v6288_v49  ;;  %v1645_v51 = vmax.f32 %v1395_v37, 0.0 }
 0x269   : > { %3036 = vmatmul.mubr.f32.gmra.mrb[206].mxu0 %v2598_v4  ;;  %v2600_v50 = vmax.f32 %v1994_v38, 0.0  ;;  %6243 = vmatprep.subr.bf16.mxu0 %v6242_v20 }
 0x26a   : > { %v1999_v0 = vpop.f32.mrb[82].mxu1  ;;  %v2601_v14 = vmax.f32 %v1996_v54, 0.0 }
 0x26b   : > { %v2000_v32 = vadd.f32 %v1999_v0, %v7150_v11  ;;  %v2001_v42 = vpop.f32.mrb[83].mxu1  ;;  %2316 = vmatmul.mubr.f32.gmra.mrb[188].mxu1 %v1642_v59  ;;  %6245 = vmatpush3.bf16.msra.mxu0 %v6242_v20 }
 0x26c   : > { %v2002_v55 = vadd.f32 %v2001_v42, %v7153_v19  ;;  %3040 = vmatprep.mubr.f32.mxu0 %v2601_v14  ;;  %2321 = vmatprep.mubr.f32.mxu1 %v6288_v49 }
 0x26d   : > { %3041 = vmatmul.mubr.f32.gmra.mrb[208].mxu0 %v2600_v50  ;;  %v2602_v22 = vmax.f32 %v2000_v32, 0.0  ;;  %v1410_v50 = vadd.f32 %v7505_v2, %v7244_v30 }
 0x26e   : > { %v2005_v13 = vpop.f32.mrb[84].mxu1  ;;  %v2603_v52 = vmax.f32 %v2002_v55, 0.0  ;;  %v1647_v55 = vmax.f32 %v1405_v39, 0.0  ;;  %v1651_v39 = vmax.f32 %v1425_v3, 0.0 }
 0x26f   : > { %v2006_v24 = vadd.f32 %v2005_v13, %v7150_v11  ;;  %v2007_v47 = vpop.f32.mrb[85].mxu1  ;;  %2322 = vmatmul.mubr.f32.gmra.mrb[190].mxu1 %v1643_v46  ;;  %v1415_v13 = vadd.f32 %v7505_v2, %v7240_v18 }
 0x270   : > { %v2008_v29 = vadd.f32 %v2007_v47, %v7153_v19  ;;  %3045 = vmatprep.mubr.f32.mxu0 %v2603_v52  ;;  %2327 = vmatprep.mubr.f32.mxu1 %v6288_v49  ;;  %v1648_v52 = vmax.f32 %v1410_v50, 0.0 }
 0x271   : > { %3046 = vmatmul.mubr.f32.gmra.mrb[210].mxu0 %v2602_v22  ;;  %v2604_v60 = vmax.f32 %v2006_v24, 0.0 }
 0x272   : > { %v2011_v53 = vpop.f32.mrb[86].mxu1  ;;  %v2605_v6 = vmax.f32 %v2008_v29, 0.0 }
 0x273   : > { %v2012_v10 = vadd.f32 %v2011_v53, %v7150_v11  ;;  %v2013_v12 = vpop.f32.mrb[87].mxu1  ;;  %2328 = vmatmul.mubr.f32.gmra.mrb[192].mxu1 %v1644_v7  ;;  %v1420_v7 = vadd.f32 %v7505_v2, %v7255_v8  ;;  %v1649_v53 = vmax.f32 %v1415_v13, 0.0 }
 0x274   : > { %v2014_v23 = vadd.f32 %v2013_v12, %v7153_v19  ;;  %3050 = vmatprep.mubr.f32.mxu0 %v2605_v6  ;;  %2333 = vmatprep.mubr.f32.mxu1 %v6288_v49 }
 0x275   : > { %3051 = vmatmul.mubr.f32.gmra.mrb[212].mxu0 %v2604_v60  ;;  %v2606_v43 = vmax.f32 %v2012_v10, 0.0 }
 0x276   : > { %v2017_v38 = vpop.f32.mrb[88].mxu1  ;;  %v2607_v34 = vmax.f32 %v2014_v23, 0.0 }
 0x277   : > { %v2018_v4 = vadd.f32 %v2017_v38, %v7150_v11  ;;  %v2019_v54 = vpop.f32.mrb[89].mxu1  ;;  %2334 = vmatmul.mubr.f32.gmra.mrb[194].mxu1 %v1645_v51  ;;  %v1650_v51 = vmax.f32 %v1420_v7, 0.0 }
 0x278   : > { %v2020_v56 = vadd.f32 %v2019_v54, %v7153_v19  ;;  %3055 = vmatprep.mubr.f32.mxu0 %v2607_v34  ;;  %2339 = vmatprep.mubr.f32.mxu1 %v6288_v49 }
 0x279   : > { %3056 = vmatmul.mubr.f32.gmra.mrb[214].mxu0 %v2606_v43  ;;  %v2608_v32 = vmax.f32 %v2018_v4, 0.0 }
 0x27a   : > { %v2023_v59 = vpop.f32.mrb[90].mxu1  ;;  %v2609_v25 = vmax.f32 %v2020_v56, 0.0  ;;  %v1430_v56 = vadd.f32 %v7505_v2, %v7262_v58 }
 0x27b   : > { %v2024_v0 = vadd.f32 %v2023_v59, %v7150_v11  ;;  %v2025_v14 = vpop.f32.mrb[91].mxu1  ;;  %2340 = vmatmul.mubr.f32.gmra.mrb[196].mxu1 %v1646_v21 }
 0x27c   : > { %v2026_v42 = vadd.f32 %v2025_v14, %v7153_v19  ;;  %3060 = vmatprep.mubr.f32.mxu0 %v2609_v25  ;;  %2345 = vmatprep.mubr.f32.mxu1 %v6288_v49 }
 0x27d   : > { %3061 = vmatmul.mubr.f32.gmra.mrb[216].mxu0 %v2608_v32  ;;  %v2610_v46 = vmax.f32 %v2024_v0, 0.0  ;;  %v1435_v32 = vadd.f32 %v7505_v2, %v7258_v5 }
 0x27e   : > { %v2029_v31 = vpop.f32.mrb[92].mxu1  ;;  %v2611_v36 = vmax.f32 %v2026_v42, 0.0  ;;  %v1652_v42 = vmax.f32 %v1430_v56, 0.0 }
 0x27f   : > { %v2030_v15 = vadd.f32 %v2029_v31, %v7150_v11  ;;  %v2031_v1 = vpop.f32.mrb[93].mxu1  ;;  %2346 = vmatmul.mubr.f32.gmra.mrb[198].mxu1 %v1647_v55 }
 0x280   : > { %v2032_v20 = vadd.f32 %v2031_v1, %v7153_v19  ;;  %3065 = vmatprep.mubr.f32.mxu0 %v2611_v36  ;;  %2351 = vmatprep.mubr.f32.mxu1 %v6288_v49  ;;  %v1440_v1 = vadd.f32 %v7505_v2, %v7273_v40 }
 0x281   : > { %3066 = vmatmul.mubr.f32.gmra.mrb[218].mxu0 %v2610_v46  ;;  %v2612_v29 = vmax.f32 %v2030_v15, 0.0  ;;  %v1653_v46 = vmax.f32 %v1435_v32, 0.0 }
 0x282   : > { %v2035_v30 = vpop.f32.mrb[94].mxu1  ;;  %v2613_v24 = vmax.f32 %v2032_v20, 0.0 }
 0x283   : > { %v2036_v47 = vadd.f32 %v2035_v30, %v7150_v11  ;;  %v2037_v22 = vpop.f32.mrb[95].mxu1  ;;  %2352 = vmatmul.mubr.f32.gmra.mrb[200].mxu1 %v1648_v52 }
 0x284   : > { %v2038_v37 = vadd.f32 %v2037_v22, %v7153_v19  ;;  %3070 = vmatprep.mubr.f32.mxu0 %v2613_v24  ;;  %2357 = vmatprep.mubr.f32.mxu1 %v6288_v49  ;;  %v1654_v22 = vmax.f32 %v1440_v1, 0.0 }
 0x285   : > { %3071 = vmatmul.mubr.f32.gmra.mrb[220].mxu0 %v2612_v29  ;;  %v2614_v60 = vmax.f32 %v2036_v47, 0.0  ;;  %v1445_v47 = vadd.f32 %v7505_v2, %v7269_v63 }
 0x286   : > { %v2041_v18 = vpop.f32.mrb[96].mxu1  ;;  %v2615_v6 = vmax.f32 %v2038_v37, 0.0 }
 0x287   : > { %v2042_v10 = vadd.f32 %v2041_v18, %v7150_v11  ;;  %v2043_v12 = vpop.f32.mrb[97].mxu1  ;;  %2358 = vmatmul.mubr.f32.gmra.mrb[202].mxu1 %v1649_v53 }
 0x288   : > { %v2044_v23 = vadd.f32 %v2043_v12, %v7153_v19  ;;  %3075 = vmatprep.mubr.f32.mxu0 %v2615_v6  ;;  %2363 = vmatprep.mubr.f32.mxu1 %v6288_v49  ;;  %v1450_v6 = vadd.f32 %v7505_v2, %v7280_v57 }
 0x289   : > { %3076 = vmatmul.mubr.f32.gmra.mrb[222].mxu0 %v2614_v60  ;;  %v2616_v54 = vmax.f32 %v2042_v10, 0.0  ;;  %v1655_v10 = vmax.f32 %v1445_v47, 0.0 }
 0x28a   : > { %v2047_v8 = vpop.f32.mrb[98].mxu1  ;;  %v2617_v38 = vmax.f32 %v2044_v23, 0.0 }
 0x28b   : > { %v2048_v34 = vadd.f32 %v2047_v8, %v7150_v11  ;;  %v2049_v4 = vpop.f32.mrb[99].mxu1  ;;  %2364 = vmatmul.mubr.f32.gmra.mrb[204].mxu1 %v1650_v51 }
 0x28c   : > { %v2050_v43 = vadd.f32 %v2049_v4, %v7153_v19  ;;  %3080 = vmatprep.mubr.f32.mxu0 %v2617_v38  ;;  %2369 = vmatprep.mubr.f32.mxu1 %v6288_v49  ;;  %v1455_v38 = vadd.f32 %v7505_v2, %v7276_v9  ;;  %v1460_v9 = vadd.f32 %v7505_v2, %v7291_v16 }
 0x28d   : > { %3081 = vmatmul.mubr.f32.gmra.mrb[224].mxu0 %v2616_v54  ;;  %v2618_v0 = vmax.f32 %v2048_v34, 0.0  ;;  %v1656_v34 = vmax.f32 %v1450_v6, 0.0  ;;  %v1465_v16 = vadd.f32 %v7505_v2, %v7289_v44  ;;  %v1470_v44 = vadd.f32 %v7505_v2, %v7300_v28 }
 0x28e   : > { %v2053_v26 = vpop.f32.mrb[100].mxu1  ;;  %v2619_v21 = vmax.f32 %v2050_v43, 0.0  ;;  %v1475_v28 = vadd.f32 %v7505_v2, %v7296_v17  ;;  %v1480_v17 = vadd.f32 %v7505_v2, %v7309_v62  ;;  %v1485_v62 = vadd.f32 %v7505_v2, %v7307_v41 }
 0x28f   : > { %v2054_v59 = vadd.f32 %v2053_v26, %v7150_v11  ;;  %v2055_v25 = vpop.f32.mrb[101].mxu1  ;;  %2370 = vmatmul.mubr.f32.gmra.mrb[206].mxu1 %v1651_v39  ;;  %v1660_v6 = vmax.f32 %v1470_v44, 0.0 }
 0x290   : > { %v2056_v14 = vadd.f32 %v2055_v25, %v7153_v19  ;;  %3085 = vmatprep.mubr.f32.mxu0 %v2619_v21  ;;  %2375 = vmatprep.mubr.f32.mxu1 %v6288_v49  ;;  %v1657_v25 = vmax.f32 %v1455_v38, 0.0 }
 0x291   : > { %3086 = vmatmul.mubr.f32.gmra.mrb[226].mxu0 %v2618_v0  ;;  %v2620_v36 = vmax.f32 %v2054_v59, 0.0 }
 0x292   : > { %v2059_v58 = vpop.f32.mrb[102].mxu1  ;;  %v2621_v50 = vmax.f32 %v2056_v14, 0.0 }
 0x293   : > { %v2060_v55 = vadd.f32 %v2059_v58, %v7150_v11  ;;  %v2061_v31 = vpop.f32.mrb[103].mxu1  ;;  %2376 = vmatmul.mubr.f32.gmra.mrb[208].mxu1 %v1652_v42 }
 0x294   : > { %v2062_v15 = vadd.f32 %v2061_v31, %v7153_v19  ;;  %3090 = vmatprep.mubr.f32.mxu0 %v2621_v50  ;;  %2381 = vmatprep.mubr.f32.mxu1 %v6288_v49 }
 0x295   : > { %3091 = vmatmul.mubr.f32.gmra.mrb[228].mxu0 %v2620_v36  ;;  %v2622_v30 = vmax.f32 %v2060_v55, 0.0  ;;  %v1658_v36 = vmax.f32 %v1460_v9, 0.0 }
 0x296   : > { %v2065_v5 = vpop.f32.mrb[104].mxu1  ;;  %v2623_v20 = vmax.f32 %v2062_v15, 0.0 }
 0x297   : > { %v2066_v13 = vadd.f32 %v2065_v5, %v7150_v11  ;;  %v2067_v52 = vpop.f32.mrb[105].mxu1  ;;  %2382 = vmatmul.mubr.f32.gmra.mrb[210].mxu1 %v1653_v46 }
 0x298   : > { %v2068_v24 = vadd.f32 %v2067_v52, %v7153_v19  ;;  %3095 = vmatprep.mubr.f32.mxu0 %v2623_v20  ;;  %2387 = vmatprep.mubr.f32.mxu1 %v6288_v49 }
 0x299   : > { %3096 = vmatmul.mubr.f32.gmra.mrb[230].mxu0 %v2622_v30  ;;  %v2624_v53 = vmax.f32 %v2066_v13, 0.0 }
 0x29a   : > { %v2071_v40 = vpop.f32.mrb[106].mxu1  ;;  %v2625_v29 = vmax.f32 %v2068_v24, 0.0  ;;  %v1659_v24 = vmax.f32 %v1465_v16, 0.0  ;;  %v8662_v16 = vld [vmem:[#allocation3_spill] sm:$0xff] }
 0x29b   : > { %v2072_v37 = vadd.f32 %v2071_v40, %v7150_v11  ;;  %v2073_v7 = vpop.f32.mrb[107].mxu1  ;;  %2388 = vmatmul.mubr.f32.gmra.mrb[212].mxu1 %v1654_v22  ;;  %v1490_v41 = vadd.f32 %v7505_v2, %v8662_v16 }
 0x29c   : > { %v2074_v18 = vadd.f32 %v2073_v7, %v7153_v19  ;;  %3100 = vmatprep.mubr.f32.mxu0 %v2625_v29  ;;  %2393 = vmatprep.mubr.f32.mxu1 %v6288_v49 }
 0x29d   : > { %3101 = vmatmul.mubr.f32.gmra.mrb[232].mxu0 %v2624_v53  ;;  %v2626_v3 = vmax.f32 %v2072_v37, 0.0 }
 0x29e   : > { %v2077_v63 = vpop.f32.mrb[108].mxu1  ;;  %v2627_v12 = vmax.f32 %v2074_v18, 0.0 }
 0x29f   : > { %v2078_v60 = vadd.f32 %v2077_v63, %v7150_v11  ;;  %v2079_v23 = vpop.f32.mrb[109].mxu1  ;;  %2394 = vmatmul.mubr.f32.gmra.mrb[214].mxu1 %v1655_v10 }
 0x2a0   : > { %v2080_v51 = vadd.f32 %v2079_v23, %v7153_v19  ;;  %v7556_v8 = vpop.f32.mrb[128].mxu0  ;;  %3105 = vmatprep.mubr.f32.mxu0 %v2627_v12  ;;  %2399 = vmatprep.mubr.f32.mxu1 %v6288_v49 }
 0x2a1   : > { %v2844_v57 = vpop.f32.mrb[129].mxu0  ;;  %3106 = vmatmul.mubr.f32.gmra.mrb[234].mxu0 %v2626_v3  ;;  %v2628_v39 = vmax.f32 %v2078_v60, 0.0 }
 0x2a2   : > { %v2083_v4 = vpop.f32.mrb[110].mxu1  ;;  %v2629_v54 = vmax.f32 %v2080_v51, 0.0  ;;  %v1661_v57 = vmax.f32 %v1475_v28, 0.0 }
 0x2a3   : > { %v2084_v43 = vadd.f32 %v2083_v4, %v7150_v11  ;;  %v2085_v56 = vpop.f32.mrb[111].mxu1  ;;  %2400 = vmatmul.mubr.f32.gmra.mrb[216].mxu1 %v1656_v34 }
 0x2a4   : > { %v2086_v26 = vadd.f32 %v2085_v56, %v7153_v19  ;;  %v7563_v21 = vpop.f32.mrb[130].mxu0  ;;  %3110 = vmatprep.mubr.f32.mxu0 %v2629_v54  ;;  %2405 = vmatprep.mubr.f32.mxu1 %v6288_v49 }
 0x2a5   : > { %v2849_v59 = vpop.f32.mrb[131].mxu0  ;;  %3111 = vmatmul.mubr.f32.gmra.mrb[236].mxu0 %v2628_v39  ;;  %v2630_v58 = vmax.f32 %v2084_v43, 0.0 }
 0x2a6   : > { %v2089_v0 = vpop.f32.mrb[112].mxu1  ;;  %v2631_v14 = vmax.f32 %v2086_v26, 0.0  ;;  %v1662_v59 = vmax.f32 %v1480_v17, 0.0 }
 0x2a7   : > { %v2090_v32 = vadd.f32 %v2089_v0, %v7150_v11  ;;  %v2091_v42 = vpop.f32.mrb[113].mxu1  ;;  %2406 = vmatmul.mubr.f32.gmra.mrb[218].mxu1 %v1657_v25 }
 0x2a8   : > { %v2092_v50 = vadd.f32 %v2091_v42, %v7153_v19  ;;  %v7570_v55 = vpop.f32.mrb[132].mxu0  ;;  %3115 = vmatprep.mubr.f32.mxu0 %v2631_v14  ;;  %2411 = vmatprep.mubr.f32.mxu1 %v6288_v49 }
 0x2a9   : > { %v2854_v31 = vpop.f32.mrb[133].mxu0  ;;  %3116 = vmatmul.mubr.f32.gmra.mrb[238].mxu0 %v2630_v58  ;;  %v2632_v20 = vmax.f32 %v2090_v32, 0.0 }
 0x2aa   : > { %v2095_v15 = vpop.f32.mrb[114].mxu1  ;;  %v2633_v1 = vmax.f32 %v2092_v50, 0.0 }
 0x2ab   : > { %v2096_v46 = vadd.f32 %v2095_v15, %v7150_v11  ;;  %v2097_v5 = vpop.f32.mrb[115].mxu1  ;;  %2412 = vmatmul.mubr.f32.gmra.mrb[220].mxu1 %v1658_v36  ;;  %v1663_v36 = vmax.f32 %v1485_v62, 0.0 }
 0x2ac   : > { %v2098_v13 = vadd.f32 %v2097_v5, %v7153_v19  ;;  %v7577_v52 = vpop.f32.mrb[134].mxu0  ;;  %3120 = vmatprep.mubr.f32.mxu0 %v2633_v1  ;;  %2417 = vmatprep.mubr.f32.mxu1 %v6288_v49 }
 0x2ad   : > { %v2859_v30 = vpop.f32.mrb[135].mxu0  ;;  %3121 = vmatmul.mubr.f32.gmra.mrb[240].mxu0 %v2632_v20  ;;  %v2634_v37 = vmax.f32 %v2096_v46, 0.0 }
 0x2ae   : > { %v2101_v47 = vpop.f32.mrb[116].mxu1  ;;  %v2635_v22 = vmax.f32 %v2098_v13, 0.0  ;;  %v8663_v30 = vld [vmem:[#allocation2_spill] sm:$0xff] }
 0x2af   : > { %v2102_v40 = vadd.f32 %v2101_v47, %v7150_v11  ;;  %v2103_v29 = vpop.f32.mrb[117].mxu1  ;;  %2418 = vmatmul.mubr.f32.gmra.mrb[222].mxu1 %v1659_v24  ;;  %v1495_v24 = vadd.f32 %v7505_v2, %v8663_v30 }
 0x2b0   : > { %v2104_v7 = vadd.f32 %v2103_v29, %v7153_v19  ;;  %v7584_v53 = vpop.f32.mrb[136].mxu0  ;;  %3125 = vmatprep.mubr.f32.mxu0 %v2635_v22  ;;  %2423 = vmatprep.mubr.f32.mxu1 %v6288_v49  ;;  %v1664_v22 = vmax.f32 %v1490_v41, 0.0 }
 0x2b1   : > { %v2864_v18 = vpop.f32.mrb[137].mxu0  ;;  %3126 = vmatmul.mubr.f32.gmra.mrb[242].mxu0 %v2634_v37  ;;  %v2636_v23 = vmax.f32 %v2102_v40, 0.0 }
 0x2b2   : > { %v2107_v10 = vpop.f32.mrb[118].mxu1  ;;  %v2637_v63 = vmax.f32 %v2104_v7, 0.0 }
 0x2b3   : > { %v2108_v12 = vadd.f32 %v2107_v10, %v7150_v11  ;;  %v2109_v60 = vpop.f32.mrb[119].mxu1  ;;  %2424 = vmatmul.mubr.f32.gmra.mrb[224].mxu1 %v1660_v6  ;;  %v1500_v10 = vadd.f32 %v7505_v2, %v7327_v27  ;;  %v1505_v27 = vadd.f32 %v7505_v2, %v7325_v35 }
 0x2b4   : > { %v2110_v3 = vadd.f32 %v2109_v60, %v7153_v19  ;;  %v7591_v51 = vpop.f32.mrb[138].mxu0  ;;  %3130 = vmatprep.mubr.f32.mxu0 %v2637_v63  ;;  %2429 = vmatprep.mubr.f32.mxu1 %v6288_v49 }
 0x2b5   : > { %v2869_v38 = vpop.f32.mrb[139].mxu0  ;;  %3131 = vmatmul.mubr.f32.gmra.mrb[244].mxu0 %v2636_v23  ;;  %v2638_v56 = vmax.f32 %v2108_v12, 0.0  ;;  %v1665_v12 = vmax.f32 %v1495_v24, 0.0 }
 0x2b6   : > { %v2113_v34 = vpop.f32.mrb[120].mxu1  ;;  %v2639_v4 = vmax.f32 %v2110_v3, 0.0 }
 0x2b7   : > { %v2114_v54 = vadd.f32 %v2113_v34, %v7150_v11  ;;  %v2115_v43 = vpop.f32.mrb[121].mxu1  ;;  %2430 = vmatmul.mubr.f32.gmra.mrb[226].mxu1 %v1661_v57 }
 0x2b8   : > { %v2116_v39 = vadd.f32 %v2115_v43, %v7153_v19  ;;  %v7598_v26 = vpop.f32.mrb[140].mxu0  ;;  %3135 = vmatprep.mubr.f32.mxu0 %v2639_v4  ;;  %2435 = vmatprep.mubr.f32.mxu1 %v6288_v49 }
 0x2b9   : > { %v2874_v9 = vpop.f32.mrb[141].mxu0  ;;  %3136 = vmatmul.mubr.f32.gmra.mrb[246].mxu0 %v2638_v56  ;;  %v2640_v42 = vmax.f32 %v2114_v54, 0.0  ;;  %v1666_v54 = vmax.f32 %v1500_v10, 0.0 }
 0x2ba   : > { %v2119_v25 = vpop.f32.mrb[122].mxu1  ;;  %v2641_v0 = vmax.f32 %v2116_v39, 0.0 }
 0x2bb   : > { %v2120_v14 = vadd.f32 %v2119_v25, %v7150_v11  ;;  %v2121_v32 = vpop.f32.mrb[123].mxu1  ;;  %2436 = vmatmul.mubr.f32.gmra.mrb[228].mxu1 %v1662_v59 }
 0x2bc   : > { %v2122_v58 = vadd.f32 %v2121_v32, %v7153_v19  ;;  %v7605_v50 = vpop.f32.mrb[142].mxu0  ;;  %3140 = vmatprep.mubr.f32.mxu0 %v2641_v0  ;;  %2441 = vmatprep.mubr.f32.mxu1 %v6288_v49  ;;  %v8664_v0 = vld [vmem:[#allocation5_spill] sm:$0xff]  ;;  %v1667_v32 = vmax.f32 %v1505_v27, 0.0 }
 0x2bd   : > { %v2879_v31 = vpop.f32.mrb[143].mxu0  ;;  %3141 = vmatmul.mubr.f32.gmra.mrb[248].mxu0 %v2640_v42  ;;  %v2642_v20 = vmax.f32 %v2120_v14, 0.0  ;;  %v1510_v35 = vadd.f32 %v7505_v2, %v8664_v0 }
 0x2be   : > { %v2125_v15 = vpop.f32.mrb[124].mxu1  ;;  %v2643_v1 = vmax.f32 %v2122_v58, 0.0 }
 0x2bf   : > { %v2126_v46 = vadd.f32 %v2125_v15, %v7150_v11  ;;  %v2127_v5 = vpop.f32.mrb[125].mxu1  ;;  %2442 = vmatmul.mubr.f32.gmra.mrb[230].mxu1 %v1663_v36 }
 0x2c0   : > { %v2128_v13 = vadd.f32 %v2127_v5, %v7153_v19  ;;  %v7612_v44 = vpop.f32.mrb[144].mxu0  ;;  %3145 = vmatprep.mubr.f32.mxu0 %v2643_v1  ;;  %2447 = vmatprep.mubr.f32.mxu1 %v6288_v49  ;;  %v8665_v1 = vld [vmem:[#allocation4_spill] sm:$0xff] }
 0x2c1   : > { %v2884_v47 = vpop.f32.mrb[145].mxu0  ;;  %3146 = vmatmul.mubr.f32.gmra.mrb[250].mxu0 %v2642_v20  ;;  %v2644_v37 = vmax.f32 %v2126_v46, 0.0  ;;  %v1515_v46 = vadd.f32 %v7505_v2, %v8665_v1  ;;  %v1668_v20 = vmax.f32 %v1510_v35, 0.0 }
 0x2c2   : > { %v2645_v40 = vmax.f32 %v2128_v13, 0.0  ;;  %v2131_v29 = vpop.f32.mrb[126].mxu1 }
 0x2c3   : > { %v2132_v7 = vadd.f32 %v2131_v29, %v7150_v11  ;;  %v2133_v28 = vpop.f32.mrb[127].mxu1  ;;  %2448 = vmatmul.mubr.f32.gmra.mrb[232].mxu1 %v1664_v22 }
 0x2c4   : > { %v2134_v18 = vadd.f32 %v2133_v28, %v7153_v19  ;;  %v7619_v6 = vpop.f32.mrb[146].mxu0  ;;  %3150 = vmatprep.mubr.f32.mxu0 %v2645_v40  ;;  %2453 = vmatprep.mubr.f32.mxu1 %v6288_v49  ;;  %v1669_v28 = vmax.f32 %v1515_v46, 0.0 }
 0x2c5   : > { %v2889_v63 = vpop.f32.mrb[147].mxu0  ;;  %3151 = vmatmul.mubr.f32.gmra.mrb[252].mxu0 %v2644_v37  ;;  %v2646_v3 = vmax.f32 %v2132_v7, 0.0  ;;  %v1520_v37 = vadd.f32 %v7505_v2, %v7345_v61  ;;  %v1525_v61 = vadd.f32 %v7505_v2, %v7343_v33 }
 0x2c6   : > { %v2647_v60 = vmax.f32 %v2134_v18, 0.0  ;;  %v2137_v23 = vpop.f32.mrb[128].mxu1 }
 0x2c7   : > { %v2138_v17 = vadd.f32 %v2137_v23, %v7150_v11  ;;  %v2139_v38 = vpop.f32.mrb[129].mxu1  ;;  %2454 = vmatmul.mubr.f32.gmra.mrb[234].mxu1 %v1665_v12 }
 0x2c8   : > { %v2140_v57 = vadd.f32 %v2139_v38, %v7153_v19  ;;  %v7626_v34 = vpop.f32.mrb[148].mxu0  ;;  %3155 = vmatprep.mubr.f32.mxu0 %v2647_v60  ;;  %2459 = vmatprep.mubr.f32.mxu1 %v6288_v49  ;;  %v1670_v38 = vmax.f32 %v1520_v37, 0.0 }
 0x2c9   : > { %v2894_v4 = vpop.f32.mrb[149].mxu0  ;;  %3156 = vmatmul.mubr.f32.gmra.mrb[254].mxu0 %v2646_v3  ;;  %v2648_v39 = vmax.f32 %v2138_v17, 0.0 }
 0x2ca   : > { %v2649_v43 = vmax.f32 %v2140_v57, 0.0  ;;  %v2143_v56 = vpop.f32.mrb[130].mxu1 }
 0x2cb   : > { %v2144_v62 = vadd.f32 %v2143_v56, %v7150_v11  ;;  %v2145_v9 = vpop.f32.mrb[131].mxu1  ;;  %2460 = vmatmul.mubr.f32.gmra.mrb[236].mxu1 %v1666_v54 }
 0x2cc   : > { %v2146_v59 = vadd.f32 %v2145_v9, %v7153_v19  ;;  %v7633_v25 = vpop.f32.mrb[150].mxu0  ;;  %3160 = vmatprep.mubr.f32.mxu0 %v2649_v43  ;;  %2465 = vmatprep.mubr.f32.mxu1 %v6288_v49 }
 0x2cd   : > { %v2899_v14 = vpop.f32.mrb[151].mxu0  ;;  %3161 = vmatmul.mubr.f32.gmra.mrb[0].mxu0 %v2648_v39  ;;  %v2650_v16 = vmax.f32 %v2144_v62, 0.0  ;;  %v8666_v62 = vld [vmem:[#allocation7_spill] sm:$0xff] }
 0x2ce   : > { %v2651_v42 = vmax.f32 %v2146_v59, 0.0  ;;  %v2149_v58 = vpop.f32.mrb[132].mxu1  ;;  %v1530_v33 = vadd.f32 %v7505_v2, %v8666_v62  ;;  %v1671_v59 = vmax.f32 %v1525_v61, 0.0 }
 0x2cf   : > { %v2150_v41 = vadd.f32 %v2149_v58, %v7150_v11  ;;  %v2151_v31 = vpop.f32.mrb[133].mxu1  ;;  %2466 = vmatmul.mubr.f32.gmra.mrb[238].mxu1 %v1667_v32 }
 0x2d0   : > { %v2152_v36 = vadd.f32 %v2151_v31, %v7153_v19  ;;  %v7640_v15 = vpop.f32.mrb[152].mxu0  ;;  %3165 = vmatprep.mubr.f32.mxu0 %v2651_v42  ;;  %2471 = vmatprep.mubr.f32.mxu1 %v6288_v49  ;;  %v1672_v1 = vmax.f32 %v1530_v33, 0.0 }
 0x2d1   : > { %v2904_v5 = vpop.f32.mrb[153].mxu0  ;;  %3166 = vmatmul.mubr.f32.gmra.mrb[2].mxu0 %v2650_v16  ;;  %v2652_v24 = vmax.f32 %v2150_v41, 0.0  ;;  %v8667_v41 = vld [vmem:[#allocation6_spill] sm:$0xff] }
 0x2d2   : > { %v2653_v13 = vmax.f32 %v2152_v36, 0.0  ;;  %v2155_v30 = vpop.f32.mrb[134].mxu1  ;;  %v1535_v31 = vadd.f32 %v7505_v2, %v8667_v41 }
 0x2d3   : > { %v2156_v47 = vadd.f32 %v2155_v30, %v7150_v11  ;;  %v2157_v22 = vpop.f32.mrb[135].mxu1  ;;  %2472 = vmatmul.mubr.f32.gmra.mrb[240].mxu1 %v1668_v20 }
 0x2d4   : > { %v2158_v40 = vadd.f32 %v2157_v22, %v7153_v19  ;;  %v7647_v29 = vpop.f32.mrb[154].mxu0  ;;  %3170 = vmatprep.mubr.f32.mxu0 %v2653_v13  ;;  %2477 = vmatprep.mubr.f32.mxu1 %v6288_v49  ;;  %v1540_v22 = vadd.f32 %v7505_v2, %v7363_v45  ;;  %v1673_v37 = vmax.f32 %v1535_v31, 0.0  ;;  %v1545_v45 = vadd.f32 %v7505_v2, %v7361_v48 }
 0x2d5   : > { %v2909_v7 = vpop.f32.mrb[155].mxu0  ;;  %3171 = vmatmul.mubr.f32.gmra.mrb[4].mxu0 %v2652_v24  ;;  %v2654_v63 = vmax.f32 %v2156_v47, 0.0 }
 0x2d6   : > { %v2655_v18 = vmax.f32 %v2158_v40, 0.0  ;;  %v2161_v10 = vpop.f32.mrb[136].mxu1 }
 0x2d7   : > { %v2162_v12 = vadd.f32 %v2161_v10, %v7150_v11  ;;  %v2163_v60 = vpop.f32.mrb[137].mxu1  ;;  %2478 = vmatmul.mubr.f32.gmra.mrb[242].mxu1 %v1669_v28 }
 0x2d8   : > { %v2164_v23 = vadd.f32 %v2163_v60, %v7153_v19  ;;  %v7654_v3 = vpop.f32.mrb[156].mxu0  ;;  %3175 = vmatprep.mubr.f32.mxu0 %v2655_v18  ;;  %2483 = vmatprep.mubr.f32.mxu1 %v6288_v49 }
 0x2d9   : > { %v2914_v17 = vpop.f32.mrb[157].mxu0  ;;  %3176 = vmatmul.mubr.f32.gmra.mrb[6].mxu0 %v2654_v63  ;;  %v2656_v4 = vmax.f32 %v2162_v12, 0.0 }
 0x2da   : > { %v2657_v57 = vmax.f32 %v2164_v23, 0.0  ;;  %v2167_v27 = vpop.f32.mrb[138].mxu1  ;;  %v7690_v23 = vld [vmem:[%s8654_s2 + $0x352] ss:$0 sm:$0xff]  ;;  %v1674_v17 = vmax.f32 %v1540_v22, 0.0 }
 0x2db   : > { %v2168_v54 = vadd.f32 %v2167_v27, %v7150_v11  ;;  %v2169_v43 = vpop.f32.mrb[139].mxu1  ;;  %2484 = vmatmul.mubr.f32.gmra.mrb[244].mxu1 %v1670_v38  ;;  %v2863_v38 = vadd.f32 %v7584_v53, %v7690_v23  ;;  %v1675_v53 = vmax.f32 %v1545_v45, 0.0  ;;  %v2883_v31 = vadd.f32 %v7612_v44, %v7690_v23 }
 0x2dc   : > { %v2170_v56 = vadd.f32 %v2169_v43, %v7153_v19  ;;  %v7661_v39 = vpop.f32.mrb[158].mxu0  ;;  %3180 = vmatprep.mubr.f32.mxu0 %v2657_v57  ;;  %2489 = vmatprep.mubr.f32.mxu1 %v6288_v49  ;;  %v2898_v45 = vadd.f32 %v7633_v25, %v7690_v23 }
 0x2dd   : > { %v2919_v9 = vpop.f32.mrb[159].mxu0  ;;  %3181 = vmatmul.mubr.f32.gmra.mrb[8].mxu0 %v2656_v4  ;;  %v2658_v14 = vmax.f32 %v2168_v54, 0.0  ;;  %v3485_v33 = vmax.f32 %v2863_v38, 0.0  ;;  %v3489_v44 = vmax.f32 %v2883_v31, 0.0 }
 0x2de   : > { %v2659_v0 = vmax.f32 %v2170_v56, 0.0  ;;  %v2173_v35 = vpop.f32.mrb[140].mxu1  ;;  %v2868_v56 = vadd.f32 %v7591_v51, %v7690_v23  ;;  %v2873_v9 = vadd.f32 %v7598_v26, %v7690_v23  ;;  %v3492_v25 = vmax.f32 %v2898_v45, 0.0 }
 0x2df   : > { %v2174_v32 = vadd.f32 %v2173_v35, %v7150_v11  ;;  %v2175_v42 = vpop.f32.mrb[141].mxu1  ;;  %2490 = vmatmul.mubr.f32.gmra.mrb[246].mxu1 %v1671_v59 }
 0x2e0   : > { %v2176_v58 = vadd.f32 %v2175_v42, %v7153_v19  ;;  %v7668_v16 = vpop.f32.mrb[160].mxu0  ;;  %3185 = vmatprep.mubr.f32.mxu0 %v2659_v0  ;;  %2495 = vmatprep.mubr.f32.mxu1 %v6288_v49  ;;  %v3486_v51 = vmax.f32 %v2868_v56, 0.0  ;;  %v3487_v26 = vmax.f32 %v2873_v9, 0.0  ;;  %v2908_v56 = vadd.f32 %v7647_v29, %v7690_v23 }
 0x2e1   : > { %v2924_v36 = vpop.f32.mrb[161].mxu0  ;;  %3186 = vmatmul.mubr.f32.gmra.mrb[10].mxu0 %v2658_v14  ;;  %v2660_v20 = vmax.f32 %v2174_v32, 0.0 }
 0x2e2   : > { %v2661_v46 = vmax.f32 %v2176_v58, 0.0  ;;  %v2179_v5 = vpop.f32.mrb[142].mxu1  ;;  %v2878_v58 = vadd.f32 %v7605_v50, %v7690_v23  ;;  %v3494_v29 = vmax.f32 %v2908_v56, 0.0 }
 0x2e3   : > { %v2180_v13 = vadd.f32 %v2179_v5, %v7150_v11  ;;  %v2181_v30 = vpop.f32.mrb[143].mxu1  ;;  %2496 = vmatmul.mubr.f32.gmra.mrb[248].mxu1 %v1672_v1 }
 0x2e4   : > { %v2182_v24 = vadd.f32 %v2181_v30, %v7153_v19  ;;  %v7675_v47 = vpop.f32.mrb[162].mxu0  ;;  %3190 = vmatprep.mubr.f32.mxu0 %v2661_v46  ;;  %2501 = vmatprep.mubr.f32.mxu1 %v6288_v49  ;;  %v3488_v50 = vmax.f32 %v2878_v58, 0.0  ;;  %v2923_v58 = vadd.f32 %v7668_v16, %v7690_v23 }
 0x2e5   : > { %v2929_v40 = vpop.f32.mrb[163].mxu0  ;;  %3191 = vmatmul.mubr.f32.gmra.mrb[12].mxu0 %v2660_v20  ;;  %v2662_v18 = vmax.f32 %v2180_v13, 0.0 }
 0x2e6   : > { %v2663_v7 = vmax.f32 %v2182_v24, 0.0  ;;  %v2185_v28 = vpop.f32.mrb[144].mxu1  ;;  %v2888_v24 = vadd.f32 %v7619_v6, %v7690_v23  ;;  %v2893_v40 = vadd.f32 %v7626_v34, %v7690_v23  ;;  %v3497_v16 = vmax.f32 %v2923_v58, 0.0 }
 0x2e7   : > { %v2186_v10 = vadd.f32 %v2185_v28, %v7150_v11  ;;  %v2187_v63 = vpop.f32.mrb[145].mxu1  ;;  %2502 = vmatmul.mubr.f32.gmra.mrb[250].mxu1 %v1673_v37 }
 0x2e8   : > { %v2188_v12 = vadd.f32 %v2187_v63, %v7153_v19  ;;  %v7682_v60 = vpop.f32.mrb[164].mxu0  ;;  %3195 = vmatprep.mubr.f32.mxu0 %v2663_v7  ;;  %2507 = vmatprep.mubr.f32.mxu1 %v6288_v49  ;;  %v3490_v6 = vmax.f32 %v2888_v24, 0.0  ;;  %v3491_v34 = vmax.f32 %v2893_v40, 0.0 }
 0x2e9   : > { %v2934_v61 = vpop.f32.mrb[165].mxu0  ;;  %3196 = vmatmul.mubr.f32.gmra.mrb[14].mxu0 %v2662_v18  ;;  %v2664_v4 = vmax.f32 %v2186_v10, 0.0 }
 0x2ea   : > { %v2665_v57 = vmax.f32 %v2188_v12, 0.0  ;;  %v2191_v27 = vpop.f32.mrb[146].mxu1 }
 0x2eb   : > { %v2192_v54 = vadd.f32 %v2191_v27, %v7150_v11  ;;  %v2193_v43 = vpop.f32.mrb[147].mxu1  ;;  %2508 = vmatmul.mubr.f32.gmra.mrb[252].mxu1 %v1674_v17  ;;  %v2903_v17 = vadd.f32 %v7640_v15, %v7690_v23 }
 0x2ec   : > { %v2194_v48 = vadd.f32 %v2193_v43, %v7153_v19  ;;  %v7696_v2 = vpop.f32.mrb[166].mxu0  ;;  %3200 = vmatprep.mubr.f32.mxu0 %v2665_v57  ;;  %2513 = vmatprep.mubr.f32.mxu1 %v6288_v49 }
 0x2ed   : > { %v2939_v62 = vpop.f32.mrb[167].mxu0  ;;  %3201 = vmatmul.mubr.f32.gmra.mrb[16].mxu0 %v2664_v4  ;;  %v2666_v35 = vmax.f32 %v2192_v54, 0.0  ;;  %v3493_v15 = vmax.f32 %v2903_v17, 0.0 }
 0x2ee   : > { %v2667_v59 = vmax.f32 %v2194_v48, 0.0  ;;  %v2197_v0 = vpop.f32.mrb[148].mxu1 }
 0x2ef   : > { %v2198_v14 = vadd.f32 %v2197_v0, %v7150_v11  ;;  %v2199_v32 = vpop.f32.mrb[149].mxu1  ;;  %2514 = vmatmul.mubr.f32.gmra.mrb[254].mxu1 %v1675_v53  ;;  %v2913_v53 = vadd.f32 %v7654_v3, %v7690_v23 }
 0x2f0   : > { %v2200_v42 = vadd.f32 %v2199_v32, %v7153_v19  ;;  %v7705_v49 = vpop.f32.mrb[168].mxu0  ;;  %3205 = vmatprep.mubr.f32.mxu0 %v2667_v59  ;;  %5940 = vmatprep.mubr.f32.mxu1 %v3485_v33 }
 0x2f1   : > { %v2944_v41 = vpop.f32.mrb[169].mxu0  ;;  %3206 = vmatmul.mubr.f32.gmra.mrb[18].mxu0 %v2666_v35  ;;  %v2668_v46 = vmax.f32 %v2198_v14, 0.0  ;;  %v3495_v3 = vmax.f32 %v2913_v53, 0.0 }
 0x2f2   : > { %v2669_v36 = vmax.f32 %v2200_v42, 0.0  ;;  %v2203_v1 = vpop.f32.mrb[150].mxu1  ;;  %v2918_v42 = vadd.f32 %v7661_v39, %v7690_v23 }
 0x2f3   : > { %v2204_v5 = vadd.f32 %v2203_v1, %v7150_v11  ;;  %v2205_v20 = vpop.f32.mrb[151].mxu1  ;;  %5941 = vmatmul.mubr.f32.vlgmr.msra.gmra.mrb[0].mxu1 %v3486_v51 }
 0x2f4   : > { %v2206_v13 = vadd.f32 %v2205_v20, %v7153_v19  ;;  %v7713_v30 = vpop.f32.mrb[170].mxu0  ;;  %3210 = vmatprep.mubr.f32.mxu0 %v2669_v36  ;;  %5943 = vmatprep.mubr.f32.mxu1 %v3487_v26  ;;  %v3496_v39 = vmax.f32 %v2918_v42, 0.0  ;;  %v2928_v20 = vadd.f32 %v7675_v47, %v7690_v23  ;;  %v2938_v47 = vadd.f32 %v7696_v2, %v7690_v23 }
 0x2f5   : > { %v2949_v22 = vpop.f32.mrb[171].mxu0  ;;  %3211 = vmatmul.mubr.f32.gmra.mrb[20].mxu0 %v2668_v46  ;;  %v2670_v28 = vmax.f32 %v2204_v5, 0.0  ;;  %v2948_v2 = vadd.f32 %v7713_v30, %v7690_v23 }
 0x2f6   : > { %v2671_v37 = vmax.f32 %v2206_v13, 0.0  ;;  %v2209_v7 = vpop.f32.mrb[152].mxu1 }
 0x2f7   : > { %v2210_v18 = vadd.f32 %v2209_v7, %v7150_v11  ;;  %v2211_v10 = vpop.f32.mrb[153].mxu1  ;;  %5944 = vmatmul.mubr.f32.gmra.mrb[2].mxu1 %v3488_v50  ;;  %v2933_v50 = vadd.f32 %v7682_v60, %v7690_v23  ;;  %v2943_v60 = vadd.f32 %v7705_v49, %v7690_v23 }
 0x2f8   : > { %v2212_v63 = vadd.f32 %v2211_v10, %v7153_v19  ;;  %v7721_v12 = vpop.f32.mrb[172].mxu0  ;;  %3215 = vmatprep.mubr.f32.mxu0 %v2671_v37  ;;  %5946 = vmatprep.mubr.f32.mxu1 %v3489_v44 }
 0x2f9   : > { %v2954_v61 = vpop.f32.mrb[173].mxu0  ;;  %3216 = vmatmul.mubr.f32.gmra.mrb[22].mxu0 %v2670_v28  ;;  %v2672_v27 = vmax.f32 %v2210_v18, 0.0  ;;  %v3498_v18 = vmax.f32 %v2928_v20, 0.0  ;;  %v2953_v49 = vadd.f32 %v7721_v12, %v7690_v23 }
 0x2fa   : > { %v2673_v38 = vmax.f32 %v2212_v63, 0.0  ;;  %v2215_v57 = vpop.f32.mrb[154].mxu1  ;;  %v3499_v63 = vmax.f32 %v2933_v50, 0.0 }
 0x2fb   : > { %v2216_v4 = vadd.f32 %v2215_v57, %v7150_v11  ;;  %v2217_v54 = vpop.f32.mrb[155].mxu1  ;;  %5947 = vmatmul.mubr.f32.gmra.mrb[4].mxu1 %v3490_v6 }
 0x2fc   : > { %v2218_v43 = vadd.f32 %v2217_v54, %v7153_v19  ;;  %v7729_v48 = vpop.f32.mrb[174].mxu0  ;;  %3220 = vmatprep.mubr.f32.mxu0 %v2673_v38  ;;  %5949 = vmatprep.mubr.f32.mxu1 %v3491_v34  ;;  %v3501_v54 = vmax.f32 %v2943_v60, 0.0 }
 0x2fd   : > { %v2959_v62 = vpop.f32.mrb[175].mxu0  ;;  %3221 = vmatmul.mubr.f32.gmra.mrb[24].mxu0 %v2672_v27  ;;  %v2674_v59 = vmax.f32 %v2216_v4, 0.0  ;;  %v3500_v27 = vmax.f32 %v2938_v47, 0.0  ;;  %v2958_v30 = vadd.f32 %v7729_v48, %v7690_v23 }
 0x2fe   : > { %v2675_v33 = vmax.f32 %v2218_v43, 0.0  ;;  %v2221_v9 = vpop.f32.mrb[156].mxu1 }
 0x2ff   : > { %v2222_v0 = vadd.f32 %v2221_v9, %v7150_v11  ;;  %v2223_v35 = vpop.f32.mrb[157].mxu1  ;;  %5950 = vmatmul.mubr.f32.gmra.mrb[6].mxu1 %v3492_v25  ;;  %v3502_v9 = vmax.f32 %v2948_v2, 0.0 }
 0x300   : > { %v2224_v14 = vadd.f32 %v2223_v35, %v7153_v19  ;;  %v7737_v32 = vpop.f32.mrb[176].mxu0  ;;  %3225 = vmatprep.mubr.f32.mxu0 %v2675_v33  ;;  %5952 = vmatprep.mubr.f32.mxu1 %v3493_v15 }
 0x301   : > { %v2964_v51 = vpop.f32.mrb[177].mxu0  ;;  %3226 = vmatmul.mubr.f32.gmra.mrb[26].mxu0 %v2674_v59  ;;  %v2676_v31 = vmax.f32 %v2222_v0, 0.0  ;;  %v3503_v0 = vmax.f32 %v2953_v49, 0.0  ;;  %v2963_v12 = vadd.f32 %v7737_v32, %v7690_v23 }
 0x302   : > { %v2677_v41 = vmax.f32 %v2224_v14, 0.0  ;;  %v2227_v26 = vpop.f32.mrb[158].mxu1 }
 0x303   : > { %v2228_v36 = vadd.f32 %v2227_v26, %v7150_v11  ;;  %v2229_v1 = vpop.f32.mrb[159].mxu1  ;;  %5953 = vmatmul.mubr.f32.gmra.mrb[8].mxu1 %v3494_v29 }
 0x304   : > { %v2230_v46 = vadd.f32 %v2229_v1, %v7153_v19  ;;  %v7745_v5 = vpop.f32.mrb[178].mxu0  ;;  %3230 = vmatprep.mubr.f32.mxu0 %v2677_v41  ;;  %5955 = vmatprep.mubr.f32.mxu1 %v3495_v3  ;;  %v3504_v41 = vmax.f32 %v2958_v30, 0.0 }
 0x305   : > { %v2969_v13 = vpop.f32.mrb[179].mxu0  ;;  %3231 = vmatmul.mubr.f32.gmra.mrb[28].mxu0 %v2676_v31  ;;  %v2678_v44 = vmax.f32 %v2228_v36, 0.0  ;;  %v2968_v48 = vadd.f32 %v7745_v5, %v7690_v23  ;;  %v3505_v31 = vmax.f32 %v2963_v12, 0.0 }
 0x306   : > { %v2679_v24 = vmax.f32 %v2230_v46, 0.0  ;;  %v2233_v22 = vpop.f32.mrb[160].mxu1 }
 0x307   : > { %v2234_v40 = vadd.f32 %v2233_v22, %v7150_v11  ;;  %v2235_v37 = vpop.f32.mrb[161].mxu1  ;;  %5956 = vmatmul.mubr.f32.gmra.mrb[10].mxu1 %v3496_v39  ;;  %v3506_v50 = vmax.f32 %v2968_v48, 0.0 }
 0x308   : > { %v2236_v7 = vadd.f32 %v2235_v37, %v7153_v19  ;;  %v2972_v28 = vpop.f32.mrb[180].mxu0  ;;  %3235 = vmatprep.mubr.f32.mxu0 %v2679_v24  ;;  %5958 = vmatprep.mubr.f32.mxu1 %v3497_v16 }
 0x309   : > { %v2974_v10 = vpop.f32.mrb[181].mxu0  ;;  %3236 = vmatmul.mubr.f32.gmra.mrb[30].mxu0 %v2678_v44  ;;  %v2680_v61 = vmax.f32 %v2234_v40, 0.0  ;;  %v2973_v32 = vadd.f32 %v2972_v28, %v7690_v23 }
 0x30a   : > { %v2681_v6 = vmax.f32 %v2236_v7, 0.0  ;;  %v2239_v45 = vpop.f32.mrb[162].mxu1 }
 0x30b   : > { %v2240_v34 = vadd.f32 %v2239_v45, %v7150_v11  ;;  %v2241_v17 = vpop.f32.mrb[163].mxu1  ;;  %5959 = vmatmul.mubr.f32.gmra.mrb[12].mxu1 %v3498_v18  ;;  %v3507_v22 = vmax.f32 %v2973_v32, 0.0 }
 0x30c   : > { %v2242_v38 = vadd.f32 %v2241_v17, %v7153_v19  ;;  %v2977_v57 = vpop.f32.mrb[182].mxu0  ;;  %3240 = vmatprep.mubr.f32.mxu0 %v2681_v6  ;;  %5961 = vmatprep.mubr.f32.mxu1 %v3499_v63 }
 0x30d   : > { %v2979_v4 = vpop.f32.mrb[183].mxu0  ;;  %3241 = vmatmul.mubr.f32.gmra.mrb[32].mxu0 %v2680_v61  ;;  %v2682_v56 = vmax.f32 %v2240_v34, 0.0  ;;  %v2978_v5 = vadd.f32 %v2977_v57, %v7690_v23 }
 0x30e   : > { %v2683_v43 = vmax.f32 %v2242_v38, 0.0  ;;  %v2245_v25 = vpop.f32.mrb[164].mxu1 }
 0x30f   : > { %v2246_v62 = vadd.f32 %v2245_v25, %v7150_v11  ;;  %v2247_v15 = vpop.f32.mrb[165].mxu1  ;;  %5962 = vmatmul.mubr.f32.gmra.mrb[14].mxu1 %v3500_v27  ;;  %v3508_v63 = vmax.f32 %v2978_v5, 0.0 }
 0x310   : > { %v2248_v53 = vadd.f32 %v2247_v15, %v7153_v19  ;;  %v2982_v33 = vpop.f32.mrb[184].mxu0  ;;  %3245 = vmatprep.mubr.f32.mxu0 %v2683_v43  ;;  %5964 = vmatprep.mubr.f32.mxu1 %v3501_v54 }
 0x311   : > { %v2984_v59 = vpop.f32.mrb[185].mxu0  ;;  %3246 = vmatmul.mubr.f32.gmra.mrb[34].mxu0 %v2682_v56  ;;  %v2684_v29 = vmax.f32 %v2246_v62, 0.0  ;;  %v2983_v44 = vadd.f32 %v2982_v33, %v7690_v23 }
 0x312   : > { %v2685_v35 = vmax.f32 %v2248_v53, 0.0  ;;  %v2251_v14 = vpop.f32.mrb[166].mxu1 }
 0x313   : > { %v2252_v42 = vadd.f32 %v2251_v14, %v7150_v11  ;;  %v2253_v51 = vpop.f32.mrb[167].mxu1  ;;  %5965 = vmatmul.mubr.f32.gmra.mrb[16].mxu1 %v3502_v9  ;;  %v3509_v45 = vmax.f32 %v2983_v44, 0.0 }
 0x314   : > { %v2254_v3 = vadd.f32 %v2253_v51, %v7153_v19  ;;  %v2987_v58 = vpop.f32.mrb[186].mxu0  ;;  %3250 = vmatprep.mubr.f32.mxu0 %v2685_v35  ;;  %5967 = vmatprep.mubr.f32.mxu1 %v3503_v0 }
 0x315   : > { %v2989_v26 = vpop.f32.mrb[187].mxu0  ;;  %3251 = vmatmul.mubr.f32.gmra.mrb[36].mxu0 %v2684_v29  ;;  %v2686_v46 = vmax.f32 %v2252_v42, 0.0  ;;  %v2988_v60 = vadd.f32 %v2987_v58, %v7690_v23 }
 0x316   : > { %v2687_v36 = vmax.f32 %v2254_v3, 0.0  ;;  %v2257_v1 = vpop.f32.mrb[168].mxu1 }
 0x317   : > { %v2258_v39 = vadd.f32 %v2257_v1, %v7150_v11  ;;  %v2259_v20 = vpop.f32.mrb[169].mxu1  ;;  %5968 = vmatmul.mubr.f32.gmra.mrb[18].mxu1 %v3504_v41  ;;  %v3510_v54 = vmax.f32 %v2988_v60, 0.0 }
 0x318   : > { %v2260_v13 = vadd.f32 %v2259_v20, %v7153_v19  ;;  %v2992_v16 = vpop.f32.mrb[188].mxu0  ;;  %3255 = vmatprep.mubr.f32.mxu0 %v2687_v36  ;;  %5970 = vmatprep.mubr.f32.mxu1 %v3505_v31 }
 0x319   : > { %v2994_v24 = vpop.f32.mrb[189].mxu0  ;;  %3256 = vmatmul.mubr.f32.gmra.mrb[38].mxu0 %v2686_v46  ;;  %v2688_v7 = vmax.f32 %v2258_v39, 0.0  ;;  %v2993_v61 = vadd.f32 %v2992_v16, %v7690_v23 }
 0x31a   : > { %v2689_v40 = vmax.f32 %v2260_v13, 0.0  ;;  %v2263_v37 = vpop.f32.mrb[170].mxu1 }
 0x31b   : > { %v2264_v28 = vadd.f32 %v2263_v37, %v7150_v11  ;;  %v2265_v18 = vpop.f32.mrb[171].mxu1  ;;  %5971 = vmatmul.mubr.f32.gmra.mrb[20].mxu1 %v3506_v50  ;;  %v3511_v25 = vmax.f32 %v2993_v61, 0.0 }
 0x31c   : > { %v2266_v47 = vadd.f32 %v2265_v18, %v7153_v19  ;;  %v2997_v10 = vpop.f32.mrb[190].mxu0  ;;  %3260 = vmatprep.mubr.f32.mxu0 %v2689_v40  ;;  %5973 = vmatprep.mubr.f32.mxu1 %v3507_v22 }
 0x31d   : > { %v2999_v6 = vpop.f32.mrb[191].mxu0  ;;  %3261 = vmatmul.mubr.f32.gmra.mrb[40].mxu0 %v2688_v7  ;;  %v2690_v38 = vmax.f32 %v2264_v28, 0.0  ;;  %v2998_v49 = vadd.f32 %v2997_v10, %v7690_v23 }
 0x31e   : > { %v2691_v34 = vmax.f32 %v2266_v47, 0.0  ;;  %v2269_v17 = vpop.f32.mrb[172].mxu1 }
 0x31f   : > { %v2270_v57 = vadd.f32 %v2269_v17, %v7150_v11  ;;  %v2271_v27 = vpop.f32.mrb[173].mxu1  ;;  %5974 = vmatmul.mubr.f32.gmra.mrb[22].mxu1 %v3508_v63  ;;  %v3512_v0 = vmax.f32 %v2998_v49, 0.0 }
 0x320   : > { %v2272_v2 = vadd.f32 %v2271_v27, %v7153_v19  ;;  %v3002_v4 = vpop.f32.mrb[192].mxu0  ;;  %3265 = vmatprep.mubr.f32.mxu0 %v2691_v34  ;;  %5976 = vmatprep.mubr.f32.mxu1 %v3509_v45 }
 0x321   : > { %v3004_v43 = vpop.f32.mrb[193].mxu0  ;;  %3266 = vmatmul.mubr.f32.gmra.mrb[42].mxu0 %v2690_v38  ;;  %v3003_v62 = vadd.f32 %v3002_v4, %v7690_v23  ;;  %v2692_v53 = vmax.f32 %v2270_v57, 0.0 }
 0x322   : > { %v2693_v56 = vmax.f32 %v2272_v2, 0.0  ;;  %v2275_v15 = vpop.f32.mrb[174].mxu1 }
 0x323   : > { %v2276_v33 = vadd.f32 %v2275_v15, %v7150_v11  ;;  %v2277_v9 = vpop.f32.mrb[175].mxu1  ;;  %5977 = vmatmul.mubr.f32.gmra.mrb[24].mxu1 %v3510_v54  ;;  %v3513_v14 = vmax.f32 %v3003_v62, 0.0 }
 0x324   : > { %v2278_v30 = vadd.f32 %v2277_v9, %v7153_v19  ;;  %v3007_v59 = vpop.f32.mrb[194].mxu0  ;;  %3270 = vmatprep.mubr.f32.mxu0 %v2693_v56  ;;  %5979 = vmatprep.mubr.f32.mxu1 %v3511_v25 }
 0x325   : > { %v3008_v12 = vadd.f32 %v3007_v59, %v7690_v23  ;;  %v3009_v35 = vpop.f32.mrb[195].mxu0  ;;  %3271 = vmatmul.mubr.f32.gmra.mrb[44].mxu0 %v2692_v53  ;;  %v2694_v51 = vmax.f32 %v2276_v33, 0.0 }
 0x326   : > { %v2695_v29 = vmax.f32 %v2278_v30, 0.0  ;;  %v2281_v42 = vpop.f32.mrb[176].mxu1 }
 0x327   : > { %v2282_v3 = vadd.f32 %v2281_v42, %v7150_v11  ;;  %v2283_v58 = vpop.f32.mrb[177].mxu1  ;;  %5980 = vmatmul.mubr.f32.gmra.mrb[26].mxu1 %v3512_v0  ;;  %v3514_v26 = vmax.f32 %v3008_v12, 0.0 }
 0x328   : > { %v2284_v41 = vadd.f32 %v2283_v58, %v7153_v19  ;;  %v3012_v48 = vpop.f32.mrb[196].mxu0  ;;  %3275 = vmatprep.mubr.f32.mxu0 %v2695_v29  ;;  %5982 = vmatprep.mubr.f32.mxu1 %v3513_v14 }
 0x329   : > { %v3013_v31 = vadd.f32 %v3012_v48, %v7690_v23  ;;  %v3014_v32 = vpop.f32.mrb[197].mxu0  ;;  %3276 = vmatmul.mubr.f32.gmra.mrb[46].mxu0 %v2694_v51  ;;  %v2696_v46 = vmax.f32 %v2282_v3, 0.0 }
 0x32a   : > { %v2697_v36 = vmax.f32 %v2284_v41, 0.0  ;;  %v2287_v1 = vpop.f32.mrb[178].mxu1 }
 0x32b   : > { %v3515_v39 = vmax.f32 %v3013_v31, 0.0  ;;  %v2288_v20 = vadd.f32 %v2287_v1, %v7150_v11  ;;  %v2289_v13 = vpop.f32.mrb[179].mxu1  ;;  %5983 = vmatmul.mubr.f32.gmra.mrb[28].mxu1 %v3514_v26 }
 0x32c   : > { %v2290_v16 = vadd.f32 %v2289_v13, %v7153_v19  ;;  %v3017_v50 = vpop.f32.mrb[198].mxu0  ;;  %3280 = vmatprep.mubr.f32.mxu0 %v2697_v36 }
 0x32d   : > { %v3018_v5 = vadd.f32 %v3017_v50, %v7690_v23  ;;  %v3019_v24 = vpop.f32.mrb[199].mxu0  ;;  %3281 = vmatmul.mubr.f32.gmra.mrb[48].mxu0 %v2696_v46  ;;  %5985 = vmatprep.mubr.f32.mxu1 %v3515_v39  ;;  %v2698_v40 = vmax.f32 %v2288_v20, 0.0 }
 0x32e   : > { %v2699_v22 = vmax.f32 %v2290_v16, 0.0  ;;  %v2293_v44 = vpop.f32.mrb[180].mxu1 }
 0x32f   : > { %v3516_v37 = vmax.f32 %v3018_v5, 0.0  ;;  %v2294_v7 = vadd.f32 %v2293_v44, %v7150_v11  ;;  %v2295_v28 = vpop.f32.mrb[181].mxu1 }
 0x330   : > { %v2296_v18 = vadd.f32 %v2295_v28, %v7153_v19  ;;  %v3022_v47 = vpop.f32.mrb[200].mxu0  ;;  %3285 = vmatprep.mubr.f32.mxu0 %v2699_v22 }
 0x331   : > { %v3023_v10 = vadd.f32 %v3022_v47, %v7690_v23  ;;  %v3024_v63 = vpop.f32.mrb[201].mxu0  ;;  %3286 = vmatmul.mubr.f32.gmra.mrb[50].mxu0 %v2698_v40  ;;  %5986 = vmatmul.mubr.f32.gmra.mrb[30].mxu1 %v3516_v37  ;;  %v2700_v45 = vmax.f32 %v2294_v7, 0.0 }
 0x332   : > { %v2701_v60 = vmax.f32 %v2296_v18, 0.0  ;;  %v2299_v6 = vpop.f32.mrb[182].mxu1 }
 0x333   : > { %v3517_v61 = vmax.f32 %v3023_v10, 0.0  ;;  %v2300_v34 = vadd.f32 %v2299_v6, %v7150_v11  ;;  %v2301_v17 = vpop.f32.mrb[183].mxu1 }
 0x334   : > { %v2302_v38 = vadd.f32 %v2301_v17, %v7153_v19  ;;  %v3027_v57 = vpop.f32.mrb[202].mxu0  ;;  %3290 = vmatprep.mubr.f32.mxu0 %v2701_v60 }
 0x335   : > { %v3028_v27 = vadd.f32 %v3027_v57, %v7690_v23  ;;  %v3029_v2 = vpop.f32.mrb[203].mxu0  ;;  %3291 = vmatmul.mubr.f32.gmra.mrb[52].mxu0 %v2700_v45  ;;  %5988 = vmatprep.mubr.f32.mxu1 %v3517_v61  ;;  %v2702_v49 = vmax.f32 %v2300_v34, 0.0 }
 0x336   : > { %v2703_v4 = vmax.f32 %v2302_v38, 0.0  ;;  %v2305_v54 = vpop.f32.mrb[184].mxu1 }
 0x337   : > { %v3518_v43 = vmax.f32 %v3028_v27, 0.0  ;;  %v2306_v25 = vadd.f32 %v2305_v54, %v7150_v11  ;;  %v2307_v56 = vpop.f32.mrb[185].mxu1 }
 0x338   : > { %v2308_v62 = vadd.f32 %v2307_v56, %v7153_v19  ;;  %v3032_v15 = vpop.f32.mrb[204].mxu0  ;;  %3295 = vmatprep.mubr.f32.mxu0 %v2703_v4 }
 0x339   : > { %v3033_v53 = vadd.f32 %v3032_v15, %v7690_v23  ;;  %v3034_v33 = vpop.f32.mrb[205].mxu0  ;;  %3296 = vmatmul.mubr.f32.gmra.mrb[54].mxu0 %v2702_v49  ;;  %5989 = vmatmul.mubr.f32.gmra.mrb[32].mxu1 %v3518_v43  ;;  %v2704_v59 = vmax.f32 %v2306_v25, 0.0 }
 0x33a   : > { %v2705_v9 = vmax.f32 %v2308_v62, 0.0  ;;  %v2311_v30 = vpop.f32.mrb[186].mxu1 }
 0x33b   : > { %v3519_v0 = vmax.f32 %v3033_v53, 0.0  ;;  %v2312_v12 = vadd.f32 %v2311_v30, %v7150_v11  ;;  %v2313_v35 = vpop.f32.mrb[187].mxu1 }
 0x33c   : > { %v2314_v14 = vadd.f32 %v2313_v35, %v7153_v19  ;;  %v3037_v29 = vpop.f32.mrb[206].mxu0  ;;  %3300 = vmatprep.mubr.f32.mxu0 %v2705_v9 }
 0x33d   : > { %v3038_v42 = vadd.f32 %v3037_v29, %v7690_v23  ;;  %v3039_v51 = vpop.f32.mrb[207].mxu0  ;;  %3301 = vmatmul.mubr.f32.gmra.mrb[56].mxu0 %v2704_v59  ;;  %5991 = vmatprep.mubr.f32.mxu1 %v3519_v0  ;;  %v2706_v41 = vmax.f32 %v2312_v12, 0.0 }
 0x33e   : > { %v2707_v3 = vmax.f32 %v2314_v14, 0.0  ;;  %v2317_v58 = vpop.f32.mrb[188].mxu1 }
 0x33f   : > { %v3520_v48 = vmax.f32 %v3038_v42, 0.0  ;;  %v2318_v26 = vadd.f32 %v2317_v58, %v7150_v11  ;;  %v2319_v31 = vpop.f32.mrb[189].mxu1 }
 0x340   : > { %v2320_v32 = vadd.f32 %v2319_v31, %v7153_v19  ;;  %v3042_v36 = vpop.f32.mrb[208].mxu0  ;;  %3305 = vmatprep.mubr.f32.mxu0 %v2707_v3 }
 0x341   : > { %v3043_v1 = vadd.f32 %v3042_v36, %v7690_v23  ;;  %v3044_v46 = vpop.f32.mrb[209].mxu0  ;;  %3306 = vmatmul.mubr.f32.gmra.mrb[58].mxu0 %v2706_v41  ;;  %5992 = vmatmul.mubr.f32.gmra.mrb[34].mxu1 %v3520_v48  ;;  %v2708_v13 = vmax.f32 %v2318_v26, 0.0 }
 0x342   : > { %v2709_v39 = vmax.f32 %v2320_v32, 0.0  ;;  %v2323_v20 = vpop.f32.mrb[190].mxu1 }
 0x343   : > { %v3521_v16 = vmax.f32 %v3043_v1, 0.0  ;;  %v2324_v50 = vadd.f32 %v2323_v20, %v7150_v11  ;;  %v2325_v5 = vpop.f32.mrb[191].mxu1 }
 0x344   : > { %v2326_v24 = vadd.f32 %v2325_v5, %v7153_v19  ;;  %v3047_v22 = vpop.f32.mrb[210].mxu0  ;;  %3310 = vmatprep.mubr.f32.mxu0 %v2709_v39 }
 0x345   : > { %v3048_v44 = vadd.f32 %v3047_v22, %v7690_v23  ;;  %v3049_v40 = vpop.f32.mrb[211].mxu0  ;;  %3311 = vmatmul.mubr.f32.gmra.mrb[60].mxu0 %v2708_v13  ;;  %5994 = vmatprep.mubr.f32.mxu1 %v3521_v16  ;;  %v2710_v28 = vmax.f32 %v2324_v50, 0.0 }
 0x346   : > { %v2711_v37 = vmax.f32 %v2326_v24, 0.0  ;;  %v2329_v7 = vpop.f32.mrb[192].mxu1 }
 0x347   : > { %v3522_v18 = vmax.f32 %v3048_v44, 0.0  ;;  %v2330_v47 = vadd.f32 %v2329_v7, %v7150_v11  ;;  %v2331_v10 = vpop.f32.mrb[193].mxu1 }
 0x348   : > { %v2332_v63 = vadd.f32 %v2331_v10, %v7153_v19  ;;  %v3052_v60 = vpop.f32.mrb[212].mxu0  ;;  %3315 = vmatprep.mubr.f32.mxu0 %v2711_v37 }
 0x349   : > { %v3053_v6 = vadd.f32 %v3052_v60, %v7690_v23  ;;  %v3054_v45 = vpop.f32.mrb[213].mxu0  ;;  %3316 = vmatmul.mubr.f32.gmra.mrb[62].mxu0 %v2710_v28  ;;  %5995 = vmatmul.mubr.f32.gmra.mrb[36].mxu1 %v3522_v18  ;;  %v2712_v17 = vmax.f32 %v2330_v47, 0.0 }
 0x34a   : > { %v2713_v61 = vmax.f32 %v2332_v63, 0.0  ;;  %v2335_v34 = vpop.f32.mrb[194].mxu1 }
 0x34b   : > { %v3523_v38 = vmax.f32 %v3053_v6, 0.0  ;;  %v2336_v57 = vadd.f32 %v2335_v34, %v7150_v11  ;;  %v2337_v27 = vpop.f32.mrb[195].mxu1 }
 0x34c   : > { %v2338_v2 = vadd.f32 %v2337_v27, %v7153_v19  ;;  %v3057_v4 = vpop.f32.mrb[214].mxu0  ;;  %3320 = vmatprep.mubr.f32.mxu0 %v2713_v61 }
 0x34d   : > { %v3058_v54 = vadd.f32 %v3057_v4, %v7690_v23  ;;  %v3059_v49 = vpop.f32.mrb[215].mxu0  ;;  %3321 = vmatmul.mubr.f32.gmra.mrb[64].mxu0 %v2712_v17  ;;  %5997 = vmatprep.mubr.f32.mxu1 %v3523_v38  ;;  %v2714_v56 = vmax.f32 %v2336_v57, 0.0 }
 0x34e   : > { %v2715_v43 = vmax.f32 %v2338_v2, 0.0  ;;  %v2341_v25 = vpop.f32.mrb[196].mxu1 }
 0x34f   : > { %v3524_v62 = vmax.f32 %v3058_v54, 0.0  ;;  %v2342_v15 = vadd.f32 %v2341_v25, %v7150_v11  ;;  %v2343_v53 = vpop.f32.mrb[197].mxu1 }
 0x350   : > { %v2344_v33 = vadd.f32 %v2343_v53, %v7153_v19  ;;  %v3062_v9 = vpop.f32.mrb[216].mxu0  ;;  %3325 = vmatprep.mubr.f32.mxu0 %v2715_v43 }
 0x351   : > { %v3063_v30 = vadd.f32 %v3062_v9, %v7690_v23  ;;  %v3064_v59 = vpop.f32.mrb[217].mxu0  ;;  %3326 = vmatmul.mubr.f32.gmra.mrb[66].mxu0 %v2714_v56  ;;  %5998 = vmatmul.mubr.f32.gmra.mrb[38].mxu1 %v3524_v62  ;;  %v2716_v35 = vmax.f32 %v2342_v15, 0.0 }
 0x352   : > { %v2717_v0 = vmax.f32 %v2344_v33, 0.0  ;;  %v2347_v12 = vpop.f32.mrb[198].mxu1 }
 0x353   : > { %v3525_v14 = vmax.f32 %v3063_v30, 0.0  ;;  %v2348_v29 = vadd.f32 %v2347_v12, %v7150_v11  ;;  %v2349_v42 = vpop.f32.mrb[199].mxu1 }
 0x354   : > { %v2350_v51 = vadd.f32 %v2349_v42, %v7153_v19  ;;  %v3067_v3 = vpop.f32.mrb[218].mxu0  ;;  %3330 = vmatprep.mubr.f32.mxu0 %v2717_v0 }
 0x355   : > { %v3068_v58 = vadd.f32 %v3067_v3, %v7690_v23  ;;  %v3069_v41 = vpop.f32.mrb[219].mxu0  ;;  %3331 = vmatmul.mubr.f32.gmra.mrb[68].mxu0 %v2716_v35  ;;  %6000 = vmatprep.mubr.f32.mxu1 %v3525_v14  ;;  %v2718_v31 = vmax.f32 %v2348_v29, 0.0 }
 0x356   : > { %v2719_v48 = vmax.f32 %v2350_v51, 0.0  ;;  %v2353_v26 = vpop.f32.mrb[200].mxu1 }
 0x357   : > { %v3526_v32 = vmax.f32 %v3068_v58, 0.0  ;;  %v2354_v36 = vadd.f32 %v2353_v26, %v7150_v11  ;;  %v2355_v1 = vpop.f32.mrb[201].mxu1 }
 0x358   : > { %v2356_v46 = vadd.f32 %v2355_v1, %v7153_v19  ;;  %v3072_v39 = vpop.f32.mrb[220].mxu0  ;;  %3335 = vmatprep.mubr.f32.mxu0 %v2719_v48 }
 0x359   : > { %v3073_v20 = vadd.f32 %v3072_v39, %v7690_v23  ;;  %v3074_v13 = vpop.f32.mrb[221].mxu0  ;;  %3336 = vmatmul.mubr.f32.gmra.mrb[70].mxu0 %v2718_v31  ;;  %6001 = vmatmul.mubr.f32.gmra.mrb[40].mxu1 %v3526_v32  ;;  %v2720_v5 = vmax.f32 %v2354_v36, 0.0 }
 0x35a   : > { %v2721_v16 = vmax.f32 %v2356_v46, 0.0  ;;  %v2359_v50 = vpop.f32.mrb[202].mxu1 }
 0x35b   : > { %v3527_v24 = vmax.f32 %v3073_v20, 0.0  ;;  %v2360_v22 = vadd.f32 %v2359_v50, %v7150_v11  ;;  %v2361_v44 = vpop.f32.mrb[203].mxu1 }
 0x35c   : > { %v2362_v40 = vadd.f32 %v2361_v44, %v7153_v19  ;;  %v3077_v37 = vpop.f32.mrb[222].mxu0  ;;  %3340 = vmatprep.mubr.f32.mxu0 %v2721_v16 }
 0x35d   : > { %v3078_v7 = vadd.f32 %v3077_v37, %v7690_v23  ;;  %v3079_v28 = vpop.f32.mrb[223].mxu0  ;;  %3341 = vmatmul.mubr.f32.gmra.mrb[72].mxu0 %v2720_v5  ;;  %6003 = vmatprep.mubr.f32.mxu1 %v3527_v24  ;;  %v2722_v10 = vmax.f32 %v2360_v22, 0.0 }
 0x35e   : > { %v2723_v18 = vmax.f32 %v2362_v40, 0.0  ;;  %v2365_v47 = vpop.f32.mrb[204].mxu1 }
 0x35f   : > { %v3528_v63 = vmax.f32 %v3078_v7, 0.0  ;;  %v2366_v60 = vadd.f32 %v2365_v47, %v7150_v11  ;;  %v2367_v6 = vpop.f32.mrb[205].mxu1 }
 0x360   : > { %v2368_v45 = vadd.f32 %v2367_v6, %v7153_v19  ;;  %v3082_v61 = vpop.f32.mrb[224].mxu0  ;;  %3345 = vmatprep.mubr.f32.mxu0 %v2723_v18 }
 0x361   : > { %v3083_v34 = vadd.f32 %v3082_v61, %v7690_v23  ;;  %v3084_v17 = vpop.f32.mrb[225].mxu0  ;;  %3346 = vmatmul.mubr.f32.gmra.mrb[74].mxu0 %v2722_v10  ;;  %6004 = vmatmul.mubr.f32.gmra.mrb[42].mxu1 %v3528_v63  ;;  %v2724_v27 = vmax.f32 %v2366_v60, 0.0 }
 0x362   : > { %v2725_v38 = vmax.f32 %v2368_v45, 0.0  ;;  %v2371_v57 = vpop.f32.mrb[206].mxu1 }
 0x363   : > { %v3529_v2 = vmax.f32 %v3083_v34, 0.0  ;;  %v2372_v4 = vadd.f32 %v2371_v57, %v7150_v11  ;;  %v2373_v54 = vpop.f32.mrb[207].mxu1  ;;  %v7854_v57 = vld [vmem:[%s8654_s2 + $0x352] ss:$0 sm:$0xff] }
 0x364   : > { %v2374_v49 = vadd.f32 %v2373_v54, %v7153_v19  ;;  %v3087_v43 = vpop.f32.mrb[226].mxu0  ;;  %3350 = vmatprep.mubr.f32.mxu0 %v2725_v38 }
 0x365   : > { %v3088_v25 = vadd.f32 %v3087_v43, %v7690_v23  ;;  %v3089_v56 = vpop.f32.mrb[227].mxu0  ;;  %3351 = vmatmul.mubr.f32.gmra.mrb[76].mxu0 %v2724_v27  ;;  %6006 = vmatprep.mubr.f32.mxu1 %v3529_v2  ;;  %v2726_v53 = vmax.f32 %v2372_v4, 0.0 }
 0x366   : > { %v2727_v62 = vmax.f32 %v2374_v49, 0.0  ;;  %v2377_v15 = vpop.f32.mrb[208].mxu1 }
 0x367   : > { %v3530_v33 = vmax.f32 %v3088_v25, 0.0  ;;  %v2378_v9 = vadd.f32 %v2377_v15, %v7150_v11  ;;  %v2379_v30 = vpop.f32.mrb[209].mxu1 }
 0x368   : > { %v2380_v59 = vadd.f32 %v2379_v30, %v7153_v19  ;;  %v3092_v0 = vpop.f32.mrb[228].mxu0  ;;  %3355 = vmatprep.mubr.f32.mxu0 %v2727_v62 }
 0x369   : > { %v3093_v12 = vadd.f32 %v3092_v0, %v7690_v23  ;;  %v3094_v35 = vpop.f32.mrb[229].mxu0  ;;  %3356 = vmatmul.mubr.f32.gmra.mrb[78].mxu0 %v2726_v53  ;;  %6007 = vmatmul.mubr.f32.gmra.mrb[44].mxu1 %v3530_v33  ;;  %v2728_v42 = vmax.f32 %v2378_v9, 0.0 }
 0x36a   : > { %v2729_v14 = vmax.f32 %v2380_v59, 0.0  ;;  %v2383_v29 = vpop.f32.mrb[210].mxu1 }
 0x36b   : > { %v3531_v51 = vmax.f32 %v3093_v12, 0.0  ;;  %v2384_v3 = vadd.f32 %v2383_v29, %v7150_v11  ;;  %v2385_v58 = vpop.f32.mrb[211].mxu1 }
 0x36c   : > { %v2386_v41 = vadd.f32 %v2385_v58, %v7153_v19  ;;  %v3097_v48 = vpop.f32.mrb[230].mxu0  ;;  %3360 = vmatprep.mubr.f32.mxu0 %v2729_v14 }
 0x36d   : > { %v3098_v26 = vadd.f32 %v3097_v48, %v7690_v23  ;;  %v3099_v31 = vpop.f32.mrb[231].mxu0  ;;  %3361 = vmatmul.mubr.f32.gmra.mrb[80].mxu0 %v2728_v42  ;;  %6009 = vmatprep.mubr.f32.mxu1 %v3531_v51  ;;  %v2730_v1 = vmax.f32 %v2384_v3, 0.0 }
 0x36e   : > { %v2731_v32 = vmax.f32 %v2386_v41, 0.0  ;;  %v2389_v36 = vpop.f32.mrb[212].mxu1 }
 0x36f   : > { %v3532_v46 = vmax.f32 %v3098_v26, 0.0  ;;  %v2390_v39 = vadd.f32 %v2389_v36, %v7150_v11  ;;  %v2391_v20 = vpop.f32.mrb[213].mxu1 }
 0x370   : > { %v2392_v13 = vadd.f32 %v2391_v20, %v7153_v19  ;;  %v3102_v16 = vpop.f32.mrb[232].mxu0  ;;  %3365 = vmatprep.mubr.f32.mxu0 %v2731_v32 }
 0x371   : > { %v3103_v50 = vadd.f32 %v3102_v16, %v7690_v23  ;;  %v3104_v5 = vpop.f32.mrb[233].mxu0  ;;  %3366 = vmatmul.mubr.f32.gmra.mrb[82].mxu0 %v2730_v1  ;;  %6010 = vmatmul.mubr.f32.gmra.mrb[46].mxu1 %v3532_v46  ;;  %v2732_v44 = vmax.f32 %v2390_v39, 0.0 }
 0x372   : > { %v2733_v24 = vmax.f32 %v2392_v13, 0.0  ;;  %v2395_v22 = vpop.f32.mrb[214].mxu1 }
 0x373   : > { %v3533_v40 = vmax.f32 %v3103_v50, 0.0  ;;  %v2396_v37 = vadd.f32 %v2395_v22, %v7150_v11  ;;  %v2397_v7 = vpop.f32.mrb[215].mxu1 }
 0x374   : > { %v2398_v28 = vadd.f32 %v2397_v7, %v7153_v19  ;;  %v3107_v18 = vpop.f32.mrb[234].mxu0  ;;  %3370 = vmatprep.mubr.f32.mxu0 %v2733_v24 }
 0x375   : > { %v3108_v47 = vadd.f32 %v3107_v18, %v7690_v23  ;;  %v3109_v10 = vpop.f32.mrb[235].mxu0  ;;  %3371 = vmatmul.mubr.f32.gmra.mrb[84].mxu0 %v2732_v44  ;;  %6012 = vmatprep.mubr.f32.mxu1 %v3533_v40  ;;  %v2734_v6 = vmax.f32 %v2396_v37, 0.0 }
 0x376   : > { %v2735_v63 = vmax.f32 %v2398_v28, 0.0  ;;  %v2401_v60 = vpop.f32.mrb[216].mxu1 }
 0x377   : > { %v3534_v45 = vmax.f32 %v3108_v47, 0.0  ;;  %v2402_v61 = vadd.f32 %v2401_v60, %v7150_v11  ;;  %v2403_v34 = vpop.f32.mrb[217].mxu1 }
 0x378   : > { %v2404_v17 = vadd.f32 %v2403_v34, %v7153_v19  ;;  %v3112_v38 = vpop.f32.mrb[236].mxu0  ;;  %3375 = vmatprep.mubr.f32.mxu0 %v2735_v63 }
 0x379   : > { %v3113_v23 = vadd.f32 %v7854_v57, %v3112_v38  ;;  %v3114_v27 = vpop.f32.mrb[237].mxu0  ;;  %3376 = vmatmul.mubr.f32.gmra.mrb[86].mxu0 %v2734_v6  ;;  %6013 = vmatmul.mubr.f32.gmra.mrb[48].mxu1 %v3534_v45  ;;  %v2736_v54 = vmax.f32 %v2402_v61, 0.0 }
 0x37a   : > { %v2737_v2 = vmax.f32 %v2404_v17, 0.0  ;;  %v2407_v4 = vpop.f32.mrb[218].mxu1 }
 0x37b   : > { %v3535_v49 = vmax.f32 %v3113_v23, 0.0  ;;  %v2408_v43 = vadd.f32 %v2407_v4, %v7150_v11  ;;  %v2409_v25 = vpop.f32.mrb[219].mxu1 }
 0x37c   : > { %v2410_v56 = vadd.f32 %v2409_v25, %v7153_v19  ;;  %v3117_v62 = vpop.f32.mrb[238].mxu0  ;;  %3380 = vmatprep.mubr.f32.mxu0 %v2737_v2 }
 0x37d   : > { %v3118_v15 = vadd.f32 %v7854_v57, %v3117_v62  ;;  %v3119_v53 = vpop.f32.mrb[239].mxu0  ;;  %3381 = vmatmul.mubr.f32.gmra.mrb[88].mxu0 %v2736_v54  ;;  %6015 = vmatprep.mubr.f32.mxu1 %v3535_v49  ;;  %v2738_v30 = vmax.f32 %v2408_v43, 0.0 }
 0x37e   : > { %v2739_v33 = vmax.f32 %v2410_v56, 0.0  ;;  %v2413_v9 = vpop.f32.mrb[220].mxu1 }
 0x37f   : > { %v3536_v59 = vmax.f32 %v3118_v15, 0.0  ;;  %v2414_v0 = vadd.f32 %v2413_v9, %v7150_v11  ;;  %v2415_v12 = vpop.f32.mrb[221].mxu1 }
 0x380   : > { %v2416_v35 = vadd.f32 %v2415_v12, %v7153_v19  ;;  %v3122_v14 = vpop.f32.mrb[240].mxu0  ;;  %3385 = vmatprep.mubr.f32.mxu0 %v2739_v33 }
 0x381   : > { %v3123_v29 = vadd.f32 %v7854_v57, %v3122_v14  ;;  %v3124_v42 = vpop.f32.mrb[241].mxu0  ;;  %3386 = vmatmul.mubr.f32.gmra.mrb[90].mxu0 %v2738_v30  ;;  %6016 = vmatmul.mubr.f32.gmra.mrb[50].mxu1 %v3536_v59  ;;  %v2740_v58 = vmax.f32 %v2414_v0, 0.0 }
 0x382   : > { %v2741_v51 = vmax.f32 %v2416_v35, 0.0  ;;  %v2419_v3 = vpop.f32.mrb[222].mxu1 }
 0x383   : > { %v3537_v41 = vmax.f32 %v3123_v29, 0.0  ;;  %v2420_v48 = vadd.f32 %v2419_v3, %v7150_v11  ;;  %v2421_v26 = vpop.f32.mrb[223].mxu1 }
 0x384   : > { %v2422_v31 = vadd.f32 %v2421_v26, %v7153_v19  ;;  %v3127_v32 = vpop.f32.mrb[242].mxu0  ;;  %3390 = vmatprep.mubr.f32.mxu0 %v2741_v51 }
 0x385   : > { %v3128_v36 = vadd.f32 %v7854_v57, %v3127_v32  ;;  %v3129_v1 = vpop.f32.mrb[243].mxu0  ;;  %3391 = vmatmul.mubr.f32.gmra.mrb[92].mxu0 %v2740_v58  ;;  %6018 = vmatprep.mubr.f32.mxu1 %v3537_v41  ;;  %v2742_v20 = vmax.f32 %v2420_v48, 0.0 }
 0x386   : > { %v2743_v46 = vmax.f32 %v2422_v31, 0.0  ;;  %v2425_v39 = vpop.f32.mrb[224].mxu1 }
 0x387   : > { %v3538_v13 = vmax.f32 %v3128_v36, 0.0  ;;  %v2426_v16 = vadd.f32 %v2425_v39, %v7150_v11  ;;  %v2427_v50 = vpop.f32.mrb[225].mxu1 }
 0x388   : > { %v2428_v5 = vadd.f32 %v2427_v50, %v7153_v19  ;;  %v3132_v24 = vpop.f32.mrb[244].mxu0  ;;  %3395 = vmatprep.mubr.f32.mxu0 %v2743_v46 }
 0x389   : > { %v3133_v22 = vadd.f32 %v7854_v57, %v3132_v24  ;;  %v3134_v44 = vpop.f32.mrb[245].mxu0  ;;  %3396 = vmatmul.mubr.f32.gmra.mrb[94].mxu0 %v2742_v20  ;;  %6019 = vmatmul.mubr.f32.gmra.mrb[52].mxu1 %v3538_v13  ;;  %v2744_v7 = vmax.f32 %v2426_v16, 0.0 }
 0x38a   : > { %v2745_v40 = vmax.f32 %v2428_v5, 0.0  ;;  %v2431_v37 = vpop.f32.mrb[226].mxu1 }
 0x38b   : > { %v3539_v28 = vmax.f32 %v3133_v22, 0.0  ;;  %v2432_v18 = vadd.f32 %v2431_v37, %v7150_v11  ;;  %v2433_v47 = vpop.f32.mrb[227].mxu1 }
 0x38c   : > { %v2434_v10 = vadd.f32 %v2433_v47, %v7153_v19  ;;  %v3137_v63 = vpop.f32.mrb[246].mxu0  ;;  %3400 = vmatprep.mubr.f32.mxu0 %v2745_v40 }
 0x38d   : > { %v3138_v60 = vadd.f32 %v7854_v57, %v3137_v63  ;;  %v3139_v6 = vpop.f32.mrb[247].mxu0  ;;  %3401 = vmatmul.mubr.f32.gmra.mrb[96].mxu0 %v2744_v7  ;;  %6021 = vmatprep.mubr.f32.mxu1 %v3539_v28  ;;  %v2746_v34 = vmax.f32 %v2432_v18, 0.0 }
 0x38e   : > { %v2747_v45 = vmax.f32 %v2434_v10, 0.0  ;;  %v2437_v61 = vpop.f32.mrb[228].mxu1 }
 0x38f   : > { %v3540_v17 = vmax.f32 %v3138_v60, 0.0  ;;  %v2438_v38 = vadd.f32 %v2437_v61, %v7150_v11  ;;  %v2439_v23 = vpop.f32.mrb[229].mxu1 }
 0x390   : > { %v2440_v27 = vadd.f32 %v2439_v23, %v7153_v19  ;;  %v3142_v2 = vpop.f32.mrb[248].mxu0  ;;  %3405 = vmatprep.mubr.f32.mxu0 %v2747_v45 }
 0x391   : > { %v3143_v4 = vadd.f32 %v7854_v57, %v3142_v2  ;;  %v3144_v54 = vpop.f32.mrb[249].mxu0  ;;  %3406 = vmatmul.mubr.f32.gmra.mrb[98].mxu0 %v2746_v34  ;;  %6022 = vmatmul.mubr.f32.gmra.mrb[54].mxu1 %v3540_v17  ;;  %v2748_v25 = vmax.f32 %v2438_v38, 0.0 }
 0x392   : > { %v2749_v49 = vmax.f32 %v2440_v27, 0.0  ;;  %v2443_v43 = vpop.f32.mrb[230].mxu1 }
 0x393   : > { %v3541_v56 = vmax.f32 %v3143_v4, 0.0  ;;  %v2444_v62 = vadd.f32 %v2443_v43, %v7150_v11  ;;  %v2445_v15 = vpop.f32.mrb[231].mxu1 }
 0x394   : > { %v2446_v53 = vadd.f32 %v2445_v15, %v7153_v19  ;;  %v3147_v33 = vpop.f32.mrb[250].mxu0  ;;  %3410 = vmatprep.mubr.f32.mxu0 %v2749_v49 }
 0x395   : > { %v3148_v9 = vadd.f32 %v7854_v57, %v3147_v33  ;;  %v3149_v30 = vpop.f32.mrb[251].mxu0  ;;  %3411 = vmatmul.mubr.f32.gmra.mrb[100].mxu0 %v2748_v25  ;;  %6024 = vmatprep.mubr.f32.mxu1 %v3541_v56  ;;  %v2750_v12 = vmax.f32 %v2444_v62, 0.0 }
 0x396   : > { %v2751_v59 = vmax.f32 %v2446_v53, 0.0  ;;  %v2449_v0 = vpop.f32.mrb[232].mxu1 }
 0x397   : > { %v3542_v35 = vmax.f32 %v3148_v9, 0.0  ;;  %v2450_v14 = vadd.f32 %v2449_v0, %v7150_v11  ;;  %v2451_v29 = vpop.f32.mrb[233].mxu1 }
 0x398   : > { %v2452_v42 = vadd.f32 %v2451_v29, %v7153_v19  ;;  %v3152_v51 = vpop.f32.mrb[252].mxu0  ;;  %3415 = vmatprep.mubr.f32.mxu0 %v2751_v59 }
 0x399   : > { %v3153_v3 = vadd.f32 %v7854_v57, %v3152_v51  ;;  %v3154_v58 = vpop.f32.mrb[253].mxu0  ;;  %3416 = vmatmul.mubr.f32.gmra.mrb[102].mxu0 %v2750_v12  ;;  %6025 = vmatmul.mubr.f32.gmra.mrb[56].mxu1 %v3542_v35  ;;  %v2752_v26 = vmax.f32 %v2450_v14, 0.0 }
 0x39a   : > { %v2753_v41 = vmax.f32 %v2452_v42, 0.0  ;;  %v2455_v48 = vpop.f32.mrb[234].mxu1 }
 0x39b   : > { %v3543_v31 = vmax.f32 %v3153_v3, 0.0  ;;  %v2456_v32 = vadd.f32 %v2455_v48, %v7150_v11  ;;  %v2457_v36 = vpop.f32.mrb[235].mxu1 }
 0x39c   : > { %v2458_v1 = vadd.f32 %v2457_v36, %v7153_v19  ;;  %v3157_v46 = vpop.f32.mrb[254].mxu0  ;;  %3420 = vmatprep.mubr.f32.mxu0 %v2753_v41 }
 0x39d   : > { %v3158_v39 = vadd.f32 %v7854_v57, %v3157_v46  ;;  %v3159_v20 = vpop.f32.mrb[255].mxu0  ;;  %3421 = vmatmul.mubr.f32.gmra.mrb[104].mxu0 %v2752_v26  ;;  %6027 = vmatprep.mubr.f32.mxu1 %v3543_v31  ;;  %v2754_v50 = vmax.f32 %v2456_v32, 0.0 }
 0x39e   : > { %v2755_v13 = vmax.f32 %v2458_v1, 0.0  ;;  %v2461_v16 = vpop.f32.mrb[236].mxu1 }
 0x39f   : > { %v3544_v5 = vmax.f32 %v3158_v39, 0.0  ;;  %v2462_v24 = vadd.f32 %v2461_v16, %v7150_v11  ;;  %v2463_v22 = vpop.f32.mrb[237].mxu1 }
 0x3a0   : > { %v2464_v44 = vadd.f32 %v2463_v22, %v7153_v19  ;;  %v3162_v40 = vpop.f32.mrb[0].mxu0  ;;  %3425 = vmatprep.mubr.f32.mxu0 %v2755_v13 }
 0x3a1   : > { %v3163_v37 = vadd.f32 %v7854_v57, %v3162_v40  ;;  %v3164_v7 = vpop.f32.mrb[1].mxu0  ;;  %3426 = vmatmul.mubr.f32.gmra.mrb[106].mxu0 %v2754_v50  ;;  %6028 = vmatmul.mubr.f32.gmra.mrb[58].mxu1 %v3544_v5  ;;  %v2756_v47 = vmax.f32 %v2462_v24, 0.0 }
 0x3a2   : > { %v2757_v28 = vmax.f32 %v2464_v44, 0.0  ;;  %v2467_v18 = vpop.f32.mrb[238].mxu1 }
 0x3a3   : > { %v3545_v10 = vmax.f32 %v3163_v37, 0.0  ;;  %v2468_v63 = vadd.f32 %v2467_v18, %v7150_v11  ;;  %v2469_v60 = vpop.f32.mrb[239].mxu1 }
 0x3a4   : > { %v2470_v6 = vadd.f32 %v2469_v60, %v7153_v19  ;;  %v3167_v45 = vpop.f32.mrb[2].mxu0  ;;  %3430 = vmatprep.mubr.f32.mxu0 %v2757_v28 }
 0x3a5   : > { %v3168_v61 = vadd.f32 %v7854_v57, %v3167_v45  ;;  %v3169_v34 = vpop.f32.mrb[3].mxu0  ;;  %3431 = vmatmul.mubr.f32.gmra.mrb[108].mxu0 %v2756_v47  ;;  %6030 = vmatprep.mubr.f32.mxu1 %v3545_v10  ;;  %v2758_v23 = vmax.f32 %v2468_v63, 0.0 }
 0x3a6   : > { %v2759_v17 = vmax.f32 %v2470_v6, 0.0  ;;  %v2473_v38 = vpop.f32.mrb[240].mxu1 }
 0x3a7   : > { %v3546_v27 = vmax.f32 %v3168_v61, 0.0  ;;  %v2474_v2 = vadd.f32 %v2473_v38, %v7150_v11  ;;  %v2475_v4 = vpop.f32.mrb[241].mxu1 }
 0x3a8   : > { %v2476_v54 = vadd.f32 %v2475_v4, %v7153_v19  ;;  %v3172_v49 = vpop.f32.mrb[4].mxu0  ;;  %3435 = vmatprep.mubr.f32.mxu0 %v2759_v17 }
 0x3a9   : > { %v3173_v43 = vadd.f32 %v7854_v57, %v3172_v49  ;;  %v3174_v25 = vpop.f32.mrb[5].mxu0  ;;  %3436 = vmatmul.mubr.f32.gmra.mrb[110].mxu0 %v2758_v23  ;;  %6031 = vmatmul.mubr.f32.gmra.mrb[60].mxu1 %v3546_v27  ;;  %v2760_v15 = vmax.f32 %v2474_v2, 0.0 }
 0x3aa   : > { %v2761_v56 = vmax.f32 %v2476_v54, 0.0  ;;  %v2479_v62 = vpop.f32.mrb[242].mxu1 }
 0x3ab   : > { %v3547_v53 = vmax.f32 %v3173_v43, 0.0  ;;  %v2480_v33 = vadd.f32 %v2479_v62, %v7150_v11  ;;  %v2481_v9 = vpop.f32.mrb[243].mxu1 }
 0x3ac   : > { %v2482_v30 = vadd.f32 %v2481_v9, %v7153_v19  ;;  %v3177_v59 = vpop.f32.mrb[6].mxu0  ;;  %3440 = vmatprep.mubr.f32.mxu0 %v2761_v56 }
 0x3ad   : > { %v3178_v0 = vadd.f32 %v7854_v57, %v3177_v59  ;;  %v3179_v12 = vpop.f32.mrb[7].mxu0  ;;  %3441 = vmatmul.mubr.f32.gmra.mrb[112].mxu0 %v2760_v15  ;;  %6033 = vmatprep.mubr.f32.mxu1 %v3547_v53  ;;  %v2762_v29 = vmax.f32 %v2480_v33, 0.0 }
 0x3ae   : > { %v2763_v35 = vmax.f32 %v2482_v30, 0.0  ;;  %v2485_v14 = vpop.f32.mrb[244].mxu1  ;;  %v2843_v12 = vadd.f32 %v7854_v57, %v7556_v8 }
 0x3af   : > { %v3548_v42 = vmax.f32 %v3178_v0, 0.0  ;;  %v2486_v51 = vadd.f32 %v2485_v14, %v7150_v11  ;;  %v2487_v3 = vpop.f32.mrb[245].mxu1 }
 0x3b0   : > { %v2488_v58 = vadd.f32 %v2487_v3, %v7153_v19  ;;  %v3182_v41 = vpop.f32.mrb[8].mxu0  ;;  %3445 = vmatprep.mubr.f32.mxu0 %v2763_v35 }
 0x3b1   : > { %v3183_v48 = vadd.f32 %v7854_v57, %v3182_v41  ;;  %v3184_v26 = vpop.f32.mrb[9].mxu0  ;;  %3446 = vmatmul.mubr.f32.gmra.mrb[114].mxu0 %v2762_v29  ;;  %6034 = vmatmul.mubr.f32.gmra.mrb[62].mxu1 %v3548_v42  ;;  %v2764_v36 = vmax.f32 %v2486_v51, 0.0  ;;  %v7918_v29 = vld [vmem:[%s8654_s2 + $0x353] ss:$0 sm:$0xff] }
 0x3b2   : > { %v2765_v31 = vmax.f32 %v2488_v58, 0.0  ;;  %v2491_v32 = vpop.f32.mrb[246].mxu1  ;;  %v2853_v26 = vadd.f32 %v7854_v57, %v7570_v55  ;;  %v2858_v55 = vadd.f32 %v7854_v57, %v7577_v52 }
 0x3b3   : > { %v3549_v1 = vmax.f32 %v3183_v48, 0.0  ;;  %v2492_v46 = vadd.f32 %v2491_v32, %v7150_v11  ;;  %v2493_v39 = vpop.f32.mrb[247].mxu1 }
 0x3b4   : > { %v2494_v20 = vadd.f32 %v2493_v39, %v7153_v19  ;;  %v3187_v13 = vpop.f32.mrb[10].mxu0  ;;  %3450 = vmatprep.mubr.f32.mxu0 %v2765_v31 }
 0x3b5   : > { %v3188_v16 = vadd.f32 %v7854_v57, %v3187_v13  ;;  %v3189_v50 = vpop.f32.mrb[11].mxu0  ;;  %3451 = vmatmul.mubr.f32.gmra.mrb[116].mxu0 %v2764_v36  ;;  %6036 = vmatprep.mubr.f32.mxu1 %v3549_v1  ;;  %v2766_v22 = vmax.f32 %v2492_v46, 0.0  ;;  %v3481_v36 = vmax.f32 %v2843_v12, 0.0  ;;  %v4447_v1 = vld [vmem:[%s7925_s25 + $0x28] sm:$0xff] }
 0x3b6   : > { %v2767_v5 = vmax.f32 %v2494_v20, 0.0  ;;  %v2497_v24 = vpop.f32.mrb[248].mxu1  ;;  %v4446_v20 = vld [vmem:[%s7925_s25 + $0x20] sm:$0xff] }
 0x3b7   : > { %v3550_v44 = vmax.f32 %v3188_v16, 0.0  ;;  %v2498_v40 = vadd.f32 %v2497_v24, %v7150_v11  ;;  %v2499_v37 = vpop.f32.mrb[249].mxu1 }
 0x3b8   : > { %v2500_v7 = vadd.f32 %v2499_v37, %v7153_v19  ;;  %v3192_v28 = vpop.f32.mrb[12].mxu0  ;;  %3455 = vmatprep.mubr.f32.mxu0 %v2767_v5 }
 0x3b9   : > { %v3193_v18 = vadd.f32 %v7854_v57, %v3192_v28  ;;  %v3194_v47 = vpop.f32.mrb[13].mxu0  ;;  %3456 = vmatmul.mubr.f32.gmra.mrb[118].mxu0 %v2766_v22  ;;  %6037 = vmatmul.mubr.f32.gmra.mrb[64].mxu1 %v3550_v44  ;;  %v2768_v60 = vmax.f32 %v2498_v40, 0.0  ;;  %v3483_v40 = vmax.f32 %v2853_v26, 0.0 }
 0x3ba   : > { %v2769_v10 = vmax.f32 %v2500_v7, 0.0  ;;  %v2503_v63 = vpop.f32.mrb[250].mxu1 }
 0x3bb   : > { %v3551_v6 = vmax.f32 %v3193_v18, 0.0  ;;  %v2504_v45 = vadd.f32 %v2503_v63, %v7150_v11  ;;  %v2505_v61 = vpop.f32.mrb[251].mxu1  ;;  %v4449_v18 = vld [vmem:[%s7925_s25 + $0x38] sm:$0xff] }
 0x3bc   : > { %v2506_v34 = vadd.f32 %v2505_v61, %v7153_v19  ;;  %v3197_v17 = vpop.f32.mrb[14].mxu0  ;;  %3460 = vmatprep.mubr.f32.mxu0 %v2769_v10 }
 0x3bd   : > { %v3198_v38 = vadd.f32 %v7854_v57, %v3197_v17  ;;  %v3199_v23 = vpop.f32.mrb[15].mxu0  ;;  %3461 = vmatmul.mubr.f32.gmra.mrb[120].mxu0 %v2768_v60  ;;  %6039 = vmatprep.mubr.f32.mxu1 %v3551_v6  ;;  %v2770_v4 = vmax.f32 %v2504_v45, 0.0  ;;  %v4448_v60 = vld [vmem:[%s7925_s25 + $0x30] sm:$0xff] }
 0x3be   : > { %v2771_v27 = vmax.f32 %v2506_v34, 0.0  ;;  %v2509_v2 = vpop.f32.mrb[252].mxu1  ;;  %v3484_v34 = vmax.f32 %v2858_v55, 0.0 }
 0x3bf   : > { %v3552_v54 = vmax.f32 %v3198_v38, 0.0  ;;  %v2510_v49 = vadd.f32 %v2509_v2, %v7150_v11  ;;  %v2511_v43 = vpop.f32.mrb[253].mxu1 }
 0x3c0   : > { %v2512_v25 = vadd.f32 %v2511_v43, %v7153_v19  ;;  %v3202_v56 = vpop.f32.mrb[16].mxu0  ;;  %3465 = vmatprep.mubr.f32.mxu0 %v2771_v27 }
 0x3c1   : > { %v3203_v62 = vadd.f32 %v7854_v57, %v3202_v56  ;;  %v3204_v15 = vpop.f32.mrb[17].mxu0  ;;  %3466 = vmatmul.mubr.f32.gmra.mrb[122].mxu0 %v2770_v4  ;;  %6040 = vmatmul.mubr.f32.gmra.mrb[66].mxu1 %v3552_v54  ;;  %v2772_v9 = vmax.f32 %v2510_v49, 0.0  ;;  %v4451_v49 = vld [vmem:[%s7925_s25 + $0x48] sm:$0xff] }
 0x3c2   : > { %v2773_v53 = vmax.f32 %v2512_v25, 0.0  ;;  %v2515_v33 = vpop.f32.mrb[254].mxu1  ;;  %v4450_v15 = vld [vmem:[%s7925_s25 + $0x40] sm:$0xff] }
 0x3c3   : > { %v3553_v30 = vmax.f32 %v3203_v62, 0.0  ;;  %v2516_v59 = vadd.f32 %v2515_v33, %v7150_v11  ;;  %v2517_v0 = vpop.f32.mrb[255].mxu1 }
 0x3c4   : > { %v2518_v35 = vadd.f32 %v2517_v0, %v7153_v19  ;;  %v3207_v14 = vpop.f32.mrb[18].mxu0  ;;  %3470 = vmatprep.mubr.f32.mxu0 %v2773_v53  ;;  %v2848_v19 = vadd.f32 %v7854_v57, %v7563_v21 }
 0x3c5   : > { %v3208_v11 = vadd.f32 %v7854_v57, %v3207_v14  ;;  %v3209_v42 = vpop.f32.mrb[19].mxu0  ;;  %3471 = vmatmul.mubr.f32.gmra.mrb[124].mxu0 %v2772_v9  ;;  %6042 = vmatprep.mubr.f32.mxu1 %v3553_v30  ;;  %v2774_v3 = vmax.f32 %v2516_v59, 0.0 }
 0x3c6   : > { %v2775_v8 = vmax.f32 %v2518_v35, 0.0  ;;  %v5942_v51 = vpop.f32.mrb[0].mxu1  ;;  %v3482_v13 = vmax.f32 %v2848_v19, 0.0  ;;  %v4453_v42 = vld [vmem:[%s7925_s25 + $0x58] sm:$0xff] }
 0x3c7   : > { %v3554_v58 = vmax.f32 %v3208_v11, 0.0  ;;  %v3701_v41 = vadd.f32 %v5942_v51, %v7918_v29  ;;  %v3695_v48 = vpop.f32.mrb[1].mxu1 }
 0x3c8   : > { %v3696_v31 = vadd.f32 %v3695_v48, %v7918_v29  ;;  %v3212_v32 = vpop.f32.mrb[20].mxu0  ;;  %3475 = vmatprep.mubr.f32.mxu0 %v2775_v8 }
 0x3c9   : > { %v4319_v46 = vmax.f32 %v3701_v41, 0.0  ;;  %v3213_v21 = vadd.f32 %v7854_v57, %v3212_v32  ;;  %v3214_v39 = vpop.f32.mrb[21].mxu0  ;;  %3476 = vmatmul.mubr.f32.gmra.mrb[126].mxu0 %v2774_v3  ;;  %6043 = vmatmul.mubr.f32.gmra.mrb[68].mxu1 %v3554_v58  ;;  %v4452_v58 = vld [vmem:[%s7925_s25 + $0x50] sm:$0xff] }
 0x3ca   : > { %v4318_v16 = vmax.f32 %v3696_v31, 0.0  ;;  %5934 = vmatprep.mubr.f32.mxu0 %v3481_v36  ;;  %v5945_v50 = vpop.f32.mrb[2].mxu1 }
 0x3cb   : > { %v3555_v5 = vmax.f32 %v3213_v21, 0.0  ;;  %v3711_v24 = vadd.f32 %v5945_v50, %v7918_v29  ;;  %v3705_v22 = vpop.f32.mrb[3].mxu1  ;;  %v4575_v44 = vmul.f32 %v4447_v1, %v4319_v46 }
 0x3cc   : > { %v3706_v37 = vadd.f32 %v3705_v22, %v7918_v29  ;;  %v3217_v7 = vpop.f32.mrb[22].mxu0  ;;  %v4574_v28 = vmul.f32 %v4446_v20, %v4318_v16  ;;  %v4455_v20 = vld [vmem:[%s7925_s25 + $0x68] sm:$0xff] }
 0x3cd   : > { %v4321_v47 = vmax.f32 %v3711_v24, 0.0  ;;  %v3218_v10 = vadd.f32 %v7854_v57, %v3217_v7  ;;  %v3219_v63 = vpop.f32.mrb[23].mxu0  ;;  %5935 = vmatmul.mubr.f32.vlgmr.msra.gmra.mrb[128].mxu0 %v3482_v13  ;;  %6045 = vmatprep.mubr.f32.mxu1 %v3555_v5  ;;  %v4714_v52 = vsel %vm4698_vm2, %v4575_v44, 0.0  ;;  %v4454_v5 = vld [vmem:[%s7925_s25 + $0x60] sm:$0xff] }
 0x3ce   : > { %v4320_v6 = vmax.f32 %v3706_v37, 0.0  ;;  %4715 = vadd.xlane.f32.xlu1 %v4714_v52  ;;  %5937 = vmatprep.mubr.f32.mxu0 %v3483_v40  ;;  %v5948_v45 = vpop.f32.mrb[4].mxu1  ;;  %v4711_v61 = vsel %vm4698_vm2, %v4574_v28, 0.0  ;;  %v4457_v63 = vld [vmem:[%s7925_s25 + $0x78] sm:$0xff] }
 0x3cf   : > { %v3556_v17 = vmax.f32 %v3218_v10, 0.0  ;;  %v3721_v38 = vadd.f32 %v5948_v45, %v7918_v29  ;;  %v3715_v23 = vpop.f32.mrb[5].mxu1  ;;  %4712 = vadd.xlane.f32.xlu0 %v4711_v61  ;;  %v4577_v27 = vmul.f32 %v4449_v18, %v4321_v47  ;;  %v4456_v61 = vld [vmem:[%s7925_s25 + $0x70] sm:$0xff] }
 0x3d0   : > { %v3716_v2 = vadd.f32 %v3715_v23, %v7918_v29  ;;  %v3222_v4 = vpop.f32.mrb[24].mxu0  ;;  %v4576_v54 = vmul.f32 %v4448_v60, %v4320_v6 }
 0x3d1   : > { %v4323_v43 = vmax.f32 %v3721_v38, 0.0  ;;  %v3223_v25 = vadd.f32 %v7854_v57, %v3222_v4  ;;  %v3224_v56 = vpop.f32.mrb[25].mxu0  ;;  %5938 = vmatmul.mubr.f32.gmra.mrb[130].mxu0 %v3484_v34  ;;  %6046 = vmatmul.mubr.f32.gmra.mrb[70].mxu1 %v3556_v17  ;;  %v4720_v62 = vsel %vm4698_vm2, %v4577_v27, 0.0 }
 0x3d2   : > { %v4322_v53 = vmax.f32 %v3716_v2, 0.0  ;;  %4721 = vadd.xlane.f32.xlu1 %v4720_v62  ;;  %v5951_v33 = vpop.f32.mrb[6].mxu1  ;;  %v4717_v9 = vsel %vm4698_vm2, %v4576_v54, 0.0 }
 0x3d3   : > { %v3557_v30 = vmax.f32 %v3223_v25, 0.0  ;;  %v3731_v59 = vadd.f32 %v5951_v33, %v7918_v29  ;;  %v3725_v0 = vpop.f32.mrb[7].mxu1  ;;  %4718 = vadd.xlane.f32.xlu0 %v4717_v9  ;;  %v4579_v12 = vmul.f32 %v4451_v49, %v4323_v43  ;;  %v4459_v25 = vld [vmem:[%s7925_s25 + $0x88] sm:$0xff]  ;;  %v4458_v33 = vld [vmem:[%s7925_s25 + $0x80] sm:$0xff] }
 0x3d4   : > { %v3726_v35 = vadd.f32 %v3725_v0, %v7918_v29  ;;  %v3227_v14 = vpop.f32.mrb[26].mxu0  ;;  %v4578_v11 = vmul.f32 %v4450_v15, %v4322_v53 }
 0x3d5   : > { %v4325_v19 = vmax.f32 %v3731_v59, 0.0  ;;  %v3228_v8 = vadd.f32 %v7854_v57, %v3227_v14  ;;  %v3229_v51 = vpop.f32.mrb[27].mxu0  ;;  %6048 = vmatprep.mubr.f32.mxu1 %v3557_v30  ;;  %v4726_v3 = vsel %vm4698_vm2, %v4579_v12, 0.0 }
 0x3d6   : > { %v4324_v41 = vmax.f32 %v3726_v35, 0.0  ;;  %4727 = vadd.xlane.f32.xlu1 %v4726_v3  ;;  %v5954_v48 = vpop.f32.mrb[8].mxu1  ;;  %v4723_v26 = vsel %vm4698_vm2, %v4578_v11, 0.0 }
 0x3d7   : > { %v3558_v31 = vmax.f32 %v3228_v8, 0.0  ;;  %v3741_v32 = vadd.f32 %v5954_v48, %v7918_v29  ;;  %v3735_v36 = vpop.f32.mrb[9].mxu1  ;;  %4724 = vadd.xlane.f32.xlu0 %v4723_v26  ;;  %v4581_v1 = vmul.f32 %v4453_v42, %v4325_v19  ;;  %v4461_v8 = vld [vmem:[%s7925_s25 + $0x98] sm:$0xff]  ;;  %v4460_v48 = vld [vmem:[%s7925_s25 + $0x90] sm:$0xff] }
 0x3d8   : > { %v3736_v46 = vadd.f32 %v3735_v36, %v7918_v29  ;;  %v3232_v21 = vpop.f32.mrb[28].mxu0  ;;  %v4580_v39 = vmul.f32 %v4452_v58, %v4324_v41 }
 0x3d9   : > { %v4327_v13 = vmax.f32 %v3741_v32, 0.0  ;;  %v3233_v16 = vadd.f32 %v7854_v57, %v3232_v21  ;;  %v3234_v50 = vpop.f32.mrb[29].mxu0  ;;  %6049 = vmatmul.mubr.f32.gmra.mrb[72].mxu1 %v3558_v31  ;;  %v4732_v55 = vsel %vm4698_vm2, %v4581_v1, 0.0 }
 0x3da   : > { %v4326_v24 = vmax.f32 %v3736_v46, 0.0  ;;  %4733 = vadd.xlane.f32.xlu1 %v4732_v55  ;;  %v5957_v22 = vpop.f32.mrb[10].mxu1  ;;  %v4729_v44 = vsel %vm4698_vm2, %v4580_v39, 0.0 }
 0x3db   : > { %v3559_v40 = vmax.f32 %v3233_v16, 0.0  ;;  %v3751_v37 = vadd.f32 %v5957_v22, %v7918_v29  ;;  %v3745_v7 = vpop.f32.mrb[11].mxu1  ;;  %4730 = vadd.xlane.f32.xlu0 %v4729_v44  ;;  %v4583_v28 = vmul.f32 %v4455_v20, %v4327_v13  ;;  %v4463_v16 = vld [vmem:[%s7925_s25 + $0xa8] sm:$0xff]  ;;  %v4462_v22 = vld [vmem:[%s7925_s25 + $0xa0] sm:$0xff] }
 0x3dc   : > { %v3746_v18 = vadd.f32 %v3745_v7, %v7918_v29  ;;  %v3237_v47 = vpop.f32.mrb[30].mxu0  ;;  %v4582_v10 = vmul.f32 %v4454_v5, %v4326_v24 }
 0x3dd   : > { %v4329_v52 = vmax.f32 %v3751_v37, 0.0  ;;  %v3238_v60 = vadd.f32 %v7854_v57, %v3237_v47  ;;  %v3239_v6 = vpop.f32.mrb[31].mxu0  ;;  %6051 = vmatprep.mubr.f32.mxu1 %v3559_v40  ;;  %v4738_v45 = vsel %vm4698_vm2, %v4583_v28, 0.0 }
 0x3de   : > { %v4328_v34 = vmax.f32 %v3746_v18, 0.0  ;;  %4739 = vadd.xlane.f32.xlu1 %v4738_v45  ;;  %v5960_v17 = vpop.f32.mrb[12].mxu1  ;;  %v4735_v38 = vsel %vm4698_vm2, %v4582_v10, 0.0 }
 0x3df   : > { %v3560_v23 = vmax.f32 %v3238_v60, 0.0  ;;  %v3761_v27 = vadd.f32 %v5960_v17, %v7918_v29  ;;  %v3755_v2 = vpop.f32.mrb[13].mxu1  ;;  %4736 = vadd.xlane.f32.xlu0 %v4735_v38  ;;  %v4585_v4 = vmul.f32 %v4457_v63, %v4329_v52  ;;  %v4465_v60 = vld [vmem:[%s7925_s25 + $0xb8] sm:$0xff]  ;;  %v4464_v17 = vld [vmem:[%s7925_s25 + $0xb0] sm:$0xff] }
 0x3e0   : > { %v3756_v54 = vadd.f32 %v3755_v2, %v7918_v29  ;;  %v3242_v49 = vpop.f32.mrb[32].mxu0  ;;  %v4584_v43 = vmul.f32 %v4456_v61, %v4328_v34 }
 0x3e1   : > { %v4331_v56 = vmax.f32 %v3761_v27, 0.0  ;;  %v3243_v62 = vadd.f32 %v7854_v57, %v3242_v49  ;;  %v3244_v15 = vpop.f32.mrb[33].mxu0  ;;  %6052 = vmatmul.mubr.f32.gmra.mrb[74].mxu1 %v3560_v23  ;;  %v4744_v53 = vsel %vm4698_vm2, %v4585_v4, 0.0 }
 0x3e2   : > { %v4330_v9 = vmax.f32 %v3756_v54, 0.0  ;;  %4745 = vadd.xlane.f32.xlu1 %v4744_v53  ;;  %v5963_v30 = vpop.f32.mrb[14].mxu1  ;;  %v4741_v59 = vsel %vm4698_vm2, %v4584_v43, 0.0 }
 0x3e3   : > { %v3561_v0 = vmax.f32 %v3243_v62, 0.0  ;;  %v3771_v12 = vadd.f32 %v5963_v30, %v7918_v29  ;;  %v3765_v35 = vpop.f32.mrb[15].mxu1  ;;  %4742 = vadd.xlane.f32.xlu0 %v4741_v59  ;;  %v4587_v14 = vmul.f32 %v4459_v25, %v4331_v56  ;;  %v4467_v62 = vld [vmem:[%s7925_s25 + $0xc8] sm:$0xff]  ;;  %v4466_v30 = vld [vmem:[%s7925_s25 + $0xc0] sm:$0xff] }
 0x3e4   : > { %v3766_v11 = vadd.f32 %v3765_v35, %v7918_v29  ;;  %v3247_v42 = vpop.f32.mrb[34].mxu0  ;;  %v4586_v19 = vmul.f32 %v4458_v33, %v4330_v9 }
 0x3e5   : > { %v4333_v51 = vmax.f32 %v3771_v12, 0.0  ;;  %v3248_v3 = vadd.f32 %v7854_v57, %v3247_v42  ;;  %v3249_v58 = vpop.f32.mrb[35].mxu0  ;;  %6054 = vmatprep.mubr.f32.mxu1 %v3561_v0  ;;  %v4750_v41 = vsel %vm4698_vm2, %v4587_v14, 0.0 }
 0x3e6   : > { %v4332_v26 = vmax.f32 %v3766_v11, 0.0  ;;  %4751 = vadd.xlane.f32.xlu1 %v4750_v41  ;;  %v5966_v31 = vpop.f32.mrb[16].mxu1  ;;  %v4747_v32 = vsel %vm4698_vm2, %v4586_v19, 0.0 }
 0x3e7   : > { %v3562_v36 = vmax.f32 %v3248_v3, 0.0  ;;  %v3781_v1 = vadd.f32 %v5966_v31, %v7918_v29  ;;  %v3775_v46 = vpop.f32.mrb[17].mxu1  ;;  %4748 = vadd.xlane.f32.xlu0 %v4747_v32  ;;  %v4589_v21 = vmul.f32 %v4461_v8, %v4333_v51  ;;  %v4469_v3 = vld [vmem:[%s7925_s25 + $0xd8] sm:$0xff]  ;;  %v4468_v31 = vld [vmem:[%s7925_s25 + $0xd0] sm:$0xff] }
 0x3e8   : > { %v3776_v39 = vadd.f32 %v3775_v46, %v7918_v29  ;;  %v3252_v20 = vpop.f32.mrb[36].mxu0  ;;  %v4588_v13 = vmul.f32 %v4460_v48, %v4332_v26 }
 0x3e9   : > { %v4335_v50 = vmax.f32 %v3781_v1, 0.0  ;;  %v3253_v55 = vadd.f32 %v7854_v57, %v3252_v20  ;;  %v3254_v5 = vpop.f32.mrb[37].mxu0  ;;  %6055 = vmatmul.mubr.f32.gmra.mrb[76].mxu1 %v3562_v36  ;;  %v4756_v24 = vsel %vm4698_vm2, %v4589_v21, 0.0 }
 0x3ea   : > { %v4334_v44 = vmax.f32 %v3776_v39, 0.0  ;;  %4757 = vadd.xlane.f32.xlu1 %v4756_v24  ;;  %v5969_v40 = vpop.f32.mrb[18].mxu1  ;;  %v4753_v37 = vsel %vm4698_vm2, %v4588_v13, 0.0 }
 0x3eb   : > { %v3563_v7 = vmax.f32 %v3253_v55, 0.0  ;;  %v3791_v28 = vadd.f32 %v5969_v40, %v7918_v29  ;;  %v3785_v18 = vpop.f32.mrb[19].mxu1  ;;  %4754 = vadd.xlane.f32.xlu0 %v4753_v37  ;;  %v4591_v47 = vmul.f32 %v4463_v16, %v4335_v50  ;;  %v4471_v55 = vld [vmem:[%s7925_s25 + $0xe8] sm:$0xff]  ;;  %v4470_v40 = vld [vmem:[%s7925_s25 + $0xe0] sm:$0xff] }
 0x3ec   : > { %v3786_v10 = vadd.f32 %v3785_v18, %v7918_v29  ;;  %v3257_v63 = vpop.f32.mrb[38].mxu0  ;;  %v4590_v52 = vmul.f32 %v4462_v22, %v4334_v44 }
 0x3ed   : > { %v4337_v6 = vmax.f32 %v3791_v28, 0.0  ;;  %v3258_v45 = vadd.f32 %v7854_v57, %v3257_v63  ;;  %v3259_v61 = vpop.f32.mrb[39].mxu0  ;;  %6057 = vmatprep.mubr.f32.mxu1 %v3563_v7  ;;  %v4762_v34 = vsel %vm4698_vm2, %v4591_v47, 0.0 }
 0x3ee   : > { %v4336_v38 = vmax.f32 %v3786_v10, 0.0  ;;  %4763 = vadd.xlane.f32.xlu1 %v4762_v34  ;;  %v5972_v23 = vpop.f32.mrb[20].mxu1  ;;  %v4759_v27 = vsel %vm4698_vm2, %v4590_v52, 0.0  ;;  %v8029_v61 = vld [vmem:[%s8654_s2 + $0x352] ss:$0 sm:$0xff] }
 0x3ef   : > { %v3564_v2 = vmax.f32 %v3258_v45, 0.0  ;;  %v3801_v4 = vadd.f32 %v5972_v23, %v7918_v29  ;;  %v3795_v54 = vpop.f32.mrb[21].mxu1  ;;  %4760 = vadd.xlane.f32.xlu0 %v4759_v27  ;;  %v4593_v49 = vmul.f32 %v4465_v60, %v4337_v6  ;;  %v4473_v6 = vld [vmem:[%s7925_s25 + $0xf8] sm:$0xff]  ;;  %v4472_v23 = vld [vmem:[%s7925_s25 + $0xf0] sm:$0xff] }
 0x3f0   : > { %v3796_v43 = vadd.f32 %v3795_v54, %v7918_v29  ;;  %v3262_v25 = vpop.f32.mrb[40].mxu0  ;;  %v4592_v56 = vmul.f32 %v4464_v17, %v4336_v38 }
 0x3f1   : > { %v4339_v15 = vmax.f32 %v3801_v4, 0.0  ;;  %v3263_v53 = vadd.f32 %v7854_v57, %v3262_v25  ;;  %v3264_v33 = vpop.f32.mrb[41].mxu0  ;;  %6058 = vmatmul.mubr.f32.gmra.mrb[78].mxu1 %v3564_v2  ;;  %v4768_v9 = vsel %vm4698_vm2, %v4593_v49, 0.0 }
 0x3f2   : > { %v4338_v59 = vmax.f32 %v3796_v43, 0.0  ;;  %4769 = vadd.xlane.f32.xlu1 %v4768_v9  ;;  %v5975_v0 = vpop.f32.mrb[22].mxu1  ;;  %v4765_v12 = vsel %vm4698_vm2, %v4592_v56, 0.0 }
 0x3f3   : > { %v3565_v35 = vmax.f32 %v3263_v53, 0.0  ;;  %v3811_v14 = vadd.f32 %v5975_v0, %v7918_v29  ;;  %v3805_v11 = vpop.f32.mrb[23].mxu1  ;;  %4766 = vadd.xlane.f32.xlu0 %v4765_v12  ;;  %v4595_v42 = vmul.f32 %v4467_v62, %v4339_v15  ;;  %v4475_v53 = vld [vmem:[%s7925_s25 + $0x108] sm:$0xff]  ;;  %v4474_v0 = vld [vmem:[%s7925_s25 + $0x100] sm:$0xff] }
 0x3f4   : > { %v3806_v19 = vadd.f32 %v3805_v11, %v7918_v29  ;;  %v3267_v8 = vpop.f32.mrb[42].mxu0  ;;  %v4594_v51 = vmul.f32 %v4466_v30, %v4338_v59 }
 0x3f5   : > { %v4341_v58 = vmax.f32 %v3811_v14, 0.0  ;;  %v3268_v41 = vadd.f32 %v7854_v57, %v3267_v8  ;;  %v3269_v48 = vpop.f32.mrb[43].mxu0  ;;  %6060 = vmatprep.mubr.f32.mxu1 %v3565_v35  ;;  %v4774_v26 = vsel %vm4698_vm2, %v4595_v42, 0.0 }
 0x3f6   : > { %v4340_v32 = vmax.f32 %v3806_v19, 0.0  ;;  %4775 = vadd.xlane.f32.xlu1 %v4774_v26  ;;  %v5978_v36 = vpop.f32.mrb[24].mxu1  ;;  %v4771_v1 = vsel %vm4698_vm2, %v4594_v51, 0.0 }
 0x3f7   : > { %v3566_v46 = vmax.f32 %v3268_v41, 0.0  ;;  %v3821_v21 = vadd.f32 %v5978_v36, %v7918_v29  ;;  %v3815_v39 = vpop.f32.mrb[25].mxu1  ;;  %4772 = vadd.xlane.f32.xlu0 %v4771_v1  ;;  %v4597_v20 = vmul.f32 %v4469_v3, %v4341_v58 }
 0x3f8   : > { %v3816_v13 = vadd.f32 %v3815_v39, %v7918_v29  ;;  %v3272_v16 = vpop.f32.mrb[44].mxu0  ;;  %v4596_v50 = vmul.f32 %v4468_v31, %v4340_v32  ;;  %v4477_v32 = vld [vmem:[%s7925_s25 + $0x118] sm:$0xff] }
 0x3f9   : > { %v4343_v5 = vmax.f32 %v3821_v21, 0.0  ;;  %v3273_v24 = vadd.f32 %v7854_v57, %v3272_v16  ;;  %v3274_v22 = vpop.f32.mrb[45].mxu0  ;;  %6061 = vmatmul.mubr.f32.gmra.mrb[80].mxu1 %v3566_v46  ;;  %v4780_v44 = vsel %vm4698_vm2, %v4597_v20, 0.0  ;;  %v4476_v46 = vld [vmem:[%s7925_s25 + $0x110] sm:$0xff] }
 0x3fa   : > { %v4342_v37 = vmax.f32 %v3816_v13, 0.0  ;;  %4781 = vadd.xlane.f32.xlu1 %v4780_v44  ;;  %v5981_v7 = vpop.f32.mrb[26].mxu1  ;;  %v4777_v28 = vsel %vm4698_vm2, %v4596_v50, 0.0 }
 0x3fb   : > { %v3567_v18 = vmax.f32 %v3273_v24, 0.0  ;;  %v3831_v47 = vadd.f32 %v5981_v7, %v7918_v29  ;;  %v3825_v10 = vpop.f32.mrb[27].mxu1  ;;  %4778 = vadd.xlane.f32.xlu0 %v4777_v28  ;;  %v4599_v63 = vmul.f32 %v4471_v55, %v4343_v5 }
 0x3fc   : > { %v3826_v57 = vadd.f32 %v3825_v10, %v7918_v29  ;;  %v3277_v52 = vpop.f32.mrb[46].mxu0  ;;  %v4598_v60 = vmul.f32 %v4470_v40, %v4342_v37 }
 0x3fd   : > { %v4345_v45 = vmax.f32 %v3831_v47, 0.0  ;;  %v3278_v34 = vadd.f32 %v8029_v61, %v3277_v52  ;;  %v3279_v17 = vpop.f32.mrb[47].mxu0  ;;  %6063 = vmatprep.mubr.f32.mxu1 %v3567_v18  ;;  %v4786_v38 = vsel %vm4698_vm2, %v4599_v63, 0.0  ;;  %v4479_v47 = vld [vmem:[%s7925_s25 + $0x128] sm:$0xff] }
 0x3fe   : > { %v4344_v27 = vmax.f32 %v3826_v57, 0.0  ;;  %4787 = vadd.xlane.f32.xlu1 %v4786_v38  ;;  %v5984_v2 = vpop.f32.mrb[28].mxu1  ;;  %v4783_v4 = vsel %vm4698_vm2, %v4598_v60, 0.0  ;;  %v4478_v57 = vld [vmem:[%s7925_s25 + $0x120] sm:$0xff] }
 0x3ff   : > { %v3568_v54 = vmax.f32 %v3278_v34, 0.0  ;;  %v3841_v49 = vadd.f32 %v5984_v2, %v7918_v29  ;;  %v3835_v43 = vpop.f32.mrb[29].mxu1  ;;  %4784 = vadd.xlane.f32.xlu0 %v4783_v4  ;;  %v4601_v25 = vmul.f32 %v4473_v6, %v4345_v45 }
 0x400   : > { %v3836_v56 = vadd.f32 %v3835_v43, %v7918_v29  ;;  %v3282_v62 = vpop.f32.mrb[48].mxu0  ;;  %v4600_v15 = vmul.f32 %v4472_v23, %v4344_v27 }
 0x401   : > { %v4347_v33 = vmax.f32 %v3841_v49, 0.0  ;;  %v3283_v9 = vadd.f32 %v8029_v61, %v3282_v62  ;;  %v3284_v30 = vpop.f32.mrb[49].mxu0  ;;  %6064 = vmatmul.mubr.f32.gmra.mrb[82].mxu1 %v3568_v54  ;;  %v4792_v59 = vsel %vm4698_vm2, %v4601_v25, 0.0  ;;  %v4481_v62 = vld [vmem:[%s7925_s25 + $0x138] sm:$0xff] }
 0x402   : > { %v4346_v12 = vmax.f32 %v3836_v56, 0.0  ;;  %4793 = vadd.xlane.f32.xlu1 %v4792_v59  ;;  %v4789_v35 = vsel %vm4698_vm2, %v4600_v15, 0.0 }
 0x403   : > { %v3569_v14 = vmax.f32 %v3283_v9, 0.0  ;;  %4790 = vadd.xlane.f32.xlu0 %v4789_v35  ;;  %v4603_v11 = vmul.f32 %v4475_v53, %v4347_v33  ;;  %v4480_v33 = vld [vmem:[%s7925_s25 + $0x130] sm:$0xff] }
 0x404   : > { %v3287_v42 = vpop.f32.mrb[50].mxu0  ;;  %v5987_v19 = vpop.f32.mrb[30].mxu1  ;;  %v4602_v8 = vmul.f32 %v4474_v0, %v4346_v12 }
 0x405   : > { %v3288_v51 = vadd.f32 %v8029_v61, %v3287_v42  ;;  %v3851_v3 = vadd.f32 %v5987_v19, %v7918_v29  ;;  %v3289_v58 = vpop.f32.mrb[51].mxu0  ;;  %v3845_v41 = vpop.f32.mrb[31].mxu1  ;;  %6066 = vmatprep.mubr.f32.mxu1 %v3569_v14  ;;  %v4798_v48 = vsel %vm4698_vm2, %v4603_v11, 0.0 }
 0x406   : > { %v3846_v26 = vadd.f32 %v3845_v41, %v7918_v29  ;;  %4799 = vadd.xlane.f32.xlu1 %v4798_v48  ;;  %v4795_v31 = vsel %vm4698_vm2, %v4602_v8, 0.0 }
 0x407   : > { %v3570_v36 = vmax.f32 %v3288_v51, 0.0  ;;  %v4349_v1 = vmax.f32 %v3851_v3, 0.0  ;;  %4796 = vadd.xlane.f32.xlu0 %v4795_v31 }
 0x408   : > { %v4348_v21 = vmax.f32 %v3846_v26, 0.0  ;;  %v3292_v39 = vpop.f32.mrb[52].mxu0  ;;  %v4483_v26 = vld [vmem:[%s7925_s25 + $0x148] sm:$0xff] }
 0x409   : > { %v3293_v20 = vadd.f32 %v8029_v61, %v3292_v39  ;;  %v3294_v13 = vpop.f32.mrb[53].mxu0  ;;  %6067 = vmatmul.mubr.f32.gmra.mrb[84].mxu1 %v3570_v36  ;;  %v4605_v16 = vmul.f32 %v4477_v32, %v4349_v1  ;;  %v4482_v36 = vld [vmem:[%s7925_s25 + $0x140] sm:$0xff] }
 0x40a   : > { %v4604_v50 = vmul.f32 %v4476_v46, %v4348_v21 }
 0x40b   : > { %v3571_v55 = vmax.f32 %v3293_v20, 0.0  ;;  %v4804_v5 = vsel %vm4698_vm2, %v4605_v16, 0.0 }
 0x40c   : > { %v3297_v24 = vpop.f32.mrb[54].mxu0  ;;  %4805 = vadd.xlane.f32.xlu1 %v4804_v5  ;;  %v5990_v22 = vpop.f32.mrb[32].mxu1  ;;  %v4801_v44 = vsel %vm4698_vm2, %v4604_v50, 0.0 }
 0x40d   : > { %v3298_v40 = vadd.f32 %v8029_v61, %v3297_v24  ;;  %v3861_v37 = vadd.f32 %v5990_v22, %v7918_v29  ;;  %v3299_v7 = vpop.f32.mrb[55].mxu0  ;;  %v3855_v28 = vpop.f32.mrb[33].mxu1  ;;  %6069 = vmatprep.mubr.f32.mxu1 %v3571_v55  ;;  %4802 = vadd.xlane.f32.xlu0 %v4801_v44 }
 0x40e   : > { %v3856_v18 = vadd.f32 %v3855_v28, %v7918_v29  ;;  %v4485_v28 = vld [vmem:[%s7925_s25 + $0x158] sm:$0xff] }
 0x40f   : > { %v3572_v10 = vmax.f32 %v3298_v40, 0.0  ;;  %v4351_v63 = vmax.f32 %v3861_v37, 0.0 }
 0x410   : > { %v4350_v52 = vmax.f32 %v3856_v18, 0.0  ;;  %v3302_v60 = vpop.f32.mrb[56].mxu0 }
 0x411   : > { %v3303_v6 = vadd.f32 %v8029_v61, %v3302_v60  ;;  %v3304_v45 = vpop.f32.mrb[57].mxu0  ;;  %6070 = vmatmul.mubr.f32.gmra.mrb[86].mxu1 %v3572_v10  ;;  %v4607_v34 = vmul.f32 %v4479_v47, %v4351_v63  ;;  %v4484_v10 = vld [vmem:[%s7925_s25 + $0x150] sm:$0xff] }
 0x412   : > { %v4606_v17 = vmul.f32 %v4478_v57, %v4350_v52 }
 0x413   : > { %v3573_v38 = vmax.f32 %v3303_v6, 0.0  ;;  %v4810_v23 = vsel %vm4698_vm2, %v4607_v34, 0.0 }
 0x414   : > { %v3307_v27 = vpop.f32.mrb[58].mxu0  ;;  %4811 = vadd.xlane.f32.xlu1 %v4810_v23  ;;  %v5993_v2 = vpop.f32.mrb[34].mxu1  ;;  %v4807_v4 = vsel %vm4698_vm2, %v4606_v17, 0.0 }
 0x415   : > { %v3308_v54 = vadd.f32 %v8029_v61, %v3307_v27  ;;  %v3871_v49 = vadd.f32 %v5993_v2, %v7918_v29  ;;  %v3309_v43 = vpop.f32.mrb[59].mxu0  ;;  %v3865_v25 = vpop.f32.mrb[35].mxu1  ;;  %6072 = vmatprep.mubr.f32.mxu1 %v3573_v38  ;;  %4808 = vadd.xlane.f32.xlu0 %v4807_v4 }
 0x416   : > { %v3866_v56 = vadd.f32 %v3865_v25, %v7918_v29  ;;  %v4487_v25 = vld [vmem:[%s7925_s25 + $0x168] sm:$0xff] }
 0x417   : > { %v3574_v15 = vmax.f32 %v3308_v54, 0.0  ;;  %v4353_v53 = vmax.f32 %v3871_v49, 0.0 }
 0x418   : > { %v4352_v9 = vmax.f32 %v3866_v56, 0.0  ;;  %v3312_v30 = vpop.f32.mrb[60].mxu0 }
 0x419   : > { %v3313_v59 = vadd.f32 %v8029_v61, %v3312_v30  ;;  %v3314_v0 = vpop.f32.mrb[61].mxu0  ;;  %6073 = vmatmul.mubr.f32.gmra.mrb[88].mxu1 %v3574_v15  ;;  %v4609_v12 = vmul.f32 %v4481_v62, %v4353_v53  ;;  %v4486_v15 = vld [vmem:[%s7925_s25 + $0x160] sm:$0xff] }
 0x41a   : > { %v4608_v35 = vmul.f32 %v4480_v33, %v4352_v9 }
 0x41b   : > { %v3575_v14 = vmax.f32 %v3313_v59, 0.0  ;;  %v4816_v11 = vsel %vm4698_vm2, %v4609_v12, 0.0 }
 0x41c   : > { %v3317_v42 = vpop.f32.mrb[62].mxu0  ;;  %4817 = vadd.xlane.f32.xlu1 %v4816_v11  ;;  %v5996_v19 = vpop.f32.mrb[36].mxu1  ;;  %v4813_v8 = vsel %vm4698_vm2, %v4608_v35, 0.0 }
 0x41d   : > { %v3318_v51 = vadd.f32 %v8029_v61, %v3317_v42  ;;  %v3881_v3 = vadd.f32 %v5996_v19, %v7918_v29  ;;  %v3319_v58 = vpop.f32.mrb[63].mxu0  ;;  %v3875_v41 = vpop.f32.mrb[37].mxu1  ;;  %6075 = vmatprep.mubr.f32.mxu1 %v3575_v14  ;;  %4814 = vadd.xlane.f32.xlu0 %v4813_v8 }
 0x41e   : > { %v3876_v48 = vadd.f32 %v3875_v41, %v7918_v29  ;;  %v4489_v41 = vld [vmem:[%s7925_s25 + $0x178] sm:$0xff] }
 0x41f   : > { %v3576_v31 = vmax.f32 %v3318_v51, 0.0  ;;  %v4355_v32 = vmax.f32 %v3881_v3, 0.0 }
 0x420   : > { %v4354_v1 = vmax.f32 %v3876_v48, 0.0  ;;  %v3322_v46 = vpop.f32.mrb[64].mxu0 }
 0x421   : > { %v3323_v21 = vadd.f32 %v8029_v61, %v3322_v46  ;;  %v3324_v39 = vpop.f32.mrb[65].mxu0  ;;  %6076 = vmatmul.mubr.f32.gmra.mrb[90].mxu1 %v3576_v31  ;;  %v4611_v20 = vmul.f32 %v4483_v26, %v4355_v32  ;;  %v4488_v31 = vld [vmem:[%s7925_s25 + $0x170] sm:$0xff] }
 0x422   : > { %v4610_v13 = vmul.f32 %v4482_v36, %v4354_v1 }
 0x423   : > { %v3577_v16 = vmax.f32 %v3323_v21, 0.0  ;;  %v4822_v50 = vsel %vm4698_vm2, %v4611_v20, 0.0 }
 0x424   : > { %v3327_v55 = vpop.f32.mrb[66].mxu0  ;;  %4823 = vadd.xlane.f32.xlu1 %v4822_v50  ;;  %v5999_v5 = vpop.f32.mrb[38].mxu1  ;;  %v4819_v24 = vsel %vm4698_vm2, %v4610_v13, 0.0 }
 0x425   : > { %v3328_v22 = vadd.f32 %v8029_v61, %v3327_v55  ;;  %v3891_v44 = vadd.f32 %v5999_v5, %v7918_v29  ;;  %v3329_v40 = vpop.f32.mrb[67].mxu0  ;;  %v3885_v37 = vpop.f32.mrb[39].mxu1  ;;  %6078 = vmatprep.mubr.f32.mxu1 %v3577_v16  ;;  %4820 = vadd.xlane.f32.xlu0 %v4819_v24 }
 0x426   : > { %v3886_v7 = vadd.f32 %v3885_v37, %v7918_v29  ;;  %v4491_v37 = vld [vmem:[%s7925_s25 + $0x188] sm:$0xff] }
 0x427   : > { %v3578_v18 = vmax.f32 %v3328_v22, 0.0  ;;  %v4357_v47 = vmax.f32 %v3891_v44, 0.0 }
 0x428   : > { %v4356_v63 = vmax.f32 %v3886_v7, 0.0  ;;  %v3332_v57 = vpop.f32.mrb[68].mxu0 }
 0x429   : > { %v3333_v52 = vadd.f32 %v8029_v61, %v3332_v57  ;;  %v3334_v60 = vpop.f32.mrb[69].mxu0  ;;  %6079 = vmatmul.mubr.f32.gmra.mrb[92].mxu1 %v3578_v18  ;;  %v4613_v6 = vmul.f32 %v4485_v28, %v4357_v47  ;;  %v4490_v18 = vld [vmem:[%s7925_s25 + $0x180] sm:$0xff] }
 0x42a   : > { %v4612_v45 = vmul.f32 %v4484_v10, %v4356_v63 }
 0x42b   : > { %v3579_v34 = vmax.f32 %v3333_v52, 0.0  ;;  %v4828_v17 = vsel %vm4698_vm2, %v4613_v6, 0.0 }
 0x42c   : > { %v3337_v38 = vpop.f32.mrb[70].mxu0  ;;  %4829 = vadd.xlane.f32.xlu1 %v4828_v17  ;;  %v6002_v23 = vpop.f32.mrb[40].mxu1  ;;  %v4825_v27 = vsel %vm4698_vm2, %v4612_v45, 0.0 }
 0x42d   : > { %v3338_v2 = vadd.f32 %v8029_v61, %v3337_v38  ;;  %v3901_v4 = vadd.f32 %v6002_v23, %v7918_v29  ;;  %v3339_v54 = vpop.f32.mrb[71].mxu0  ;;  %v3895_v49 = vpop.f32.mrb[41].mxu1  ;;  %6081 = vmatprep.mubr.f32.mxu1 %v3579_v34  ;;  %4826 = vadd.xlane.f32.xlu0 %v4825_v27 }
 0x42e   : > { %v3896_v43 = vadd.f32 %v3895_v49, %v7918_v29  ;;  %v4493_v49 = vld [vmem:[%s7925_s25 + $0x198] sm:$0xff] }
 0x42f   : > { %v3580_v56 = vmax.f32 %v3338_v2, 0.0  ;;  %v4359_v62 = vmax.f32 %v3901_v4, 0.0 }
 0x430   : > { %v4358_v53 = vmax.f32 %v3896_v43, 0.0  ;;  %v3342_v33 = vpop.f32.mrb[72].mxu0 }
 0x431   : > { %v3343_v9 = vadd.f32 %v8029_v61, %v3342_v33  ;;  %v3344_v30 = vpop.f32.mrb[73].mxu0  ;;  %6082 = vmatmul.mubr.f32.gmra.mrb[94].mxu1 %v3580_v56  ;;  %v4615_v59 = vmul.f32 %v4487_v25, %v4359_v62  ;;  %v4492_v56 = vld [vmem:[%s7925_s25 + $0x190] sm:$0xff] }
 0x432   : > { %v4614_v0 = vmul.f32 %v4486_v15, %v4358_v53 }
 0x433   : > { %v3581_v12 = vmax.f32 %v3343_v9, 0.0  ;;  %v4834_v35 = vsel %vm4698_vm2, %v4615_v59, 0.0 }
 0x434   : > { %v3347_v14 = vpop.f32.mrb[74].mxu0  ;;  %4835 = vadd.xlane.f32.xlu1 %v4834_v35  ;;  %v6005_v11 = vpop.f32.mrb[42].mxu1  ;;  %v4831_v42 = vsel %vm4698_vm2, %v4614_v0, 0.0 }
 0x435   : > { %v3348_v19 = vadd.f32 %v8029_v61, %v3347_v14  ;;  %v3911_v8 = vadd.f32 %v6005_v11, %v7918_v29  ;;  %v3349_v51 = vpop.f32.mrb[75].mxu0  ;;  %v3905_v3 = vpop.f32.mrb[43].mxu1  ;;  %6084 = vmatprep.mubr.f32.mxu1 %v3581_v12  ;;  %4832 = vadd.xlane.f32.xlu0 %v4831_v42  ;;  %v8120_v11 = vld [vmem:[%s8654_s2 + $0x353] ss:$0 sm:$0xff] }
 0x436   : > { %v3906_v58 = vadd.f32 %v3905_v3, %v7918_v29  ;;  %v4495_v3 = vld [vmem:[%s7925_s25 + $0x1a8] sm:$0xff] }
 0x437   : > { %v3582_v48 = vmax.f32 %v3348_v19, 0.0  ;;  %v4361_v26 = vmax.f32 %v3911_v8, 0.0 }
 0x438   : > { %v4360_v32 = vmax.f32 %v3906_v58, 0.0  ;;  %v3352_v36 = vpop.f32.mrb[76].mxu0 }
 0x439   : > { %v3353_v1 = vadd.f32 %v8029_v61, %v3352_v36  ;;  %v3354_v46 = vpop.f32.mrb[77].mxu0  ;;  %6085 = vmatmul.mubr.f32.gmra.mrb[96].mxu1 %v3582_v48  ;;  %v4617_v21 = vmul.f32 %v4489_v41, %v4361_v26  ;;  %v4494_v48 = vld [vmem:[%s7925_s25 + $0x1a0] sm:$0xff] }
 0x43a   : > { %v4616_v39 = vmul.f32 %v4488_v31, %v4360_v32 }
 0x43b   : > { %v3583_v20 = vmax.f32 %v3353_v1, 0.0  ;;  %v4840_v13 = vsel %vm4698_vm2, %v4617_v21, 0.0 }
 0x43c   : > { %v3357_v16 = vpop.f32.mrb[78].mxu0  ;;  %4841 = vadd.xlane.f32.xlu1 %v4840_v13  ;;  %v6008_v50 = vpop.f32.mrb[44].mxu1  ;;  %v4837_v55 = vsel %vm4698_vm2, %v4616_v39, 0.0 }
 0x43d   : > { %v3358_v5 = vadd.f32 %v8029_v61, %v3357_v16  ;;  %v3921_v24 = vadd.f32 %v6008_v50, %v7918_v29  ;;  %v3359_v22 = vpop.f32.mrb[79].mxu0  ;;  %v3915_v44 = vpop.f32.mrb[45].mxu1  ;;  %6087 = vmatprep.mubr.f32.mxu1 %v3583_v20  ;;  %4838 = vadd.xlane.f32.xlu0 %v4837_v55 }
 0x43e   : > { %v3916_v40 = vadd.f32 %v3915_v44, %v7918_v29  ;;  %v4497_v44 = vld [vmem:[%s7925_s25 + $0x1b8] sm:$0xff] }
 0x43f   : > { %v3584_v7 = vmax.f32 %v3358_v5, 0.0  ;;  %v4363_v28 = vmax.f32 %v3921_v24, 0.0 }
 0x440   : > { %v4362_v47 = vmax.f32 %v3916_v40, 0.0  ;;  %v3362_v10 = vpop.f32.mrb[80].mxu0 }
 0x441   : > { %v3363_v63 = vadd.f32 %v8029_v61, %v3362_v10  ;;  %v3364_v57 = vpop.f32.mrb[81].mxu0  ;;  %6088 = vmatmul.mubr.f32.gmra.mrb[98].mxu1 %v3584_v7  ;;  %v4619_v52 = vmul.f32 %v4491_v37, %v4363_v28  ;;  %v4496_v7 = vld [vmem:[%s7925_s25 + $0x1b0] sm:$0xff] }
 0x442   : > { %v4618_v60 = vmul.f32 %v4490_v18, %v4362_v47 }
 0x443   : > { %v3585_v6 = vmax.f32 %v3363_v63, 0.0  ;;  %v4846_v45 = vsel %vm4698_vm2, %v4619_v52, 0.0 }
 0x444   : > { %v3367_v34 = vpop.f32.mrb[82].mxu0  ;;  %4847 = vadd.xlane.f32.xlu1 %v4846_v45  ;;  %v6011_v17 = vpop.f32.mrb[46].mxu1  ;;  %v4843_v38 = vsel %vm4698_vm2, %v4618_v60, 0.0 }
 0x445   : > { %v3368_v23 = vadd.f32 %v8029_v61, %v3367_v34  ;;  %v3931_v27 = vadd.f32 %v6011_v17, %v7918_v29  ;;  %v3369_v2 = vpop.f32.mrb[83].mxu0  ;;  %v3925_v4 = vpop.f32.mrb[47].mxu1  ;;  %6090 = vmatprep.mubr.f32.mxu1 %v3585_v6  ;;  %4844 = vadd.xlane.f32.xlu0 %v4843_v38 }
 0x446   : > { %v3926_v54 = vadd.f32 %v3925_v4, %v7918_v29 }
 0x447   : > { %v3586_v43 = vmax.f32 %v3368_v23, 0.0  ;;  %v4365_v25 = vmax.f32 %v3931_v27, 0.0 }
 0x448   : > { %v4364_v62 = vmax.f32 %v3926_v54, 0.0  ;;  %v3372_v15 = vpop.f32.mrb[84].mxu0  ;;  %v4499_v54 = vld [vmem:[%s7925_s25 + $0x1c8] sm:$0xff] }
 0x449   : > { %v3373_v53 = vadd.f32 %v8029_v61, %v3372_v15  ;;  %v3374_v33 = vpop.f32.mrb[85].mxu0  ;;  %6091 = vmatmul.mubr.f32.gmra.mrb[100].mxu1 %v3586_v43  ;;  %v4621_v9 = vmul.f32 %v4493_v49, %v4365_v25  ;;  %v4498_v15 = vld [vmem:[%s7925_s25 + $0x1c0] sm:$0xff] }
 0x44a   : > { %v4620_v30 = vmul.f32 %v4492_v56, %v4364_v62 }
 0x44b   : > { %v3587_v59 = vmax.f32 %v3373_v53, 0.0  ;;  %v4852_v0 = vsel %vm4698_vm2, %v4621_v9, 0.0 }
 0x44c   : > { %v3377_v12 = vpop.f32.mrb[86].mxu0  ;;  %4853 = vadd.xlane.f32.xlu1 %v4852_v0  ;;  %v6014_v29 = vpop.f32.mrb[48].mxu1  ;;  %v4849_v35 = vsel %vm4698_vm2, %v4620_v30, 0.0 }
 0x44d   : > { %v3378_v14 = vadd.f32 %v8029_v61, %v3377_v12  ;;  %v3941_v42 = vadd.f32 %v8120_v11, %v6014_v29  ;;  %v3379_v19 = vpop.f32.mrb[87].mxu0  ;;  %v3935_v8 = vpop.f32.mrb[49].mxu1  ;;  %6093 = vmatprep.mubr.f32.mxu1 %v3587_v59  ;;  %4850 = vadd.xlane.f32.xlu0 %v4849_v35 }
 0x44e   : > { %v3936_v51 = vadd.f32 %v8120_v11, %v3935_v8 }
 0x44f   : > { %v3588_v58 = vmax.f32 %v3378_v14, 0.0  ;;  %v4367_v41 = vmax.f32 %v3941_v42, 0.0 }
 0x450   : > { %v4366_v26 = vmax.f32 %v3936_v51, 0.0  ;;  %v3382_v31 = vpop.f32.mrb[88].mxu0 }
 0x451   : > { %v3383_v32 = vadd.f32 %v8029_v61, %v3382_v31  ;;  %v3384_v36 = vpop.f32.mrb[89].mxu0  ;;  %6094 = vmatmul.mubr.f32.gmra.mrb[102].mxu1 %v3588_v58  ;;  %v4623_v1 = vmul.f32 %v4495_v3, %v4367_v41 }
 0x452   : > { %v4622_v46 = vmul.f32 %v4494_v48, %v4366_v26  ;;  %v4501_v48 = vld [vmem:[%s7925_s25 + $0x1d8] sm:$0xff] }
 0x453   : > { %v3589_v21 = vmax.f32 %v3383_v32, 0.0  ;;  %v4858_v39 = vsel %vm4698_vm2, %v4623_v1, 0.0 }
 0x454   : > { %v3387_v20 = vpop.f32.mrb[90].mxu0  ;;  %4859 = vadd.xlane.f32.xlu1 %v4858_v39  ;;  %v6017_v13 = vpop.f32.mrb[50].mxu1  ;;  %v4855_v16 = vsel %vm4698_vm2, %v4622_v46, 0.0  ;;  %v4500_v46 = vld [vmem:[%s7925_s25 + $0x1d0] sm:$0xff] }
 0x455   : > { %v3388_v50 = vadd.f32 %v8029_v61, %v3387_v20  ;;  %v3951_v55 = vadd.f32 %v8120_v11, %v6017_v13  ;;  %v3389_v5 = vpop.f32.mrb[91].mxu0  ;;  %v3945_v24 = vpop.f32.mrb[51].mxu1  ;;  %6096 = vmatprep.mubr.f32.mxu1 %v3589_v21  ;;  %4856 = vadd.xlane.f32.xlu0 %v4855_v16 }
 0x456   : > { %v3946_v22 = vadd.f32 %v8120_v11, %v3945_v24 }
 0x457   : > { %v3590_v40 = vmax.f32 %v3388_v50, 0.0  ;;  %v4369_v37 = vmax.f32 %v3951_v55, 0.0 }
 0x458   : > { %v4368_v28 = vmax.f32 %v3946_v22, 0.0  ;;  %v3392_v18 = vpop.f32.mrb[92].mxu0 }
 0x459   : > { %v3393_v47 = vadd.f32 %v8029_v61, %v3392_v18  ;;  %v3394_v10 = vpop.f32.mrb[93].mxu0  ;;  %6097 = vmatmul.mubr.f32.gmra.mrb[104].mxu1 %v3590_v40  ;;  %v4625_v63 = vmul.f32 %v4497_v44, %v4369_v37 }
 0x45a   : > { %v4624_v57 = vmul.f32 %v4496_v7, %v4368_v28  ;;  %v4503_v10 = vld [vmem:[%s7925_s25 + $0x1e8] sm:$0xff] }
 0x45b   : > { %v3591_v52 = vmax.f32 %v3393_v47, 0.0  ;;  %v4716_v60 = vpop.xlane.xlu1 %4715  ;;  %v4864_v6 = vsel %vm4698_vm2, %v4625_v63, 0.0 }
 0x45c   : > { %5089 = vst.msk [vmem:[%s8140_s4 + $0x28] sm:$0xff] %vm5083_vm3, %v4716_v60  ;;  %v3397_v45 = vpop.f32.mrb[94].mxu0  ;;  %4865 = vadd.xlane.f32.xlu1 %v4864_v6  ;;  %v6020_v34 = vpop.f32.mrb[52].mxu1  ;;  %v4861_v17 = vsel %vm4698_vm2, %v4624_v57, 0.0 }
 0x45d   : > { %v3398_v38 = vadd.f32 %v8029_v61, %v3397_v45  ;;  %v3961_v23 = vadd.f32 %v8120_v11, %v6020_v34  ;;  %v4713_v27 = vpop.xlane.xlu0 %4712  ;;  %v3399_v2 = vpop.f32.mrb[95].mxu0  ;;  %6099 = vmatprep.mubr.f32.mxu1 %v3591_v52  ;;  %4862 = vadd.xlane.f32.xlu0 %v4861_v17  ;;  %v4502_v45 = vld [vmem:[%s7925_s25 + $0x1e0] sm:$0xff] }
 0x45e   : > { %5088 = vst.msk [vmem:[%s8140_s4 + $0x20] sm:$0xff] %vm5083_vm3, %v4713_v27  ;;  %v3955_v4 = vpop.f32.mrb[53].mxu1 }
 0x45f   : > { %v3592_v49 = vmax.f32 %v3398_v38, 0.0  ;;  %v4371_v43 = vmax.f32 %v3961_v23, 0.0  ;;  %v3956_v25 = vadd.f32 %v8120_v11, %v3955_v4  ;;  %v4722_v56 = vpop.xlane.xlu1 %4721 }
 0x460   : > { %5091 = vst.msk [vmem:[%s8140_s4 + $0x38] sm:$0xff] %vm5083_vm3, %v4722_v56  ;;  %v3402_v62 = vpop.f32.mrb[96].mxu0 }
 0x461   : > { %v4370_v53 = vmax.f32 %v3956_v25, 0.0  ;;  %v3403_v33 = vadd.f32 %v8029_v61, %v3402_v62  ;;  %v4719_v9 = vpop.xlane.xlu0 %4718  ;;  %v3404_v30 = vpop.f32.mrb[97].mxu0  ;;  %6100 = vmatmul.mubr.f32.gmra.mrb[106].mxu1 %v3592_v49  ;;  %v4627_v59 = vmul.f32 %v4499_v54, %v4371_v43 }
 0x462   : > { %5090 = vst.msk [vmem:[%s8140_s4 + $0x30] sm:$0xff] %vm5083_vm3, %v4719_v9  ;;  %v4505_v30 = vld [vmem:[%s7925_s25 + $0x1f8] sm:$0xff] }
 0x463   : > { %v3593_v0 = vmax.f32 %v3403_v33, 0.0  ;;  %v4728_v12 = vpop.xlane.xlu1 %4727  ;;  %v4870_v29 = vsel %vm4698_vm2, %v4627_v59, 0.0  ;;  %v4626_v35 = vmul.f32 %v4498_v15, %v4370_v53 }
 0x464   : > { %5093 = vst.msk [vmem:[%s8140_s4 + $0x48] sm:$0xff] %vm5083_vm3, %v4728_v12  ;;  %v3407_v14 = vpop.f32.mrb[98].mxu0  ;;  %4871 = vadd.xlane.f32.xlu1 %v4870_v29  ;;  %v6023_v42 = vpop.f32.mrb[54].mxu1 }
 0x465   : > { %v3408_v19 = vadd.f32 %v8029_v61, %v3407_v14  ;;  %v3971_v8 = vadd.f32 %v8120_v11, %v6023_v42  ;;  %v4725_v51 = vpop.xlane.xlu0 %4724  ;;  %v3409_v3 = vpop.f32.mrb[99].mxu0  ;;  %6102 = vmatprep.mubr.f32.mxu1 %v3593_v0  ;;  %v4867_v58 = vsel %vm4698_vm2, %v4626_v35, 0.0  ;;  %v4504_v14 = vld [vmem:[%s7925_s25 + $0x1f0] sm:$0xff] }
 0x466   : > { %5092 = vst.msk [vmem:[%s8140_s4 + $0x40] sm:$0xff] %vm5083_vm3, %v4725_v51  ;;  %v3965_v41 = vpop.f32.mrb[55].mxu1  ;;  %4868 = vadd.xlane.f32.xlu0 %v4867_v58 }
 0x467   : > { %v3594_v26 = vmax.f32 %v3408_v19, 0.0  ;;  %v4373_v31 = vmax.f32 %v3971_v8, 0.0  ;;  %v3966_v32 = vadd.f32 %v8120_v11, %v3965_v41  ;;  %v4734_v36 = vpop.xlane.xlu1 %4733 }
 0x468   : > { %5095 = vst.msk [vmem:[%s8140_s4 + $0x58] sm:$0xff] %vm5083_vm3, %v4734_v36  ;;  %v3412_v1 = vpop.f32.mrb[100].mxu0 }
 0x469   : > { %v4372_v21 = vmax.f32 %v3966_v32, 0.0  ;;  %v3413_v39 = vadd.f32 %v8029_v61, %v3412_v1  ;;  %v4731_v20 = vpop.xlane.xlu0 %4730  ;;  %v3414_v13 = vpop.f32.mrb[101].mxu0  ;;  %6103 = vmatmul.mubr.f32.gmra.mrb[108].mxu1 %v3594_v26  ;;  %v4629_v16 = vmul.f32 %v4501_v48, %v4373_v31 }
 0x46a   : > { %5094 = vst.msk [vmem:[%s8140_s4 + $0x50] sm:$0xff] %vm5083_vm3, %v4731_v20  ;;  %v4507_v13 = vld [vmem:[%s7925_s25 + $0x208] sm:$0xff] }
 0x46b   : > { %v3595_v50 = vmax.f32 %v3413_v39, 0.0  ;;  %v4740_v55 = vpop.xlane.xlu1 %4739  ;;  %v4876_v5 = vsel %vm4698_vm2, %v4629_v16, 0.0  ;;  %v4628_v24 = vmul.f32 %v4500_v46, %v4372_v21 }
 0x46c   : > { %5097 = vst.msk [vmem:[%s8140_s4 + $0x68] sm:$0xff] %vm5083_vm3, %v4740_v55  ;;  %v3417_v22 = vpop.f32.mrb[102].mxu0  ;;  %4877 = vadd.xlane.f32.xlu1 %v4876_v5  ;;  %v6026_v44 = vpop.f32.mrb[56].mxu1 }
 0x46d   : > { %v3418_v40 = vadd.f32 %v8029_v61, %v3417_v22  ;;  %v3981_v37 = vadd.f32 %v8120_v11, %v6026_v44  ;;  %v4737_v7 = vpop.xlane.xlu0 %4736  ;;  %v3419_v28 = vpop.f32.mrb[103].mxu0  ;;  %6105 = vmatprep.mubr.f32.mxu1 %v3595_v50  ;;  %v4873_v18 = vsel %vm4698_vm2, %v4628_v24, 0.0  ;;  %v4506_v22 = vld [vmem:[%s7925_s25 + $0x200] sm:$0xff] }
 0x46e   : > { %5096 = vst.msk [vmem:[%s8140_s4 + $0x60] sm:$0xff] %vm5083_vm3, %v4737_v7  ;;  %v3975_v47 = vpop.f32.mrb[57].mxu1  ;;  %4874 = vadd.xlane.f32.xlu0 %v4873_v18 }
 0x46f   : > { %v3596_v63 = vmax.f32 %v3418_v40, 0.0  ;;  %v4375_v57 = vmax.f32 %v3981_v37, 0.0  ;;  %v3976_v52 = vadd.f32 %v8120_v11, %v3975_v47  ;;  %v4746_v60 = vpop.xlane.xlu1 %4745 }
 0x470   : > { %5099 = vst.msk [vmem:[%s8140_s4 + $0x78] sm:$0xff] %vm5083_vm3, %v4746_v60  ;;  %v3422_v6 = vpop.f32.mrb[104].mxu0 }
 0x471   : > { %v4374_v34 = vmax.f32 %v3976_v52, 0.0  ;;  %v3423_v17 = vadd.f32 %v8029_v61, %v3422_v6  ;;  %v4743_v38 = vpop.xlane.xlu0 %4742  ;;  %v3424_v23 = vpop.f32.mrb[105].mxu0  ;;  %6106 = vmatmul.mubr.f32.gmra.mrb[110].mxu1 %v3596_v63  ;;  %v4631_v27 = vmul.f32 %v4503_v10, %v4375_v57 }
 0x472   : > { %5098 = vst.msk [vmem:[%s8140_s4 + $0x70] sm:$0xff] %vm5083_vm3, %v4743_v38  ;;  %v4509_v23 = vld [vmem:[%s7925_s25 + $0x218] sm:$0xff] }
 0x473   : > { %v3597_v2 = vmax.f32 %v3423_v17, 0.0  ;;  %v4752_v4 = vpop.xlane.xlu1 %4751  ;;  %v4882_v54 = vsel %vm4698_vm2, %v4631_v27, 0.0  ;;  %v4630_v49 = vmul.f32 %v4502_v45, %v4374_v34 }
 0x474   : > { %5101 = vst.msk [vmem:[%s8140_s4 + $0x88] sm:$0xff] %vm5083_vm3, %v4752_v4  ;;  %v3427_v43 = vpop.f32.mrb[106].mxu0  ;;  %4883 = vadd.xlane.f32.xlu1 %v4882_v54  ;;  %v6029_v25 = vpop.f32.mrb[58].mxu1 }
 0x475   : > { %v3428_v56 = vadd.f32 %v8029_v61, %v3427_v43  ;;  %v3991_v62 = vadd.f32 %v8120_v11, %v6029_v25  ;;  %v4749_v15 = vpop.xlane.xlu0 %4748  ;;  %v3429_v53 = vpop.f32.mrb[107].mxu0  ;;  %6108 = vmatprep.mubr.f32.mxu1 %v3597_v2  ;;  %v4879_v33 = vsel %vm4698_vm2, %v4630_v49, 0.0  ;;  %v4508_v43 = vld [vmem:[%s7925_s25 + $0x210] sm:$0xff] }
 0x476   : > { %5100 = vst.msk [vmem:[%s8140_s4 + $0x80] sm:$0xff] %vm5083_vm3, %v4749_v15  ;;  %v3985_v9 = vpop.f32.mrb[59].mxu1  ;;  %4880 = vadd.xlane.f32.xlu0 %v4879_v33 }
 0x477   : > { %v3598_v59 = vmax.f32 %v3428_v56, 0.0  ;;  %v4377_v0 = vmax.f32 %v3991_v62, 0.0  ;;  %v3986_v12 = vadd.f32 %v8120_v11, %v3985_v9  ;;  %v4758_v29 = vpop.xlane.xlu1 %4757 }
 0x478   : > { %5103 = vst.msk [vmem:[%s8140_s4 + $0x98] sm:$0xff] %vm5083_vm3, %v4758_v29  ;;  %v3432_v35 = vpop.f32.mrb[108].mxu0 }
 0x479   : > { %v4376_v42 = vmax.f32 %v3986_v12, 0.0  ;;  %v3433_v19 = vadd.f32 %v8029_v61, %v3432_v35  ;;  %v4755_v8 = vpop.xlane.xlu0 %4754  ;;  %v3434_v51 = vpop.f32.mrb[109].mxu0  ;;  %6109 = vmatmul.mubr.f32.gmra.mrb[112].mxu1 %v3598_v59  ;;  %v4633_v3 = vmul.f32 %v4505_v30, %v4377_v0 }
 0x47a   : > { %5102 = vst.msk [vmem:[%s8140_s4 + $0x90] sm:$0xff] %vm5083_vm3, %v4755_v8  ;;  %v4511_v51 = vld [vmem:[%s7925_s25 + $0x228] sm:$0xff] }
 0x47b   : > { %v3599_v58 = vmax.f32 %v3433_v19, 0.0  ;;  %v4764_v41 = vpop.xlane.xlu1 %4763  ;;  %v4888_v48 = vsel %vm4698_vm2, %v4633_v3, 0.0  ;;  %v4632_v26 = vmul.f32 %v4504_v14, %v4376_v42 }
 0x47c   : > { %5105 = vst.msk [vmem:[%s8140_s4 + $0xa8] sm:$0xff] %vm5083_vm3, %v4764_v41  ;;  %v3437_v31 = vpop.f32.mrb[110].mxu0  ;;  %4889 = vadd.xlane.f32.xlu1 %v4888_v48  ;;  %v6032_v32 = vpop.f32.mrb[60].mxu1 }
 0x47d   : > { %v3438_v36 = vadd.f32 %v8029_v61, %v3437_v31  ;;  %v4001_v1 = vadd.f32 %v8120_v11, %v6032_v32  ;;  %v4761_v46 = vpop.xlane.xlu0 %4760  ;;  %v3439_v21 = vpop.f32.mrb[111].mxu0  ;;  %6111 = vmatprep.mubr.f32.mxu1 %v3599_v58  ;;  %v4885_v39 = vsel %vm4698_vm2, %v4632_v26, 0.0  ;;  %v4510_v26 = vld [vmem:[%s7925_s25 + $0x220] sm:$0xff]  ;;  %v6277_v32 = vld [vmem:[%s8654_s2 + $0x352] ss:$0 sm:$0xff] }
 0x47e   : > { %5104 = vst.msk [vmem:[%s8140_s4 + $0xa0] sm:$0xff] %vm5083_vm3, %v4761_v46  ;;  %v3995_v20 = vpop.f32.mrb[61].mxu1  ;;  %4886 = vadd.xlane.f32.xlu0 %v4885_v39 }
 0x47f   : > { %v3600_v16 = vmax.f32 %v3438_v36, 0.0  ;;  %v4379_v50 = vmax.f32 %v4001_v1, 0.0  ;;  %v3996_v55 = vadd.f32 %v8120_v11, %v3995_v20  ;;  %v4770_v5 = vpop.xlane.xlu1 %4769 }
 0x480   : > { %5107 = vst.msk [vmem:[%s8140_s4 + $0xb8] sm:$0xff] %vm5083_vm3, %v4770_v5  ;;  %v3442_v24 = vpop.f32.mrb[112].mxu0 }
 0x481   : > { %v4378_v44 = vmax.f32 %v3996_v55, 0.0  ;;  %v3443_v40 = vadd.f32 %v8029_v61, %v3442_v24  ;;  %v4767_v37 = vpop.xlane.xlu0 %4766  ;;  %v3444_v7 = vpop.f32.mrb[113].mxu0  ;;  %6112 = vmatmul.mubr.f32.gmra.mrb[114].mxu1 %v3600_v16  ;;  %v4635_v28 = vmul.f32 %v4507_v13, %v4379_v50 }
 0x482   : > { %5106 = vst.msk [vmem:[%s8140_s4 + $0xb0] sm:$0xff] %vm5083_vm3, %v4767_v37  ;;  %v4513_v7 = vld [vmem:[%s7925_s25 + $0x238] sm:$0xff] }
 0x483   : > { %v3601_v18 = vmax.f32 %v3443_v40, 0.0  ;;  %v4776_v47 = vpop.xlane.xlu1 %4775  ;;  %v4894_v10 = vsel %vm4698_vm2, %v4635_v28, 0.0  ;;  %v4634_v63 = vmul.f32 %v4506_v22, %v4378_v44 }
 0x484   : > { %5109 = vst.msk [vmem:[%s8140_s4 + $0xc8] sm:$0xff] %vm5083_vm3, %v4776_v47  ;;  %v3447_v57 = vpop.f32.mrb[114].mxu0  ;;  %4895 = vadd.xlane.f32.xlu1 %v4894_v10  ;;  %v6035_v52 = vpop.f32.mrb[62].mxu1 }
 0x485   : > { %v3448_v60 = vadd.f32 %v8029_v61, %v3447_v57  ;;  %v4011_v6 = vadd.f32 %v8120_v11, %v6035_v52  ;;  %v4773_v45 = vpop.xlane.xlu0 %4772  ;;  %v3449_v34 = vpop.f32.mrb[115].mxu0  ;;  %6114 = vmatprep.mubr.f32.mxu1 %v3601_v18  ;;  %v4891_v17 = vsel %vm4698_vm2, %v4634_v63, 0.0  ;;  %v4512_v63 = vld [vmem:[%s7925_s25 + $0x230] sm:$0xff] }
 0x486   : > { %5108 = vst.msk [vmem:[%s8140_s4 + $0xc0] sm:$0xff] %vm5083_vm3, %v4773_v45  ;;  %v4005_v38 = vpop.f32.mrb[63].mxu1  ;;  %4892 = vadd.xlane.f32.xlu0 %v4891_v17 }
 0x487   : > { %v3602_v27 = vmax.f32 %v3448_v60, 0.0  ;;  %v4381_v2 = vmax.f32 %v4011_v6, 0.0  ;;  %v4006_v4 = vadd.f32 %v8120_v11, %v4005_v38  ;;  %v4782_v54 = vpop.xlane.xlu1 %4781 }
 0x488   : > { %5111 = vst.msk [vmem:[%s8140_s4 + $0xd8] sm:$0xff] %vm5083_vm3, %v4782_v54  ;;  %v3452_v49 = vpop.f32.mrb[116].mxu0 }
 0x489   : > { %v4380_v25 = vmax.f32 %v4006_v4, 0.0  ;;  %v3453_v56 = vadd.f32 %v8029_v61, %v3452_v49  ;;  %v4779_v62 = vpop.xlane.xlu0 %4778  ;;  %v3454_v15 = vpop.f32.mrb[117].mxu0  ;;  %6115 = vmatmul.mubr.f32.gmra.mrb[116].mxu1 %v3602_v27  ;;  %v4637_v53 = vmul.f32 %v4509_v23, %v4381_v2 }
 0x48a   : > { %5110 = vst.msk [vmem:[%s8140_s4 + $0xd0] sm:$0xff] %vm5083_vm3, %v4779_v62  ;;  %v4515_v62 = vld [vmem:[%s7925_s25 + $0x248] sm:$0xff] }
 0x48b   : > { %v3603_v33 = vmax.f32 %v3453_v56, 0.0  ;;  %v4788_v9 = vpop.xlane.xlu1 %4787  ;;  %v4900_v30 = vsel %vm4698_vm2, %v4637_v53, 0.0  ;;  %v4636_v59 = vmul.f32 %v4508_v43, %v4380_v25 }
 0x48c   : > { %5113 = vst.msk [vmem:[%s8140_s4 + $0xe8] sm:$0xff] %vm5083_vm3, %v4788_v9  ;;  %v3457_v0 = vpop.f32.mrb[118].mxu0  ;;  %4901 = vadd.xlane.f32.xlu1 %v4900_v30  ;;  %v6038_v12 = vpop.f32.mrb[64].mxu1 }
 0x48d   : > { %v3458_v29 = vadd.f32 %v8029_v61, %v3457_v0  ;;  %v4021_v35 = vadd.f32 %v8120_v11, %v6038_v12  ;;  %v4785_v14 = vpop.xlane.xlu0 %4784  ;;  %v3459_v42 = vpop.f32.mrb[119].mxu0  ;;  %6117 = vmatprep.mubr.f32.mxu1 %v3603_v33  ;;  %v4897_v19 = vsel %vm4698_vm2, %v4636_v59, 0.0  ;;  %v4514_v33 = vld [vmem:[%s7925_s25 + $0x240] sm:$0xff] }
 0x48e   : > { %5112 = vst.msk [vmem:[%s8140_s4 + $0xe0] sm:$0xff] %vm5083_vm3, %v4785_v14  ;;  %v4015_v8 = vpop.f32.mrb[65].mxu1  ;;  %4898 = vadd.xlane.f32.xlu0 %v4897_v19  ;;  %v4443_v19 = vld [vmem:[%s7925_s25 + $0x8] sm:$0xff] }
 0x48f   : > { %v3604_v3 = vmax.f32 %v3458_v29, 0.0  ;;  %v4383_v58 = vmax.f32 %v4021_v35, 0.0  ;;  %v4016_v41 = vadd.f32 %v8120_v11, %v4015_v8  ;;  %v4794_v48 = vpop.xlane.xlu1 %4793 }
 0x490   : > { %5115 = vst.msk [vmem:[%s8140_s4 + $0xf8] sm:$0xff] %vm5083_vm3, %v4794_v48  ;;  %v3462_v61 = vpop.f32.mrb[120].mxu0 }
 0x491   : > { %v4382_v31 = vmax.f32 %v4016_v41, 0.0  ;;  %v3463_v36 = vadd.f32 %v6277_v32, %v3462_v61  ;;  %v4791_v1 = vpop.xlane.xlu0 %4790  ;;  %v3464_v46 = vpop.f32.mrb[121].mxu0  ;;  %6118 = vmatmul.mubr.f32.gmra.mrb[118].mxu1 %v3604_v3  ;;  %v4639_v21 = vmul.f32 %v4511_v51, %v4383_v58 }
 0x492   : > { %5114 = vst.msk [vmem:[%s8140_s4 + $0xf0] sm:$0xff] %vm5083_vm3, %v4791_v1  ;;  %v4442_v1 = vld [vmem:[%s7925_s25] sm:$0xff] }
 0x493   : > { %v3605_v39 = vmax.f32 %v3463_v36, 0.0  ;;  %v4800_v20 = vpop.xlane.xlu1 %4799  ;;  %v4906_v13 = vsel %vm4698_vm2, %v4639_v21, 0.0  ;;  %v4638_v16 = vmul.f32 %v4510_v26, %v4382_v31  ;;  %v4445_v21 = vld [vmem:[%s7925_s25 + $0x18] sm:$0xff] }
 0x494   : > { %5117 = vst.msk [vmem:[%s8140_s4 + $0x108] sm:$0xff] %vm5083_vm3, %v4800_v20  ;;  %v3467_v50 = vpop.f32.mrb[122].mxu0  ;;  %4907 = vadd.xlane.f32.xlu1 %v4906_v13  ;;  %v6041_v55 = vpop.f32.mrb[66].mxu1 }
 0x495   : > { %v3468_v5 = vadd.f32 %v6277_v32, %v3467_v50  ;;  %v4031_v24 = vadd.f32 %v8120_v11, %v6041_v55  ;;  %v4797_v22 = vpop.xlane.xlu0 %4796  ;;  %v3469_v44 = vpop.f32.mrb[123].mxu0  ;;  %6120 = vmatprep.mubr.f32.mxu1 %v3605_v39  ;;  %v4903_v40 = vsel %vm4698_vm2, %v4638_v16, 0.0 }
 0x496   : > { %5116 = vst.msk [vmem:[%s8140_s4 + $0x100] sm:$0xff] %vm5083_vm3, %v4797_v22  ;;  %v4025_v37 = vpop.f32.mrb[67].mxu1  ;;  %4904 = vadd.xlane.f32.xlu0 %v4903_v40  ;;  %v4516_v44 = vld [vmem:[%s7925_s25 + $0x250] sm:$0xff] }
 0x497   : > { %v3606_v28 = vmax.f32 %v3468_v5, 0.0  ;;  %v4385_v18 = vmax.f32 %v4031_v24, 0.0  ;;  %v4026_v47 = vadd.f32 %v8120_v11, %v4025_v37  ;;  %v4517_v5 = vld [vmem:[%s7925_s25 + $0x258] sm:$0xff] }
 0x498   : > { %v3472_v10 = vpop.f32.mrb[124].mxu0 }
 0x499   : > { %v4384_v57 = vmax.f32 %v4026_v47, 0.0  ;;  %v3473_v52 = vadd.f32 %v6277_v32, %v3472_v10  ;;  %v3474_v60 = vpop.f32.mrb[125].mxu0  ;;  %6121 = vmatmul.mubr.f32.gmra.mrb[120].mxu1 %v3606_v28  ;;  %v4806_v6 = vpop.xlane.xlu1 %4805  ;;  %v4641_v45 = vmul.f32 %v4513_v7, %v4385_v18 }
 0x49a   : > { %5119 = vst.msk [vmem:[%s8140_s4 + $0x118] sm:$0xff] %vm5083_vm3, %v4806_v6  ;;  %v4803_v34 = vpop.xlane.xlu0 %4802 }
 0x49b   : > { %v3607_v17 = vmax.f32 %v3473_v52, 0.0  ;;  %5118 = vst.msk [vmem:[%s8140_s4 + $0x110] sm:$0xff] %vm5083_vm3, %v4803_v34  ;;  %v4912_v38 = vsel %vm4698_vm2, %v4641_v45, 0.0  ;;  %v4640_v23 = vmul.f32 %v4512_v63, %v4384_v57  ;;  %v4444_v63 = vld [vmem:[%s7925_s25 + $0x10] sm:$0xff] }
 0x49c   : > { %v3477_v27 = vpop.f32.mrb[126].mxu0  ;;  %4913 = vadd.xlane.f32.xlu1 %v4912_v38  ;;  %v6044_v2 = vpop.f32.mrb[68].mxu1 }
 0x49d   : > { %v3478_v4 = vadd.f32 %v6277_v32, %v3477_v27  ;;  %v4041_v54 = vadd.f32 %v8120_v11, %v6044_v2  ;;  %v3479_v49 = vpop.f32.mrb[127].mxu0  ;;  %v4035_v43 = vpop.f32.mrb[69].mxu1  ;;  %6123 = vmatprep.mubr.f32.mxu1 %v3607_v17  ;;  %v4909_v25 = vsel %vm4698_vm2, %v4640_v23, 0.0  ;;  %v4518_v17 = vld [vmem:[%s7925_s25 + $0x260] sm:$0xff]  ;;  %v4519_v27 = vld [vmem:[%s7925_s25 + $0x268] sm:$0xff] }
 0x49e   : > { %v4036_v56 = vadd.f32 %v8120_v11, %v4035_v43  ;;  %4910 = vadd.xlane.f32.xlu0 %v4909_v25 }
 0x49f   : > { %v3608_v15 = vmax.f32 %v3478_v4, 0.0  ;;  %v4387_v53 = vmax.f32 %v4041_v54, 0.0 }
 0x4a0   : > { %v4386_v9 = vmax.f32 %v4036_v56, 0.0  ;;  %v5936_v30 = vpop.f32.mrb[128].mxu0 }
 0x4a1   : > { %v3681_v59 = vadd.f32 %v8120_v11, %v5936_v30  ;;  %6124 = vmatmul.mubr.f32.gmra.mrb[122].mxu1 %v3608_v15  ;;  %v4812_v0 = vpop.xlane.xlu1 %4811  ;;  %v3675_v12 = vpop.f32.mrb[129].mxu0  ;;  %v4643_v29 = vmul.f32 %v4515_v62, %v4387_v53 }
 0x4a2   : > { %5121 = vst.msk [vmem:[%s8140_s4 + $0x128] sm:$0xff] %vm5083_vm3, %v4812_v0  ;;  %v3676_v35 = vadd.f32 %v8120_v11, %v3675_v12  ;;  %v4809_v14 = vpop.xlane.xlu0 %4808  ;;  %v4642_v42 = vmul.f32 %v4514_v33, %v4386_v9  ;;  %v4521_v33 = vld [vmem:[%s7925_s25 + $0x278] sm:$0xff] }
 0x4a3   : > { %v4315_v8 = vmax.f32 %v3681_v59, 0.0  ;;  %5120 = vst.msk [vmem:[%s8140_s4 + $0x120] sm:$0xff] %vm5083_vm3, %v4809_v14  ;;  %v4918_v51 = vsel %vm4698_vm2, %v4643_v29, 0.0  ;;  %v4520_v59 = vld [vmem:[%s7925_s25 + $0x270] sm:$0xff] }
 0x4a4   : > { %v4314_v3 = vmax.f32 %v3676_v35, 0.0  ;;  %4919 = vadd.xlane.f32.xlu1 %v4918_v51  ;;  %v5939_v58 = vpop.f32.mrb[130].mxu0  ;;  %v6047_v41 = vpop.f32.mrb[70].mxu1  ;;  %v4915_v48 = vsel %vm4698_vm2, %v4642_v42, 0.0 }
 0x4a5   : > { %v3691_v61 = vadd.f32 %v8120_v11, %v5939_v58  ;;  %v4051_v26 = vadd.f32 %v8120_v11, %v6047_v41  ;;  %v4045_v31 = vpop.f32.mrb[71].mxu1  ;;  %4916 = vadd.xlane.f32.xlu0 %v4915_v48  ;;  %v3685_v32 = vpop.f32.mrb[131].mxu0  ;;  %v4571_v36 = vmul.f32 %v4443_v19, %v4315_v8  ;;  %v4523_v41 = vld [vmem:[%s7925_s25 + $0x288] sm:$0xff] }
 0x4a6   : > { %v4046_v46 = vadd.f32 %v8120_v11, %v4045_v31  ;;  %v3686_v13 = vadd.f32 %v8120_v11, %v3685_v32  ;;  %v4570_v55 = vmul.f32 %v4442_v1, %v4314_v3 }
 0x4a7   : > { %v4317_v39 = vmax.f32 %v3691_v61, 0.0  ;;  %v4389_v20 = vmax.f32 %v4051_v26, 0.0  ;;  %v4702_v16 = vsel %vm4698_vm2, %v4571_v36, 0.0  ;;  %v4522_v61 = vld [vmem:[%s7925_s25 + $0x280] sm:$0xff] }
 0x4a8   : > { %v4388_v50 = vmax.f32 %v4046_v46, 0.0  ;;  %v4316_v37 = vmax.f32 %v3686_v13, 0.0  ;;  %v4699_v47 = vsel %vm4698_vm2, %v4570_v55, 0.0 }
 0x4a9   : > { %v4818_v24 = vpop.xlane.xlu1 %4817  ;;  %4703 = vadd.xlane.f32.xlu0 %v4702_v16  ;;  %v4573_v22 = vmul.f32 %v4445_v21, %v4317_v39  ;;  %v4645_v28 = vmul.f32 %v4517_v5, %v4389_v20  ;;  %v4524_v5 = vld [vmem:[%s7925_s25 + $0x290] sm:$0xff] }
 0x4aa   : > { %5123 = vst.msk [vmem:[%s8140_s4 + $0x138] sm:$0xff] %vm5083_vm3, %v4818_v24  ;;  %v4815_v40 = vpop.xlane.xlu0 %4814  ;;  %v4644_v10 = vmul.f32 %v4516_v44, %v4388_v50  ;;  %v4572_v34 = vmul.f32 %v4444_v63, %v4316_v37  ;;  %v4525_v50 = vld [vmem:[%s7925_s25 + $0x298] sm:$0xff] }
 0x4ab   : > { %5122 = vst.msk [vmem:[%s8140_s4 + $0x130] sm:$0xff] %vm5083_vm3, %v4815_v40  ;;  %v4708_v7 = vsel %vm4698_vm2, %v4573_v22, 0.0  ;;  %v4924_v45 = vsel %vm4698_vm2, %v4645_v28, 0.0 }
 0x4ac   : > { %v6050_v18 = vpop.f32.mrb[72].mxu1  ;;  %4709 = vadd.xlane.f32.xlu1 %v4708_v7  ;;  %v4921_v23 = vsel %vm4698_vm2, %v4644_v10, 0.0  ;;  %v4705_v49 = vsel %vm4698_vm2, %v4572_v34, 0.0 }
 0x4ad   : > { %v4061_v57 = vadd.f32 %v8120_v11, %v6050_v18  ;;  %v4055_v52 = vpop.f32.mrb[73].mxu1  ;;  %4700 = vadd.xlane.f32.xlu0 %v4699_v47 }
 0x4ae   : > { %v4056_v60 = vadd.f32 %v8120_v11, %v4055_v52 }
 0x4af   : > { %v4391_v6 = vmax.f32 %v4061_v57, 0.0  ;;  %v4527_v57 = vld [vmem:[%s7925_s25 + $0x2a8] sm:$0xff] }
 0x4b0   : > { %v4390_v38 = vmax.f32 %v4056_v60, 0.0  ;;  %4925 = vadd.xlane.f32.xlu1 %v4924_v45  ;;  %v4526_v60 = vld [vmem:[%s7925_s25 + $0x2a0] sm:$0xff] }
 0x4b1   : > { %v4824_v2 = vpop.xlane.xlu1 %4823  ;;  %4922 = vadd.xlane.f32.xlu0 %v4921_v23  ;;  %v4647_v43 = vmul.f32 %v4519_v27, %v4391_v6 }
 0x4b2   : > { %5125 = vst.msk [vmem:[%s8140_s4 + $0x148] sm:$0xff] %vm5083_vm3, %v4824_v2  ;;  %v4821_v4 = vpop.xlane.xlu0 %4820  ;;  %v4646_v54 = vmul.f32 %v4518_v17, %v4390_v38 }
 0x4b3   : > { %5124 = vst.msk [vmem:[%s8140_s4 + $0x140] sm:$0xff] %vm5083_vm3, %v4821_v4  ;;  %v4930_v30 = vsel %vm4698_vm2, %v4647_v43, 0.0  ;;  %v4529_v43 = vld [vmem:[%s7925_s25 + $0x2b8] sm:$0xff] }
 0x4b4   : > { %v6053_v25 = vpop.f32.mrb[74].mxu1  ;;  %4706 = vadd.xlane.f32.xlu1 %v4705_v49  ;;  %v4927_v56 = vsel %vm4698_vm2, %v4646_v54, 0.0 }
 0x4b5   : > { %v4071_v62 = vadd.f32 %v8120_v11, %v6053_v25  ;;  %v4065_v15 = vpop.f32.mrb[75].mxu1  ;;  %4928 = vadd.xlane.f32.xlu0 %v4927_v56  ;;  %v4528_v56 = vld [vmem:[%s7925_s25 + $0x2b0] sm:$0xff] }
 0x4b6   : > { %v4066_v53 = vadd.f32 %v8120_v11, %v4065_v15 }
 0x4b7   : > { %v4393_v9 = vmax.f32 %v4071_v62, 0.0 }
 0x4b8   : > { %v4392_v0 = vmax.f32 %v4066_v53, 0.0  ;;  %4931 = vadd.xlane.f32.xlu1 %v4930_v30 }
 0x4b9   : > { %v4830_v12 = vpop.xlane.xlu1 %4829  ;;  %v4649_v29 = vmul.f32 %v4521_v33, %v4393_v9 }
 0x4ba   : > { %5127 = vst.msk [vmem:[%s8140_s4 + $0x158] sm:$0xff] %vm5083_vm3, %v4830_v12  ;;  %v4827_v35 = vpop.xlane.xlu0 %4826  ;;  %v4648_v14 = vmul.f32 %v4520_v59, %v4392_v0 }
 0x4bb   : > { %5126 = vst.msk [vmem:[%s8140_s4 + $0x150] sm:$0xff] %vm5083_vm3, %v4827_v35  ;;  %v4936_v42 = vsel %vm4698_vm2, %v4649_v29, 0.0 }
 0x4bc   : > { %v6056_v19 = vpop.f32.mrb[76].mxu1  ;;  %4937 = vadd.xlane.f32.xlu1 %v4936_v42  ;;  %v4933_v8 = vsel %vm4698_vm2, %v4648_v14, 0.0  ;;  %v4531_v14 = vld [vmem:[%s7925_s25 + $0x2c8] sm:$0xff] }
 0x4bd   : > { %v4081_v51 = vadd.f32 %v8120_v11, %v6056_v19  ;;  %v4075_v3 = vpop.f32.mrb[77].mxu1  ;;  %4934 = vadd.xlane.f32.xlu0 %v4933_v8  ;;  %v4530_v19 = vld [vmem:[%s7925_s25 + $0x2c0] sm:$0xff] }
 0x4be   : > { %v4076_v58 = vadd.f32 %v8120_v11, %v4075_v3 }
 0x4bf   : > { %v4395_v48 = vmax.f32 %v4081_v51, 0.0 }
 0x4c0   : > { %v4394_v26 = vmax.f32 %v4076_v58, 0.0 }
 0x4c1   : > { %v4836_v31 = vpop.xlane.xlu1 %4835  ;;  %v4651_v32 = vmul.f32 %v4523_v41, %v4395_v48 }
 0x4c2   : > { %5129 = vst.msk [vmem:[%s8140_s4 + $0x168] sm:$0xff] %vm5083_vm3, %v4836_v31  ;;  %v4833_v36 = vpop.xlane.xlu0 %4832  ;;  %v4650_v1 = vmul.f32 %v4522_v61, %v4394_v26 }
 0x4c3   : > { %5128 = vst.msk [vmem:[%s8140_s4 + $0x160] sm:$0xff] %vm5083_vm3, %v4833_v36  ;;  %v4942_v46 = vsel %vm4698_vm2, %v4651_v32, 0.0 }
 0x4c4   : > { %v6059_v21 = vpop.f32.mrb[78].mxu1  ;;  %4943 = vadd.xlane.f32.xlu1 %v4942_v46  ;;  %v4939_v39 = vsel %vm4698_vm2, %v4650_v1, 0.0  ;;  %v4533_v1 = vld [vmem:[%s7925_s25 + $0x2d8] sm:$0xff] }
 0x4c5   : > { %v4091_v20 = vadd.f32 %v8120_v11, %v6059_v21  ;;  %v4085_v13 = vpop.f32.mrb[79].mxu1  ;;  %4940 = vadd.xlane.f32.xlu0 %v4939_v39  ;;  %v4532_v21 = vld [vmem:[%s7925_s25 + $0x2d0] sm:$0xff] }
 0x4c6   : > { %v4086_v16 = vadd.f32 %v8120_v11, %v4085_v13 }
 0x4c7   : > { %v4397_v55 = vmax.f32 %v4091_v20, 0.0 }
 0x4c8   : > { %v4396_v24 = vmax.f32 %v4086_v16, 0.0 }
 0x4c9   : > { %v4842_v22 = vpop.xlane.xlu1 %4841  ;;  %v4653_v44 = vmul.f32 %v4525_v50, %v4397_v55 }
 0x4ca   : > { %5131 = vst.msk [vmem:[%s8140_s4 + $0x178] sm:$0xff] %vm5083_vm3, %v4842_v22  ;;  %v4839_v40 = vpop.xlane.xlu0 %4838  ;;  %v4652_v37 = vmul.f32 %v4524_v5, %v4396_v24  ;;  %v8387_v24 = vld [vmem:[%s8654_s2 + $0x353] ss:$0 sm:$0xff] }
 0x4cb   : > { %5130 = vst.msk [vmem:[%s8140_s4 + $0x170] sm:$0xff] %vm5083_vm3, %v4839_v40  ;;  %v4948_v7 = vsel %vm4698_vm2, %v4653_v44, 0.0 }
 0x4cc   : > { %v6062_v28 = vpop.f32.mrb[80].mxu1  ;;  %4949 = vadd.xlane.f32.xlu1 %v4948_v7  ;;  %v4945_v18 = vsel %vm4698_vm2, %v4652_v37, 0.0  ;;  %v4535_v37 = vld [vmem:[%s7925_s25 + $0x2e8] sm:$0xff] }
 0x4cd   : > { %v4101_v47 = vadd.f32 %v8120_v11, %v6062_v28  ;;  %v4095_v10 = vpop.f32.mrb[81].mxu1  ;;  %4946 = vadd.xlane.f32.xlu0 %v4945_v18  ;;  %v4534_v28 = vld [vmem:[%s7925_s25 + $0x2e0] sm:$0xff] }
 0x4ce   : > { %v4096_v63 = vadd.f32 %v8120_v11, %v4095_v10 }
 0x4cf   : > { %v4399_v52 = vmax.f32 %v4101_v47, 0.0 }
 0x4d0   : > { %v4398_v6 = vmax.f32 %v4096_v63, 0.0 }
 0x4d1   : > { %v4848_v45 = vpop.xlane.xlu1 %4847  ;;  %v4655_v34 = vmul.f32 %v4527_v57, %v4399_v52 }
 0x4d2   : > { %5133 = vst.msk [vmem:[%s8140_s4 + $0x188] sm:$0xff] %vm5083_vm3, %v4848_v45  ;;  %v4845_v17 = vpop.xlane.xlu0 %4844  ;;  %v4654_v38 = vmul.f32 %v4526_v60, %v4398_v6 }
 0x4d3   : > { %5132 = vst.msk [vmem:[%s8140_s4 + $0x180] sm:$0xff] %vm5083_vm3, %v4845_v17  ;;  %v4954_v23 = vsel %vm4698_vm2, %v4655_v34, 0.0 }
 0x4d4   : > { %v6065_v27 = vpop.f32.mrb[82].mxu1  ;;  %4955 = vadd.xlane.f32.xlu1 %v4954_v23  ;;  %v4951_v2 = vsel %vm4698_vm2, %v4654_v38, 0.0  ;;  %v4537_v38 = vld [vmem:[%s7925_s25 + $0x2f8] sm:$0xff] }
 0x4d5   : > { %v4111_v4 = vadd.f32 %v8120_v11, %v6065_v27  ;;  %v4105_v54 = vpop.f32.mrb[83].mxu1  ;;  %4952 = vadd.xlane.f32.xlu0 %v4951_v2  ;;  %v4536_v27 = vld [vmem:[%s7925_s25 + $0x2f0] sm:$0xff] }
 0x4d6   : > { %v4106_v49 = vadd.f32 %v8120_v11, %v4105_v54 }
 0x4d7   : > { %v4401_v25 = vmax.f32 %v4111_v4, 0.0 }
 0x4d8   : > { %v4400_v62 = vmax.f32 %v4106_v49, 0.0 }
 0x4d9   : > { %v4854_v15 = vpop.xlane.xlu1 %4853  ;;  %v4657_v53 = vmul.f32 %v4529_v43, %v4401_v25 }
 0x4da   : > { %5135 = vst.msk [vmem:[%s8140_s4 + $0x198] sm:$0xff] %vm5083_vm3, %v4854_v15  ;;  %v4851_v33 = vpop.xlane.xlu0 %4850  ;;  %v4656_v9 = vmul.f32 %v4528_v56, %v4400_v62 }
 0x4db   : > { %5134 = vst.msk [vmem:[%s8140_s4 + $0x190] sm:$0xff] %vm5083_vm3, %v4851_v33  ;;  %v4960_v30 = vsel %vm4698_vm2, %v4657_v53, 0.0 }
 0x4dc   : > { %v6068_v59 = vpop.f32.mrb[84].mxu1  ;;  %4961 = vadd.xlane.f32.xlu1 %v4960_v30  ;;  %v4957_v0 = vsel %vm4698_vm2, %v4656_v9, 0.0  ;;  %v4539_v9 = vld [vmem:[%s7925_s25 + $0x308] sm:$0xff] }
 0x4dd   : > { %v4121_v12 = vadd.f32 %v8120_v11, %v6068_v59  ;;  %v4115_v29 = vpop.f32.mrb[85].mxu1  ;;  %4958 = vadd.xlane.f32.xlu0 %v4957_v0  ;;  %v4538_v59 = vld [vmem:[%s7925_s25 + $0x300] sm:$0xff] }
 0x4de   : > { %v4116_v35 = vadd.f32 %v8120_v11, %v4115_v29 }
 0x4df   : > { %v4403_v42 = vmax.f32 %v4121_v12, 0.0 }
 0x4e0   : > { %v4402_v8 = vmax.f32 %v4116_v35, 0.0 }
 0x4e1   : > { %v4860_v51 = vpop.xlane.xlu1 %4859  ;;  %v4659_v3 = vmul.f32 %v4531_v14, %v4403_v42 }
 0x4e2   : > { %5137 = vst.msk [vmem:[%s8140_s4 + $0x1a8] sm:$0xff] %vm5083_vm3, %v4860_v51  ;;  %v4857_v58 = vpop.xlane.xlu0 %4856  ;;  %v4658_v41 = vmul.f32 %v4530_v19, %v4402_v8 }
 0x4e3   : > { %5136 = vst.msk [vmem:[%s8140_s4 + $0x1a0] sm:$0xff] %vm5083_vm3, %v4857_v58  ;;  %v4966_v48 = vsel %vm4698_vm2, %v4659_v3, 0.0  ;;  %v4541_v58 = vld [vmem:[%s7925_s25 + $0x318] sm:$0xff] }
 0x4e4   : > { %v6071_v61 = vpop.f32.mrb[86].mxu1  ;;  %4967 = vadd.xlane.f32.xlu1 %v4966_v48  ;;  %v4963_v26 = vsel %vm4698_vm2, %v4658_v41, 0.0 }
 0x4e5   : > { %v4131_v31 = vadd.f32 %v8120_v11, %v6071_v61  ;;  %v4125_v32 = vpop.f32.mrb[87].mxu1  ;;  %4964 = vadd.xlane.f32.xlu0 %v4963_v26  ;;  %v4540_v61 = vld [vmem:[%s7925_s25 + $0x310] sm:$0xff] }
 0x4e6   : > { %v4126_v36 = vadd.f32 %v8120_v11, %v4125_v32 }
 0x4e7   : > { %v4405_v46 = vmax.f32 %v4131_v31, 0.0 }
 0x4e8   : > { %v4404_v39 = vmax.f32 %v4126_v36, 0.0 }
 0x4e9   : > { %v4866_v20 = vpop.xlane.xlu1 %4865  ;;  %v4661_v13 = vmul.f32 %v4533_v1, %v4405_v46 }
 0x4ea   : > { %5139 = vst.msk [vmem:[%s8140_s4 + $0x1b8] sm:$0xff] %vm5083_vm3, %v4866_v20  ;;  %v4863_v16 = vpop.xlane.xlu0 %4862  ;;  %v4660_v50 = vmul.f32 %v4532_v21, %v4404_v39 }
 0x4eb   : > { %5138 = vst.msk [vmem:[%s8140_s4 + $0x1b0] sm:$0xff] %vm5083_vm3, %v4863_v16  ;;  %v4972_v55 = vsel %vm4698_vm2, %v4661_v13, 0.0  ;;  %v4543_v16 = vld [vmem:[%s7925_s25 + $0x328] sm:$0xff] }
 0x4ec   : > { %v6074_v5 = vpop.f32.mrb[88].mxu1  ;;  %4973 = vadd.xlane.f32.xlu1 %v4972_v55  ;;  %v4969_v11 = vsel %vm4698_vm2, %v4660_v50, 0.0 }
 0x4ed   : > { %v4141_v22 = vadd.f32 %v8387_v24, %v6074_v5  ;;  %v4135_v44 = vpop.f32.mrb[89].mxu1  ;;  %4970 = vadd.xlane.f32.xlu0 %v4969_v11  ;;  %v4542_v5 = vld [vmem:[%s7925_s25 + $0x320] sm:$0xff] }
 0x4ee   : > { %v4136_v40 = vadd.f32 %v8387_v24, %v4135_v44 }
 0x4ef   : > { %v4407_v7 = vmax.f32 %v4141_v22, 0.0 }
 0x4f0   : > { %v4406_v18 = vmax.f32 %v4136_v40, 0.0 }
 0x4f1   : > { %v4872_v47 = vpop.xlane.xlu1 %4871  ;;  %v4663_v10 = vmul.f32 %v4535_v37, %v4407_v7 }
 0x4f2   : > { %5141 = vst.msk [vmem:[%s8140_s4 + $0x1c8] sm:$0xff] %vm5083_vm3, %v4872_v47  ;;  %v4662_v63 = vmul.f32 %v4534_v28, %v4406_v18 }
 0x4f3   : > { %v4869_v57 = vpop.xlane.xlu0 %4868  ;;  %v4978_v52 = vsel %vm4698_vm2, %v4663_v10, 0.0 }
 0x4f4   : > { %5140 = vst.msk [vmem:[%s8140_s4 + $0x1c0] sm:$0xff] %vm5083_vm3, %v4869_v57  ;;  %v6077_v60 = vpop.f32.mrb[90].mxu1  ;;  %4979 = vadd.xlane.f32.xlu1 %v4978_v52  ;;  %v4975_v6 = vsel %vm4698_vm2, %v4662_v63, 0.0  ;;  %v4545_v63 = vld [vmem:[%s7925_s25 + $0x338] sm:$0xff] }
 0x4f5   : > { %v4151_v45 = vadd.f32 %v8387_v24, %v6077_v60  ;;  %v4145_v34 = vpop.f32.mrb[91].mxu1  ;;  %4976 = vadd.xlane.f32.xlu0 %v4975_v6  ;;  %v4544_v60 = vld [vmem:[%s7925_s25 + $0x330] sm:$0xff] }
 0x4f6   : > { %v4146_v17 = vadd.f32 %v8387_v24, %v4145_v34 }
 0x4f7   : > { %v4409_v23 = vmax.f32 %v4151_v45, 0.0 }
 0x4f8   : > { %v4408_v2 = vmax.f32 %v4146_v17, 0.0 }
 0x4f9   : > { %v4878_v4 = vpop.xlane.xlu1 %4877  ;;  %v4665_v54 = vmul.f32 %v4537_v38, %v4409_v23 }
 0x4fa   : > { %5143 = vst.msk [vmem:[%s8140_s4 + $0x1d8] sm:$0xff] %vm5083_vm3, %v4878_v4  ;;  %v4664_v49 = vmul.f32 %v4536_v27, %v4408_v2 }
 0x4fb   : > { %v4875_v43 = vpop.xlane.xlu0 %4874  ;;  %v4984_v25 = vsel %vm4698_vm2, %v4665_v54, 0.0 }
 0x4fc   : > { %5142 = vst.msk [vmem:[%s8140_s4 + $0x1d0] sm:$0xff] %vm5083_vm3, %v4875_v43  ;;  %v6080_v56 = vpop.f32.mrb[92].mxu1  ;;  %4985 = vadd.xlane.f32.xlu1 %v4984_v25  ;;  %v4981_v62 = vsel %vm4698_vm2, %v4664_v49, 0.0  ;;  %v4547_v49 = vld [vmem:[%s7925_s25 + $0x348] sm:$0xff] }
 0x4fd   : > { %v4161_v15 = vadd.f32 %v8387_v24, %v6080_v56  ;;  %v4155_v53 = vpop.f32.mrb[93].mxu1  ;;  %4982 = vadd.xlane.f32.xlu0 %v4981_v62  ;;  %v4546_v56 = vld [vmem:[%s7925_s25 + $0x340] sm:$0xff] }
 0x4fe   : > { %v4156_v33 = vadd.f32 %v8387_v24, %v4155_v53 }
 0x4ff   : > { %v4411_v30 = vmax.f32 %v4161_v15, 0.0 }
 0x500   : > { %v4410_v0 = vmax.f32 %v4156_v33, 0.0 }
 0x501   : > { %v4884_v12 = vpop.xlane.xlu1 %4883  ;;  %v4667_v29 = vmul.f32 %v4539_v9, %v4411_v30 }
 0x502   : > { %5145 = vst.msk [vmem:[%s8140_s4 + $0x1e8] sm:$0xff] %vm5083_vm3, %v4884_v12  ;;  %v4666_v35 = vmul.f32 %v4538_v59, %v4410_v0 }
 0x503   : > { %v4881_v14 = vpop.xlane.xlu0 %4880  ;;  %v4990_v42 = vsel %vm4698_vm2, %v4667_v29, 0.0 }
 0x504   : > { %5144 = vst.msk [vmem:[%s8140_s4 + $0x1e0] sm:$0xff] %vm5083_vm3, %v4881_v14  ;;  %v6083_v19 = vpop.f32.mrb[94].mxu1  ;;  %4991 = vadd.xlane.f32.xlu1 %v4990_v42  ;;  %v4987_v8 = vsel %vm4698_vm2, %v4666_v35, 0.0  ;;  %v4549_v35 = vld [vmem:[%s7925_s25 + $0x358] sm:$0xff] }
 0x505   : > { %v4171_v51 = vadd.f32 %v8387_v24, %v6083_v19  ;;  %v4165_v3 = vpop.f32.mrb[95].mxu1  ;;  %4988 = vadd.xlane.f32.xlu0 %v4987_v8  ;;  %v4548_v19 = vld [vmem:[%s7925_s25 + $0x350] sm:$0xff] }
 0x506   : > { %v4166_v41 = vadd.f32 %v8387_v24, %v4165_v3 }
 0x507   : > { %v4413_v48 = vmax.f32 %v4171_v51, 0.0 }
 0x508   : > { %v4412_v26 = vmax.f32 %v4166_v41, 0.0 }
 0x509   : > { %v4669_v31 = vmul.f32 %v4541_v58, %v4413_v48  ;;  %v4890_v32 = vpop.xlane.xlu1 %4889 }
 0x50a   : > { %v4668_v36 = vmul.f32 %v4540_v61, %v4412_v26  ;;  %5147 = vst.msk [vmem:[%s8140_s4 + $0x1f8] sm:$0xff] %vm5083_vm3, %v4890_v32 }
 0x50b   : > { %v4887_v1 = vpop.xlane.xlu0 %4886  ;;  %v4996_v46 = vsel %vm4698_vm2, %v4669_v31, 0.0 }
 0x50c   : > { %5146 = vst.msk [vmem:[%s8140_s4 + $0x1f0] sm:$0xff] %vm5083_vm3, %v4887_v1  ;;  %v6086_v21 = vpop.f32.mrb[96].mxu1  ;;  %4997 = vadd.xlane.f32.xlu1 %v4996_v46  ;;  %v4993_v39 = vsel %vm4698_vm2, %v4668_v36, 0.0  ;;  %v4551_v36 = vld [vmem:[%s7925_s25 + $0x368] sm:$0xff] }
 0x50d   : > { %v4181_v20 = vadd.f32 %v8387_v24, %v6086_v21  ;;  %v4175_v13 = vpop.f32.mrb[97].mxu1  ;;  %4994 = vadd.xlane.f32.xlu0 %v4993_v39  ;;  %v4550_v21 = vld [vmem:[%s7925_s25 + $0x360] sm:$0xff] }
 0x50e   : > { %v4176_v50 = vadd.f32 %v8387_v24, %v4175_v13 }
 0x50f   : > { %v4415_v55 = vmax.f32 %v4181_v20, 0.0 }
 0x510   : > { %v4414_v11 = vmax.f32 %v4176_v50, 0.0 }
 0x511   : > { %v4671_v22 = vmul.f32 %v4543_v16, %v4415_v55  ;;  %v4896_v44 = vpop.xlane.xlu1 %4895 }
 0x512   : > { %v4670_v40 = vmul.f32 %v4542_v5, %v4414_v11  ;;  %5149 = vst.msk [vmem:[%s8140_s4 + $0x208] sm:$0xff] %vm5083_vm3, %v4896_v44 }
 0x513   : > { %v4893_v37 = vpop.xlane.xlu0 %4892  ;;  %v5002_v7 = vsel %vm4698_vm2, %v4671_v22, 0.0 }
 0x514   : > { %5148 = vst.msk [vmem:[%s8140_s4 + $0x200] sm:$0xff] %vm5083_vm3, %v4893_v37  ;;  %v6089_v28 = vpop.f32.mrb[98].mxu1  ;;  %5003 = vadd.xlane.f32.xlu1 %v5002_v7  ;;  %v4999_v18 = vsel %vm4698_vm2, %v4670_v40, 0.0  ;;  %v4553_v40 = vld [vmem:[%s7925_s25 + $0x378] sm:$0xff] }
 0x515   : > { %v4191_v47 = vadd.f32 %v8387_v24, %v6089_v28  ;;  %v4185_v10 = vpop.f32.mrb[99].mxu1  ;;  %5000 = vadd.xlane.f32.xlu0 %v4999_v18  ;;  %v4552_v18 = vld [vmem:[%s7925_s25 + $0x370] sm:$0xff] }
 0x516   : > { %v4186_v57 = vadd.f32 %v8387_v24, %v4185_v10 }
 0x517   : > { %v4417_v52 = vmax.f32 %v4191_v47, 0.0 }
 0x518   : > { %v4416_v6 = vmax.f32 %v4186_v57, 0.0 }
 0x519   : > { %v4673_v45 = vmul.f32 %v4545_v63, %v4417_v52  ;;  %v4902_v34 = vpop.xlane.xlu1 %4901 }
 0x51a   : > { %v4672_v17 = vmul.f32 %v4544_v60, %v4416_v6  ;;  %5151 = vst.msk [vmem:[%s8140_s4 + $0x218] sm:$0xff] %vm5083_vm3, %v4902_v34 }
 0x51b   : > { %v4899_v38 = vpop.xlane.xlu0 %4898  ;;  %v5008_v23 = vsel %vm4698_vm2, %v4673_v45, 0.0 }
 0x51c   : > { %5150 = vst.msk [vmem:[%s8140_s4 + $0x210] sm:$0xff] %vm5083_vm3, %v4899_v38  ;;  %v6092_v27 = vpop.f32.mrb[100].mxu1  ;;  %5009 = vadd.xlane.f32.xlu1 %v5008_v23  ;;  %v5005_v2 = vsel %vm4698_vm2, %v4672_v17, 0.0  ;;  %v4555_v23 = vld [vmem:[%s7925_s25 + $0x388] sm:$0xff] }
 0x51d   : > { %v4201_v4 = vadd.f32 %v8387_v24, %v6092_v27  ;;  %v4195_v54 = vpop.f32.mrb[101].mxu1  ;;  %5006 = vadd.xlane.f32.xlu0 %v5005_v2 }
 0x51e   : > { %v4196_v43 = vadd.f32 %v8387_v24, %v4195_v54  ;;  %v4554_v54 = vld [vmem:[%s7925_s25 + $0x380] sm:$0xff] }
 0x51f   : > { %v4419_v25 = vmax.f32 %v4201_v4, 0.0 }
 0x520   : > { %v4418_v62 = vmax.f32 %v4196_v43, 0.0 }
 0x521   : > { %v4675_v15 = vmul.f32 %v4547_v49, %v4419_v25  ;;  %v4908_v53 = vpop.xlane.xlu1 %4907 }
 0x522   : > { %v4674_v33 = vmul.f32 %v4546_v56, %v4418_v62  ;;  %5153 = vst.msk [vmem:[%s8140_s4 + $0x228] sm:$0xff] %vm5083_vm3, %v4908_v53 }
 0x523   : > { %v4905_v9 = vpop.xlane.xlu0 %4904  ;;  %v5014_v30 = vsel %vm4698_vm2, %v4675_v15, 0.0 }
 0x524   : > { %5152 = vst.msk [vmem:[%s8140_s4 + $0x220] sm:$0xff] %vm5083_vm3, %v4905_v9  ;;  %v6095_v59 = vpop.f32.mrb[102].mxu1  ;;  %5015 = vadd.xlane.f32.xlu1 %v5014_v30  ;;  %v5011_v0 = vsel %vm4698_vm2, %v4674_v33, 0.0 }
 0x525   : > { %v4211_v12 = vadd.f32 %v8387_v24, %v6095_v59  ;;  %v4205_v29 = vpop.f32.mrb[103].mxu1  ;;  %5012 = vadd.xlane.f32.xlu0 %v5011_v0  ;;  %v4557_v0 = vld [vmem:[%s7925_s25 + $0x398] sm:$0xff] }
 0x526   : > { %v4206_v14 = vadd.f32 %v8387_v24, %v4205_v29 }
 0x527   : > { %v4421_v42 = vmax.f32 %v4211_v12, 0.0 }
 0x528   : > { %v4420_v8 = vmax.f32 %v4206_v14, 0.0 }
 0x529   : > { %v4677_v51 = vmul.f32 %v4549_v35, %v4421_v42  ;;  %v4914_v3 = vpop.xlane.xlu1 %4913  ;;  %v4556_v35 = vld [vmem:[%s7925_s25 + $0x390] sm:$0xff] }
 0x52a   : > { %v4676_v58 = vmul.f32 %v4548_v19, %v4420_v8  ;;  %5155 = vst.msk [vmem:[%s8140_s4 + $0x238] sm:$0xff] %vm5083_vm3, %v4914_v3 }
 0x52b   : > { %v4911_v41 = vpop.xlane.xlu0 %4910  ;;  %v5020_v48 = vsel %vm4698_vm2, %v4677_v51, 0.0 }
 0x52c   : > { %5154 = vst.msk [vmem:[%s8140_s4 + $0x230] sm:$0xff] %vm5083_vm3, %v4911_v41  ;;  %v6098_v61 = vpop.f32.mrb[104].mxu1  ;;  %5021 = vadd.xlane.f32.xlu1 %v5020_v48  ;;  %v5017_v26 = vsel %vm4698_vm2, %v4676_v58, 0.0 }
 0x52d   : > { %v4221_v31 = vadd.f32 %v8387_v24, %v6098_v61  ;;  %v4215_v32 = vpop.f32.mrb[105].mxu1  ;;  %5018 = vadd.xlane.f32.xlu0 %v5017_v26  ;;  %v4559_v26 = vld [vmem:[%s7925_s25 + $0x3a8] sm:$0xff] }
 0x52e   : > { %v4216_v1 = vadd.f32 %v8387_v24, %v4215_v32 }
 0x52f   : > { %v4423_v46 = vmax.f32 %v4221_v31, 0.0 }
 0x530   : > { %v4422_v39 = vmax.f32 %v4216_v1, 0.0 }
 0x531   : > { %v4679_v20 = vmul.f32 %v4551_v36, %v4423_v46  ;;  %v4920_v13 = vpop.xlane.xlu1 %4919  ;;  %v4558_v36 = vld [vmem:[%s7925_s25 + $0x3a0] sm:$0xff] }
 0x532   : > { %v4678_v16 = vmul.f32 %v4550_v21, %v4422_v39  ;;  %5157 = vst.msk [vmem:[%s8140_s4 + $0x248] sm:$0xff] %vm5083_vm3, %v4920_v13  ;;  %v4917_v50 = vpop.xlane.xlu0 %4916 }
 0x533   : > { %5156 = vst.msk [vmem:[%s8140_s4 + $0x240] sm:$0xff] %vm5083_vm3, %v4917_v50  ;;  %v5026_v55 = vsel %vm4698_vm2, %v4679_v20, 0.0 }
 0x534   : > { %v6101_v5 = vpop.f32.mrb[106].mxu1  ;;  %5027 = vadd.xlane.f32.xlu1 %v5026_v55  ;;  %v5023_v11 = vsel %vm4698_vm2, %v4678_v16, 0.0 }
 0x535   : > { %v4231_v22 = vadd.f32 %v8387_v24, %v6101_v5  ;;  %v4225_v44 = vpop.f32.mrb[107].mxu1  ;;  %5024 = vadd.xlane.f32.xlu0 %v5023_v11  ;;  %v4561_v11 = vld [vmem:[%s7925_s25 + $0x3b8] sm:$0xff] }
 0x536   : > { %v4226_v37 = vadd.f32 %v8387_v24, %v4225_v44  ;;  %v4704_v7 = vpop.xlane.xlu0 %4703 }
 0x537   : > { %v4425_v28 = vmax.f32 %v4231_v22, 0.0  ;;  %5085 = vst.msk [vmem:[%s8140_s4 + $0x8] sm:$0xff] %vm5083_vm3, %v4704_v7 }
 0x538   : > { %v4424_v47 = vmax.f32 %v4226_v37, 0.0 }
 0x539   : > { %v4681_v10 = vmul.f32 %v4553_v40, %v4425_v28  ;;  %v4710_v63 = vpop.xlane.xlu1 %4709  ;;  %v4560_v40 = vld [vmem:[%s7925_s25 + $0x3b0] sm:$0xff] }
 0x53a   : > { %v4680_v57 = vmul.f32 %v4552_v18, %v4424_v47  ;;  %5087 = vst.msk [vmem:[%s8140_s4 + $0x18] sm:$0xff] %vm5083_vm3, %v4710_v63  ;;  %v4701_v52 = vpop.xlane.xlu0 %4700 }
 0x53b   : > { %5084 = vst.msk [vmem:[%s8140_s4] sm:$0xff] %vm5083_vm3, %v4701_v52  ;;  %v5032_v60 = vsel %vm4698_vm2, %v4681_v10, 0.0 }
 0x53c   : > { %v6104_v6 = vpop.f32.mrb[108].mxu1  ;;  %5033 = vadd.xlane.f32.xlu1 %v5032_v60  ;;  %v5029_v45 = vsel %vm4698_vm2, %v4680_v57, 0.0 }
 0x53d   : > { %v4241_v34 = vadd.f32 %v8387_v24, %v6104_v6  ;;  %v4235_v17 = vpop.f32.mrb[109].mxu1  ;;  %v4926_v38 = vpop.xlane.xlu1 %4925  ;;  %5030 = vadd.xlane.f32.xlu0 %v5029_v45  ;;  %v4563_v6 = vld [vmem:[%s7925_s25 + $0x3c8] sm:$0xff] }
 0x53e   : > { %v4236_v27 = vadd.f32 %v8387_v24, %v4235_v17  ;;  %5159 = vst.msk [vmem:[%s8140_s4 + $0x258] sm:$0xff] %vm5083_vm3, %v4926_v38  ;;  %v4923_v2 = vpop.xlane.xlu0 %4922  ;;  %v4562_v17 = vld [vmem:[%s7925_s25 + $0x3c0] sm:$0xff] }
 0x53f   : > { %v4427_v4 = vmax.f32 %v4241_v34, 0.0  ;;  %5158 = vst.msk [vmem:[%s8140_s4 + $0x250] sm:$0xff] %vm5083_vm3, %v4923_v2 }
 0x540   : > { %v4426_v49 = vmax.f32 %v4236_v27, 0.0 }
 0x541   : > { %v4683_v43 = vmul.f32 %v4555_v23, %v4427_v4  ;;  %v4707_v25 = vpop.xlane.xlu1 %4706 }
 0x542   : > { %v4682_v56 = vmul.f32 %v4554_v54, %v4426_v49  ;;  %5086 = vst.msk [vmem:[%s8140_s4 + $0x10] sm:$0xff] %vm5083_vm3, %v4707_v25  ;;  %v4929_v62 = vpop.xlane.xlu0 %4928 }
 0x543   : > { %5160 = vst.msk [vmem:[%s8140_s4 + $0x260] sm:$0xff] %vm5083_vm3, %v4929_v62  ;;  %v5038_v15 = vsel %vm4698_vm2, %v4683_v43, 0.0  ;;  %v4565_v62 = vld [vmem:[%s7925_s25 + $0x3d8] sm:$0xff] }
 0x544   : > { %v6107_v53 = vpop.f32.mrb[110].mxu1  ;;  %5039 = vadd.xlane.f32.xlu1 %v5038_v15  ;;  %v5035_v33 = vsel %vm4698_vm2, %v4682_v56, 0.0 }
 0x545   : > { %v4251_v9 = vadd.f32 %v8387_v24, %v6107_v53  ;;  %v4245_v30 = vpop.f32.mrb[111].mxu1  ;;  %v4932_v59 = vpop.xlane.xlu1 %4931  ;;  %5036 = vadd.xlane.f32.xlu0 %v5035_v33  ;;  %v4564_v33 = vld [vmem:[%s7925_s25 + $0x3d0] sm:$0xff] }
 0x546   : > { %v4246_v12 = vadd.f32 %v8387_v24, %v4245_v30  ;;  %5161 = vst.msk [vmem:[%s8140_s4 + $0x268] sm:$0xff] %vm5083_vm3, %v4932_v59 }
 0x547   : > { %v4429_v29 = vmax.f32 %v4251_v9, 0.0 }
 0x548   : > { %v4428_v14 = vmax.f32 %v4246_v12, 0.0 }
 0x549   : > { %v4685_v42 = vmul.f32 %v4557_v0, %v4429_v29  ;;  %v4938_v19 = vpop.xlane.xlu1 %4937 }
 0x54a   : > { %v4684_v8 = vmul.f32 %v4556_v35, %v4428_v14  ;;  %5163 = vst.msk [vmem:[%s8140_s4 + $0x278] sm:$0xff] %vm5083_vm3, %v4938_v19  ;;  %v4935_v51 = vpop.xlane.xlu0 %4934 }
 0x54b   : > { %5162 = vst.msk [vmem:[%s8140_s4 + $0x270] sm:$0xff] %vm5083_vm3, %v4935_v51  ;;  %v5044_v3 = vsel %vm4698_vm2, %v4685_v42, 0.0 }
 0x54c   : > { %v6110_v58 = vpop.f32.mrb[112].mxu1  ;;  %5045 = vadd.xlane.f32.xlu1 %v5044_v3  ;;  %v5041_v41 = vsel %vm4698_vm2, %v4684_v8, 0.0  ;;  %v4567_v8 = vld [vmem:[%s7925_s25 + $0x3e8] sm:$0xff] }
 0x54d   : > { %v4261_v48 = vadd.f32 %v8387_v24, %v6110_v58  ;;  %v4255_v61 = vpop.f32.mrb[113].mxu1  ;;  %5042 = vadd.xlane.f32.xlu0 %v5041_v41  ;;  %v4566_v58 = vld [vmem:[%s7925_s25 + $0x3e0] sm:$0xff] }
 0x54e   : > { %v4256_v31 = vadd.f32 %v8387_v24, %v4255_v61 }
 0x54f   : > { %v4431_v32 = vmax.f32 %v4261_v48, 0.0 }
 0x550   : > { %v4430_v1 = vmax.f32 %v4256_v31, 0.0 }
 0x551   : > { %v4687_v46 = vmul.f32 %v4559_v26, %v4431_v32  ;;  %v4944_v21 = vpop.xlane.xlu1 %4943 }
 0x552   : > { %v4686_v39 = vmul.f32 %v4558_v36, %v4430_v1  ;;  %5165 = vst.msk [vmem:[%s8140_s4 + $0x288] sm:$0xff] %vm5083_vm3, %v4944_v21  ;;  %v4941_v20 = vpop.xlane.xlu0 %4940 }
 0x553   : > { %5164 = vst.msk [vmem:[%s8140_s4 + $0x280] sm:$0xff] %vm5083_vm3, %v4941_v20  ;;  %v5050_v13 = vsel %vm4698_vm2, %v4687_v46, 0.0 }
 0x554   : > { %v6113_v16 = vpop.f32.mrb[114].mxu1  ;;  %5051 = vadd.xlane.f32.xlu1 %v5050_v13  ;;  %v5047_v50 = vsel %vm4698_vm2, %v4686_v39, 0.0  ;;  %v4569_v39 = vld [vmem:[%s7925_s25 + $0x3f8] sm:$0xff] }
 0x555   : > { %v4271_v55 = vadd.f32 %v8387_v24, %v6113_v16  ;;  %v4265_v5 = vpop.f32.mrb[115].mxu1  ;;  %5048 = vadd.xlane.f32.xlu0 %v5047_v50  ;;  %v4568_v16 = vld [vmem:[%s7925_s25 + $0x3f0] sm:$0xff] }
 0x556   : > { %v4266_v22 = vadd.f32 %v8387_v24, %v4265_v5 }
 0x557   : > { %v4433_v44 = vmax.f32 %v4271_v55, 0.0 }
 0x558   : > { %v4432_v37 = vmax.f32 %v4266_v22, 0.0 }
 0x559   : > { %v4689_v7 = vmul.f32 %v4561_v11, %v4433_v44  ;;  %v4950_v28 = vpop.xlane.xlu1 %4949 }
 0x55a   : > { %v4688_v18 = vmul.f32 %v4560_v40, %v4432_v37  ;;  %5167 = vst.msk [vmem:[%s8140_s4 + $0x298] sm:$0xff] %vm5083_vm3, %v4950_v28  ;;  %v4947_v47 = vpop.xlane.xlu0 %4946 }
 0x55b   : > { %5166 = vst.msk [vmem:[%s8140_s4 + $0x290] sm:$0xff] %vm5083_vm3, %v4947_v47  ;;  %v5056_v10 = vsel %vm4698_vm2, %v4689_v7, 0.0 }
 0x55c   : > { %v6116_v63 = vpop.f32.mrb[116].mxu1  ;;  %5057 = vadd.xlane.f32.xlu1 %v5056_v10  ;;  %v5053_v57 = vsel %vm4698_vm2, %v4688_v18, 0.0 }
 0x55d   : > { %v4281_v52 = vadd.f32 %v8387_v24, %v6116_v63  ;;  %v4275_v60 = vpop.f32.mrb[117].mxu1  ;;  %5054 = vadd.xlane.f32.xlu0 %v5053_v57 }
 0x55e   : > { %v4276_v45 = vadd.f32 %v8387_v24, %v4275_v60 }
 0x55f   : > { %v4435_v34 = vmax.f32 %v4281_v52, 0.0 }
 0x560   : > { %v4434_v38 = vmax.f32 %v4276_v45, 0.0 }
 0x561   : > { %v4691_v23 = vmul.f32 %v4563_v6, %v4435_v34  ;;  %v4956_v27 = vpop.xlane.xlu1 %4955 }
 0x562   : > { %v4690_v2 = vmul.f32 %v4562_v17, %v4434_v38  ;;  %5169 = vst.msk [vmem:[%s8140_s4 + $0x2a8] sm:$0xff] %vm5083_vm3, %v4956_v27  ;;  %v4953_v4 = vpop.xlane.xlu0 %4952 }
 0x563   : > { %5168 = vst.msk [vmem:[%s8140_s4 + $0x2a0] sm:$0xff] %vm5083_vm3, %v4953_v4  ;;  %v5062_v54 = vsel %vm4698_vm2, %v4691_v23, 0.0 }
 0x564   : > { %v6119_v49 = vpop.f32.mrb[118].mxu1  ;;  %5063 = vadd.xlane.f32.xlu1 %v5062_v54  ;;  %v5059_v43 = vsel %vm4698_vm2, %v4690_v2, 0.0 }
 0x565   : > { %v4291_v25 = vadd.f32 %v8387_v24, %v6119_v49  ;;  %v4285_v56 = vpop.f32.mrb[119].mxu1  ;;  %5060 = vadd.xlane.f32.xlu0 %v5059_v43 }
 0x566   : > { %v4286_v15 = vadd.f32 %v8387_v24, %v4285_v56 }
 0x567   : > { %v4437_v53 = vmax.f32 %v4291_v25, 0.0 }
 0x568   : > { %v4436_v9 = vmax.f32 %v4286_v15, 0.0 }
 0x569   : > { %v4693_v30 = vmul.f32 %v4565_v62, %v4437_v53  ;;  %v4962_v59 = vpop.xlane.xlu1 %4961 }
 0x56a   : > { %v4692_v0 = vmul.f32 %v4564_v33, %v4436_v9  ;;  %5171 = vst.msk [vmem:[%s8140_s4 + $0x2b8] sm:$0xff] %vm5083_vm3, %v4962_v59  ;;  %v4959_v12 = vpop.xlane.xlu0 %4958 }
 0x56b   : > { %5170 = vst.msk [vmem:[%s8140_s4 + $0x2b0] sm:$0xff] %vm5083_vm3, %v4959_v12  ;;  %v5068_v29 = vsel %vm4698_vm2, %v4693_v30, 0.0 }
 0x56c   : > { %v6122_v35 = vpop.f32.mrb[120].mxu1  ;;  %5069 = vadd.xlane.f32.xlu1 %v5068_v29  ;;  %v5065_v14 = vsel %vm4698_vm2, %v4692_v0, 0.0 }
 0x56d   : > { %v4301_v42 = vadd.f32 %v8387_v24, %v6122_v35  ;;  %v4295_v19 = vpop.f32.mrb[121].mxu1  ;;  %5066 = vadd.xlane.f32.xlu0 %v5065_v14 }
 0x56e   : > { %v4296_v51 = vadd.f32 %v8387_v24, %v4295_v19 }
 0x56f   : > { %v4439_v3 = vmax.f32 %v4301_v42, 0.0 }
 0x570   : > { %v4438_v41 = vmax.f32 %v4296_v51, 0.0 }
 0x571   : > { %v4695_v48 = vmul.f32 %v4567_v8, %v4439_v3  ;;  %v4968_v61 = vpop.xlane.xlu1 %4967 }
 0x572   : > { %v4694_v26 = vmul.f32 %v4566_v58, %v4438_v41  ;;  %5173 = vst.msk [vmem:[%s8140_s4 + $0x2c8] sm:$0xff] %vm5083_vm3, %v4968_v61  ;;  %v4965_v31 = vpop.xlane.xlu0 %4964 }
 0x573   : > { %5172 = vst.msk [vmem:[%s8140_s4 + $0x2c0] sm:$0xff] %vm5083_vm3, %v4965_v31  ;;  %v5074_v32 = vsel %vm4698_vm2, %v4695_v48, 0.0 }
 0x574   : > { %v6125_v36 = vpop.f32.mrb[122].mxu1  ;;  %5075 = vadd.xlane.f32.xlu1 %v5074_v32  ;;  %v5071_v1 = vsel %vm4698_vm2, %v4694_v26, 0.0 }
 0x575   : > { %v4311_v46 = vadd.f32 %v8387_v24, %v6125_v36  ;;  %v4305_v21 = vpop.f32.mrb[123].mxu1  ;;  %5072 = vadd.xlane.f32.xlu0 %v5071_v1 }
 0x576   : > { %v4306_v20 = vadd.f32 %v8387_v24, %v4305_v21 }
 0x577   : > { %v4441_v13 = vmax.f32 %v4311_v46, 0.0 }
 0x578   : > { %v4440_v50 = vmax.f32 %v4306_v20, 0.0 }
 0x579   : > { %v4697_v55 = vmul.f32 %v4569_v39, %v4441_v13  ;;  %v4974_v5 = vpop.xlane.xlu1 %4973 }
 0x57a   : > { %v4696_v11 = vmul.f32 %v4568_v16, %v4440_v50  ;;  %5175 = vst.msk [vmem:[%s8140_s4 + $0x2d8] sm:$0xff] %vm5083_vm3, %v4974_v5  ;;  %v4971_v22 = vpop.xlane.xlu0 %4970 }
 0x57b   : > { %5174 = vst.msk [vmem:[%s8140_s4 + $0x2d0] sm:$0xff] %vm5083_vm3, %v4971_v22  ;;  %v5080_v44 = vsel %vm4698_vm2, %v4697_v55, 0.0 }
 0x57c   : > { %5081 = vadd.xlane.f32.xlu1 %v5080_v44  ;;  %v5077_v24 = vsel %vm4698_vm2, %v4696_v11, 0.0 }
 0x57d   : > { %5078 = vadd.xlane.f32.xlu0 %v5077_v24 }
 0x581   : > { %v4980_v40 = vpop.xlane.xlu1 %4979 }
 0x582   : > { %5177 = vst.msk [vmem:[%s8140_s4 + $0x2e8] sm:$0xff] %vm5083_vm3, %v4980_v40  ;;  %v4977_v37 = vpop.xlane.xlu0 %4976 }
 0x583   : > { %5176 = vst.msk [vmem:[%s8140_s4 + $0x2e0] sm:$0xff] %vm5083_vm3, %v4977_v37 }
 0x589   : > { %v4986_v7 = vpop.xlane.xlu1 %4985 }
 0x58a   : > { %5179 = vst.msk [vmem:[%s8140_s4 + $0x2f8] sm:$0xff] %vm5083_vm3, %v4986_v7  ;;  %v4983_v28 = vpop.xlane.xlu0 %4982 }
 0x58b   : > { %5178 = vst.msk [vmem:[%s8140_s4 + $0x2f0] sm:$0xff] %vm5083_vm3, %v4983_v28 }
 0x591   : > { %v4992_v18 = vpop.xlane.xlu1 %4991 }
 0x592   : > { %5181 = vst.msk [vmem:[%s8140_s4 + $0x308] sm:$0xff] %vm5083_vm3, %v4992_v18  ;;  %v4989_v47 = vpop.xlane.xlu0 %4988 }
 0x593   : > { %5180 = vst.msk [vmem:[%s8140_s4 + $0x300] sm:$0xff] %vm5083_vm3, %v4989_v47 }
 0x599   : > { %v4998_v10 = vpop.xlane.xlu1 %4997 }
 0x59a   : > { %5183 = vst.msk [vmem:[%s8140_s4 + $0x318] sm:$0xff] %vm5083_vm3, %v4998_v10  ;;  %v4995_v63 = vpop.xlane.xlu0 %4994 }
 0x59b   : > { %5182 = vst.msk [vmem:[%s8140_s4 + $0x310] sm:$0xff] %vm5083_vm3, %v4995_v63 }
 0x5a1   : > { %v5004_v57 = vpop.xlane.xlu1 %5003 }
 0x5a2   : > { %5185 = vst.msk [vmem:[%s8140_s4 + $0x328] sm:$0xff] %vm5083_vm3, %v5004_v57  ;;  %v5001_v52 = vpop.xlane.xlu0 %5000 }
 0x5a3   : > { %5184 = vst.msk [vmem:[%s8140_s4 + $0x320] sm:$0xff] %vm5083_vm3, %v5001_v52 }
 0x5a9   : > { %v5010_v60 = vpop.xlane.xlu1 %5009 }
 0x5aa   : > { %5187 = vst.msk [vmem:[%s8140_s4 + $0x338] sm:$0xff] %vm5083_vm3, %v5010_v60  ;;  %v5007_v6 = vpop.xlane.xlu0 %5006 }
 0x5ab   : > { %5186 = vst.msk [vmem:[%s8140_s4 + $0x330] sm:$0xff] %vm5083_vm3, %v5007_v6 }
 0x5b1   : > { %v5016_v45 = vpop.xlane.xlu1 %5015 }
 0x5b2   : > { %5189 = vst.msk [vmem:[%s8140_s4 + $0x348] sm:$0xff] %vm5083_vm3, %v5016_v45  ;;  %v5013_v34 = vpop.xlane.xlu0 %5012 }
 0x5b3   : > { %5188 = vst.msk [vmem:[%s8140_s4 + $0x340] sm:$0xff] %vm5083_vm3, %v5013_v34 }
 0x5b9   : > { %v5022_v17 = vpop.xlane.xlu1 %5021 }
 0x5ba   : > { %5191 = vst.msk [vmem:[%s8140_s4 + $0x358] sm:$0xff] %vm5083_vm3, %v5022_v17  ;;  %v5019_v38 = vpop.xlane.xlu0 %5018 }
 0x5bb   : > { %5190 = vst.msk [vmem:[%s8140_s4 + $0x350] sm:$0xff] %vm5083_vm3, %v5019_v38 }
 0x5c1   : > { %v5028_v23 = vpop.xlane.xlu1 %5027 }
 0x5c2   : > { %5193 = vst.msk [vmem:[%s8140_s4 + $0x368] sm:$0xff] %vm5083_vm3, %v5028_v23  ;;  %v5025_v27 = vpop.xlane.xlu0 %5024 }
 0x5c3   : > { %5192 = vst.msk [vmem:[%s8140_s4 + $0x360] sm:$0xff] %vm5083_vm3, %v5025_v27 }
 0x5c9   : > { %v5034_v2 = vpop.xlane.xlu1 %5033 }
 0x5ca   : > { %5195 = vst.msk [vmem:[%s8140_s4 + $0x378] sm:$0xff] %vm5083_vm3, %v5034_v2  ;;  %v5031_v4 = vpop.xlane.xlu0 %5030 }
 0x5cb   : > { %5194 = vst.msk [vmem:[%s8140_s4 + $0x370] sm:$0xff] %vm5083_vm3, %v5031_v4 }
 0x5d1   : > { %v5040_v54 = vpop.xlane.xlu1 %5039 }
 0x5d2   : > { %5197 = vst.msk [vmem:[%s8140_s4 + $0x388] sm:$0xff] %vm5083_vm3, %v5040_v54  ;;  %v5037_v49 = vpop.xlane.xlu0 %5036 }
 0x5d3   : > { %5196 = vst.msk [vmem:[%s8140_s4 + $0x380] sm:$0xff] %vm5083_vm3, %v5037_v49 }
 0x5d9   : > { %v5046_v43 = vpop.xlane.xlu1 %5045 }
 0x5da   : > { %5199 = vst.msk [vmem:[%s8140_s4 + $0x398] sm:$0xff] %vm5083_vm3, %v5046_v43  ;;  %v5043_v25 = vpop.xlane.xlu0 %5042 }
 0x5db   : > { %5198 = vst.msk [vmem:[%s8140_s4 + $0x390] sm:$0xff] %vm5083_vm3, %v5043_v25 }
 0x5e1   : > { %v5052_v56 = vpop.xlane.xlu1 %5051 }
 0x5e2   : > { %5201 = vst.msk [vmem:[%s8140_s4 + $0x3a8] sm:$0xff] %vm5083_vm3, %v5052_v56  ;;  %v5049_v62 = vpop.xlane.xlu0 %5048 }
 0x5e3   : > { %5200 = vst.msk [vmem:[%s8140_s4 + $0x3a0] sm:$0xff] %vm5083_vm3, %v5049_v62 }
 0x5e9   : > { %v5058_v15 = vpop.xlane.xlu1 %5057 }
 0x5ea   : > { %5203 = vst.msk [vmem:[%s8140_s4 + $0x3b8] sm:$0xff] %vm5083_vm3, %v5058_v15  ;;  %v5055_v53 = vpop.xlane.xlu0 %5054 }
 0x5eb   : > { %5202 = vst.msk [vmem:[%s8140_s4 + $0x3b0] sm:$0xff] %vm5083_vm3, %v5055_v53 }
 0x5f1   : > { %v5064_v33 = vpop.xlane.xlu1 %5063 }
 0x5f2   : > { %5205 = vst.msk [vmem:[%s8140_s4 + $0x3c8] sm:$0xff] %vm5083_vm3, %v5064_v33  ;;  %v5061_v9 = vpop.xlane.xlu0 %5060 }
 0x5f3   : > { %5204 = vst.msk [vmem:[%s8140_s4 + $0x3c0] sm:$0xff] %vm5083_vm3, %v5061_v9 }
 0x5f9   : > { %v5070_v30 = vpop.xlane.xlu1 %5069 }
 0x5fa   : > { %5207 = vst.msk [vmem:[%s8140_s4 + $0x3d8] sm:$0xff] %vm5083_vm3, %v5070_v30  ;;  %v5067_v59 = vpop.xlane.xlu0 %5066 }
 0x5fb   : > { %5206 = vst.msk [vmem:[%s8140_s4 + $0x3d0] sm:$0xff] %vm5083_vm3, %v5067_v59 }
 0x601   : > { %v5076_v0 = vpop.xlane.xlu1 %5075 }
 0x602   : > { %5209 = vst.msk [vmem:[%s8140_s4 + $0x3e8] sm:$0xff] %vm5083_vm3, %v5076_v0  ;;  %v5073_v12 = vpop.xlane.xlu0 %5072 }
 0x603   : > { %5208 = vst.msk [vmem:[%s8140_s4 + $0x3e0] sm:$0xff] %vm5083_vm3, %v5073_v12 }
 0x609   : > { %v5082_v29 = vpop.xlane.xlu1 %5081 }
 0x60a   : > { %5211 = vst.msk [vmem:[%s8140_s4 + $0x3f8] sm:$0xff] %vm5083_vm3, %v5082_v29  ;;  %v5079_v35 = vpop.xlane.xlu0 %5078 }
 0x60b   : > { %5210 = vst.msk [vmem:[%s8140_s4 + $0x3f0] sm:$0xff] %vm5083_vm3, %v5079_v35 }
 0x60c PF: > { %s13_s12 = sadd.s32 1, %s6285_s12  }
 0x60d   : > { %p10_p5 = scmp.ge.s32.totalorder %s13_s12, 4  }
 0x60f   :  { %12 = sbr.rel (!%p10_p5) target bundleno = 1 (0x1), region = 66 }

</bundles_post_ra>
